<compile_context>
chip_gen: v5e
topology: v5e:2x2
jax: 0.10.0
libtpu: 0.0.40
codegen_flags: <defaults>
</compile_context>

<pallas_src>
import jax
import jax.numpy as jnp
from jax.experimental import pallas as pl
from jax.experimental.pallas import tpu as pltpu


# ---------------------------------------------------------------------------
# helpers
# ---------------------------------------------------------------------------

def _round_up(x, m):
    return (x + m - 1) // m * m


def _pick_tile(m_pad, max_tile):
    # Largest multiple of 128 <= max_tile that divides m_pad (m_pad % 128 == 0),
    # so no extra lane padding is needed beyond the 128-round-up.
    best = 128
    t = 128
    while t <= min(max_tile, m_pad):
        if m_pad % t == 0:
            best = t
        t += 128
    return best


# ---------------------------------------------------------------------------
# Pallas kernels
# ---------------------------------------------------------------------------

def _conv_kernel(w_ref, p_ref, b_ref, o_ref):
    # w: (OC, K) bf16   p: (npos, K, TM) bf16   b: (OC, 1) f32
    # o: (OC, TM) bf16 = relu( max_p( w @ p[p] ) + b )
    # npos == 1 -> plain conv; npos == 4 -> conv fused with 2x2 max-pool.
    w = w_ref[...]
    acc = jnp.dot(w, p_ref[0], preferred_element_type=jnp.float32)
    for p in range(1, p_ref.shape[0]):                      # static unroll (<=4)
        acc = jnp.maximum(
            acc, jnp.dot(w, p_ref[p], preferred_element_type=jnp.float32))
    acc = jnp.maximum(acc + b_ref[...], 0.0)                # bias + relu epilogue
    o_ref[...] = acc.astype(o_ref.dtype)


def _fc_head_kernel(x_ref, w1_ref, b1_ref, w2_ref, b2_ref, o_ref):
    # Fused fc1 -> relu -> fc2 -> log_softmax.
    # x: (BM, 576) bf16, w1: (576, 256) bf16, w2: (256, 10) bf16, biases f32.
    h = jnp.dot(x_ref[...], w1_ref[...], preferred_element_type=jnp.float32)
    h = jnp.maximum(h + b1_ref[...], 0.0)
    y = jnp.dot(h.astype(jnp.bfloat16), w2_ref[...],
                preferred_element_type=jnp.float32)
    y = y + b2_ref[...]
    z = y - jnp.max(y, axis=-1, keepdims=True)              # stable log_softmax
    lse = jnp.log(jnp.sum(jnp.exp(z), axis=-1, keepdims=True))
    o_ref[...] = (z - lse).astype(o_ref.dtype)


# ---------------------------------------------------------------------------
# Conv layer: host-side window slicing (pure strided slices, no transposes)
# + Pallas matmul with fused bias / pool / relu
# ---------------------------------------------------------------------------

def _im2col_grouped(a, kh, kw, pool):
    """a: (C, B, H, W) -> P: (npos, KH*KW*C, Mq), Mq = B*OH'*OW'.

    Row order is (kh, kw, c) to match weights stored as (OC, KH*KW*C).
    Column order is (b, oh', ow').  For pool=True the 4 pool-window positions
    become the leading `npos` axis (max-reduced inside the kernel).
    """
    C, B, H, W = a.shape
    oh, ow = H - kh + 1, W - kw + 1
    if pool:
        oh2, ow2 = oh // 2, ow // 2
        positions = [(0, 0), (0, 1), (1, 0), (1, 1)]
    else:
        oh2, ow2 = oh, ow
        positions = [(0, 0)]
    mq = B * oh2 * ow2
    groups = []
    for (pr, pc) in positions:
        rows = []
        for i in range(kh):
            for j in range(kw):
                if pool:
                    sl = a[:, :, pr + i: pr + i + 2 * oh2: 2,
                              pc + j: pc + j + 2 * ow2: 2]
                else:
                    sl = a[:, :, i: i + oh2, j: j + ow2]
                rows.append(sl.reshape(C, mq))
        groups.append(jnp.stack(rows, axis=0).reshape(kh * kw * C, mq))
    return jnp.stack(groups, axis=0), (oh2, ow2)


def conv2d_block(a, w2d, b, kh, kw, *, pool, max_tile=512):
    """a: (C, B, H, W) bf16 -> (OC, B, OH', OW') bf16 (pooled+relu if pool)."""
    C, B, H, W = a.shape
    P, (oh2, ow2) = _im2col_grouped(a, kh, kw, pool)        # (npos, K0, Mq) bf16
    npos, K0, mq = P.shape
    OC, K = w2d.shape
    if K0 < K:                                              # conv1: K 25 -> 32
        P = jnp.pad(P, ((0, 0), (0, K - K0), (0, 0)))
    m_pad = _round_up(mq, 128)                              # lane-dense output
    tm = _pick_tile(m_pad, max_tile)                        # <=512: v7x VMEM-safe
    if m_pad > mq:
        P = jnp.pad(P, ((0, 0), (0, 0), (0, m_pad - mq)))

    out = pl.pallas_call(
        _conv_kernel,
        out_shape=jax.ShapeDtypeStruct((OC, m_pad), jnp.bfloat16),
        grid=(m_pad // tm,),
        in_specs=[
            pl.BlockSpec((OC, K), lambda i: (0, 0)),          # weights pinned
            pl.BlockSpec((npos, K, tm), lambda i: (0, 0, i)),  # patch tile
            pl.BlockSpec((OC, 1), lambda i: (0, 0)),          # bias pinned
        ],
        out_specs=pl.BlockSpec((OC, tm), lambda i: (0, i)),
        compiler_params=pltpu.CompilerParams(
            dimension_semantics=("parallel",)),
    )(w2d, P, b)
    return out[:, :mq].reshape(OC, B, oh2, ow2)


# ---------------------------------------------------------------------------
# Fused FC head: fc1 -> relu -> fc2 -> log_softmax
# ---------------------------------------------------------------------------

def fc_head(x, w1, b1, w2, b2, *, max_rows=256):
    B, K = x.shape
    bp = _round_up(B, 8)
    bm = min(max_rows, bp)
    bp = _round_up(bp, bm)
    if bp > B:
        x = jnp.pad(x, ((0, bp - B), (0, 0)))
    H1 = w1.shape[1]
    N = w2.shape[1]
    out = pl.pallas_call(
        _fc_head_kernel,
        out_shape=jax.ShapeDtypeStruct((bp, N), jnp.float32),
        grid=(bp // bm,),
        in_specs=[
            pl.BlockSpec((bm, K), lambda i: (i, 0)),
            pl.BlockSpec((K, H1), lambda i: (0, 0)),
            pl.BlockSpec((1, H1), lambda i: (0, 0)),
            pl.BlockSpec((H1, N), lambda i: (0, 0)),
            pl.BlockSpec((1, N), lambda i: (0, 0)),
        ],
        out_specs=pl.BlockSpec((bm, N), lambda i: (i, 0)),
        compiler_params=pltpu.CompilerParams(
            dimension_semantics=("parallel",)),
    )(x, w1, b1, w2, b2)
    return out[:B]


# ---------------------------------------------------------------------------
# Parameter init (PyTorch-like uniform) with weights pre-reshaped / padded /
# cast to bf16 ONCE (no per-forward transposes).
# ---------------------------------------------------------------------------

def _prep_conv(w, b, k_pad_to=None):
    OC, C, KH, KW = w.shape
    w2d = w.transpose(0, 2, 3, 1).reshape(OC, KH * KW * C)   # rows = (kh, kw, c)
    if k_pad_to is not None and w2d.shape[1] < k_pad_to:
        w2d = jnp.pad(w2d, ((0, 0), (0, k_pad_to - w2d.shape[1])))
    return w2d.astype(jnp.bfloat16), b.reshape(OC, 1).astype(jnp.float32)


def init_params(key):
    def uniform(k, shape, fan_in):
        bound = 1.0 / (fan_in ** 0.5)
        return jax.random.uniform(k, shape, jnp.float32, -bound, bound)

    ks = jax.random.split(key, 10)
    c1w, c1b = _prep_conv(uniform(ks[0], (32, 1, 5, 5), 25),
                          uniform(ks[1], (32,), 25), k_pad_to=32)
    c2w, c2b = _prep_conv(uniform(ks[2], (32, 32, 5, 5), 800),
                          uniform(ks[3], (32,), 800))
    c3w, c3b = _prep_conv(uniform(ks[4], (64, 32, 5, 5), 800),
                          uniform(ks[5], (64,), 800))
    fc1_w = uniform(ks[6], (256, 576), 576)
    fc1_b = uniform(ks[7], (256,), 576)
    fc2_w = uniform(ks[8], (10, 256), 256)
    fc2_b = uniform(ks[9], (10,), 256)
    return {
        "conv1_w": c1w, "conv1_b": c1b,
        "conv2_w": c2w, "conv2_b": c2b,
        "conv3_w": c3w, "conv3_b": c3b,
        "fc1_w": fc1_w.T.astype(jnp.bfloat16),             # (576, 256)
        "fc1_b": fc1_b.reshape(1, 256).astype(jnp.float32),
        "fc2_w": fc2_w.T.astype(jnp.bfloat16),             # (256, 10)
        "fc2_b": fc2_b.reshape(1, 10).astype(jnp.float32),
    }


# ---------------------------------------------------------------------------
# Forward pass (eval mode: dropout == identity)
# ---------------------------------------------------------------------------

def cnn_forward(params, x):
    # x: (B, 1, 28, 28) float32
    B = x.shape[0]
    a = jnp.transpose(x, (1, 0, 2, 3)).astype(jnp.bfloat16)           # (1,B,28,28)
    a = conv2d_block(a, params["conv1_w"], params["conv1_b"], 5, 5,
                     pool=False)                                      # (32,B,24,24)
    a = conv2d_block(a, params["conv2_w"], params["conv2_b"], 5, 5,
                     pool=True)                                       # (32,B,10,10)
    # dropout p=0.5: identity in eval mode
    a = conv2d_block(a, params["conv3_w"], params["conv3_b"], 5, 5,
                     pool=True)                                       # (64,B,3,3)
    # dropout: identity in eval mode
    # NCHW flatten (matches PyTorch x.view(-1, 3*3*64)); tiny transpose.
    x2 = jnp.transpose(a, (1, 0, 2, 3)).reshape(B, 64 * 3 * 3)        # (B,576) bf16
    # dropout before fc2: identity in eval mode (fused fc1+fc2+log_softmax)
    return fc_head(x2, params["fc1_w"], params["fc1_b"],
                   params["fc2_w"], params["fc2_b"])                  # (B,10) f32


if __name__ == "__main__":
    key = jax.random.PRNGKey(0)
    k_param, k_x = jax.random.split(key)
    params = init_params(k_param)
    x = jax.random.normal(k_x, (2, 1, 28, 28), dtype=jnp.float32)

    out = jax.jit(cnn_forward)(params, x)
    out = jax.block_until_ready(out)

    assert out.shape == (2, 10), out.shape
    assert bool(jnp.all(jnp.isfinite(out)))
    # log-softmax rows should sum to ~1 in prob space
    assert bool(jnp.allclose(jnp.sum(jnp.exp(out), axis=1), 1.0, atol=1e-4))
    print("KERNEL_OK")
</pallas_src>

<mosaic_0001>
module attributes {stable_mosaic.version = 11 : i64} {
  func.func @_conv_kernel(%arg0: i32, %arg1: memref<32x32xbf16, #tpu.memory_space<vmem>>, %arg2: memref<1x32x384xbf16, #tpu.memory_space<vmem>>, %arg3: memref<32x1xf32, #tpu.memory_space<vmem>>, %arg4: memref<32x384xbf16, #tpu.memory_space<vmem>>) attributes {dimension_semantics = [#tpu.dimension_semantics<parallel>], iteration_bounds = array<i64: 3>, scalar_prefetch = 0 : i64, scratch_operands = 0 : i64, tpu.core_type = #tpu.core_type<tc>, window_params = [{pipeline_mode = #tpu.pipeline_mode<synchronous>, transform_indices = @transform_0, window_bounds = array<i64: 32, 32>}, {transform_indices = @transform_1, window_bounds = array<i64: 1, 32, 384>}, {pipeline_mode = #tpu.pipeline_mode<synchronous>, transform_indices = @transform_2, window_bounds = array<i64: 32, 1>}, {transform_indices = @transform_3, window_bounds = array<i64: 32, 384>}]} {
    %c0 = arith.constant 0 : index
    %c0_0 = arith.constant 0 : index
    %0 = vector.load %arg1[%c0, %c0_0] : memref<32x32xbf16, #tpu.memory_space<vmem>>, vector<32x32xbf16>
    %c0_1 = arith.constant 0 : index
    %c0_2 = arith.constant 0 : index
    %c0_3 = arith.constant 0 : index
    %1 = vector.load %arg2[%c0_1, %c0_2, %c0_3] : memref<1x32x384xbf16, #tpu.memory_space<vmem>>, vector<1x32x384xbf16>
    %2 = vector.shape_cast %1 : vector<1x32x384xbf16> to vector<32x384xbf16>
    %cst = arith.constant dense<0.000000e+00> : vector<32x384xf32>
    %3 = tpu.matmul %0, %2, %cst {dimension_numbers = #tpu.dot_dimension_numbers<[1], [0], [0], [1], [0, 0, 1, 1], [], []>} : vector<32x32xbf16>, vector<32x384xbf16>, vector<32x384xf32> -> vector<32x384xf32>
    %c0_4 = arith.constant 0 : index
    %c0_5 = arith.constant 0 : index
    %4 = vector.load %arg3[%c0_4, %c0_5] : memref<32x1xf32, #tpu.memory_space<vmem>>, vector<32x1xf32>
    %5 = vector.broadcast %4 : vector<32x1xf32> to vector<32x384xf32>
    %6 = arith.addf %3, %5 : vector<32x384xf32>
    %cst_6 = arith.constant 0.000000e+00 : f32
    %7 = vector.broadcast %cst_6 : f32 to vector<32x384xf32>
    %8 = arith.maximumf %6, %7 : vector<32x384xf32>
    %9 = arith.truncf %8 : vector<32x384xf32> to vector<32x384xbf16>
    %c0_7 = arith.constant 0 : index
    %c0_8 = arith.constant 0 : index
    %10 = vector.load %arg4[%c0_7, %c0_8] : memref<32x384xbf16, #tpu.memory_space<vmem>>, vector<32x384xbf16>
    tpu.vector_store %arg4[%c0_7, %c0_8], %9 {strides = array<i32>} : memref<32x384xbf16, #tpu.memory_space<vmem>>, vector<32x384xbf16>,
    return
  }
  func.func @transform_0(%arg0: i32) -> (i32, i32) {
    %c0_i32 = arith.constant 0 : i32
    %c0_i32_0 = arith.constant 0 : i32
    %c0_i32_1 = arith.constant 0 : i32
    return %c0_i32, %c0_i32_0 : i32, i32
  }
  func.func @transform_1(%arg0: i32) -> (i32, i32, i32) {
    %c0_i32 = arith.constant 0 : i32
    %c0_i32_0 = arith.constant 0 : i32
    %c0_i32_1 = arith.constant 0 : i32
    return %c0_i32, %c0_i32_0, %arg0 : i32, i32, i32
  }
  func.func @transform_2(%arg0: i32) -> (i32, i32) {
    %c0_i32 = arith.constant 0 : i32
    %c0_i32_0 = arith.constant 0 : i32
    %c0_i32_1 = arith.constant 0 : i32
    return %c0_i32, %c0_i32_0 : i32, i32
  }
  func.func @transform_3(%arg0: i32) -> (i32, i32) {
    %c0_i32 = arith.constant 0 : i32
    %c0_i32_0 = arith.constant 0 : i32
    return %c0_i32, %arg0 : i32, i32
  }
}

module attributes {stable_mosaic.version = 11 : i64} {
  func.func @_conv_kernel(%arg0: i32, %arg1: memref<32x800xbf16, #tpu.memory_space<vmem>>, %arg2: memref<4x800x256xbf16, #tpu.memory_space<vmem>>, %arg3: memref<32x1xf32, #tpu.memory_space<vmem>>, %arg4: memref<32x256xbf16, #tpu.memory_space<vmem>>) attributes {dimension_semantics = [#tpu.dimension_semantics<parallel>], iteration_bounds = array<i64: 1>, scalar_prefetch = 0 : i64, scratch_operands = 0 : i64, tpu.core_type = #tpu.core_type<tc>, window_params = [{pipeline_mode = #tpu.pipeline_mode<synchronous>, transform_indices = @transform_0, window_bounds = array<i64: 32, 800>}, {transform_indices = @transform_1, window_bounds = array<i64: 4, 800, 256>}, {pipeline_mode = #tpu.pipeline_mode<synchronous>, transform_indices = @transform_2, window_bounds = array<i64: 32, 1>}, {transform_indices = @transform_3, window_bounds = array<i64: 32, 256>}]} {
    %c0 = arith.constant 0 : index
    %c0_0 = arith.constant 0 : index
    %0 = vector.load %arg1[%c0, %c0_0] : memref<32x800xbf16, #tpu.memory_space<vmem>>, vector<32x800xbf16>
    %c0_1 = arith.constant 0 : index
    %c0_2 = arith.constant 0 : index
    %c0_3 = arith.constant 0 : index
    %1 = vector.load %arg2[%c0_1, %c0_2, %c0_3] : memref<4x800x256xbf16, #tpu.memory_space<vmem>>, vector<1x800x256xbf16>
    %2 = vector.shape_cast %1 : vector<1x800x256xbf16> to vector<800x256xbf16>
    %cst = arith.constant dense<0.000000e+00> : vector<32x256xf32>
    %3 = tpu.matmul %0, %2, %cst {dimension_numbers = #tpu.dot_dimension_numbers<[1], [0], [0], [1], [0, 0, 1, 1], [], []>} : vector<32x800xbf16>, vector<800x256xbf16>, vector<32x256xf32> -> vector<32x256xf32>
    %c1 = arith.constant 1 : index
    %c0_4 = arith.constant 0 : index
    %c0_5 = arith.constant 0 : index
    %4 = vector.load %arg2[%c1, %c0_4, %c0_5] : memref<4x800x256xbf16, #tpu.memory_space<vmem>>, vector<1x800x256xbf16>
    %5 = vector.shape_cast %4 : vector<1x800x256xbf16> to vector<800x256xbf16>
    %cst_6 = arith.constant dense<0.000000e+00> : vector<32x256xf32>
    %6 = tpu.matmul %0, %5, %cst_6 {dimension_numbers = #tpu.dot_dimension_numbers<[1], [0], [0], [1], [0, 0, 1, 1], [], []>} : vector<32x800xbf16>, vector<800x256xbf16>, vector<32x256xf32> -> vector<32x256xf32>
    %7 = arith.maximumf %3, %6 : vector<32x256xf32>
    %c2 = arith.constant 2 : index
    %c0_7 = arith.constant 0 : index
    %c0_8 = arith.constant 0 : index
    %8 = vector.load %arg2[%c2, %c0_7, %c0_8] : memref<4x800x256xbf16, #tpu.memory_space<vmem>>, vector<1x800x256xbf16>
    %9 = vector.shape_cast %8 : vector<1x800x256xbf16> to vector<800x256xbf16>
    %cst_9 = arith.constant dense<0.000000e+00> : vector<32x256xf32>
    %10 = tpu.matmul %0, %9, %cst_9 {dimension_numbers = #tpu.dot_dimension_numbers<[1], [0], [0], [1], [0, 0, 1, 1], [], []>} : vector<32x800xbf16>, vector<800x256xbf16>, vector<32x256xf32> -> vector<32x256xf32>
    %11 = arith.maximumf %7, %10 : vector<32x256xf32>
    %c3 = arith.constant 3 : index
    %c0_10 = arith.constant 0 : index
    %c0_11 = arith.constant 0 : index
    %12 = vector.load %arg2[%c3, %c0_10, %c0_11] : memref<4x800x256xbf16, #tpu.memory_space<vmem>>, vector<1x800x256xbf16>
    %13 = vector.shape_cast %12 : vector<1x800x256xbf16> to vector<800x256xbf16>
    %cst_12 = arith.constant dense<0.000000e+00> : vector<32x256xf32>
    %14 = tpu.matmul %0, %13, %cst_12 {dimension_numbers = #tpu.dot_dimension_numbers<[1], [0], [0], [1], [0, 0, 1, 1], [], []>} : vector<32x800xbf16>, vector<800x256xbf16>, vector<32x256xf32> -> vector<32x256xf32>
    %15 = arith.maximumf %11, %14 : vector<32x256xf32>
    %c0_13 = arith.constant 0 : index
    %c0_14 = arith.constant 0 : index
    %16 = vector.load %arg3[%c0_13, %c0_14] : memref<32x1xf32, #tpu.memory_space<vmem>>, vector<32x1xf32>
    %17 = vector.broadcast %16 : vector<32x1xf32> to vector<32x256xf32>
    %18 = arith.addf %15, %17 : vector<32x256xf32>
    %cst_15 = arith.constant 0.000000e+00 : f32
    %19 = vector.broadcast %cst_15 : f32 to vector<32x256xf32>
    %20 = arith.maximumf %18, %19 : vector<32x256xf32>
    %21 = arith.truncf %20 : vector<32x256xf32> to vector<32x256xbf16>
    %c0_16 = arith.constant 0 : index
    %c0_17 = arith.constant 0 : index
    %22 = vector.load %arg4[%c0_16, %c0_17] : memref<32x256xbf16, #tpu.memory_space<vmem>>, vector<32x256xbf16>
    tpu.vector_store %arg4[%c0_16, %c0_17], %21 {strides = array<i32>} : memref<32x256xbf16, #tpu.memory_space<vmem>>, vector<32x256xbf16>,
    return
  }
  func.func @transform_0(%arg0: i32) -> (i32, i32) {
    %c0_i32 = arith.constant 0 : i32
    %c0_i32_0 = arith.constant 0 : i32
    %c0_i32_1 = arith.constant 0 : i32
    return %c0_i32, %c0_i32_0 : i32, i32
  }
  func.func @transform_1(%arg0: i32) -> (i32, i32, i32) {
    %c0_i32 = arith.constant 0 : i32
    %c0_i32_0 = arith.constant 0 : i32
    %c0_i32_1 = arith.constant 0 : i32
    return %c0_i32, %c0_i32_0, %arg0 : i32, i32, i32
  }
  func.func @transform_2(%arg0: i32) -> (i32, i32) {
    %c0_i32 = arith.constant 0 : i32
    %c0_i32_0 = arith.constant 0 : i32
    %c0_i32_1 = arith.constant 0 : i32
    return %c0_i32, %c0_i32_0 : i32, i32
  }
  func.func @transform_3(%arg0: i32) -> (i32, i32) {
    %c0_i32 = arith.constant 0 : i32
    %c0_i32_0 = arith.constant 0 : i32
    return %c0_i32, %arg0 : i32, i32
  }
}

module attributes {stable_mosaic.version = 11 : i64} {
  func.func @_conv_kernel(%arg0: i32, %arg1: memref<64x800xbf16, #tpu.memory_space<vmem>>, %arg2: memref<4x800x128xbf16, #tpu.memory_space<vmem>>, %arg3: memref<64x1xf32, #tpu.memory_space<vmem>>, %arg4: memref<64x128xbf16, #tpu.memory_space<vmem>>) attributes {dimension_semantics = [#tpu.dimension_semantics<parallel>], iteration_bounds = array<i64: 1>, scalar_prefetch = 0 : i64, scratch_operands = 0 : i64, tpu.core_type = #tpu.core_type<tc>, window_params = [{pipeline_mode = #tpu.pipeline_mode<synchronous>, transform_indices = @transform_0, window_bounds = array<i64: 64, 800>}, {transform_indices = @transform_1, window_bounds = array<i64: 4, 800, 128>}, {pipeline_mode = #tpu.pipeline_mode<synchronous>, transform_indices = @transform_2, window_bounds = array<i64: 64, 1>}, {transform_indices = @transform_3, window_bounds = array<i64: 64, 128>}]} {
    %c0 = arith.constant 0 : index
    %c0_0 = arith.constant 0 : index
    %0 = vector.load %arg1[%c0, %c0_0] : memref<64x800xbf16, #tpu.memory_space<vmem>>, vector<64x800xbf16>
    %c0_1 = arith.constant 0 : index
    %c0_2 = arith.constant 0 : index
    %c0_3 = arith.constant 0 : index
    %1 = vector.load %arg2[%c0_1, %c0_2, %c0_3] : memref<4x800x128xbf16, #tpu.memory_space<vmem>>, vector<1x800x128xbf16>
    %2 = vector.shape_cast %1 : vector<1x800x128xbf16> to vector<800x128xbf16>
    %cst = arith.constant dense<0.000000e+00> : vector<64x128xf32>
    %3 = tpu.matmul %0, %2, %cst {dimension_numbers = #tpu.dot_dimension_numbers<[1], [0], [0], [1], [0, 0, 1, 1], [], []>} : vector<64x800xbf16>, vector<800x128xbf16>, vector<64x128xf32> -> vector<64x128xf32>
    %c1 = arith.constant 1 : index
    %c0_4 = arith.constant 0 : index
    %c0_5 = arith.constant 0 : index
    %4 = vector.load %arg2[%c1, %c0_4, %c0_5] : memref<4x800x128xbf16, #tpu.memory_space<vmem>>, vector<1x800x128xbf16>
    %5 = vector.shape_cast %4 : vector<1x800x128xbf16> to vector<800x128xbf16>
    %cst_6 = arith.constant dense<0.000000e+00> : vector<64x128xf32>
    %6 = tpu.matmul %0, %5, %cst_6 {dimension_numbers = #tpu.dot_dimension_numbers<[1], [0], [0], [1], [0, 0, 1, 1], [], []>} : vector<64x800xbf16>, vector<800x128xbf16>, vector<64x128xf32> -> vector<64x128xf32>
    %7 = arith.maximumf %3, %6 : vector<64x128xf32>
    %c2 = arith.constant 2 : index
    %c0_7 = arith.constant 0 : index
    %c0_8 = arith.constant 0 : index
    %8 = vector.load %arg2[%c2, %c0_7, %c0_8] : memref<4x800x128xbf16, #tpu.memory_space<vmem>>, vector<1x800x128xbf16>
    %9 = vector.shape_cast %8 : vector<1x800x128xbf16> to vector<800x128xbf16>
    %cst_9 = arith.constant dense<0.000000e+00> : vector<64x128xf32>
    %10 = tpu.matmul %0, %9, %cst_9 {dimension_numbers = #tpu.dot_dimension_numbers<[1], [0], [0], [1], [0, 0, 1, 1], [], []>} : vector<64x800xbf16>, vector<800x128xbf16>, vector<64x128xf32> -> vector<64x128xf32>
    %11 = arith.maximumf %7, %10 : vector<64x128xf32>
    %c3 = arith.constant 3 : index
    %c0_10 = arith.constant 0 : index
    %c0_11 = arith.constant 0 : index
    %12 = vector.load %arg2[%c3, %c0_10, %c0_11] : memref<4x800x128xbf16, #tpu.memory_space<vmem>>, vector<1x800x128xbf16>
    %13 = vector.shape_cast %12 : vector<1x800x128xbf16> to vector<800x128xbf16>
    %cst_12 = arith.constant dense<0.000000e+00> : vector<64x128xf32>
    %14 = tpu.matmul %0, %13, %cst_12 {dimension_numbers = #tpu.dot_dimension_numbers<[1], [0], [0], [1], [0, 0, 1, 1], [], []>} : vector<64x800xbf16>, vector<800x128xbf16>, vector<64x128xf32> -> vector<64x128xf32>
    %15 = arith.maximumf %11, %14 : vector<64x128xf32>
    %c0_13 = arith.constant 0 : index
    %c0_14 = arith.constant 0 : index
    %16 = vector.load %arg3[%c0_13, %c0_14] : memref<64x1xf32, #tpu.memory_space<vmem>>, vector<64x1xf32>
    %17 = vector.broadcast %16 : vector<64x1xf32> to vector<64x128xf32>
    %18 = arith.addf %15, %17 : vector<64x128xf32>
    %cst_15 = arith.constant 0.000000e+00 : f32
    %19 = vector.broadcast %cst_15 : f32 to vector<64x128xf32>
    %20 = arith.maximumf %18, %19 : vector<64x128xf32>
    %21 = arith.truncf %20 : vector<64x128xf32> to vector<64x128xbf16>
    %c0_16 = arith.constant 0 : index
    %c0_17 = arith.constant 0 : index
    %22 = vector.load %arg4[%c0_16, %c0_17] : memref<64x128xbf16, #tpu.memory_space<vmem>>, vector<64x128xbf16>
    tpu.vector_store %arg4[%c0_16, %c0_17], %21 {strides = array<i32>} : memref<64x128xbf16, #tpu.memory_space<vmem>>, vector<64x128xbf16>,
    return
  }
  func.func @transform_0(%arg0: i32) -> (i32, i32) {
    %c0_i32 = arith.constant 0 : i32
    %c0_i32_0 = arith.constant 0 : i32
    %c0_i32_1 = arith.constant 0 : i32
    return %c0_i32, %c0_i32_0 : i32, i32
  }
  func.func @transform_1(%arg0: i32) -> (i32, i32, i32) {
    %c0_i32 = arith.constant 0 : i32
    %c0_i32_0 = arith.constant 0 : i32
    %c0_i32_1 = arith.constant 0 : i32
    return %c0_i32, %c0_i32_0, %arg0 : i32, i32, i32
  }
  func.func @transform_2(%arg0: i32) -> (i32, i32) {
    %c0_i32 = arith.constant 0 : i32
    %c0_i32_0 = arith.constant 0 : i32
    %c0_i32_1 = arith.constant 0 : i32
    return %c0_i32, %c0_i32_0 : i32, i32
  }
  func.func @transform_3(%arg0: i32) -> (i32, i32) {
    %c0_i32 = arith.constant 0 : i32
    %c0_i32_0 = arith.constant 0 : i32
    return %c0_i32, %arg0 : i32, i32
  }
}

module attributes {stable_mosaic.version = 11 : i64} {
  func.func @_fc_head_kernel(%arg0: i32, %arg1: memref<8x576xbf16, #tpu.memory_space<vmem>>, %arg2: memref<576x256xbf16, #tpu.memory_space<vmem>>, %arg3: memref<1x256xf32, #tpu.memory_space<vmem>>, %arg4: memref<256x10xbf16, #tpu.memory_space<vmem>>, %arg5: memref<1x10xf32, #tpu.memory_space<vmem>>, %arg6: memref<8x10xf32, #tpu.memory_space<vmem>>) attributes {dimension_semantics = [#tpu.dimension_semantics<parallel>], iteration_bounds = array<i64: 1>, scalar_prefetch = 0 : i64, scratch_operands = 0 : i64, tpu.core_type = #tpu.core_type<tc>, window_params = [{transform_indices = @transform_0, window_bounds = array<i64: 8, 576>}, {pipeline_mode = #tpu.pipeline_mode<synchronous>, transform_indices = @transform_1, window_bounds = array<i64: 576, 256>}, {pipeline_mode = #tpu.pipeline_mode<synchronous>, transform_indices = @transform_2, window_bounds = array<i64: 1, 256>}, {pipeline_mode = #tpu.pipeline_mode<synchronous>, transform_indices = @transform_3, window_bounds = array<i64: 256, 10>}, {pipeline_mode = #tpu.pipeline_mode<synchronous>, transform_indices = @transform_4, window_bounds = array<i64: 1, 10>}, {transform_indices = @transform_5, window_bounds = array<i64: 8, 10>}]} {
    %c0 = arith.constant 0 : index
    %c0_0 = arith.constant 0 : index
    %0 = vector.load %arg1[%c0, %c0_0] : memref<8x576xbf16, #tpu.memory_space<vmem>>, vector<8x576xbf16>
    %c0_1 = arith.constant 0 : index
    %c0_2 = arith.constant 0 : index
    %1 = vector.load %arg2[%c0_1, %c0_2] : memref<576x256xbf16, #tpu.memory_space<vmem>>, vector<576x256xbf16>
    %cst = arith.constant dense<0.000000e+00> : vector<8x256xf32>
    %2 = tpu.matmul %0, %1, %cst {dimension_numbers = #tpu.dot_dimension_numbers<[1], [0], [0], [1], [0, 0, 1, 1], [], []>} : vector<8x576xbf16>, vector<576x256xbf16>, vector<8x256xf32> -> vector<8x256xf32>
    %c0_3 = arith.constant 0 : index
    %c0_4 = arith.constant 0 : index
    %3 = vector.load %arg3[%c0_3, %c0_4] : memref<1x256xf32, #tpu.memory_space<vmem>>, vector<1x256xf32>
    %4 = vector.broadcast %3 : vector<1x256xf32> to vector<8x256xf32>
    %5 = arith.addf %2, %4 : vector<8x256xf32>
    %cst_5 = arith.constant 0.000000e+00 : f32
    %6 = vector.broadcast %cst_5 : f32 to vector<8x256xf32>
    %7 = arith.maximumf %5, %6 : vector<8x256xf32>
    %8 = arith.truncf %7 : vector<8x256xf32> to vector<8x256xbf16>
    %c0_6 = arith.constant 0 : index
    %c0_7 = arith.constant 0 : index
    %9 = vector.load %arg4[%c0_6, %c0_7] : memref<256x10xbf16, #tpu.memory_space<vmem>>, vector<256x10xbf16>
    %cst_8 = arith.constant dense<0.000000e+00> : vector<8x10xf32>
    %10 = tpu.matmul %8, %9, %cst_8 {dimension_numbers = #tpu.dot_dimension_numbers<[1], [0], [0], [1], [0, 0, 1, 1], [], []>} : vector<8x256xbf16>, vector<256x10xbf16>, vector<8x10xf32> -> vector<8x10xf32>
    %c0_9 = arith.constant 0 : index
    %c0_10 = arith.constant 0 : index
    %11 = vector.load %arg5[%c0_9, %c0_10] : memref<1x10xf32, #tpu.memory_space<vmem>>, vector<1x10xf32>
    %12 = vector.broadcast %11 : vector<1x10xf32> to vector<8x10xf32>
    %13 = arith.addf %10, %12 : vector<8x10xf32>
    %cst_11 = arith.constant dense<0xFF800000> : vector<8xf32>
    %14 = vector.multi_reduction <maximumf>, %13, %cst_11 [1] : vector<8x10xf32> to vector<8xf32>
    %15 = vector.shape_cast %14 : vector<8xf32> to vector<8x1xf32>
    %16 = vector.broadcast %15 : vector<8x1xf32> to vector<8x10xf32>
    %17 = arith.subf %13, %16 : vector<8x10xf32>
    %18 = math.exp %17 : vector<8x10xf32>
    %cst_12 = arith.constant dense<0.000000e+00> : vector<8xf32>
    %19 = vector.multi_reduction <add>, %18, %cst_12 [1] : vector<8x10xf32> to vector<8xf32>
    %20 = vector.shape_cast %19 : vector<8xf32> to vector<8x1xf32>
    %21 = math.log %20 : vector<8x1xf32>
    %22 = vector.broadcast %21 : vector<8x1xf32> to vector<8x10xf32>
    %23 = arith.subf %17, %22 : vector<8x10xf32>
    %c0_13 = arith.constant 0 : index
    %c0_14 = arith.constant 0 : index
    %24 = vector.load %arg6[%c0_13, %c0_14] : memref<8x10xf32, #tpu.memory_space<vmem>>, vector<8x10xf32>
    tpu.vector_store %arg6[%c0_13, %c0_14], %23 {strides = array<i32>} : memref<8x10xf32, #tpu.memory_space<vmem>>, vector<8x10xf32>,
    return
  }
  func.func @transform_0(%arg0: i32) -> (i32, i32) {
    %c0_i32 = arith.constant 0 : i32
    %c0_i32_0 = arith.constant 0 : i32
    return %arg0, %c0_i32 : i32, i32
  }
  func.func @transform_1(%arg0: i32) -> (i32, i32) {
    %c0_i32 = arith.constant 0 : i32
    %c0_i32_0 = arith.constant 0 : i32
    %c0_i32_1 = arith.constant 0 : i32
    return %c0_i32, %c0_i32_0 : i32, i32
  }
  func.func @transform_2(%arg0: i32) -> (i32, i32) {
    %c0_i32 = arith.constant 0 : i32
    %c0_i32_0 = arith.constant 0 : i32
    %c0_i32_1 = arith.constant 0 : i32
    return %c0_i32, %c0_i32_0 : i32, i32
  }
  func.func @transform_3(%arg0: i32) -> (i32, i32) {
    %c0_i32 = arith.constant 0 : i32
    %c0_i32_0 = arith.constant 0 : i32
    %c0_i32_1 = arith.constant 0 : i32
    return %c0_i32, %c0_i32_0 : i32, i32
  }
  func.func @transform_4(%arg0: i32) -> (i32, i32) {
    %c0_i32 = arith.constant 0 : i32
    %c0_i32_0 = arith.constant 0 : i32
    %c0_i32_1 = arith.constant 0 : i32
    return %c0_i32, %c0_i32_0 : i32, i32
  }
  func.func @transform_5(%arg0: i32) -> (i32, i32) {
    %c0_i32 = arith.constant 0 : i32
    %c0_i32_0 = arith.constant 0 : i32
    return %arg0, %c0_i32 : i32, i32
  }
}

</mosaic_0001>

<bundles_post_ra>
// kernel: cnn_forward.4
= control target key start
LH: loop header
LB: loop body
LE: loop exit
PB: predicated region body
PF: predicated region fallthrough
CT: control target
= control target key end

     0   :  { %s646_s12 = smov 0   ;;  %s648_s13 = smov 0   ;;  %s746_s0 = inlined_call_operand.vmem [shape: bf16[32,32], index: 0, kind: input, shape index: {}]   ;;  %s747_s1 = inlined_call_operand.vmem [shape: bf16[1,32,1152], index: 1, kind: input, shape index: {}]   ;;  %s748_s2 = inlined_call_operand.vmem [shape: f32[32,1], index: 2, kind: input, shape index: {}]   ;;  %s749_s3 = inlined_call_operand.vmem [shape: bf16[32,1152], index: 3, kind: output, shape index: {}]  }
   0x1   :  { %s650_s14 = smov 0  }
   0x2 LB: > { %s497_s15 = sadd.s32 4294967295, %s623_s14   ;;  %s663_s16 = sadd.s32 1, %s623_s14   ;;  %s623_s14 = sphi %s650_s14, %s753_s14   ;;  %s619_s13 = sphi %s648_s13, %s752_s13   ;;  %s615_s12 = sphi %s646_s12, %s751_s12  }
   0x3   : > { %s38_s17 = ssub.s32 %s623_s14, %s663_s16  ;;  %s41_s18 = sadd.s32 1, %s619_s13 }
   0x4   : > { %p39_p0 = scmp.eq.s32.totalorder %s38_s17, 0  ;;  %p48_p1 = scmp.ne.s32.totalorder %s619_s13, %s615_s12 }
   0x5   : > { %p49_p2 = scmp.eq.s32.totalorder %s623_s14, 0  ;;  %p99_p3 = scmp.eq.s32.totalorder %s497_s15, 2 }
   0x6   : > { %s674_s19 = scalar_select %p39_p0, %s619_s13, %s41_s18  }
   0x7   : > { %p50_p4 = por %p49_p2, %p48_p1  ;;  %p676_p5 = por %p99_p3, %p48_p1 }
   0x8   : > { %p500_p6 = scmp.ge.s32.totalorder %s623_s14, 3 }
   0xa   : > { %127 = sbr.rel (%p500_p6) target bundleno = 28 (0x1c), region = 24 }
   0xf   : > { %130 = sbr.rel (!%p50_p4) target bundleno = 28 (0x1c), region = 28  ;;  %s132_s21 = sand.u32 (%p50_p4), 1, %s619_s13  }
  0x10   : > { %s560_s22 = smul.u32 (%p50_p4), 12, %s623_s14 }
  0x11   : > { %s572_s23 = smul.u32 (%p50_p4), 48, %s132_s21 }
  0x12   : > { %s137_s26 = scalar_lea.vmem (%p50_p4), %s747_s1, %s560_s22 }
  0x13   : > { %v152_v0 = vld [vmem:[%s137_s26] sm:$0xff] (%p50_p4)  ;;  %v156_v2 = vld [vmem:[%s137_s26 + $0x48] sm:$0xff] (%p50_p4)  ;;  %s134_s27 = scalar_lea.vmem (%p50_p4), [#allocation2], %s572_s23  ;;  %v506_v6 = vld [vmem:[%s137_s26 + $0x50] sm:$0xf] (%p50_p4) }
  0x14   : > { %v154_v1 = vld [vmem:[%s137_s26 + $0x24] sm:$0xff]  ;;  %153 = vst [vmem:[%s134_s27] sm:$0xff] %v152_v0  ;;  %v158_v3 = vld [vmem:[%s137_s26 + $0x6c] sm:$0xff]  ;;  %v508_v7 = vld [vmem:[%s137_s26 + $0x74] sm:$0xf] }
  0x15   : > { %155 = vst [vmem:[%s134_s27 + $0xc] sm:$0xff] %v154_v1  ;;  %v502_v4 = vld [vmem:[%s137_s26 + $0x8] sm:$0xf]  ;;  %v504_v5 = vld [vmem:[%s137_s26 + $0x2c] sm:$0xf] }
  0x16   : > { %157 = vst [vmem:[%s134_s27 + $0x18] sm:$0xff] %v156_v2 }
  0x17   : > { %159 = vst [vmem:[%s134_s27 + $0x24] sm:$0xff] %v158_v3 }
  0x18   : > { %503 = vst [vmem:[%s134_s27 + $0x8] sm:$0xf] %v502_v4 }
  0x19   : > { %505 = vst [vmem:[%s134_s27 + $0x14] sm:$0xf] %v504_v5 }
  0x1a   : > { %507 = vst [vmem:[%s134_s27 + $0x20] sm:$0xf] %v506_v6 }
  0x1b   : > { %509 = vst [vmem:[%s134_s27 + $0x2c] sm:$0xf] %v508_v7 }
  0x1c PF: > { %p510_p7 = scmp.ge.s32.totalorder %s623_s14, 1  ;;  %p180_p8 = scmp.lt.s32.totalorder %s623_s14, 4 }
  0x1e   : > { %p181_p9 = pnand %p510_p7, %p180_p8 }
  0x1f   : > { %s187_s28 = sand.u32 (!%p181_p9), 1, %s615_s12  }
  0x20   : > { %184 = sbr.rel (%p181_p9) target bundleno = 220 (0xdc), region = 54 }
  0x21   : > { %s692_s4 = smul.u32 (!%p181_p9), 48, %s187_s28 }
  0x23   : > { %s189_s7 = scalar_lea.vmem (!%p181_p9), [#allocation2], %s692_s4  ;;  %s711_s22 = scalar_lea.vmem (!%p181_p9), [#allocation3], %s692_s4 }
  0x25   : > { %v224_v8 = vld [vmem:[%s748_s2] sm:$0xff]  ;;  %v625_v9 = vmov 0   ;;  %v226_v10 = vld [vmem:[%s748_s2 + $0x10] sm:$0xff]  ;;  %v533_v11 = vld [vmem:[%s189_s7 + $0x18] sm:$0xf]  ;;  %vm290_vm0 = vcmask 261120  }
  0x26   : > { %599 = vset.pattern.permute.xlu0 %v625_v9  ;;  %600 = vset.pattern.permute.xlu1 %v625_v9  ;;  %v567_v12 = vld [vmem:[%s189_s7 + $0x20] sm:$0xf0]  ;;  %v566_v13 = vld [vmem:[%s189_s7 + $0x1c] sm:$0xf]  ;;  %v535_v15 = vld [vmem:[%s189_s7 + $0x24] sm:$0xf0] }
  0x27   : > { %230 = vperm.xlu0 %599, %v224_v8   ;;  %240 = vperm.xlu1 %600, %v226_v10   ;;  %v534_v14 = vor.u32 %v567_v12, %v533_v11  ;;  %v541_v16 = vld [vmem:[%s189_s7 + $0x20] sm:$0xf]  ;;  %v568_v17 = vld [vmem:[%s189_s7 + $0x28] sm:$0xf0]  ;;  %v538_v20 = vor.u32 %v566_v13, %v535_v15  ;;  %v563_v24 = vld [vmem:[%s189_s7 + $0x4] sm:$0xf] }
  0x28   : > { %v225_v18 = vld [vmem:[%s748_s2 + $0x8] sm:$0xff]  ;;  %v227_v19 = vld [vmem:[%s748_s2 + $0x18] sm:$0xff]  ;;  %v542_v21 = vor.u32 %v568_v17, %v541_v16  ;;  %v521_v22 = vld [vmem:[%s189_s7] sm:$0xf]  ;;  %s569_s23 = smul.u32 (%p676_p5), 12, %s497_s15 }
  0x29   : > { %v564_v23 = vld [vmem:[%s189_s7 + $0x8] sm:$0xf0]  ;;  %303 = vmatpush.bf16.msra.mxu0 %v534_v14  ;;  %v523_v26 = vld [vmem:[%s189_s7 + $0xc] sm:$0xf0]  ;;  %v529_v27 = vld [vmem:[%s189_s7 + $0x8] sm:$0xf]  ;;  %570 = vmatpush.bf16.msra.mxu3 %v534_v14 }
  0x2a   : > { %v522_v25 = vor.u32 %v564_v23, %v521_v22  ;;  %v565_v28 = vld [vmem:[%s189_s7 + $0x10] sm:$0xf0]  ;;  %322 = vmatpush.bf16.msra.mxu1 %v538_v20  ;;  %341 = vmatpush.bf16.msra.mxu2 %v542_v21  ;;  %v526_v29 = vor.u32 %v563_v24, %v523_v26  ;;  %v562_v32 = vld [vmem:[%s746_s0 + $0x8] sm:$0xff]  ;;  %s391_s26 = scalar_lea.vmem (%p676_p5), %s749_s3, %s569_s23 }
  0x2b   : > { %v530_v30 = vor.u32 %v565_v28, %v529_v27  ;;  %v561_v31 = vld [vmem:[%s746_s0] sm:$0xff] }
  0x2d   : > { %304 = vmatpush.bf16.msra.mxu0 %v522_v25  ;;  %571 = vmatpush.bf16.msra.mxu3 %v522_v25 }
  0x2e   : > { %323 = vmatpush.bf16.msra.mxu1 %v526_v29  ;;  %342 = vmatpush.bf16.msra.mxu2 %v530_v30 }
  0x2f   : > { %235 = vperm.xlu0 %599, %v225_v18   ;;  %245 = vperm.xlu1 %600, %v227_v19  }
  0x30   : > { %543 = vmatmul.msk.bf16.vlgmr.msra.gmra.mxu0 %vm290_vm0, %v561_v31  ;;  %544 = vmatmul.msk.bf16.vlgmr.msra.gmra.mxu3 %vm290_vm0, %v562_v32 }
  0x31   : > { %545 = vmatmul.msk.bf16.vlgmr.msra.gmra.mxu1 %vm290_vm0, %v561_v31  ;;  %547 = vmatmul.msk.bf16.vlgmr.msra.gmra.mxu2 %vm290_vm0, %v561_v31 }
  0x41   : > { %546 = vmatmul.msk.bf16.gmra.mxu1 %vm290_vm0, %v562_v32  ;;  %548 = vmatmul.msk.bf16.gmra.mxu2 %vm290_vm0, %v562_v32 }
  0x99   : > { %v231_v33 = vpop.permute.xlu0 %230  ;;  %v241_v50 = vpop.permute.xlu1 %240 }
  0xa1   : > { %v236_v41 = vpop.permute.xlu0 %235  ;;  %v246_v0 = vpop.permute.xlu1 %245 }
  0xad   : > { %v306_v34 = vpop.f32.mrf.mxu0 }
  0xae   : > { %v307_v35 = vadd.f32 %v306_v34, %v231_v33  ;;  %v325_v36 = vpop.f32.mrf.mxu1 }
  0xaf   : > { %v326_v37 = vadd.f32 %v325_v36, %v231_v33 }
  0xb0   : > { %v354_v38 = vmax.f32 %v307_v35, 0.0 }
  0xb1   : > { %v355_v39 = vmax.f32 %v326_v37, 0.0 }
  0xb3   : > { %v366_v40 = vpack.c.bf16 %v355_v39, %v354_v38  ;;  %v311_v51 = vpop.f32.mrf.mxu3 }
  0xb4   : > { %v344_v42 = vpop.f32.mrf.mxu2  ;;  %v312_v55 = vadd.f32 %v311_v51, %v241_v50 }
  0xb5   : > { %374 = vst [vmem:[%s711_s22] sm:$0xff] %v366_v40  ;;  %v345_v43 = vadd.f32 %v344_v42, %v231_v33  ;;  %v308_v44 = vpop.f32.mrf.mxu0 }
  0xb6   : > { %v309_v45 = vadd.f32 %v308_v44, %v236_v41  ;;  %v327_v46 = vpop.f32.mrf.mxu1  ;;  %v360_v59 = vmax.f32 %v312_v55, 0.0 }
  0xb7   : > { %v356_v47 = vmax.f32 %v345_v43, 0.0  ;;  %v328_v48 = vadd.f32 %v327_v46, %v236_v41 }
  0xb8   : > { %v357_v49 = vmax.f32 %v309_v45, 0.0 }
  0xb9   : > { %v367_v52 = vpack.c.bf16 %v356_v47, %v356_v47  ;;  %v358_v53 = vmax.f32 %v328_v48, 0.0 }
  0xbb   : > { %375 = vst [vmem:[%s711_s22 + $0x8] sm:$0xf] %v367_v52  ;;  %v368_v54 = vpack.c.bf16 %v358_v53, %v357_v49  ;;  %v313_v1 = vpop.f32.mrf.mxu3 }
  0xbc   : > { %v346_v56 = vpop.f32.mrf.mxu2  ;;  %v314_v4 = vadd.f32 %v313_v1, %v246_v0  ;;  %v406_v17 = vld [vmem:[%s711_s22] sm:$0xff] (%p676_p5) }
  0xbd   : > { %376 = vst [vmem:[%s711_s22 + $0xc] sm:$0xff] %v368_v54  ;;  %v347_v57 = vadd.f32 %v346_v56, %v236_v41 }
  0xbe   : > { %v330_v58 = vpop.f32.mrf.mxu1  ;;  %v363_v9 = vmax.f32 %v314_v4, 0.0  ;;  %407 = vst [vmem:[%s391_s26] sm:$0xff] (%p676_p5), %v406_v17 }
  0xbf   : > { %v359_v60 = vmax.f32 %v347_v57, 0.0  ;;  %v331_v61 = vadd.f32 %v330_v58, %v241_v50 }
  0xc1   : > { %v369_v62 = vpack.c.bf16 %v359_v60, %v359_v60  ;;  %v361_v63 = vmax.f32 %v331_v61, 0.0 }
  0xc2   : > { %v550_v21 = vld [vmem:[%s711_s22 + $0x8] sm:$0xf] (%p676_p5) }
  0xc3   : > { %377 = vst [vmem:[%s711_s22 + $0x14] sm:$0xf] %v369_v62  ;;  %v370_v2 = vpack.c.bf16 %v361_v63, %v360_v59 }
  0xc4   : > { %v349_v3 = vpop.f32.mrf.mxu2  ;;  %v408_v18 = vld [vmem:[%s711_s22 + $0xc] sm:$0xff] (%p676_p5)  ;;  %551 = vst [vmem:[%s391_s26 + $0x8] sm:$0xf] (%p676_p5), %v550_v21 }
  0xc5   : > { %378 = vst [vmem:[%s711_s22 + $0x18] sm:$0xff] %v370_v2  ;;  %v350_v5 = vadd.f32 %v349_v3, %v241_v50 }
  0xc6   : > { %v332_v6 = vpop.f32.mrf.mxu1  ;;  %409 = vst [vmem:[%s391_s26 + $0x24] sm:$0xff] (%p676_p5), %v408_v18 }
  0xc7   : > { %v362_v7 = vmax.f32 %v350_v5, 0.0  ;;  %v333_v8 = vadd.f32 %v332_v6, %v246_v0 }
  0xc9   : > { %v371_v10 = vpack.c.bf16 %v362_v7, %v362_v7  ;;  %v364_v11 = vmax.f32 %v333_v8, 0.0 }
  0xca   : > { %v552_v22 = vld [vmem:[%s711_s22 + $0x14] sm:$0xf] (%p676_p5) }
  0xcb   : > { %379 = vst [vmem:[%s711_s22 + $0x20] sm:$0xf] %v371_v10  ;;  %v372_v12 = vpack.c.bf16 %v364_v11, %v363_v9 }
  0xcc   : > { %v351_v13 = vpop.f32.mrf.mxu2  ;;  %v410_v19 = vld [vmem:[%s711_s22 + $0x18] sm:$0xff] (%p676_p5)  ;;  %553 = vst [vmem:[%s391_s26 + $0x2c] sm:$0xf] (%p676_p5), %v552_v22 }
  0xcd   : > { %380 = vst [vmem:[%s711_s22 + $0x24] sm:$0xff] %v372_v12  ;;  %v352_v14 = vadd.f32 %v351_v13, %v246_v0 }
  0xce   : > { %411 = vst [vmem:[%s391_s26 + $0x48] sm:$0xff] (%p676_p5), %v410_v19 }
  0xcf   : > { %v365_v15 = vmax.f32 %v352_v14, 0.0  ;;  %388 = sbr.rel (!%p676_p5) target bundleno = 220 (0xdc), region = 62 }
  0xd1   : > { %v373_v16 = vpack.c.bf16 %v365_v15, %v365_v15 }
  0xd2   : > { %v554_v23 = vld [vmem:[%s711_s22 + $0x20] sm:$0xf] (%p676_p5) }
  0xd3   : > { %381 = vst [vmem:[%s711_s22 + $0x2c] sm:$0xf] %v373_v16 }
  0xd4   : > { %v412_v20 = vld [vmem:[%s711_s22 + $0x24] sm:$0xff]  ;;  %555 = vst [vmem:[%s391_s26 + $0x50] sm:$0xf] %v554_v23 }
  0xd5   : > { %413 = vst [vmem:[%s391_s26 + $0x6c] sm:$0xff] %v412_v20 }
  0xda   : > { %v556_v24 = vld [vmem:[%s711_s22 + $0x2c] sm:$0xf] }
  0xdb   : > { %557 = vst [vmem:[%s391_s26 + $0x74] sm:$0xf] %v556_v24 }
  0xdc PF: > { %p10_p10 = scmp.ge.s32.totalorder %s663_s16, 5   ;;  %s751_s12 = smov %s619_s13 }
  0xdd   : > { %s752_s13 = smov %s674_s19  ;;  %s753_s14 = smov %s663_s16 }
  0xde   :  { %12 = sbr.rel (!%p10_p10) target bundleno = 2 (0x2), region = 131 }

// kernel: cnn_forward.5
= control target key start
LH: loop header
LB: loop body
LE: loop exit
PB: predicated region body
PF: predicated region fallthrough
CT: control target
= control target key end

     0   :  { %vm701_vm0 = vcmask 261120   ;;  %s8908_s1 = inlined_call_operand.vmem [shape: bf16[4,800,256], index: 1, kind: input, shape index: {}]   ;;  %s8909_s0 = inlined_call_operand.vmem [shape: bf16[32,800], index: 0, kind: input, shape index: {}]   ;;  %s8910_s2 = inlined_call_operand.vmem [shape: f32[32,1], index: 2, kind: input, shape index: {}]   ;;  %s8911_s3 = inlined_call_operand.vmem [shape: bf16[32,256], index: 3, kind: output, shape index: {}]  }
   0x1   :  { %v3765_v0 = vld [vmem:[%s8908_s1 + $0x70] sm:$0xf]  ;;  %v5652_v1 = vld [vmem:[%s8908_s1 + $0x74] sm:$0xf0]  ;;  %v3757_v11 = vld [vmem:[%s8908_s1 + $0x60] sm:$0xf] }
   0x2   :  { %v3829_v2 = vld [vmem:[%s8908_s1 + $0xf0] sm:$0xf]  ;;  %v3766_v3 = vor.u32 %v5652_v1, %v3765_v0  ;;  %v5668_v4 = vld [vmem:[%s8908_s1 + $0xf4] sm:$0xf0]  ;;  %v5650_v13 = vld [vmem:[%s8908_s1 + $0x64] sm:$0xf0] }
   0x3   :  { %v3893_v5 = vld [vmem:[%s8908_s1 + $0x170] sm:$0xf]  ;;  %v5684_v6 = vld [vmem:[%s8908_s1 + $0x174] sm:$0xf0]  ;;  %v3830_v7 = vor.u32 %v5668_v4, %v3829_v2  ;;  %v3821_v14 = vld [vmem:[%s8908_s1 + $0xe0] sm:$0xf]  ;;  %v3758_v16 = vor.u32 %v5650_v13, %v3757_v11 }
   0x4   :  { %v3894_v8 = vor.u32 %v5684_v6, %v3893_v5  ;;  %v3957_v9 = vld [vmem:[%s8908_s1 + $0x1f0] sm:$0xf]  ;;  %v5700_v10 = vld [vmem:[%s8908_s1 + $0x1f4] sm:$0xf0]  ;;  %708 = vmatpush.bf16.msra.mxu0 %v3766_v3  ;;  %v5666_v15 = vld [vmem:[%s8908_s1 + $0xe4] sm:$0xf0] }
   0x5   :  { %v3958_v12 = vor.u32 %v5700_v10, %v3957_v9  ;;  %727 = vmatpush.bf16.msra.mxu1 %v3830_v7  ;;  %v3822_v17 = vor.u32 %v5666_v15, %v3821_v14  ;;  %v3885_v18 = vld [vmem:[%s8908_s1 + $0x160] sm:$0xf]  ;;  %v5682_v19 = vld [vmem:[%s8908_s1 + $0x164] sm:$0xf0]  ;;  %v3749_v23 = vld [vmem:[%s8908_s1 + $0x50] sm:$0xf] }
   0x6   :  { %746 = vmatpush.bf16.msra.mxu2 %v3894_v8  ;;  %v3949_v20 = vld [vmem:[%s8908_s1 + $0x1e0] sm:$0xf]  ;;  %v3886_v21 = vor.u32 %v5682_v19, %v3885_v18  ;;  %v5698_v22 = vld [vmem:[%s8908_s1 + $0x1e4] sm:$0xf0]  ;;  %v5648_v24 = vld [vmem:[%s8908_s1 + $0x54] sm:$0xf0] }
   0x7   :  { %765 = vmatpush.bf16.msra.mxu3 %v3958_v12  ;;  %v3950_v25 = vor.u32 %v5698_v22, %v3949_v20  ;;  %v3813_v26 = vld [vmem:[%s8908_s1 + $0xd0] sm:$0xf]  ;;  %v5664_v27 = vld [vmem:[%s8908_s1 + $0xd4] sm:$0xf0]  ;;  %v3750_v29 = vor.u32 %v5648_v24, %v3749_v23  ;;  %v3741_v35 = vld [vmem:[%s8908_s1 + $0x40] sm:$0xf] }
   0x8   :  { %v3877_v28 = vld [vmem:[%s8908_s1 + $0x150] sm:$0xf]  ;;  %709 = vmatpush.bf16.msra.mxu0 %v3758_v16  ;;  %v5680_v30 = vld [vmem:[%s8908_s1 + $0x154] sm:$0xf0]  ;;  %v3814_v33 = vor.u32 %v5664_v27, %v3813_v26  ;;  %v5646_v36 = vld [vmem:[%s8908_s1 + $0x44] sm:$0xf0] }
   0x9   :  { %v3941_v31 = vld [vmem:[%s8908_s1 + $0x1d0] sm:$0xf]  ;;  %v5696_v32 = vld [vmem:[%s8908_s1 + $0x1d4] sm:$0xf0]  ;;  %728 = vmatpush.bf16.msra.mxu1 %v3822_v17  ;;  %v3878_v34 = vor.u32 %v5680_v30, %v3877_v28  ;;  %v3805_v37 = vld [vmem:[%s8908_s1 + $0xc0] sm:$0xf]  ;;  %v3742_v44 = vor.u32 %v5646_v36, %v3741_v35 }
   0xa   :  { %747 = vmatpush.bf16.msra.mxu2 %v3886_v21  ;;  %v3942_v38 = vor.u32 %v5696_v32, %v3941_v31  ;;  %v5662_v39 = vld [vmem:[%s8908_s1 + $0xc4] sm:$0xf0]  ;;  %v3869_v40 = vld [vmem:[%s8908_s1 + $0x140] sm:$0xf]  ;;  %v3733_v47 = vld [vmem:[%s8908_s1 + $0x30] sm:$0xf] }
   0xb   :  { %766 = vmatpush.bf16.msra.mxu3 %v3950_v25  ;;  %v5678_v41 = vld [vmem:[%s8908_s1 + $0x144] sm:$0xf0]  ;;  %v3933_v42 = vld [vmem:[%s8908_s1 + $0x1c0] sm:$0xf]  ;;  %v3806_v45 = vor.u32 %v5662_v39, %v3805_v37  ;;  %v5644_v48 = vld [vmem:[%s8908_s1 + $0x34] sm:$0xf0] }
   0xc   :  { %v5694_v43 = vld [vmem:[%s8908_s1 + $0x1c4] sm:$0xf0]  ;;  %710 = vmatpush.bf16.msra.mxu0 %v3750_v29  ;;  %v3870_v46 = vor.u32 %v5678_v41, %v3869_v40  ;;  %v3797_v49 = vld [vmem:[%s8908_s1 + $0xb0] sm:$0xf]  ;;  %v5660_v51 = vld [vmem:[%s8908_s1 + $0xb4] sm:$0xf0]  ;;  %v3734_v56 = vor.u32 %v5644_v48, %v3733_v47 }
   0xd   :  { %729 = vmatpush.bf16.msra.mxu1 %v3814_v33  ;;  %v3934_v50 = vor.u32 %v5694_v43, %v3933_v42  ;;  %v3861_v52 = vld [vmem:[%s8908_s1 + $0x130] sm:$0xf]  ;;  %v5676_v53 = vld [vmem:[%s8908_s1 + $0x134] sm:$0xf0]  ;;  %v3798_v57 = vor.u32 %v5660_v51, %v3797_v49  ;;  %v3725_v59 = vld [vmem:[%s8908_s1 + $0x20] sm:$0xf] }
   0xe   :  { %748 = vmatpush.bf16.msra.mxu2 %v3878_v34  ;;  %v3925_v54 = vld [vmem:[%s8908_s1 + $0x1b0] sm:$0xf]  ;;  %v5692_v55 = vld [vmem:[%s8908_s1 + $0x1b4] sm:$0xf0]  ;;  %v3862_v58 = vor.u32 %v5676_v53, %v3861_v52  ;;  %v5642_v60 = vld [vmem:[%s8908_s1 + $0x24] sm:$0xf0] }
   0xf   :  { %767 = vmatpush.bf16.msra.mxu3 %v3942_v38  ;;  %v3789_v61 = vld [vmem:[%s8908_s1 + $0xa0] sm:$0xf]  ;;  %v3926_v62 = vor.u32 %v5692_v55, %v3925_v54  ;;  %v5658_v63 = vld [vmem:[%s8908_s1 + $0xa4] sm:$0xf0]  ;;  %v3726_v4 = vor.u32 %v5642_v60, %v3725_v59  ;;  %v3717_v7 = vld [vmem:[%s8908_s1 + $0x10] sm:$0xf] }
  0x10   :  { %711 = vmatpush.bf16.msra.mxu0 %v3742_v44  ;;  %v3853_v0 = vld [vmem:[%s8908_s1 + $0x120] sm:$0xf]  ;;  %v5674_v1 = vld [vmem:[%s8908_s1 + $0x124] sm:$0xf0]  ;;  %v3790_v5 = vor.u32 %v5658_v63, %v3789_v61  ;;  %v5640_v8 = vld [vmem:[%s8908_s1 + $0x14] sm:$0xf0] }
  0x11   :  { %730 = vmatpush.bf16.msra.mxu1 %v3806_v45  ;;  %v3917_v2 = vld [vmem:[%s8908_s1 + $0x1a0] sm:$0xf]  ;;  %v5690_v3 = vld [vmem:[%s8908_s1 + $0x1a4] sm:$0xf0]  ;;  %v3854_v6 = vor.u32 %v5674_v1, %v3853_v0  ;;  %v3781_v9 = vld [vmem:[%s8908_s1 + $0x90] sm:$0xf]  ;;  %v3718_v17 = vor.u32 %v5640_v8, %v3717_v7 }
  0x12   :  { %749 = vmatpush.bf16.msra.mxu2 %v3870_v46  ;;  %v3918_v10 = vor.u32 %v5690_v3, %v3917_v2  ;;  %v5656_v11 = vld [vmem:[%s8908_s1 + $0x94] sm:$0xf0]  ;;  %v3845_v12 = vld [vmem:[%s8908_s1 + $0x110] sm:$0xf]  ;;  %v3709_v16 = vld [vmem:[%s8908_s1] sm:$0xf] }
  0x13   :  { %768 = vmatpush.bf16.msra.mxu3 %v3934_v50  ;;  %v5672_v13 = vld [vmem:[%s8908_s1 + $0x114] sm:$0xf0]  ;;  %v3909_v14 = vld [vmem:[%s8908_s1 + $0x190] sm:$0xf]  ;;  %v5638_v18 = vld [vmem:[%s8908_s1 + $0x4] sm:$0xf0]  ;;  %v3782_v21 = vor.u32 %v5656_v11, %v3781_v9 }
  0x14   :  { %712 = vmatpush.bf16.msra.mxu0 %v3734_v56  ;;  %v5688_v15 = vld [vmem:[%s8908_s1 + $0x194] sm:$0xf0]  ;;  %v3773_v19 = vld [vmem:[%s8908_s1 + $0x80] sm:$0xf]  ;;  %v5654_v20 = vld [vmem:[%s8908_s1 + $0x84] sm:$0xf0]  ;;  %v3846_v22 = vor.u32 %v5672_v13, %v3845_v12  ;;  %v3710_v33 = vor.u32 %v5638_v18, %v3709_v16 }
  0x15   :  { %731 = vmatpush.bf16.msra.mxu1 %v3798_v57  ;;  %v3837_v23 = vld [vmem:[%s8908_s1 + $0x100] sm:$0xf]  ;;  %v5670_v24 = vld [vmem:[%s8908_s1 + $0x104] sm:$0xf0]  ;;  %v3910_v26 = vor.u32 %v5688_v15, %v3909_v14  ;;  %v5626_v29 = vld [vmem:[%s8909_s0 + $0x18] sm:$0xf0]  ;;  %v3774_v37 = vor.u32 %v5654_v20, %v3773_v19 }
  0x16   :  { %750 = vmatpush.bf16.msra.mxu2 %v3862_v58  ;;  %v3901_v25 = vld [vmem:[%s8908_s1 + $0x180] sm:$0xf]  ;;  %v5686_v27 = vld [vmem:[%s8908_s1 + $0x184] sm:$0xf0]  ;;  %v5623_v30 = vld [vmem:[%s8909_s0 + $0x4] sm:$0xf]  ;;  %v3838_v38 = vor.u32 %v5670_v24, %v3837_v23 }
  0x17   :  { %769 = vmatpush.bf16.msra.mxu3 %v3926_v62  ;;  %v3653_v28 = vld [vmem:[%s8909_s0] sm:$0xf]  ;;  %v4101_v31 = vld [vmem:[%s8908_s1 + $0x310] sm:$0xf]  ;;  %v5736_v32 = vld [vmem:[%s8908_s1 + $0x314] sm:$0xf0]  ;;  %v3902_v42 = vor.u32 %v5686_v27, %v3901_v25 }
  0x18   :  { %713 = vmatpush.bf16.msra.mxu0 %v3726_v4  ;;  %v3655_v34 = vld [vmem:[%s8909_s0 + $0x1c] sm:$0xf0]  ;;  %v4085_v35 = vld [vmem:[%s8908_s1 + $0x2f0] sm:$0xf]  ;;  %v5732_v36 = vld [vmem:[%s8908_s1 + $0x2f4] sm:$0xf0]  ;;  %v4102_v44 = vor.u32 %v5736_v32, %v4101_v31  ;;  %v6295_v47 = vor.u32 %v5626_v29, %v3653_v28 }
  0x19   :  { %732 = vmatpush.bf16.msra.mxu1 %v3790_v5  ;;  %v3661_v39 = vld [vmem:[%s8909_s0 + $0x8] sm:$0xf]  ;;  %v5627_v40 = vld [vmem:[%s8909_s0 + $0x20] sm:$0xf0]  ;;  %v5624_v41 = vld [vmem:[%s8909_s0 + $0xc] sm:$0xf]  ;;  %v4086_v48 = vor.u32 %v5732_v36, %v4085_v35  ;;  %v6303_v51 = vor.u32 %v5623_v30, %v3655_v34 }
  0x1a   :  { %751 = vmatpush.bf16.msra.mxu2 %v3854_v6  ;;  %v3663_v43 = vld [vmem:[%s8909_s0 + $0x24] sm:$0xf0]  ;;  %v4021_v45 = vld [vmem:[%s8908_s1 + $0x270] sm:$0xf]  ;;  %v5716_v46 = vld [vmem:[%s8908_s1 + $0x274] sm:$0xf0]  ;;  %v6305_v52 = vor.u32 %v5627_v40, %v3661_v39 }
  0x1b   :  { %770 = vmatpush.bf16.msra.mxu3 %v3918_v10  ;;  %v5651_v49 = vld [vmem:[%s8908_s1 + $0x74] sm:$0xf]  ;;  %v3767_v50 = vld [vmem:[%s8908_s1 + $0x78] sm:$0xf0]  ;;  %v4077_v53 = vld [vmem:[%s8908_s1 + $0x2e0] sm:$0xf]  ;;  %v6313_v55 = vor.u32 %v5624_v41, %v3663_v43  ;;  %v4022_v56 = vor.u32 %v5716_v46, %v4021_v45 }
  0x1c   :  { %714 = vmatpush.bf16.msra.mxu0 %v3718_v17  ;;  %v5730_v54 = vld [vmem:[%s8908_s1 + $0x2e4] sm:$0xf0]  ;;  %v3770_v57 = vor.u32 %v5651_v49, %v3767_v50  ;;  %v4013_v58 = vld [vmem:[%s8908_s1 + $0x260] sm:$0xf]  ;;  %v5649_v61 = vld [vmem:[%s8908_s1 + $0x64] sm:$0xf] }
  0x1d   :  { %733 = vmatpush.bf16.msra.mxu1 %v3782_v21  ;;  %v5714_v59 = vld [vmem:[%s8908_s1 + $0x264] sm:$0xf0]  ;;  %v4078_v60 = vor.u32 %v5730_v54, %v4077_v53  ;;  %v3759_v62 = vld [vmem:[%s8908_s1 + $0x68] sm:$0xf0]  ;;  %v4069_v63 = vld [vmem:[%s8908_s1 + $0x2d0] sm:$0xf] }
  0x1e   :  { %752 = vmatpush.bf16.msra.mxu2 %v3846_v22  ;;  %v5728_v0 = vld [vmem:[%s8908_s1 + $0x2d4] sm:$0xf0]  ;;  %v4093_v1 = vld [vmem:[%s8908_s1 + $0x300] sm:$0xf]  ;;  %v5734_v2 = vld [vmem:[%s8908_s1 + $0x304] sm:$0xf0]  ;;  %v4014_v3 = vor.u32 %v5714_v59, %v4013_v58  ;;  %v3762_v5 = vor.u32 %v5649_v61, %v3759_v62 }
  0x1f   :  { %771 = vmatpush.bf16.msra.mxu3 %v3910_v26  ;;  %v4094_v4 = vor.u32 %v5734_v2, %v4093_v1  ;;  %v4005_v6 = vld [vmem:[%s8908_s1 + $0x250] sm:$0xf]  ;;  %v5712_v7 = vld [vmem:[%s8908_s1 + $0x254] sm:$0xf0]  ;;  %v4070_v8 = vor.u32 %v5728_v0, %v4069_v63  ;;  %v5647_v9 = vld [vmem:[%s8908_s1 + $0x54] sm:$0xf] }
  0x20   :  { %715 = vmatpush.bf16.msra.mxu0 %v3710_v33  ;;  %v3751_v10 = vld [vmem:[%s8908_s1 + $0x58] sm:$0xf0]  ;;  %v4061_v11 = vld [vmem:[%s8908_s1 + $0x2c0] sm:$0xf]  ;;  %v5726_v12 = vld [vmem:[%s8908_s1 + $0x2c4] sm:$0xf0]  ;;  %v4006_v13 = vor.u32 %v5712_v7, %v4005_v6 }
  0x21   :  { %734 = vmatpush.bf16.msra.mxu1 %v3774_v37  ;;  %v3997_v14 = vld [vmem:[%s8908_s1 + $0x240] sm:$0xf]  ;;  %v5710_v15 = vld [vmem:[%s8908_s1 + $0x244] sm:$0xf0]  ;;  %v3754_v16 = vor.u32 %v5647_v9, %v3751_v10  ;;  %v5645_v17 = vld [vmem:[%s8908_s1 + $0x44] sm:$0xf]  ;;  %v4062_v20 = vor.u32 %v5726_v12, %v4061_v11 }
  0x22   :  { %753 = vmatpush.bf16.msra.mxu2 %v3838_v38  ;;  %v3743_v18 = vld [vmem:[%s8908_s1 + $0x48] sm:$0xf0]  ;;  %v3681_v19 = vld [vmem:[%s8909_s0 + $0x38] sm:$0xf]  ;;  %v5633_v21 = vld [vmem:[%s8909_s0 + $0x50] sm:$0xf0]  ;;  %v3998_v27 = vor.u32 %v5710_v15, %v3997_v14 }
  0x23   :  { %772 = vmatpush.bf16.msra.mxu3 %v3902_v42  ;;  %716 = vmatmul.bf16.vlgmr.msra.gmra.mxu0 %v6295_v47  ;;  %v5630_v22 = vld [vmem:[%s8909_s0 + $0x3c] sm:$0xf]  ;;  %v3683_v23 = vld [vmem:[%s8909_s0 + $0x54] sm:$0xf0]  ;;  %v3689_v24 = vld [vmem:[%s8909_s0 + $0x40] sm:$0xf]  ;;  %v3746_v31 = vor.u32 %v5645_v17, %v3743_v18  ;;  %v6412_v35 = vor.u32 %v5633_v21, %v3681_v19 }
  0x24   :  { %735 = vmatmul.bf16.vlgmr.msra.gmra.mxu1 %v6303_v51  ;;  %784 = vmatpush.bf16.msrb.mxu0 %v4022_v56  ;;  %v4053_v25 = vld [vmem:[%s8908_s1 + $0x2b0] sm:$0xf]  ;;  %v5724_v26 = vld [vmem:[%s8908_s1 + $0x2b4] sm:$0xf0]  ;;  %v5634_v28 = vld [vmem:[%s8909_s0 + $0x58] sm:$0xf0]  ;;  %v6423_v40 = vor.u32 %v5630_v22, %v3683_v23 }
  0x25   :  { %803 = vmatpush.bf16.msrb.mxu1 %v4086_v48  ;;  %754 = vmatmul.bf16.vlgmr.msra.gmra.mxu2 %v6305_v52  ;;  %v5631_v29 = vld [vmem:[%s8909_s0 + $0x44] sm:$0xf]  ;;  %v3691_v30 = vld [vmem:[%s8909_s0 + $0x5c] sm:$0xf0]  ;;  %v3989_v32 = vld [vmem:[%s8908_s1 + $0x230] sm:$0xf]  ;;  %v4054_v36 = vor.u32 %v5724_v26, %v4053_v25  ;;  %v6425_v41 = vor.u32 %v5634_v28, %v3689_v24 }
  0x26   :  { %828 = vmatpush.bf16.msrb.mxu2 %v4102_v44  ;;  %773 = vmatmul.bf16.vlgmr.msra.gmra.mxu3 %v6313_v55  ;;  %v5708_v33 = vld [vmem:[%s8908_s1 + $0x234] sm:$0xf0]  ;;  %v5643_v34 = vld [vmem:[%s8908_s1 + $0x34] sm:$0xf]  ;;  %v3735_v37 = vld [vmem:[%s8908_s1 + $0x38] sm:$0xf0]  ;;  %v6433_v45 = vor.u32 %v5631_v29, %v3691_v30 }
  0x27   :  { %841 = vmatpush.bf16.msrb.mxu3 %v3770_v57  ;;  %v5699_v38 = vld [vmem:[%s8908_s1 + $0x1f4] sm:$0xf]  ;;  %v3959_v39 = vld [vmem:[%s8908_s1 + $0x1f8] sm:$0xf0]  ;;  %v4045_v42 = vld [vmem:[%s8908_s1 + $0x2a0] sm:$0xf]  ;;  %v3990_v46 = vor.u32 %v5708_v33, %v3989_v32  ;;  %v3738_v49 = vor.u32 %v5643_v34, %v3735_v37 }
  0x28   :  { %785 = vmatpush.bf16.msrb.mxu0 %v4014_v3  ;;  %v5722_v43 = vld [vmem:[%s8908_s1 + $0x2a4] sm:$0xf0]  ;;  %v3962_v44 = vor.u32 %v5699_v38, %v3959_v39  ;;  %v3981_v48 = vld [vmem:[%s8908_s1 + $0x220] sm:$0xf]  ;;  %v5697_v53 = vld [vmem:[%s8908_s1 + $0x1e4] sm:$0xf] }
  0x29   :  { %804 = vmatpush.bf16.msrb.mxu1 %v4078_v60  ;;  %v5706_v50 = vld [vmem:[%s8908_s1 + $0x224] sm:$0xf0]  ;;  %v3951_v54 = vld [vmem:[%s8908_s1 + $0x1e8] sm:$0xf0]  ;;  %v4046_v56 = vor.u32 %v5722_v43, %v4045_v42  ;;  %v5641_v57 = vld [vmem:[%s8908_s1 + $0x24] sm:$0xf] }
  0x2a   :  { %829 = vmatpush.bf16.msrb.mxu2 %v4094_v4  ;;  %v3727_v58 = vld [vmem:[%s8908_s1 + $0x28] sm:$0xf0]  ;;  %v3954_v59 = vor.u32 %v5697_v53, %v3951_v54  ;;  %v4037_v60 = vld [vmem:[%s8908_s1 + $0x290] sm:$0xf]  ;;  %v5720_v61 = vld [vmem:[%s8908_s1 + $0x294] sm:$0xf0]  ;;  %v3982_v63 = vor.u32 %v5706_v50, %v3981_v48 }
  0x2b   :  { %842 = vmatpush.bf16.msrb.mxu3 %v3762_v5  ;;  %v5695_v62 = vld [vmem:[%s8908_s1 + $0x1d4] sm:$0xf]  ;;  %v3943_v0 = vld [vmem:[%s8908_s1 + $0x1d8] sm:$0xf0]  ;;  %v3730_v1 = vor.u32 %v5641_v57, %v3727_v58  ;;  %v3973_v2 = vld [vmem:[%s8908_s1 + $0x210] sm:$0xf]  ;;  %v4038_v6 = vor.u32 %v5720_v61, %v4037_v60 }
  0x2c   :  { %786 = vmatpush.bf16.msrb.mxu0 %v4006_v13  ;;  %v5704_v3 = vld [vmem:[%s8908_s1 + $0x214] sm:$0xf0]  ;;  %v5639_v4 = vld [vmem:[%s8908_s1 + $0x14] sm:$0xf]  ;;  %v3946_v5 = vor.u32 %v5695_v62, %v3943_v0  ;;  %v3719_v7 = vld [vmem:[%s8908_s1 + $0x18] sm:$0xf0] }
  0x2d   :  { %805 = vmatpush.bf16.msrb.mxu1 %v4070_v8  ;;  %v5693_v8 = vld [vmem:[%s8908_s1 + $0x1c4] sm:$0xf]  ;;  %v3935_v9 = vld [vmem:[%s8908_s1 + $0x1c8] sm:$0xf0]  ;;  %v4029_v10 = vld [vmem:[%s8908_s1 + $0x280] sm:$0xf]  ;;  %v3974_v12 = vor.u32 %v5704_v3, %v3973_v2 }
  0x2e   :  { %898 = vmatpush.bf16.msra.mxu2 %v3962_v44  ;;  %v5718_v11 = vld [vmem:[%s8908_s1 + $0x284] sm:$0xf0]  ;;  %v3965_v13 = vld [vmem:[%s8908_s1 + $0x200] sm:$0xf]  ;;  %v5683_v14 = vld [vmem:[%s8908_s1 + $0x174] sm:$0xf] }
  0x2f   :  { %843 = vmatpush.bf16.msrb.mxu3 %v3754_v16  ;;  %v3895_v15 = vld [vmem:[%s8908_s1 + $0x178] sm:$0xf0]  ;;  %v3722_v16 = vor.u32 %v5639_v4, %v3719_v7  ;;  %v5702_v17 = vld [vmem:[%s8908_s1 + $0x204] sm:$0xf0]  ;;  %v5637_v18 = vld [vmem:[%s8908_s1 + $0x4] sm:$0xf]  ;;  %v4030_v21 = vor.u32 %v5718_v11, %v4029_v10 }
  0x30   :  { %787 = vmatpush.bf16.msrb.mxu0 %v3998_v27  ;;  %v3711_v19 = vld [vmem:[%s8908_s1 + $0x8] sm:$0xf0]  ;;  %v3669_v22 = vld [vmem:[%s8909_s0 + $0x10] sm:$0xf]  ;;  %v5667_v24 = vld [vmem:[%s8908_s1 + $0xf4] sm:$0xf]  ;;  %v3898_v27 = vor.u32 %v5683_v14, %v3895_v15 }
  0x31   :  { %806 = vmatpush.bf16.msrb.mxu1 %v4062_v20  ;;  %v3938_v20 = vor.u32 %v5693_v8, %v3935_v9  ;;  %v5628_v23 = vld [vmem:[%s8909_s0 + $0x28] sm:$0xf0]  ;;  %v3831_v25 = vld [vmem:[%s8908_s1 + $0xf8] sm:$0xf0]  ;;  %v5715_v26 = vld [vmem:[%s8908_s1 + $0x274] sm:$0xf] }
  0x32   :  { %899 = vmatpush.bf16.msra.mxu2 %v3954_v59  ;;  %v4023_v28 = vld [vmem:[%s8908_s1 + $0x278] sm:$0xf0]  ;;  %v5691_v29 = vld [vmem:[%s8908_s1 + $0x1b4] sm:$0xf]  ;;  %v3671_v33 = vld [vmem:[%s8909_s0 + $0x2c] sm:$0xf0]  ;;  %v3834_v38 = vor.u32 %v5667_v24, %v3831_v25  ;;  %v6562_v50 = vor.u32 %v5628_v23, %v3669_v22 }
  0x33   :  { %844 = vmatpush.bf16.msrb.mxu3 %v3746_v31  ;;  %721 = vmatmul.bf16.gmra.mxu0 %v6412_v35  ;;  %v3927_v30 = vld [vmem:[%s8908_s1 + $0x1b8] sm:$0xf0]  ;;  %v3966_v31 = vor.u32 %v5702_v17, %v3965_v13  ;;  %v5625_v32 = vld [vmem:[%s8909_s0 + $0x14] sm:$0xf]  ;;  %v3677_v34 = vld [vmem:[%s8909_s0 + $0x18] sm:$0xf]  ;;  %v4026_v43 = vor.u32 %v5715_v26, %v4023_v28 }
  0x34   :  { %740 = vmatmul.bf16.gmra.mxu1 %v6423_v40  ;;  %788 = vmatpush.bf16.msrb.mxu0 %v3990_v46  ;;  %v5629_v37 = vld [vmem:[%s8909_s0 + $0x30] sm:$0xf0]  ;;  %v5665_v39 = vld [vmem:[%s8908_s1 + $0xe4] sm:$0xf]  ;;  %v3823_v42 = vld [vmem:[%s8908_s1 + $0xe8] sm:$0xf0]  ;;  %v6564_v53 = vor.u32 %v5625_v32, %v3671_v33 }
  0x35   :  { %807 = vmatpush.bf16.msrb.mxu1 %v4054_v36  ;;  %759 = vmatmul.bf16.gmra.mxu2 %v6425_v41  ;;  %v3714_v36 = vor.u32 %v5637_v18, %v3711_v19  ;;  %v5681_v44 = vld [vmem:[%s8908_s1 + $0x164] sm:$0xf]  ;;  %v3887_v46 = vld [vmem:[%s8908_s1 + $0x168] sm:$0xf0]  ;;  %v6575_v58 = vor.u32 %v5629_v37, %v3677_v34  ;;  %v3826_v59 = vor.u32 %v5665_v39, %v3823_v42  ;;  %v5663_v61 = vld [vmem:[%s8908_s1 + $0xd4] sm:$0xf] }
  0x36   :  { %778 = vmatmul.bf16.gmra.mxu3 %v6433_v45  ;;  %900 = vmatpush.bf16.msra.mxu2 %v3946_v5  ;;  %v5713_v48 = vld [vmem:[%s8908_s1 + $0x264] sm:$0xf]  ;;  %v4015_v54 = vld [vmem:[%s8908_s1 + $0x268] sm:$0xf0]  ;;  %v3890_v60 = vor.u32 %v5681_v44, %v3887_v46  ;;  %v3815_v62 = vld [vmem:[%s8908_s1 + $0xd8] sm:$0xf0] }
  0x37   :  { %845 = vmatpush.bf16.msrb.mxu3 %v3738_v49  ;;  %v3930_v49 = vor.u32 %v5691_v29, %v3927_v30  ;;  %v3919_v57 = vld [vmem:[%s8908_s1 + $0x1a8] sm:$0xf0]  ;;  %v5679_v0 = vld [vmem:[%s8908_s1 + $0x154] sm:$0xf]  ;;  %v4007_v4 = vld [vmem:[%s8908_s1 + $0x258] sm:$0xf0]  ;;  %v3818_v7 = vor.u32 %v5663_v61, %v3815_v62 }
  0x38   :  { %789 = vmatpush.bf16.msrb.mxu0 %v3982_v63  ;;  %v4018_v63 = vor.u32 %v5713_v48, %v4015_v54  ;;  %v5711_v2 = vld [vmem:[%s8908_s1 + $0x254] sm:$0xf]  ;;  %v5661_v9 = vld [vmem:[%s8908_s1 + $0xc4] sm:$0xf]  ;;  %v3807_v10 = vld [vmem:[%s8908_s1 + $0xc8] sm:$0xf0] }
  0x39   :  { %808 = vmatpush.bf16.msrb.mxu1 %v4046_v56  ;;  %v5689_v56 = vld [vmem:[%s8908_s1 + $0x1a4] sm:$0xf]  ;;  %v5687_v5 = vld [vmem:[%s8908_s1 + $0x194] sm:$0xf]  ;;  %v4010_v11 = vor.u32 %v5711_v2, %v4007_v4  ;;  %v3871_v13 = vld [vmem:[%s8908_s1 + $0x148] sm:$0xf0] }
  0x3a   :  { %901 = vmatpush.bf16.msra.mxu2 %v3938_v20  ;;  %v3922_v3 = vor.u32 %v5689_v56, %v3919_v57  ;;  %v5709_v14 = vld [vmem:[%s8908_s1 + $0x244] sm:$0xf]  ;;  %v3903_v18 = vld [vmem:[%s8908_s1 + $0x188] sm:$0xf0]  ;;  %v4269_v19 = vld [vmem:[%s8908_s1 + $0x390] sm:$0xf] }
  0x3b   :  { %846 = vmatpush.bf16.msrb.mxu3 %v3730_v1  ;;  %v3879_v1 = vld [vmem:[%s8908_s1 + $0x158] sm:$0xf0]  ;;  %v5685_v17 = vld [vmem:[%s8908_s1 + $0x184] sm:$0xf]  ;;  %v5752_v20 = vld [vmem:[%s8908_s1 + $0x394] sm:$0xf0] }
  0x3c   :  { %790 = vmatpush.bf16.msrb.mxu0 %v3974_v12  ;;  %v3882_v8 = vor.u32 %v5679_v0, %v3879_v1  ;;  %v5677_v12 = vld [vmem:[%s8908_s1 + $0x144] sm:$0xf]  ;;  %v5659_v23 = vld [vmem:[%s8908_s1 + $0xb4] sm:$0xf]  ;;  %v3697_v25 = vld [vmem:[%s8909_s0 + $0x48] sm:$0xf]  ;;  %v3906_v29 = vor.u32 %v5685_v17, %v3903_v18  ;;  %v4270_v33 = vor.u32 %v5752_v20, %v4269_v19 }
  0x3d   :  { %809 = vmatpush.bf16.msrb.mxu1 %v4038_v6  ;;  %v3911_v6 = vld [vmem:[%s8908_s1 + $0x198] sm:$0xf0]  ;;  %v3874_v22 = vor.u32 %v5677_v12, %v3871_v13  ;;  %v5635_v30 = vld [vmem:[%s8909_s0 + $0x60] sm:$0xf0]  ;;  %v5632_v34 = vld [vmem:[%s8909_s0 + $0x4c] sm:$0xf] }
  0x3e   :  { %902 = vmatpush.bf16.msra.mxu2 %v3930_v49  ;;  %v3914_v15 = vor.u32 %v5687_v5, %v3911_v6  ;;  %v3799_v26 = vld [vmem:[%s8908_s1 + $0xb8] sm:$0xf0]  ;;  %v3705_v37 = vld [vmem:[%s8909_s0 + $0x50] sm:$0xf]  ;;  %v3791_v44 = vld [vmem:[%s8908_s1 + $0xa8] sm:$0xf0]  ;;  %v6687_v56 = vor.u32 %v5635_v30, %v3697_v25 }
  0x3f   :  { %847 = vmatpush.bf16.msrb.mxu3 %v3722_v16  ;;  %v3999_v16 = vld [vmem:[%s8908_s1 + $0x248] sm:$0xf0]  ;;  %v3863_v28 = vld [vmem:[%s8908_s1 + $0x138] sm:$0xf0]  ;;  %v3802_v39 = vor.u32 %v5659_v23, %v3799_v26  ;;  %v5673_v48 = vld [vmem:[%s8908_s1 + $0x124] sm:$0xf] }
  0x40   :  { %791 = vmatpush.bf16.msrb.mxu0 %v3966_v31  ;;  %v4002_v24 = vor.u32 %v5709_v14, %v3999_v16  ;;  %v5707_v31 = vld [vmem:[%s8908_s1 + $0x234] sm:$0xf]  ;;  %v3991_v32 = vld [vmem:[%s8908_s1 + $0x238] sm:$0xf0]  ;;  %v3855_v49 = vld [vmem:[%s8908_s1 + $0x128] sm:$0xf0] }
  0x41   :  { %810 = vmatpush.bf16.msrb.mxu1 %v4030_v21  ;;  %v3810_v21 = vor.u32 %v5661_v9, %v3807_v10  ;;  %v3994_v46 = vor.u32 %v5707_v31, %v3991_v32  ;;  %v5705_v54 = vld [vmem:[%s8908_s1 + $0x224] sm:$0xf]  ;;  %v5750_v61 = vld [vmem:[%s8908_s1 + $0x384] sm:$0xf0]  ;;  %v3858_v0 = vor.u32 %v5673_v48, %v3855_v49  ;;  %v5655_v1 = vld [vmem:[%s8908_s1 + $0x94] sm:$0xf] }
  0x42   :  { %903 = vmatpush.bf16.msra.mxu2 %v3922_v3  ;;  %v3783_v2 = vld [vmem:[%s8908_s1 + $0x98] sm:$0xf0]  ;;  %v5671_v4 = vld [vmem:[%s8908_s1 + $0x114] sm:$0xf]  ;;  %v4253_v9 = vld [vmem:[%s8908_s1 + $0x370] sm:$0xf] }
  0x43   :  { %848 = vmatpush.bf16.msrb.mxu3 %v3714_v36  ;;  %792 = vmatmul.bf16.vlgmr.msrb.gmra.mxu0 %v6562_v50  ;;  %v3699_v36 = vld [vmem:[%s8909_s0 + $0x64] sm:$0xf0]  ;;  %v3847_v5 = vld [vmem:[%s8908_s1 + $0x118] sm:$0xf0]  ;;  %v5703_v6 = vld [vmem:[%s8908_s1 + $0x214] sm:$0xf] }
  0x44   :  { %860 = vmatpush.bf16.msra.mxu0 %v3834_v38  ;;  %811 = vmatmul.bf16.vlgmr.msrb.gmra.mxu1 %v6564_v53  ;;  %v5636_v38 = vld [vmem:[%s8909_s0 + $0x68] sm:$0xf0]  ;;  %v6689_v57 = vor.u32 %v5632_v34, %v3699_v36  ;;  %v5748_v10 = vld [vmem:[%s8908_s1 + $0x374] sm:$0xf0]  ;;  %v3850_v12 = vor.u32 %v5671_v4, %v3847_v5  ;;  %v5653_v13 = vld [vmem:[%s8908_s1 + $0x84] sm:$0xf] }
  0x45   :  { %879 = vmatpush.bf16.msra.mxu1 %v3898_v27  ;;  %4107 = vmatmul.msk.bf16.vlgmr.msrb.gmra.mxu2 %vm701_vm0, %v6575_v58  ;;  %v5675_v27 = vld [vmem:[%s8908_s1 + $0x134] sm:$0xf]  ;;  %v6700_v62 = vor.u32 %v5636_v38, %v3705_v37  ;;  %v3775_v14 = vld [vmem:[%s8908_s1 + $0x88] sm:$0xf0]  ;;  %v5701_v18 = vld [vmem:[%s8908_s1 + $0x204] sm:$0xf]  ;;  %v4254_v20 = vor.u32 %v5748_v10, %v4253_v9 }
  0x46   :  { %849 = vmatmul.bf16.vlgmr.msrb.gmra.mxu3 %v6295_v47  ;;  %904 = vmatpush.bf16.msra.mxu2 %v3914_v15  ;;  %v3866_v42 = vor.u32 %v5675_v27, %v3863_v28  ;;  %v5669_v15 = vld [vmem:[%s8908_s1 + $0x104] sm:$0xf]  ;;  %v3839_v17 = vld [vmem:[%s8908_s1 + $0x108] sm:$0xf0]  ;;  %v4333_v23 = vld [vmem:[%s8908_s1 + $0x410] sm:$0xf]  ;;  %v3778_v27 = vor.u32 %v5653_v13, %v3775_v14 }
  0x47   :  { %917 = vmatpush.bf16.msra.mxu3 %v4026_v43  ;;  %v5657_v43 = vld [vmem:[%s8908_s1 + $0xa4] sm:$0xf]  ;;  %v3967_v19 = vld [vmem:[%s8908_s1 + $0x208] sm:$0xf0]  ;;  %v5735_v25 = vld [vmem:[%s8908_s1 + $0x314] sm:$0xf]  ;;  %v3842_v28 = vor.u32 %v5669_v15, %v3839_v17 }
  0x48   :  { %861 = vmatpush.bf16.msra.mxu0 %v3826_v59  ;;  %v3983_v59 = vld [vmem:[%s8908_s1 + $0x228] sm:$0xf0]  ;;  %v4103_v26 = vld [vmem:[%s8908_s1 + $0x318] sm:$0xf0]  ;;  %v5746_v30 = vld [vmem:[%s8908_s1 + $0x364] sm:$0xf0]  ;;  %v3970_v31 = vor.u32 %v5701_v18, %v3967_v19 }
  0x49   :  { %880 = vmatpush.bf16.msra.mxu1 %v3890_v60  ;;  %v4261_v60 = vld [vmem:[%s8908_s1 + $0x380] sm:$0xf]  ;;  %v3986_v3 = vor.u32 %v5705_v54, %v3983_v59  ;;  %v4106_v34 = vor.u32 %v5735_v25, %v4103_v26  ;;  %v5729_v36 = vld [vmem:[%s8908_s1 + $0x2e4] sm:$0xf]  ;;  %v4079_v37 = vld [vmem:[%s8908_s1 + $0x2e8] sm:$0xf0] }
  0x4a   :  { %905 = vmatpush.bf16.msra.mxu2 %v3906_v29  ;;  %v4245_v29 = vld [vmem:[%s8908_s1 + $0x360] sm:$0xf]  ;;  %v5744_v48 = vld [vmem:[%s8908_s1 + $0x354] sm:$0xf0]  ;;  %v4071_v49 = vld [vmem:[%s8908_s1 + $0x2d8] sm:$0xf0] }
  0x4b   :  { %918 = vmatpush.bf16.msra.mxu3 %v4018_v63  ;;  %v3794_v63 = vor.u32 %v5657_v43, %v3791_v44  ;;  %v4246_v38 = vor.u32 %v5746_v30, %v4245_v29  ;;  %v4082_v43 = vor.u32 %v5729_v36, %v4079_v37  ;;  %v5727_v44 = vld [vmem:[%s8908_s1 + $0x2d4] sm:$0xf]  ;;  %v5733_v54 = vld [vmem:[%s8908_s1 + $0x304] sm:$0xf]  ;;  %v4095_v59 = vld [vmem:[%s8908_s1 + $0x308] sm:$0xf0] }
  0x4c   :  { %862 = vmatpush.bf16.msra.mxu0 %v3818_v7  ;;  %v4262_v7 = vor.u32 %v5750_v61, %v4261_v60  ;;  %v4317_v61 = vld [vmem:[%s8908_s1 + $0x3f0] sm:$0xf]  ;;  %v4229_v4 = vld [vmem:[%s8908_s1 + $0x340] sm:$0xf]  ;;  %v5742_v5 = vld [vmem:[%s8908_s1 + $0x344] sm:$0xf0] }
  0x4d   :  { %881 = vmatpush.bf16.msra.mxu1 %v3882_v8  ;;  %v3975_v8 = vld [vmem:[%s8908_s1 + $0x218] sm:$0xf0]  ;;  %v4230_v13 = vor.u32 %v5742_v5, %v4229_v4  ;;  %v4221_v14 = vld [vmem:[%s8908_s1 + $0x330] sm:$0xf]  ;;  %v4453_v17 = vld [vmem:[%s8908_s1 + $0x500] sm:$0xf] }
  0x4e   :  { %1575 = vmatpush.bf16.msrb.mxu2 %v4270_v33  ;;  %v3978_v16 = vor.u32 %v5703_v6, %v3975_v8  ;;  %v4063_v6 = vld [vmem:[%s8908_s1 + $0x2c8] sm:$0xf0]  ;;  %v5800_v8 = vld [vmem:[%s8908_s1 + $0x514] sm:$0xf0]  ;;  %v5798_v18 = vld [vmem:[%s8908_s1 + $0x504] sm:$0xf0] }
  0x4f   :  { %919 = vmatpush.bf16.msra.mxu3 %v4010_v11  ;;  %v3786_v11 = vor.u32 %v5655_v1, %v3783_v2  ;;  %v4074_v1 = vor.u32 %v5727_v44, %v4071_v49  ;;  %v5725_v2 = vld [vmem:[%s8908_s1 + $0x2c4] sm:$0xf]  ;;  %v5723_v19 = vld [vmem:[%s8908_s1 + $0x2b4] sm:$0xf]  ;;  %v5760_v25 = vld [vmem:[%s8908_s1 + $0x3d4] sm:$0xf0] }
  0x50   :  { %863 = vmatpush.bf16.msra.mxu0 %v3810_v21  ;;  %v5731_v21 = vld [vmem:[%s8908_s1 + $0x2f4] sm:$0xf]  ;;  %v4066_v15 = vor.u32 %v5725_v2, %v4063_v6  ;;  %v5721_v29 = vld [vmem:[%s8908_s1 + $0x2a4] sm:$0xf]  ;;  %v4213_v30 = vld [vmem:[%s8908_s1 + $0x320] sm:$0xf] }
  0x51   :  { %882 = vmatpush.bf16.msra.mxu1 %v3874_v22  ;;  %v4087_v22 = vld [vmem:[%s8908_s1 + $0x2f8] sm:$0xf0]  ;;  %v5719_v44 = vld [vmem:[%s8908_s1 + $0x294] sm:$0xf]  ;;  %v5794_v49 = vld [vmem:[%s8908_s1 + $0x4e4] sm:$0xf0] }
  0x52   :  { %1576 = vmatpush.bf16.msrb.mxu2 %v4262_v7  ;;  %v4090_v32 = vor.u32 %v5731_v21, %v4087_v22  ;;  %v4461_v7 = vld [vmem:[%s8908_s1 + $0x510] sm:$0xf]  ;;  %v4454_v21 = vor.u32 %v5798_v18, %v4453_v17  ;;  %v4031_v4 = vld [vmem:[%s8908_s1 + $0x288] sm:$0xf0] }
  0x53   :  { %920 = vmatpush.bf16.msra.mxu3 %v4002_v24  ;;  %797 = vmatmul.bf16.gmra.mxu0 %v6687_v56  ;;  %v5768_v24 = vld [vmem:[%s8908_s1 + $0x414] sm:$0xf0]  ;;  %v4462_v9 = vor.u32 %v5800_v8, %v4461_v7  ;;  %v4445_v22 = vld [vmem:[%s8908_s1 + $0x4f0] sm:$0xf] }
  0x54   :  { %864 = vmatpush.bf16.msra.mxu0 %v3802_v39  ;;  %816 = vmatmul.bf16.gmra.mxu1 %v6689_v57  ;;  %v4334_v33 = vor.u32 %v5768_v24, %v4333_v23  ;;  %v4325_v39 = vld [vmem:[%s8908_s1 + $0x400] sm:$0xf]  ;;  %v4301_v24 = vld [vmem:[%s8908_s1 + $0x3d0] sm:$0xf]  ;;  %v5812_v7 = vld [vmem:[%s8908_s1 + $0x574] sm:$0xf0] }
  0x55   :  { %883 = vmatpush.bf16.msra.mxu1 %v3866_v42  ;;  %4108 = vmatmul.msk.bf16.gmra.mxu2 %vm701_vm0, %v6700_v62  ;;  %v5766_v42 = vld [vmem:[%s8908_s1 + $0x404] sm:$0xf0]  ;;  %v4302_v37 = vor.u32 %v5760_v25, %v4301_v24  ;;  %v4509_v6 = vld [vmem:[%s8908_s1 + $0x570] sm:$0xf]  ;;  %v4389_v25 = vld [vmem:[%s8908_s1 + $0x480] sm:$0xf] }
  0x56   :  { %854 = vmatmul.bf16.gmra.mxu3 %v6412_v35  ;;  %1577 = vmatpush.bf16.msrb.mxu2 %v4254_v20  ;;  %v4326_v60 = vor.u32 %v5766_v42, %v4325_v39  ;;  %v4055_v20 = vld [vmem:[%s8908_s1 + $0x2b8] sm:$0xf0]  ;;  %v5758_v39 = vld [vmem:[%s8908_s1 + $0x3c4] sm:$0xf0]  ;;  %v4429_v8 = vld [vmem:[%s8908_s1 + $0x4d0] sm:$0xf]  ;;  %v4510_v18 = vor.u32 %v5812_v7, %v4509_v6 }
  0x57   :  { %921 = vmatpush.bf16.msra.mxu3 %v3994_v46  ;;  %v4237_v46 = vld [vmem:[%s8908_s1 + $0x350] sm:$0xf]  ;;  %v5810_v24 = vld [vmem:[%s8908_s1 + $0x564] sm:$0xf0]  ;;  %v5751_v7 = vld [vmem:[%s8908_s1 + $0x394] sm:$0xf] }
  0x58   :  { %865 = vmatpush.bf16.msra.mxu0 %v3794_v63  ;;  %v5764_v63 = vld [vmem:[%s8908_s1 + $0x3f4] sm:$0xf0]  ;;  %v4589_v17 = vld [vmem:[%s8908_s1 + $0x610] sm:$0xf] }
  0x59   :  { %884 = vmatpush.bf16.msra.mxu1 %v3858_v0  ;;  %v4238_v0 = vor.u32 %v5744_v48, %v4237_v46  ;;  %v4318_v10 = vor.u32 %v5764_v63, %v4317_v61  ;;  %v4437_v48 = vld [vmem:[%s8908_s1 + $0x4e0] sm:$0xf]  ;;  %v4285_v63 = vld [vmem:[%s8908_s1 + $0x3b0] sm:$0xf] }
  0x5a   :  { %1578 = vmatpush.bf16.msrb.mxu2 %v4246_v38  ;;  %v4293_v38 = vld [vmem:[%s8908_s1 + $0x3c0] sm:$0xf] }
  0x5b   :  { %922 = vmatpush.bf16.msra.mxu3 %v3986_v3  ;;  %v4098_v3 = vor.u32 %v5733_v54, %v4095_v59  ;;  %v4039_v54 = vld [vmem:[%s8908_s1 + $0x298] sm:$0xf0]  ;;  %v4517_v59 = vld [vmem:[%s8908_s1 + $0x580] sm:$0xf]  ;;  %v4294_v61 = vor.u32 %v5758_v39, %v4293_v38  ;;  %v5808_v38 = vld [vmem:[%s8908_s1 + $0x554] sm:$0xf0] }
  0x5c   :  { %866 = vmatpush.bf16.msra.mxu0 %v3786_v11  ;;  %v4309_v11 = vld [vmem:[%s8908_s1 + $0x3e0] sm:$0xf]  ;;  %v4042_v2 = vor.u32 %v5719_v44, %v4039_v54  ;;  %v4381_v39 = vld [vmem:[%s8908_s1 + $0x470] sm:$0xf] }
  0x5d   :  { %885 = vmatpush.bf16.msra.mxu1 %v3850_v12  ;;  %v5762_v12 = vld [vmem:[%s8908_s1 + $0x3e4] sm:$0xf0]  ;;  %v4405_v54 = vld [vmem:[%s8908_s1 + $0x4a0] sm:$0xf] }
  0x5e   :  { %1579 = vmatpush.bf16.msrb.mxu2 %v4238_v0  ;;  %v4310_v23 = vor.u32 %v5762_v12, %v4309_v11  ;;  %v5756_v0 = vld [vmem:[%s8908_s1 + $0x3b4] sm:$0xf0] }
  0x5f   :  { %923 = vmatpush.bf16.msra.mxu3 %v3978_v16  ;;  %v5740_v16 = vld [vmem:[%s8908_s1 + $0x334] sm:$0xf0]  ;;  %v4286_v12 = vor.u32 %v5756_v0, %v4285_v63  ;;  %v4373_v0 = vld [vmem:[%s8908_s1 + $0x460] sm:$0xf] }
  0x60   :  { %867 = vmatpush.bf16.msra.mxu0 %v3778_v27  ;;  %v4222_v26 = vor.u32 %v5740_v16, %v4221_v14  ;;  %v5796_v27 = vld [vmem:[%s8908_s1 + $0x4f4] sm:$0xf0]  ;;  %v5754_v14 = vld [vmem:[%s8908_s1 + $0x3a4] sm:$0xf0] }
  0x61   :  { %886 = vmatpush.bf16.msra.mxu1 %v3842_v28  ;;  %v4058_v28 = vor.u32 %v5723_v19, %v4055_v20  ;;  %v4446_v36 = vor.u32 %v5796_v27, %v4445_v22  ;;  %v5784_v11 = vld [vmem:[%s8908_s1 + $0x494] sm:$0xf0]  ;;  %v4421_v19 = vld [vmem:[%s8908_s1 + $0x4c0] sm:$0xf]  ;;  %v5790_v20 = vld [vmem:[%s8908_s1 + $0x4c4] sm:$0xf0] }
  0x62   :  { %1580 = vmatpush.bf16.msrb.mxu2 %v4230_v13  ;;  %v4277_v13 = vld [vmem:[%s8908_s1 + $0x3a0] sm:$0xf]  ;;  %v5832_v22 = vld [vmem:[%s8908_s1 + $0x614] sm:$0xf0] }
  0x63   :  { %924 = vmatpush.bf16.msra.mxu3 %v3970_v31  ;;  %868 = vmatmul.bf16.vlgmr.msra.gmra.mxu0 %v6303_v51  ;;  %v5738_v31 = vld [vmem:[%s8908_s1 + $0x324] sm:$0xf0]  ;;  %v4278_v27 = vor.u32 %v5754_v14, %v4277_v13  ;;  %v4365_v13 = vld [vmem:[%s8908_s1 + $0x450] sm:$0xf]  ;;  %v5776_v14 = vld [vmem:[%s8908_s1 + $0x454] sm:$0xf0] }
  0x64   :  { %936 = vmatpush.bf16.msrb.mxu0 %v4090_v32  ;;  %887 = vmatmul.bf16.vlgmr.msra.gmra.mxu1 %v6305_v52  ;;  %v4047_v32 = vld [vmem:[%s8908_s1 + $0x2a8] sm:$0xf0]  ;;  %v4214_v42 = vor.u32 %v5738_v31, %v4213_v30  ;;  %v4581_v30 = vld [vmem:[%s8908_s1 + $0x600] sm:$0xf] }
  0x65   :  { %961 = vmatpush.bf16.msrb.mxu1 %v4106_v34  ;;  %906 = vmatmul.bf16.vlgmr.msra.gmra.mxu2 %v6313_v55  ;;  %v5816_v34 = vld [vmem:[%s8908_s1 + $0x594] sm:$0xf0] }
  0x66   :  { %925 = vmatmul.bf16.vlgmr.msra.gmra.mxu3 %v6562_v50  ;;  %1581 = vmatpush.bf16.msrb.mxu2 %v4222_v26  ;;  %v5782_v26 = vld [vmem:[%s8908_s1 + $0x484] sm:$0xf0] }
  0x67   :  { %1594 = vmatpush.bf16.msrb.mxu3 %v4334_v33  ;;  %v4525_v33 = vld [vmem:[%s8908_s1 + $0x590] sm:$0xf] }
  0x68   :  { %937 = vmatpush.bf16.msrb.mxu0 %v4082_v43  ;;  %v4050_v43 = vor.u32 %v5721_v29, %v4047_v32  ;;  %v4526_v46 = vor.u32 %v5816_v34, %v4525_v33  ;;  %v4590_v29 = vor.u32 %v5832_v22, %v4589_v17  ;;  %v4413_v32 = vld [vmem:[%s8908_s1 + $0x4b0] sm:$0xf]  ;;  %v5788_v33 = vld [vmem:[%s8908_s1 + $0x4b4] sm:$0xf0]  ;;  %v4390_v34 = vor.u32 %v5782_v26, %v4389_v25  ;;  %v4263_v22 = vld [vmem:[%s8908_s1 + $0x388] sm:$0xf0] }
  0x69   :  { %962 = vmatpush.bf16.msrb.mxu1 %v4098_v3  ;;  %v5717_v3 = vld [vmem:[%s8908_s1 + $0x284] sm:$0xf]  ;;  %v5824_v17 = vld [vmem:[%s8908_s1 + $0x5d4] sm:$0xf0]  ;;  %v4366_v26 = vor.u32 %v5776_v14, %v4365_v13 }
  0x6a   :  { %1582 = vmatpush.bf16.msrb.mxu2 %v4214_v42  ;;  %v4034_v16 = vor.u32 %v5717_v3, %v4031_v4  ;;  %v5780_v42 = vld [vmem:[%s8908_s1 + $0x474] sm:$0xf0]  ;;  %v4565_v4 = vld [vmem:[%s8908_s1 + $0x5e0] sm:$0xf] }
  0x6b   :  { %1595 = vmatpush.bf16.msrb.mxu3 %v4326_v60  ;;  %v5814_v60 = vld [vmem:[%s8908_s1 + $0x584] sm:$0xf0]  ;;  %v4382_v63 = vor.u32 %v5780_v42, %v4381_v39  ;;  %v4349_v39 = vld [vmem:[%s8908_s1 + $0x430] sm:$0xf]  ;;  %v5772_v42 = vld [vmem:[%s8908_s1 + $0x434] sm:$0xf0] }
  0x6c   :  { %938 = vmatpush.bf16.msrb.mxu0 %v4074_v1  ;;  %v4438_v1 = vor.u32 %v5794_v49, %v4437_v48  ;;  %v4518_v5 = vor.u32 %v5814_v60, %v4517_v59  ;;  %v5828_v48 = vld [vmem:[%s8908_s1 + $0x5f4] sm:$0xf0]  ;;  %v4485_v59 = vld [vmem:[%s8908_s1 + $0x540] sm:$0xf]  ;;  %v5806_v60 = vld [vmem:[%s8908_s1 + $0x544] sm:$0xf0] }
  0x6d   :  { %1632 = vmatpush.bf16.msra.mxu1 %v4462_v9  ;;  %v5792_v9 = vld [vmem:[%s8908_s1 + $0x4d4] sm:$0xf0]  ;;  %v4486_v6 = vor.u32 %v5806_v60, %v4485_v59  ;;  %v4247_v59 = vld [vmem:[%s8908_s1 + $0x368] sm:$0xf0]  ;;  %v4350_v60 = vor.u32 %v5772_v42, %v4349_v39  ;;  %v5739_v42 = vld [vmem:[%s8908_s1 + $0x334] sm:$0xf] }
  0x6e   :  { %1651 = vmatpush.bf16.msra.mxu2 %v4526_v46  ;;  %v4573_v46 = vld [vmem:[%s8908_s1 + $0x5f0] sm:$0xf] }
  0x6f   :  { %1596 = vmatpush.bf16.msrb.mxu3 %v4318_v10  ;;  %v4397_v10 = vld [vmem:[%s8908_s1 + $0x490] sm:$0xf]  ;;  %v4574_v3 = vor.u32 %v5828_v48, %v4573_v46  ;;  %v5765_v46 = vld [vmem:[%s8908_s1 + $0x404] sm:$0xf]  ;;  %v4327_v48 = vld [vmem:[%s8908_s1 + $0x408] sm:$0xf0] }
  0x70   :  { %939 = vmatpush.bf16.msrb.mxu0 %v4066_v15  ;;  %v4430_v15 = vor.u32 %v5792_v9, %v4429_v8  ;;  %v4477_v8 = vld [vmem:[%s8908_s1 + $0x530] sm:$0xf]  ;;  %v5804_v9 = vld [vmem:[%s8908_s1 + $0x534] sm:$0xf0] }
  0x71   :  { %1633 = vmatpush.bf16.msra.mxu1 %v4454_v21  ;;  %v4398_v21 = vor.u32 %v5784_v11, %v4397_v10  ;;  %v4271_v10 = vld [vmem:[%s8908_s1 + $0x398] sm:$0xf0] }
  0x72   :  { %1652 = vmatpush.bf16.msra.mxu2 %v4518_v5  ;;  %v5826_v5 = vld [vmem:[%s8908_s1 + $0x5e4] sm:$0xf0]  ;;  %v4274_v11 = vor.u32 %v5751_v7, %v4271_v10  ;;  %v5783_v7 = vld [vmem:[%s8908_s1 + $0x494] sm:$0xf]  ;;  %v4399_v10 = vld [vmem:[%s8908_s1 + $0x498] sm:$0xf0] }
  0x73   :  { %1597 = vmatpush.bf16.msrb.mxu3 %v4310_v23  ;;  %873 = vmatmul.bf16.gmra.mxu0 %v6423_v40  ;;  %v4501_v23 = vld [vmem:[%s8908_s1 + $0x560] sm:$0xf] }
  0x74   :  { %940 = vmatpush.bf16.msrb.mxu0 %v4058_v28  ;;  %892 = vmatmul.bf16.gmra.mxu1 %v6425_v41  ;;  %v4422_v28 = vor.u32 %v5790_v20, %v4421_v19  ;;  %v4502_v31 = vor.u32 %v5810_v24, %v4501_v23  ;;  %v5749_v19 = vld [vmem:[%s8908_s1 + $0x384] sm:$0xf]  ;;  %v4469_v20 = vld [vmem:[%s8908_s1 + $0x520] sm:$0xf]  ;;  %v5767_v23 = vld [vmem:[%s8908_s1 + $0x414] sm:$0xf] }
  0x75   :  { %1634 = vmatpush.bf16.msra.mxu1 %v4446_v36  ;;  %911 = vmatmul.bf16.gmra.mxu2 %v6433_v45  ;;  %v5830_v36 = vld [vmem:[%s8908_s1 + $0x604] sm:$0xf0]  ;;  %v4335_v24 = vld [vmem:[%s8908_s1 + $0x418] sm:$0xf0]  ;;  %v4266_v25 = vor.u32 %v5749_v19, %v4263_v22  ;;  %v4402_v19 = vor.u32 %v5783_v7, %v4399_v10  ;;  %v4597_v22 = vld [vmem:[%s8908_s1 + $0x620] sm:$0xf] }
  0x76   :  { %930 = vmatmul.bf16.gmra.mxu3 %v6687_v56  ;;  %1653 = vmatpush.bf16.msra.mxu2 %v4510_v18  ;;  %v4582_v44 = vor.u32 %v5830_v36, %v4581_v30  ;;  %v4478_v18 = vor.u32 %v5804_v9, %v4477_v8  ;;  %v5774_v30 = vld [vmem:[%s8908_s1 + $0x444] sm:$0xf0]  ;;  %v4338_v36 = vor.u32 %v5767_v23, %v4335_v24  ;;  %v4605_v8 = vld [vmem:[%s8908_s1 + $0x630] sm:$0xf]  ;;  %v5836_v9 = vld [vmem:[%s8908_s1 + $0x634] sm:$0xf0] }
  0x77   :  { %1598 = vmatpush.bf16.msrb.mxu3 %v4302_v37  ;;  %v4493_v37 = vld [vmem:[%s8908_s1 + $0x550] sm:$0xf]  ;;  %v5834_v23 = vld [vmem:[%s8908_s1 + $0x624] sm:$0xf0]  ;;  %v4391_v24 = vld [vmem:[%s8908_s1 + $0x488] sm:$0xf0] }
  0x78   :  { %941 = vmatpush.bf16.msrb.mxu0 %v4050_v43  ;;  %v4414_v43 = vor.u32 %v5788_v33, %v4413_v32  ;;  %v4494_v49 = vor.u32 %v5808_v38, %v4493_v37  ;;  %v4255_v32 = vld [vmem:[%s8908_s1 + $0x378] sm:$0xf0]  ;;  %v4549_v33 = vld [vmem:[%s8908_s1 + $0x5c0] sm:$0xf] }
  0x79   :  { %1635 = vmatpush.bf16.msra.mxu1 %v4438_v1  ;;  %v5778_v1 = vld [vmem:[%s8908_s1 + $0x464] sm:$0xf0] }
  0x7a   :  { %1654 = vmatpush.bf16.msra.mxu2 %v4502_v31 }
  0x7b   :  { %1599 = vmatpush.bf16.msrb.mxu3 %v4294_v61  ;;  %v5786_v61 = vld [vmem:[%s8908_s1 + $0x4a4] sm:$0xf0] }
  0x7c   :  { %942 = vmatpush.bf16.msrb.mxu0 %v4042_v2  ;;  %v4406_v2 = vor.u32 %v5786_v61, %v4405_v54  ;;  %v5745_v54 = vld [vmem:[%s8908_s1 + $0x364] sm:$0xf]  ;;  %v4341_v61 = vld [vmem:[%s8908_s1 + $0x420] sm:$0xf] }
  0x7d   :  { %1636 = vmatpush.bf16.msra.mxu1 %v4430_v15  ;;  %v4566_v15 = vor.u32 %v5826_v5, %v4565_v4  ;;  %v5763_v4 = vld [vmem:[%s8908_s1 + $0x3f4] sm:$0xf]  ;;  %v4319_v5 = vld [vmem:[%s8908_s1 + $0x3f8] sm:$0xf0] }
  0x7e   :  { %1655 = vmatpush.bf16.msra.mxu2 %v4494_v49  ;;  %v5820_v49 = vld [vmem:[%s8908_s1 + $0x5b4] sm:$0xf0]  ;;  %v4322_v14 = vor.u32 %v5763_v4, %v4319_v5  ;;  %v5815_v5 = vld [vmem:[%s8908_s1 + $0x594] sm:$0xf] }
  0x7f   :  { %1600 = vmatpush.bf16.msrb.mxu3 %v4286_v12  ;;  %v4374_v12 = vor.u32 %v5778_v1, %v4373_v0  ;;  %v4533_v0 = vld [vmem:[%s8908_s1 + $0x5a0] sm:$0xf]  ;;  %v4330_v1 = vor.u32 %v5765_v46, %v4327_v48 }
  0x80   :  { %943 = vmatpush.bf16.msrb.mxu0 %v4034_v16  ;;  %v4557_v16 = vld [vmem:[%s8908_s1 + $0x5d0] sm:$0xf] }
  0x81   :  { %1637 = vmatpush.bf16.msra.mxu1 %v4422_v28  ;;  %v4558_v28 = vor.u32 %v5824_v17, %v4557_v16  ;;  %v4606_v16 = vor.u32 %v5836_v9, %v4605_v8  ;;  %v5761_v17 = vld [vmem:[%s8908_s1 + $0x3e4] sm:$0xf]  ;;  %v5775_v8 = vld [vmem:[%s8908_s1 + $0x454] sm:$0xf]  ;;  %v4367_v9 = vld [vmem:[%s8908_s1 + $0x458] sm:$0xf0] }
  0x82   :  { %1656 = vmatpush.bf16.msra.mxu2 %v4486_v6  ;;  %v4250_v6 = vor.u32 %v5745_v54, %v4247_v59  ;;  %v4375_v54 = vld [vmem:[%s8908_s1 + $0x468] sm:$0xf0] }
  0x83   :  { %1601 = vmatpush.bf16.msrb.mxu3 %v4278_v27  ;;  %944 = vmatmul.bf16.vlgmr.msrb.gmra.mxu0 %v6564_v53  ;;  %v5747_v27 = vld [vmem:[%s8908_s1 + $0x374] sm:$0xf] }
  0x84   :  { %1613 = vmatpush.bf16.msra.mxu0 %v4398_v21  ;;  %4109 = vmatmul.msk.bf16.vlgmr.msrb.gmra.mxu1 %vm701_vm0, %v6575_v58  ;;  %v5802_v21 = vld [vmem:[%s8908_s1 + $0x524] sm:$0xf0]  ;;  %v4258_v37 = vor.u32 %v5747_v27, %v4255_v32 }
  0x85   :  { %1638 = vmatpush.bf16.msra.mxu1 %v4414_v43  ;;  %1583 = vmatmul.bf16.vlgmr.msrb.gmra.mxu2 %v6295_v47  ;;  %v4470_v31 = vor.u32 %v5802_v21, %v4469_v20  ;;  %v5781_v20 = vld [vmem:[%s8908_s1 + $0x484] sm:$0xf] }
  0x86   :  { %1602 = vmatmul.bf16.vlgmr.msrb.gmra.mxu3 %v6303_v51  ;;  %1657 = vmatpush.bf16.msra.mxu2 %v4478_v18  ;;  %v4311_v18 = vld [vmem:[%s8908_s1 + $0x3e8] sm:$0xf0] }
  0x87   :  { %1670 = vmatpush.bf16.msra.mxu3 %v4590_v29  ;;  %v4357_v29 = vld [vmem:[%s8908_s1 + $0x440] sm:$0xf]  ;;  %v4314_v27 = vor.u32 %v5761_v17, %v4311_v18 }
  0x88   :  { %1614 = vmatpush.bf16.msra.mxu0 %v4390_v34  ;;  %v5822_v34 = vld [vmem:[%s8908_s1 + $0x5c4] sm:$0xf0]  ;;  %v4358_v38 = vor.u32 %v5774_v30, %v4357_v29  ;;  %v4303_v29 = vld [vmem:[%s8908_s1 + $0x3d8] sm:$0xf0]  ;;  %v4598_v30 = vor.u32 %v5834_v23, %v4597_v22  ;;  %v4455_v22 = vld [vmem:[%s8908_s1 + $0x508] sm:$0xf0] }
  0x89   :  { %1639 = vmatpush.bf16.msra.mxu1 %v4406_v2  ;;  %v4550_v43 = vor.u32 %v5822_v34, %v4549_v33  ;;  %v5779_v33 = vld [vmem:[%s8908_s1 + $0x474] sm:$0xf] }
  0x8a   :  { %1658 = vmatpush.bf16.msra.mxu2 %v4470_v31  ;;  %v4394_v31 = vor.u32 %v5781_v20, %v4391_v24  ;;  %v4591_v20 = vld [vmem:[%s8908_s1 + $0x618] sm:$0xf0]  ;;  %v4370_v24 = vor.u32 %v5775_v8, %v4367_v9 }
  0x8b   :  { %1671 = vmatpush.bf16.msra.mxu3 %v4582_v44  ;;  %v4541_v44 = vld [vmem:[%s8908_s1 + $0x5b0] sm:$0xf] }
  0x8c   :  { %1615 = vmatpush.bf16.msra.mxu0 %v4382_v63  ;;  %v5770_v63 = vld [vmem:[%s8908_s1 + $0x424] sm:$0xf0]  ;;  %v4542_v2 = vor.u32 %v5820_v49, %v4541_v44  ;;  %v5777_v49 = vld [vmem:[%s8908_s1 + $0x464] sm:$0xf] }
  0x8d   :  { %1708 = vmatpush.bf16.msrb.mxu1 %v4274_v11  ;;  %v5743_v11 = vld [vmem:[%s8908_s1 + $0x354] sm:$0xf]  ;;  %v4342_v13 = vor.u32 %v5770_v63, %v4341_v61  ;;  %v4287_v61 = vld [vmem:[%s8908_s1 + $0x3b8] sm:$0xf0]  ;;  %v4378_v7 = vor.u32 %v5777_v49, %v4375_v54 }
  0x8e   :  { %1727 = vmatpush.bf16.msrb.mxu2 %v4338_v36  ;;  %v4383_v36 = vld [vmem:[%s8908_s1 + $0x478] sm:$0xf0]  ;;  %v5811_v54 = vld [vmem:[%s8908_s1 + $0x574] sm:$0xf] }
  0x8f   :  { %1672 = vmatpush.bf16.msra.mxu3 %v4574_v3  ;;  %v5818_v3 = vld [vmem:[%s8908_s1 + $0x5a4] sm:$0xf0]  ;;  %v4386_v48 = vor.u32 %v5779_v33, %v4383_v36  ;;  %v5829_v36 = vld [vmem:[%s8908_s1 + $0x604] sm:$0xf] }
  0x90   :  { %1616 = vmatpush.bf16.msra.mxu0 %v4374_v12  ;;  %v4239_v12 = vld [vmem:[%s8908_s1 + $0x358] sm:$0xf0] }
  0x91   :  { %1709 = vmatpush.bf16.msrb.mxu1 %v4266_v25  ;;  %v4242_v21 = vor.u32 %v5743_v11, %v4239_v12  ;;  %v5741_v25 = vld [vmem:[%s8908_s1 + $0x344] sm:$0xf] }
  0x92   :  { %1728 = vmatpush.bf16.msrb.mxu2 %v4330_v1  ;;  %v5737_v1 = vld [vmem:[%s8908_s1 + $0x324] sm:$0xf] }
  0x93   :  { %1673 = vmatpush.bf16.msra.mxu3 %v4566_v15  ;;  %949 = vmatmul.bf16.gmra.mxu0 %v6689_v57  ;;  %v4534_v15 = vor.u32 %v5818_v3, %v4533_v0  ;;  %v5799_v0 = vld [vmem:[%s8908_s1 + $0x514] sm:$0xf]  ;;  %v4463_v3 = vld [vmem:[%s8908_s1 + $0x518] sm:$0xf0]  ;;  %v5753_v12 = vld [vmem:[%s8908_s1 + $0x3a4] sm:$0xf] }
  0x94   :  { %1617 = vmatpush.bf16.msra.mxu0 %v4366_v26  ;;  %4110 = vmatmul.msk.bf16.gmra.mxu1 %vm701_vm0, %v6700_v62  ;;  %v4231_v26 = vld [vmem:[%s8908_s1 + $0x348] sm:$0xf0]  ;;  %v4466_v4 = vor.u32 %v5799_v0, %v4463_v3 }
  0x95   :  { %1710 = vmatpush.bf16.msrb.mxu1 %v4258_v37  ;;  %1588 = vmatmul.bf16.gmra.mxu2 %v6412_v35  ;;  %v4234_v32 = vor.u32 %v5741_v25, %v4231_v26  ;;  %v5757_v37 = vld [vmem:[%s8908_s1 + $0x3c4] sm:$0xf]  ;;  %v4439_v3 = vld [vmem:[%s8908_s1 + $0x4e8] sm:$0xf0] }
  0x96   :  { %1607 = vmatmul.bf16.gmra.mxu3 %v6423_v40  ;;  %1729 = vmatpush.bf16.msrb.mxu2 %v4322_v14  ;;  %v5813_v26 = vld [vmem:[%s8908_s1 + $0x584] sm:$0xf] }
  0x97   :  { %1674 = vmatpush.bf16.msra.mxu3 %v4558_v28  ;;  %v5759_v28 = vld [vmem:[%s8908_s1 + $0x3d4] sm:$0xf] }
  0x98   :  { %1618 = vmatpush.bf16.msra.mxu0 %v4358_v38  ;;  %v4306_v34 = vor.u32 %v5759_v28, %v4303_v29  ;;  %v4295_v38 = vld [vmem:[%s8908_s1 + $0x3c8] sm:$0xf0] }
  0x99   :  { %1711 = vmatpush.bf16.msrb.mxu1 %v4250_v6  ;;  %v4298_v59 = vor.u32 %v5757_v37, %v4295_v38  ;;  %v4527_v6 = vld [vmem:[%s8908_s1 + $0x598] sm:$0xf0]  ;;  %v4583_v37 = vld [vmem:[%s8908_s1 + $0x608] sm:$0xf0] }
  0x9a   :  { %1730 = vmatpush.bf16.msrb.mxu2 %v4314_v27  ;;  %v4519_v27 = vld [vmem:[%s8908_s1 + $0x588] sm:$0xf0]  ;;  %v4586_v49 = vor.u32 %v5829_v36, %v4583_v37  ;;  %v5833_v37 = vld [vmem:[%s8908_s1 + $0x624] sm:$0xf] }
  0x9b   :  { %1675 = vmatpush.bf16.msra.mxu3 %v4550_v43  ;;  %v4223_v43 = vld [vmem:[%s8908_s1 + $0x338] sm:$0xf0]  ;;  %v4522_v38 = vor.u32 %v5813_v26, %v4519_v27 }
  0x9c   :  { %1619 = vmatpush.bf16.msra.mxu0 %v4350_v60  ;;  %v5755_v60 = vld [vmem:[%s8908_s1 + $0x3b4] sm:$0xf]  ;;  %v4226_v63 = vor.u32 %v5739_v42, %v4223_v43 }
  0x9d   :  { %1712 = vmatpush.bf16.msrb.mxu1 %v4242_v21  ;;  %v4290_v10 = vor.u32 %v5755_v60, %v4287_v61  ;;  %v4530_v21 = vor.u32 %v5815_v5, %v4527_v6  ;;  %v5793_v60 = vld [vmem:[%s8908_s1 + $0x4e4] sm:$0xf] }
  0x9e   :  { %1731 = vmatpush.bf16.msrb.mxu2 %v4306_v34  ;;  %v5795_v34 = vld [vmem:[%s8908_s1 + $0x4f4] sm:$0xf]  ;;  %v5769_v5 = vld [vmem:[%s8908_s1 + $0x424] sm:$0xf]  ;;  %v4442_v6 = vor.u32 %v5793_v60, %v4439_v3  ;;  %v4487_v60 = vld [vmem:[%s8908_s1 + $0x548] sm:$0xf0] }
  0x9f   :  { %1676 = vmatpush.bf16.msra.mxu3 %v4542_v2  ;;  %v4215_v2 = vld [vmem:[%s8908_s1 + $0x328] sm:$0xf0] }
  0xa0   :  { %1620 = vmatpush.bf16.msra.mxu0 %v4342_v13  ;;  %v717_v39 = vpop.f32.mrf.mxu0  ;;  %v4279_v13 = vld [vmem:[%s8908_s1 + $0x3a8] sm:$0xf0]  ;;  %v4218_v14 = vor.u32 %v5737_v1, %v4215_v2  ;;  %v5827_v1 = vld [vmem:[%s8908_s1 + $0x5f4] sm:$0xf]  ;;  %v4575_v2 = vld [vmem:[%s8908_s1 + $0x5f8] sm:$0xf0] }
  0xa1   :  { %1713 = vmatpush.bf16.msrb.mxu1 %v4234_v32  ;;  %v736_v44 = vpop.f32.mrf.mxu1  ;;  %v4359_v32 = vld [vmem:[%s8908_s1 + $0x448] sm:$0xf0] }
  0xa2   :  { %v737_v46 = vadd.f32 %v736_v44, %v717_v39  ;;  %1732 = vmatpush.bf16.msrb.mxu2 %v4298_v59  ;;  %v4447_v39 = vld [vmem:[%s8908_s1 + $0x4f8] sm:$0xf0]  ;;  %v5771_v44 = vld [vmem:[%s8908_s1 + $0x434] sm:$0xf] }
  0xa3   :  { %1677 = vmatpush.bf16.msra.mxu3 %v4534_v15  ;;  %1621 = vmatmul.bf16.vlgmr.msra.gmra.mxu0 %v6305_v52  ;;  %v5797_v15 = vld [vmem:[%s8908_s1 + $0x504] sm:$0xf]  ;;  %v4450_v42 = vor.u32 %v5795_v34, %v4447_v39  ;;  %v4511_v59 = vld [vmem:[%s8908_s1 + $0x578] sm:$0xf0]  ;;  %v4423_v39 = vld [vmem:[%s8908_s1 + $0x4c8] sm:$0xf0] }
  0xa4   :  { %1695 = vmatpush.bf16.msrb.mxu0 %v4606_v16  ;;  %1640 = vmatmul.bf16.vlgmr.msra.gmra.mxu1 %v6313_v55  ;;  %v4458_v25 = vor.u32 %v5797_v15, %v4455_v22  ;;  %v5809_v15 = vld [vmem:[%s8908_s1 + $0x564] sm:$0xf] }
  0xa5   :  { %1659 = vmatmul.bf16.vlgmr.msra.gmra.mxu2 %v6562_v50  ;;  %1714 = vmatpush.bf16.msrb.mxu1 %v4226_v63 }
  0xa6   :  { %1678 = vmatmul.bf16.vlgmr.msra.gmra.mxu3 %v6564_v53  ;;  %1733 = vmatpush.bf16.msrb.mxu2 %v4290_v10  ;;  %v4343_v10 = vld [vmem:[%s8908_s1 + $0x428] sm:$0xf0] }
  0xa7   :  { %1746 = vmatpush.bf16.msrb.mxu3 %v4402_v19  ;;  %v5831_v19 = vld [vmem:[%s8908_s1 + $0x614] sm:$0xf]  ;;  %v4346_v22 = vor.u32 %v5769_v5, %v4343_v10 }
  0xa8   :  { %1696 = vmatpush.bf16.msrb.mxu0 %v4598_v30  ;;  %v755_v11 = vpop.f32.mrf.mxu2  ;;  %v719_v18 = vpop.f32.mrf.mxu0  ;;  %v4282_v30 = vor.u32 %v5753_v12, %v4279_v13  ;;  %v4594_v33 = vor.u32 %v5831_v19, %v4591_v20  ;;  %v4607_v12 = vld [vmem:[%s8908_s1 + $0x638] sm:$0xf0]  ;;  %v4514_v13 = vor.u32 %v5811_v54, %v4511_v59  ;;  %v4567_v19 = vld [vmem:[%s8908_s1 + $0x5e8] sm:$0xf0]  ;;  %v5805_v59 = vld [vmem:[%s8908_s1 + $0x544] sm:$0xf] }
  0xa9   :  { %v756_v16 = vadd.f32 %v755_v11, %v737_v46  ;;  %v774_v17 = vpop.f32.mrf.mxu3  ;;  %v738_v23 = vpop.f32.mrf.mxu1  ;;  %1715 = vmatpush.bf16.msrb.mxu1 %v4218_v14  ;;  %v4351_v46 = vld [vmem:[%s8908_s1 + $0x438] sm:$0xf0]  ;;  %v5835_v11 = vld [vmem:[%s8908_s1 + $0x634] sm:$0xf]  ;;  %v4578_v14 = vor.u32 %v5827_v1, %v4575_v2  ;;  %v4490_v3 = vor.u32 %v5805_v59, %v4487_v60  ;;  %v5850_v59 = vld [vmem:[%s8908_s1 + $0x6a4] sm:$0xf0] }
  0xaa   :  { %v739_v29 = vadd.f32 %v738_v23, %v719_v18  ;;  %1734 = vmatpush.bf16.msrb.mxu2 %v4282_v30  ;;  %v4354_v9 = vor.u32 %v5771_v44, %v4351_v46  ;;  %v5825_v18 = vld [vmem:[%s8908_s1 + $0x5e4] sm:$0xf]  ;;  %v4431_v20 = vld [vmem:[%s8908_s1 + $0x4d8] sm:$0xf0]  ;;  %v4610_v27 = vor.u32 %v5835_v11, %v4607_v12  ;;  %v5807_v30 = vld [vmem:[%s8908_s1 + $0x554] sm:$0xf] }
  0xab   :  { %1747 = vmatpush.bf16.msrb.mxu3 %v4394_v31  ;;  %v7269_v28 = vadd.f32 %v774_v17, %v756_v16  ;;  %v5773_v31 = vld [vmem:[%s8908_s1 + $0x444] sm:$0xf]  ;;  %v4503_v16 = vld [vmem:[%s8908_s1 + $0x568] sm:$0xf0]  ;;  %v5791_v17 = vld [vmem:[%s8908_s1 + $0x4d4] sm:$0xf] }
  0xac   :  { %1765 = vmatpush.bf16.msra.mxu0 %v4466_v4  ;;  %v4362_v43 = vor.u32 %v5773_v31, %v4359_v32  ;;  %v4506_v23 = vor.u32 %v5809_v15, %v4503_v16  ;;  %v4495_v31 = vld [vmem:[%s8908_s1 + $0x558] sm:$0xf0]  ;;  %v5789_v32 = vld [vmem:[%s8908_s1 + $0x4c4] sm:$0xf]  ;;  %v5819_v12 = vld [vmem:[%s8908_s1 + $0x5b4] sm:$0xf] }
  0xad   :  { %1784 = vmatpush.bf16.msra.mxu1 %v4530_v21  ;;  %v4434_v21 = vor.u32 %v5791_v17, %v4431_v20  ;;  %v4415_v1 = vld [vmem:[%s8908_s1 + $0x4b8] sm:$0xf0]  ;;  %v5817_v20 = vld [vmem:[%s8908_s1 + $0x5a4] sm:$0xf]  ;;  %v4829_v60 = vld [vmem:[%s8908_s1 + $0x720] sm:$0xf] }
  0xae   :  { %1803 = vmatpush.bf16.msra.mxu2 %v4594_v33 }
  0xaf   :  { %1748 = vmatpush.bf16.msrb.mxu3 %v4386_v48 }
  0xb0   :  { %1766 = vmatpush.bf16.msra.mxu0 %v4458_v25  ;;  %v757_v48 = vpop.f32.mrf.mxu2  ;;  %v722_v0 = vpop.f32.mrf.mxu0  ;;  %v4559_v25 = vld [vmem:[%s8908_s1 + $0x5d8] sm:$0xf0] }
  0xb1   :  { %v758_v61 = vadd.f32 %v757_v48, %v739_v29  ;;  %v776_v63 = vpop.f32.mrf.mxu3  ;;  %1785 = vmatpush.bf16.msra.mxu1 %v4522_v38  ;;  %v741_v4 = vpop.f32.mrf.mxu1  ;;  %v4570_v29 = vor.u32 %v5825_v18, %v4567_v19  ;;  %v4599_v38 = vld [vmem:[%s8908_s1 + $0x628] sm:$0xf0]  ;;  %v4498_v48 = vor.u32 %v5807_v30, %v4495_v31  ;;  %v4837_v30 = vld [vmem:[%s8908_s1 + $0x730] sm:$0xf]  ;;  %v5868_v31 = vld [vmem:[%s8908_s1 + $0x734] sm:$0xf0] }
  0xb2   :  { %v742_v8 = vadd.f32 %v741_v4, %v722_v0  ;;  %1804 = vmatpush.bf16.msra.mxu2 %v4586_v49  ;;  %v4602_v54 = vor.u32 %v5833_v37, %v4599_v38  ;;  %v4551_v0 = vld [vmem:[%s8908_s1 + $0x5c8] sm:$0xf0] }
  0xb3   :  { %1749 = vmatpush.bf16.msrb.mxu3 %v4378_v7  ;;  %v7316_v7 = vadd.f32 %v776_v63, %v758_v61  ;;  %1626 = vmatmul.bf16.gmra.mxu0 %v6425_v41  ;;  %v5787_v61 = vld [vmem:[%s8908_s1 + $0x4b4] sm:$0xf]  ;;  %v5821_v63 = vld [vmem:[%s8908_s1 + $0x5c4] sm:$0xf] }
  0xb4   :  { %1767 = vmatpush.bf16.msra.mxu0 %v4450_v42  ;;  %1645 = vmatmul.bf16.gmra.mxu1 %v6433_v45  ;;  %v4418_v2 = vor.u32 %v5787_v61, %v4415_v1  ;;  %v4554_v5 = vor.u32 %v5821_v63, %v4551_v0  ;;  %v5866_v61 = vld [vmem:[%s8908_s1 + $0x724] sm:$0xf0] }
  0xb5   :  { %1664 = vmatmul.bf16.gmra.mxu2 %v6687_v56  ;;  %1786 = vmatpush.bf16.msra.mxu1 %v4514_v13  ;;  %v4543_v13 = vld [vmem:[%s8908_s1 + $0x5b8] sm:$0xf0] }
  0xb6   :  { %1683 = vmatmul.bf16.gmra.mxu3 %v6689_v57  ;;  %1805 = vmatpush.bf16.msra.mxu2 %v4578_v14  ;;  %v4407_v14 = vld [vmem:[%s8908_s1 + $0x4a8] sm:$0xf0] }
  0xb7   :  { %1750 = vmatpush.bf16.msrb.mxu3 %v4370_v24  ;;  %v5823_v24 = vld [vmem:[%s8908_s1 + $0x5d4] sm:$0xf] }
  0xb8   :  { %1768 = vmatpush.bf16.msra.mxu0 %v4442_v6  ;;  %v760_v26 = vpop.f32.mrf.mxu2  ;;  %v724_v36 = vpop.f32.mrf.mxu0  ;;  %v4562_v49 = vor.u32 %v5823_v24, %v4559_v25  ;;  %v5803_v6 = vld [vmem:[%s8908_s1 + $0x534] sm:$0xf]  ;;  %v4546_v24 = vor.u32 %v5819_v12, %v4543_v13  ;;  %v4901_v25 = vld [vmem:[%s8908_s1 + $0x7b0] sm:$0xf]  ;;  %v5848_v13 = vld [vmem:[%s8908_s1 + $0x694] sm:$0xf0] }
  0xb9   :  { %v761_v33 = vadd.f32 %v760_v26, %v742_v8  ;;  %v779_v34 = vpop.f32.mrf.mxu3  ;;  %v743_v42 = vpop.f32.mrf.mxu1  ;;  %1787 = vmatpush.bf16.msra.mxu1 %v4506_v23  ;;  %v4479_v8 = vld [vmem:[%s8908_s1 + $0x538] sm:$0xf0]  ;;  %v5801_v23 = vld [vmem:[%s8908_s1 + $0x524] sm:$0xf]  ;;  %v4773_v26 = vld [vmem:[%s8908_s1 + $0x6b0] sm:$0xf] }
  0xba   :  { %v744_v46 = vadd.f32 %v743_v42, %v724_v36  ;;  %1806 = vmatpush.bf16.msra.mxu2 %v4570_v29  ;;  %v4482_v19 = vor.u32 %v5803_v6, %v4479_v8  ;;  %v5852_v29 = vld [vmem:[%s8908_s1 + $0x6b4] sm:$0xf0]  ;;  %v4838_v42 = vor.u32 %v5868_v31, %v4837_v30 }
  0xbb   :  { %1751 = vmatpush.bf16.msrb.mxu3 %v4362_v43  ;;  %v4426_v43 = vor.u32 %v5789_v32, %v4423_v39  ;;  %v7373_v44 = vadd.f32 %v779_v34, %v761_v33  ;;  %v5884_v32 = vld [vmem:[%s8908_s1 + $0x7b4] sm:$0xf0]  ;;  %v4774_v33 = vor.u32 %v5852_v29, %v4773_v26  ;;  %v4965_v34 = vld [vmem:[%s8908_s1 + $0x830] sm:$0xf]  ;;  %v4813_v26 = vld [vmem:[%s8908_s1 + $0x700] sm:$0xf] }
  0xbc   :  { %1769 = vmatpush.bf16.msra.mxu0 %v4434_v21  ;;  %v4535_v21 = vld [vmem:[%s8908_s1 + $0x5a8] sm:$0xf0]  ;;  %v5900_v36 = vld [vmem:[%s8908_s1 + $0x834] sm:$0xf0] }
  0xbd   :  { %1788 = vmatpush.bf16.msra.mxu1 %v4498_v48  ;;  %v4966_v38 = vor.u32 %v5900_v36, %v4965_v34  ;;  %v4538_v39 = vor.u32 %v5817_v20, %v4535_v21  ;;  %v4885_v20 = vld [vmem:[%s8908_s1 + $0x790] sm:$0xf]  ;;  %v5880_v21 = vld [vmem:[%s8908_s1 + $0x794] sm:$0xf0] }
  0xbe   :  { %1807 = vmatpush.bf16.msra.mxu2 %v4562_v49  ;;  %v4886_v36 = vor.u32 %v5880_v21, %v4885_v20  ;;  %v4861_v21 = vld [vmem:[%s8908_s1 + $0x760] sm:$0xf] }
  0xbf   :  { %1752 = vmatpush.bf16.msrb.mxu3 %v4354_v9  ;;  %v5785_v9 = vld [vmem:[%s8908_s1 + $0x4a4] sm:$0xf] }
  0xc0   :  { %1770 = vmatpush.bf16.msra.mxu0 %v4426_v43  ;;  %v762_v4 = vpop.f32.mrf.mxu2  ;;  %v793_v15 = vpop.f32.mrf.mxu0  ;;  %v4893_v43 = vld [vmem:[%s8908_s1 + $0x7a0] sm:$0xf] }
  0xc1   :  { %v763_v10 = vadd.f32 %v762_v4, %v744_v46  ;;  %v781_v11 = vpop.f32.mrf.mxu3  ;;  %v812_v16 = vpop.f32.mrf.mxu1  ;;  %v794_v18 = vadd.f32 %v793_v15, %v7269_v28  ;;  %1789 = vmatpush.bf16.msra.mxu1 %v4490_v3  ;;  %v4471_v28 = vld [vmem:[%s8908_s1 + $0x528] sm:$0xf0]  ;;  %v4765_v46 = vld [vmem:[%s8908_s1 + $0x6a0] sm:$0xf] }
  0xc2   :  { %1808 = vmatpush.bf16.msra.mxu2 %v4554_v5  ;;  %v4474_v37 = vor.u32 %v5801_v23, %v4471_v28  ;;  %v4766_v3 = vor.u32 %v5850_v59, %v4765_v46  ;;  %v4957_v4 = vld [vmem:[%s8908_s1 + $0x820] sm:$0xf]  ;;  %v5898_v5 = vld [vmem:[%s8908_s1 + $0x824] sm:$0xf0]  ;;  %v4741_v46 = vld [vmem:[%s8908_s1 + $0x670] sm:$0xf] }
  0xc3   :  { %1753 = vmatpush.bf16.msrb.mxu3 %v4346_v22  ;;  %v7411_v17 = vadd.f32 %v781_v11, %v763_v10  ;;  %v4410_v22 = vor.u32 %v5785_v9, %v4407_v14  ;;  %4611 = vmatmul.msk.bf16.vlgmr.msrb.gmra.mxu0 %vm701_vm0, %v6575_v58  ;;  %v4958_v8 = vor.u32 %v5898_v5, %v4957_v4  ;;  %v4757_v10 = vld [vmem:[%s8908_s1 + $0x690] sm:$0xf]  ;;  %v5864_v14 = vld [vmem:[%s8908_s1 + $0x714] sm:$0xf0]  ;;  %v4749_v23 = vld [vmem:[%s8908_s1 + $0x680] sm:$0xf] }
  0xc4   :  { %1771 = vmatpush.bf16.msra.mxu0 %v4418_v2  ;;  %1716 = vmatmul.bf16.vlgmr.msrb.gmra.mxu1 %v6295_v47  ;;  %v5882_v2 = vld [vmem:[%s8908_s1 + $0x7a4] sm:$0xf0]  ;;  %v4830_v9 = vor.u32 %v5866_v61, %v4829_v60  ;;  %v4758_v15 = vor.u32 %v5848_v13, %v4757_v10  ;;  %v5860_v59 = vld [vmem:[%s8908_s1 + $0x6f4] sm:$0xf0]  ;;  %v4933_v60 = vld [vmem:[%s8908_s1 + $0x7f0] sm:$0xf] }
  0xc5   :  { %1735 = vmatmul.bf16.vlgmr.msrb.gmra.mxu2 %v6303_v51  ;;  %1790 = vmatpush.bf16.msra.mxu1 %v4482_v19  ;;  %v4894_v12 = vor.u32 %v5882_v2, %v4893_v43  ;;  %v5892_v61 = vld [vmem:[%s8908_s1 + $0x7f4] sm:$0xf0]  ;;  %v4869_v2 = vld [vmem:[%s8908_s1 + $0x770] sm:$0xf]  ;;  %v5842_v10 = vld [vmem:[%s8908_s1 + $0x664] sm:$0xf0] }
  0xc6   :  { %1754 = vmatmul.bf16.vlgmr.msrb.gmra.mxu3 %v6305_v52  ;;  %1809 = vmatpush.bf16.msra.mxu2 %v4546_v24  ;;  %v4934_v5 = vor.u32 %v5892_v61, %v4933_v60 }
  0xc7   :  { %1828 = vmatpush.bf16.msra.mxu3 %v4610_v27  ;;  %v813_v27 = vadd.f32 %v812_v16, %v794_v18  ;;  %v4949_v16 = vld [vmem:[%s8908_s1 + $0x810] sm:$0xf]  ;;  %v5896_v18 = vld [vmem:[%s8908_s1 + $0x814] sm:$0xf0] }
  0xc8   :  { %1772 = vmatpush.bf16.msra.mxu0 %v4410_v22  ;;  %v831_v48 = vpop.f32.mrf.mxu2  ;;  %v795_v0 = vpop.f32.mrf.mxu0  ;;  %v4950_v19 = vor.u32 %v5896_v18, %v4949_v16  ;;  %v5890_v16 = vld [vmem:[%s8908_s1 + $0x7e4] sm:$0xf0] }
  0xc9   :  { %v7461_v49 = vpop.f32.mrf.mxu3  ;;  %v7472_v63 = vadd.f32 %v831_v48, %v813_v27  ;;  %v814_v1 = vpop.f32.mrf.mxu1  ;;  %v796_v6 = vadd.f32 %v795_v0, %v7316_v7  ;;  %1791 = vmatpush.bf16.msra.mxu1 %v4474_v37  ;;  %v4821_v7 = vld [vmem:[%s8908_s1 + $0x710] sm:$0xf]  ;;  %v5862_v27 = vld [vmem:[%s8908_s1 + $0x704] sm:$0xf0] }
  0xca   :  { %1810 = vmatpush.bf16.msra.mxu2 %v4538_v39  ;;  %v4822_v22 = vor.u32 %v5864_v14, %v4821_v7  ;;  %v5878_v39 = vld [vmem:[%s8908_s1 + $0x784] sm:$0xf0] }
  0xcb   :  { %1829 = vmatpush.bf16.msra.mxu3 %v4602_v54  ;;  %v4902_v54 = vor.u32 %v5884_v32, %v4901_v25  ;;  %v815_v11 = vadd.f32 %v814_v1, %v796_v6  ;;  %v5846_v25 = vld [vmem:[%s8908_s1 + $0x684] sm:$0xf0]  ;;  %v4941_v32 = vld [vmem:[%s8908_s1 + $0x800] sm:$0xf] }
  0xcc   :  { %2450 = vmatpush.bf16.msrb.mxu0 %v4774_v33  ;;  %v5894_v33 = vld [vmem:[%s8908_s1 + $0x804] sm:$0xf0]  ;;  %v4750_v37 = vor.u32 %v5846_v25, %v4749_v23  ;;  %v4733_v6 = vld [vmem:[%s8908_s1 + $0x660] sm:$0xf] }
  0xcd   :  { %2469 = vmatpush.bf16.msrb.mxu1 %v4838_v42  ;;  %v4814_v42 = vor.u32 %v5862_v27, %v4813_v26  ;;  %v4942_v43 = vor.u32 %v5894_v33, %v4941_v32  ;;  %v4734_v20 = vor.u32 %v5842_v10, %v4733_v6  ;;  %v5840_v26 = vld [vmem:[%s8908_s1 + $0x654] sm:$0xf0]  ;;  %v4789_v27 = vld [vmem:[%s8908_s1 + $0x6d0] sm:$0xf] }
  0xce   :  { %2488 = vmatpush.bf16.msrb.mxu2 %v4902_v54  ;;  %v4805_v54 = vld [vmem:[%s8908_s1 + $0x6f0] sm:$0xf]  ;;  %v5888_v32 = vld [vmem:[%s8908_s1 + $0x7d4] sm:$0xf0] }
  0xcf   :  { %2507 = vmatpush.bf16.msrb.mxu3 %v4966_v38  ;;  %v4877_v38 = vld [vmem:[%s8908_s1 + $0x780] sm:$0xf]  ;;  %v4806_v4 = vor.u32 %v5860_v59, %v4805_v54  ;;  %v5854_v54 = vld [vmem:[%s8908_s1 + $0x6c4] sm:$0xf0] }
  0xd0   :  { %2451 = vmatpush.bf16.msrb.mxu0 %v4766_v3  ;;  %v833_v24 = vpop.f32.mrf.mxu2  ;;  %v798_v30 = vpop.f32.mrf.mxu0  ;;  %v4878_v0 = vor.u32 %v5878_v39, %v4877_v38  ;;  %v5876_v3 = vld [vmem:[%s8908_s1 + $0x774] sm:$0xf0] }
  0xd1   :  { %2470 = vmatpush.bf16.msrb.mxu1 %v4830_v9  ;;  %v7511_v28 = vpop.f32.mrf.mxu3  ;;  %v7522_v29 = vadd.f32 %v833_v24, %v815_v11  ;;  %v817_v31 = vpop.f32.mrf.mxu1  ;;  %v799_v34 = vadd.f32 %v798_v30, %v7373_v44  ;;  %v5844_v44 = vld [vmem:[%s8908_s1 + $0x674] sm:$0xf0]  ;;  %v4797_v11 = vld [vmem:[%s8908_s1 + $0x6e0] sm:$0xf] }
  0xd2   :  { %2489 = vmatpush.bf16.msrb.mxu2 %v4894_v12  ;;  %v4742_v1 = vor.u32 %v5844_v44, %v4741_v46  ;;  %v5858_v12 = vld [vmem:[%s8908_s1 + $0x6e4] sm:$0xf0]  ;;  %v5856_v30 = vld [vmem:[%s8908_s1 + $0x6d4] sm:$0xf0]  ;;  %v4781_v44 = vld [vmem:[%s8908_s1 + $0x6c0] sm:$0xf] }
  0xd3   :  { %2508 = vmatpush.bf16.msrb.mxu3 %v4958_v8  ;;  %v818_v48 = vadd.f32 %v817_v31, %v799_v34  ;;  %4612 = vmatmul.msk.bf16.gmra.mxu0 %vm701_vm0, %v6700_v62  ;;  %v4798_v23 = vor.u32 %v5858_v12, %v4797_v11  ;;  %v4917_v31 = vld [vmem:[%s8908_s1 + $0x7d0] sm:$0xf]  ;;  %v4790_v38 = vor.u32 %v5856_v30, %v4789_v27  ;;  %v5916_v11 = vld [vmem:[%s8908_s1 + $0x8b4] sm:$0xf0] }
  0xd4   :  { %2452 = vmatpush.bf16.msrb.mxu0 %v4758_v15  ;;  %1721 = vmatmul.bf16.gmra.mxu1 %v6412_v35  ;;  %v4925_v15 = vld [vmem:[%s8908_s1 + $0x7e0] sm:$0xf]  ;;  %v4918_v39 = vor.u32 %v5888_v32, %v4917_v31  ;;  %v5093_v12 = vld [vmem:[%s8908_s1 + $0x930] sm:$0xf]  ;;  %v5930_v32 = vld [vmem:[%s8908_s1 + $0x924] sm:$0xf0] }
  0xd5   :  { %2471 = vmatpush.bf16.msrb.mxu1 %v4822_v22  ;;  %1740 = vmatmul.bf16.gmra.mxu2 %v6423_v40  ;;  %v5874_v22 = vld [vmem:[%s8908_s1 + $0x764] sm:$0xf0]  ;;  %v4926_v24 = vor.u32 %v5890_v16, %v4925_v15  ;;  %v5932_v15 = vld [vmem:[%s8908_s1 + $0x934] sm:$0xf0]  ;;  %v5851_v16 = vld [vmem:[%s8908_s1 + $0x6b4] sm:$0xf] }
  0xd6   :  { %1759 = vmatmul.bf16.gmra.mxu3 %v6425_v41  ;;  %2490 = vmatpush.bf16.msrb.mxu2 %v4886_v36  ;;  %v4862_v33 = vor.u32 %v5874_v22, %v4861_v21  ;;  %v4853_v36 = vld [vmem:[%s8908_s1 + $0x750] sm:$0xf]  ;;  %v5094_v21 = vor.u32 %v5932_v15, %v5093_v12  ;;  %v5845_v12 = vld [vmem:[%s8908_s1 + $0x684] sm:$0xf] }
  0xd7   :  { %2509 = vmatpush.bf16.msrb.mxu3 %v4950_v19  ;;  %v4870_v19 = vor.u32 %v5876_v3, %v4869_v2 }
  0xd8   :  { %2453 = vmatpush.bf16.msrb.mxu0 %v4750_v37  ;;  %v836_v8 = vpop.f32.mrf.mxu2  ;;  %v800_v7 = vpop.f32.mrf.mxu0  ;;  %v5872_v37 = vld [vmem:[%s8908_s1 + $0x754] sm:$0xf0] }
  0xd9   :  { %2472 = vmatpush.bf16.msrb.mxu1 %v4814_v42  ;;  %v7569_v9 = vpop.f32.mrf.mxu3  ;;  %v7580_v13 = vadd.f32 %v836_v8, %v818_v48  ;;  %v819_v14 = vpop.f32.mrf.mxu1  ;;  %v801_v18 = vadd.f32 %v800_v7, %v7411_v17  ;;  %v4725_v17 = vld [vmem:[%s8908_s1 + $0x650] sm:$0xf]  ;;  %v4717_v42 = vld [vmem:[%s8908_s1 + $0x640] sm:$0xf]  ;;  %v5838_v48 = vld [vmem:[%s8908_s1 + $0x644] sm:$0xf0]  ;;  %v4854_v3 = vor.u32 %v5872_v37, %v4853_v36  ;;  %v4782_v8 = vor.u32 %v5854_v54, %v4781_v44 }
  0xda   :  { %2491 = vmatpush.bf16.msrb.mxu2 %v4878_v0  ;;  %v4726_v34 = vor.u32 %v5840_v26, %v4725_v17  ;;  %v4909_v0 = vld [vmem:[%s8908_s1 + $0x7c0] sm:$0xf]  ;;  %v4718_v6 = vor.u32 %v5838_v48, %v4717_v42  ;;  %v5013_v44 = vld [vmem:[%s8908_s1 + $0x890] sm:$0xf]  ;;  %v5912_v54 = vld [vmem:[%s8908_s1 + $0x894] sm:$0xf0] }
  0xdb   :  { %2510 = vmatpush.bf16.msrb.mxu3 %v4942_v43  ;;  %v820_v25 = vadd.f32 %v819_v14, %v801_v18  ;;  %v4775_v18 = vld [vmem:[%s8908_s1 + $0x6b8] sm:$0xf0]  ;;  %v5021_v17 = vld [vmem:[%s8908_s1 + $0x8a0] sm:$0xf] }
  0xdc   :  { %2454 = vmatpush.bf16.msrb.mxu0 %v4742_v1  ;;  %v5886_v1 = vld [vmem:[%s8908_s1 + $0x7c4] sm:$0xf0]  ;;  %v4778_v22 = vor.u32 %v5851_v16, %v4775_v18  ;;  %v5085_v26 = vld [vmem:[%s8908_s1 + $0x920] sm:$0xf] }
  0xdd   :  { %2473 = vmatpush.bf16.msrb.mxu1 %v4806_v4  ;;  %v4845_v4 = vld [vmem:[%s8908_s1 + $0x740] sm:$0xf]  ;;  %v4910_v10 = vor.u32 %v5886_v1, %v4909_v0  ;;  %v5928_v0 = vld [vmem:[%s8908_s1 + $0x914] sm:$0xf0]  ;;  %v5847_v1 = vld [vmem:[%s8908_s1 + $0x694] sm:$0xf] }
  0xde   :  { %2492 = vmatpush.bf16.msrb.mxu2 %v4870_v19  ;;  %v5109_v19 = vld [vmem:[%s8908_s1 + $0x950] sm:$0xf] }
  0xdf   :  { %2511 = vmatpush.bf16.msrb.mxu3 %v4934_v5  ;;  %v5870_v5 = vld [vmem:[%s8908_s1 + $0x744] sm:$0xf0] }
  0xe0   :  { %2455 = vmatpush.bf16.msrb.mxu0 %v4734_v20  ;;  %v838_v43 = vpop.f32.mrf.mxu2  ;;  %v869_v60 = vpop.f32.mrf.mxu0  ;;  %v5936_v20 = vld [vmem:[%s8908_s1 + $0x954] sm:$0xf0] }
  0xe1   :  { %2474 = vmatpush.bf16.msrb.mxu1 %v4798_v23  ;;  %v7622_v46 = vpop.f32.mrf.mxu3  ;;  %v7633_v59 = vadd.f32 %v838_v43, %v820_v25  ;;  %v888_v61 = vpop.f32.mrf.mxu1  ;;  %v870_v2 = vadd.f32 %v869_v60, %v7461_v49  ;;  %v5029_v49 = vld [vmem:[%s8908_s1 + $0x8b0] sm:$0xf]  ;;  %v4846_v23 = vor.u32 %v5870_v5, %v4845_v4  ;;  %v5914_v25 = vld [vmem:[%s8908_s1 + $0x8a4] sm:$0xf0]  ;;  %v5005_v5 = vld [vmem:[%s8908_s1 + $0x880] sm:$0xf] }
  0xe2   :  { %2493 = vmatpush.bf16.msrb.mxu2 %v4862_v33  ;;  %v5030_v14 = vor.u32 %v5916_v11, %v5029_v49  ;;  %v5022_v31 = vor.u32 %v5914_v25, %v5021_v17  ;;  %v5849_v33 = vld [vmem:[%s8908_s1 + $0x6a4] sm:$0xf]  ;;  %v5077_v60 = vld [vmem:[%s8908_s1 + $0x910] sm:$0xf]  ;;  %v5926_v11 = vld [vmem:[%s8908_s1 + $0x904] sm:$0xf0] }
  0xe3   :  { %2512 = vmatpush.bf16.msrb.mxu3 %v4926_v24  ;;  %v889_v7 = vadd.f32 %v888_v61, %v870_v2  ;;  %1773 = vmatmul.bf16.vlgmr.msra.gmra.mxu0 %v6313_v55  ;;  %v5110_v24 = vor.u32 %v5936_v20, %v5109_v19  ;;  %v4759_v2 = vld [vmem:[%s8908_s1 + $0x698] sm:$0xf0]  ;;  %v5061_v17 = vld [vmem:[%s8908_s1 + $0x8f0] sm:$0xf] }
  0xe4   :  { %2456 = vmatpush.bf16.msrb.mxu0 %v4726_v34  ;;  %1792 = vmatmul.bf16.vlgmr.msra.gmra.mxu1 %v6562_v50  ;;  %v4767_v34 = vld [vmem:[%s8908_s1 + $0x6a8] sm:$0xf0]  ;;  %v4762_v4 = vor.u32 %v5847_v1, %v4759_v2 }
  0xe5   :  { %2475 = vmatpush.bf16.msrb.mxu1 %v4790_v38  ;;  %1811 = vmatmul.bf16.vlgmr.msra.gmra.mxu2 %v6564_v53  ;;  %v4770_v42 = vor.u32 %v5849_v33, %v4767_v34 }
  0xe6   :  { %4613 = vmatmul.msk.bf16.vlgmr.msra.gmra.mxu3 %vm701_vm0, %v6575_v58  ;;  %2494 = vmatpush.bf16.msrb.mxu2 %v4854_v3  ;;  %v5078_v3 = vor.u32 %v5928_v0, %v5077_v60  ;;  %v4735_v60 = vld [vmem:[%s8908_s1 + $0x668] sm:$0xf0] }
  0xe7   :  { %2513 = vmatpush.bf16.msrb.mxu3 %v4918_v39  ;;  %v5086_v39 = vor.u32 %v5930_v32, %v5085_v26  ;;  %v5843_v26 = vld [vmem:[%s8908_s1 + $0x674] sm:$0xf] }
  0xe8   :  { %2457 = vmatpush.bf16.msrb.mxu0 %v4718_v6  ;;  %v907_v27 = vpop.f32.mrf.mxu2  ;;  %v871_v37 = vpop.f32.mrf.mxu0  ;;  %v5910_v6 = vld [vmem:[%s8908_s1 + $0x884] sm:$0xf0] }
  0xe9   :  { %2476 = vmatpush.bf16.msrb.mxu1 %v4782_v8  ;;  %v926_v30 = vpop.f32.mrf.mxu3  ;;  %v908_v36 = vadd.f32 %v907_v27, %v889_v7  ;;  %v890_v38 = vpop.f32.mrf.mxu1  ;;  %v872_v43 = vadd.f32 %v871_v37, %v7511_v28  ;;  %v5014_v28 = vor.u32 %v5912_v54, %v5013_v44  ;;  %v5069_v8 = vld [vmem:[%s8908_s1 + $0x900] sm:$0xf]  ;;  %v4751_v7 = vld [vmem:[%s8908_s1 + $0x688] sm:$0xf0]  ;;  %v5006_v19 = vor.u32 %v5910_v6, %v5005_v5  ;;  %v4743_v27 = vld [vmem:[%s8908_s1 + $0x678] sm:$0xf0] }
  0xea   :  { %2495 = vmatpush.bf16.msrb.mxu2 %v4846_v23  ;;  %v5070_v20 = vor.u32 %v5926_v11, %v5069_v8  ;;  %v4997_v23 = vld [vmem:[%s8908_s1 + $0x870] sm:$0xf]  ;;  %v4989_v37 = vld [vmem:[%s8908_s1 + $0x860] sm:$0xf]  ;;  %v5922_v44 = vld [vmem:[%s8908_s1 + $0x8e4] sm:$0xf0] }
  0xeb   :  { %2514 = vmatpush.bf16.msrb.mxu3 %v4910_v10  ;;  %v7696_v48 = vadd.f32 %v926_v30, %v908_v36  ;;  %v891_v61 = vadd.f32 %v890_v38, %v872_v43  ;;  %v5101_v30 = vld [vmem:[%s8908_s1 + $0x940] sm:$0xf]  ;;  %v4746_v36 = vor.u32 %v5843_v26, %v4743_v27  ;;  %v5906_v38 = vld [vmem:[%s8908_s1 + $0x864] sm:$0xf0]  ;;  %v5841_v54 = vld [vmem:[%s8908_s1 + $0x664] sm:$0xf] }
  0xec   :  { %2526 = vmatpush.bf16.msra.mxu0 %v5030_v14  ;;  %v4990_v2 = vor.u32 %v5906_v38, %v4989_v37  ;;  %v4738_v5 = vor.u32 %v5841_v54, %v4735_v60  ;;  %v4981_v6 = vld [vmem:[%s8908_s1 + $0x850] sm:$0xf]  ;;  %v5904_v8 = vld [vmem:[%s8908_s1 + $0x854] sm:$0xf0]  ;;  %v5839_v11 = vld [vmem:[%s8908_s1 + $0x654] sm:$0xf] }
  0xed   :  { %2545 = vmatpush.bf16.msra.mxu1 %v5094_v21  ;;  %v5915_v60 = vld [vmem:[%s8908_s1 + $0x8b4] sm:$0xf] }
  0xee   :  { %2570 = vmatpush.bf16.msra.mxu2 %v5110_v24  ;;  %v5908_v24 = vld [vmem:[%s8908_s1 + $0x874] sm:$0xf0] }
  0xef   :  { %2583 = vmatpush.bf16.msra.mxu3 %v4778_v22  ;;  %v4754_v22 = vor.u32 %v5845_v12, %v4751_v7  ;;  %v4998_v33 = vor.u32 %v5908_v24, %v4997_v23  ;;  %v4727_v12 = vld [vmem:[%s8908_s1 + $0x658] sm:$0xf0]  ;;  %v4982_v7 = vor.u32 %v5904_v8, %v4981_v6  ;;  %v5918_v23 = vld [vmem:[%s8908_s1 + $0x8c4] sm:$0xf0]  ;;  %v5837_v24 = vld [vmem:[%s8908_s1 + $0x644] sm:$0xf] }
  0xf0   :  { %2527 = vmatpush.bf16.msra.mxu0 %v5022_v31  ;;  %v909_v10 = vpop.f32.mrf.mxu2  ;;  %v874_v15 = vpop.f32.mrf.mxu0  ;;  %v5934_v31 = vld [vmem:[%s8908_s1 + $0x944] sm:$0xf0]  ;;  %v4831_v8 = vld [vmem:[%s8908_s1 + $0x728] sm:$0xf0] }
  0xf1   :  { %2546 = vmatpush.bf16.msra.mxu1 %v5086_v39  ;;  %v928_v49 = vpop.f32.mrf.mxu3  ;;  %v910_v14 = vadd.f32 %v909_v10, %v891_v61  ;;  %v893_v16 = vpop.f32.mrf.mxu1  ;;  %v875_v18 = vadd.f32 %v874_v15, %v7569_v9  ;;  %v5924_v9 = vld [vmem:[%s8908_s1 + $0x8f4] sm:$0xf0]  ;;  %v5102_v32 = vor.u32 %v5934_v31, %v5101_v30  ;;  %v5053_v39 = vld [vmem:[%s8908_s1 + $0x8e0] sm:$0xf]  ;;  %v4730_v15 = vor.u32 %v5839_v11, %v4727_v12 }
  0xf2   :  { %v5062_v34 = vor.u32 %v5924_v9, %v5061_v17  ;;  %v4719_v17 = vld [vmem:[%s8908_s1 + $0x648] sm:$0xf0] }
  0xf3   :  { %2584 = vmatpush.bf16.msra.mxu3 %v4770_v42  ;;  %v7735_v21 = vadd.f32 %v928_v49, %v910_v14  ;;  %v894_v25 = vadd.f32 %v893_v16, %v875_v18  ;;  %1778 = vmatmul.bf16.gmra.mxu0 %v6433_v45  ;;  %v5920_v49 = vld [vmem:[%s8908_s1 + $0x8d4] sm:$0xf0]  ;;  %v4973_v16 = vld [vmem:[%s8908_s1 + $0x840] sm:$0xf]  ;;  %v5902_v18 = vld [vmem:[%s8908_s1 + $0x844] sm:$0xf0] }
  0xf4   :  { %2528 = vmatpush.bf16.msra.mxu0 %v5014_v28  ;;  %1797 = vmatmul.bf16.gmra.mxu1 %v6687_v56  ;;  %v4974_v30 = vor.u32 %v5902_v18, %v4973_v16  ;;  %v5023_v16 = vld [vmem:[%s8908_s1 + $0x8a8] sm:$0xf0] }
  0xf5   :  { %2547 = vmatpush.bf16.msra.mxu1 %v5078_v3  ;;  %1816 = vmatmul.bf16.gmra.mxu2 %v6689_v57  ;;  %v5054_v3 = vor.u32 %v5922_v44, %v5053_v39  ;;  %v4839_v39 = vld [vmem:[%s8908_s1 + $0x738] sm:$0xf0] }
  0xf6   :  { %4614 = vmatmul.msk.bf16.gmra.mxu3 %vm701_vm0, %v6700_v62  ;;  %2571 = vmatpush.bf16.msra.mxu2 %v5102_v32 }
  0xf7   :  { %2585 = vmatpush.bf16.msra.mxu3 %v4762_v4 }
  0xf8   :  { %2529 = vmatpush.bf16.msra.mxu0 %v5006_v19  ;;  %v912_v42 = vpop.f32.mrf.mxu2  ;;  %v876_v28 = vpop.f32.mrf.mxu0  ;;  %v5037_v19 = vld [vmem:[%s8908_s1 + $0x8c0] sm:$0xf] }
  0xf9   :  { %2548 = vmatpush.bf16.msra.mxu1 %v5070_v20  ;;  %v931_v43 = vpop.f32.mrf.mxu3  ;;  %v913_v61 = vadd.f32 %v912_v42, %v894_v25  ;;  %v895_v0 = vpop.f32.mrf.mxu1  ;;  %v877_v1 = vadd.f32 %v876_v28, %v7622_v46  ;;  %v5045_v46 = vld [vmem:[%s8908_s1 + $0x8d0] sm:$0xf]  ;;  %v5038_v31 = vor.u32 %v5918_v23, %v5037_v19  ;;  %v5883_v42 = vld [vmem:[%s8908_s1 + $0x7b4] sm:$0xf] }
  0xfa   :  { %v5046_v14 = vor.u32 %v5920_v49, %v5045_v46  ;;  %v5881_v46 = vld [vmem:[%s8908_s1 + $0x7a4] sm:$0xf]  ;;  %v5863_v23 = vld [vmem:[%s8908_s1 + $0x714] sm:$0xf] }
  0xfb   :  { %2586 = vmatpush.bf16.msra.mxu3 %v4754_v22  ;;  %v7785_v4 = vadd.f32 %v931_v43, %v913_v61  ;;  %v896_v10 = vadd.f32 %v895_v0, %v877_v1  ;;  %v4903_v43 = vld [vmem:[%s8908_s1 + $0x7b8] sm:$0xf0]  ;;  %v5897_v0 = vld [vmem:[%s8908_s1 + $0x824] sm:$0xf]  ;;  %v4959_v1 = vld [vmem:[%s8908_s1 + $0x828] sm:$0xf0] }
  0xfc   :  { %2530 = vmatpush.bf16.msra.mxu0 %v4998_v33  ;;  %v4722_v33 = vor.u32 %v5837_v24, %v4719_v17  ;;  %v4906_v54 = vor.u32 %v5883_v42, %v4903_v43  ;;  %v5031_v61 = vld [vmem:[%s8908_s1 + $0x8b8] sm:$0xf0]  ;;  %v4962_v6 = vor.u32 %v5897_v0, %v4959_v1  ;;  %v4815_v43 = vld [vmem:[%s8908_s1 + $0x708] sm:$0xf0]  ;;  %v5909_v0 = vld [vmem:[%s8908_s1 + $0x884] sm:$0xf] }
  0xfd   :  { %2549 = vmatpush.bf16.msra.mxu1 %v5062_v34  ;;  %v5899_v34 = vld [vmem:[%s8908_s1 + $0x834] sm:$0xf]  ;;  %v5034_v28 = vor.u32 %v5915_v60, %v5031_v61  ;;  %v5007_v1 = vld [vmem:[%s8908_s1 + $0x888] sm:$0xf0] }
  0xff   :  { %2587 = vmatpush.bf16.msra.mxu3 %v4746_v36  ;;  %v4967_v36 = vld [vmem:[%s8908_s1 + $0x838] sm:$0xf0] }
 0x100   :  { %2531 = vmatpush.bf16.msra.mxu0 %v4990_v2  ;;  %v914_v20 = vpop.f32.mrf.mxu2  ;;  %v945_v9 = vpop.f32.mrf.mxu0  ;;  %v4970_v38 = vor.u32 %v5899_v34, %v4967_v36  ;;  %v5865_v2 = vld [vmem:[%s8908_s1 + $0x724] sm:$0xf]  ;;  %v4943_v36 = vld [vmem:[%s8908_s1 + $0x808] sm:$0xf0] }
 0x101   :  { %2550 = vmatpush.bf16.msra.mxu1 %v5054_v3  ;;  %v933_v22 = vpop.f32.mrf.mxu3  ;;  %v915_v25 = vadd.f32 %v914_v20, %v896_v10  ;;  %v964_v26 = vpop.f32.mrf.mxu1  ;;  %v946_v27 = vadd.f32 %v945_v9, %v7696_v48  ;;  %v5867_v48 = vld [vmem:[%s8908_s1 + $0x734] sm:$0xf]  ;;  %v4895_v10 = vld [vmem:[%s8908_s1 + $0x7a8] sm:$0xf0]  ;;  %v4887_v9 = vld [vmem:[%s8908_s1 + $0x798] sm:$0xf0] }
 0x102   :  { %v4842_v44 = vor.u32 %v5867_v48, %v4839_v39  ;;  %v5895_v20 = vld [vmem:[%s8908_s1 + $0x814] sm:$0xf]  ;;  %v5893_v34 = vld [vmem:[%s8908_s1 + $0x804] sm:$0xf] }
 0x103   :  { %2588 = vmatpush.bf16.msra.mxu3 %v4738_v5  ;;  %v7824_v32 = vadd.f32 %v933_v22, %v915_v25  ;;  %v7835_v37 = vadd.f32 %v964_v26, %v946_v27  ;;  %2458 = vmatmul.bf16.vlgmr.msrb.gmra.mxu0 %v6295_v47  ;;  %v4951_v22 = vld [vmem:[%s8908_s1 + $0x818] sm:$0xf0]  ;;  %v5879_v25 = vld [vmem:[%s8908_s1 + $0x794] sm:$0xf]  ;;  %v5861_v48 = vld [vmem:[%s8908_s1 + $0x704] sm:$0xf]  ;;  %v4946_v42 = vor.u32 %v5893_v34, %v4943_v36 }
 0x104   :  { %2532 = vmatpush.bf16.msra.mxu0 %v4982_v7  ;;  %2477 = vmatmul.bf16.vlgmr.msrb.gmra.mxu1 %v6303_v51  ;;  %v4834_v7 = vor.u32 %v5865_v2, %v4831_v8  ;;  %v4954_v17 = vor.u32 %v5895_v20, %v4951_v22  ;;  %v4890_v27 = vor.u32 %v5879_v25, %v4887_v9  ;;  %v5891_v8 = vld [vmem:[%s8908_s1 + $0x7f4] sm:$0xf]  ;;  %v5889_v22 = vld [vmem:[%s8908_s1 + $0x7e4] sm:$0xf] }
 0x105   :  { %2551 = vmatpush.bf16.msra.mxu1 %v5046_v14  ;;  %2496 = vmatmul.bf16.vlgmr.msrb.gmra.mxu2 %v6305_v52  ;;  %v4898_v14 = vor.u32 %v5881_v46, %v4895_v10  ;;  %v4935_v46 = vld [vmem:[%s8908_s1 + $0x7f8] sm:$0xf0]  ;;  %v5859_v10 = vld [vmem:[%s8908_s1 + $0x6f4] sm:$0xf]  ;;  %v5905_v36 = vld [vmem:[%s8908_s1 + $0x864] sm:$0xf] }
 0x106   :  { %2515 = vmatmul.bf16.vlgmr.msrb.gmra.mxu3 %v6313_v55  ;;  %2640 = vmatpush.bf16.msrb.mxu2 %v4970_v38 }
 0x107   :  { %2589 = vmatpush.bf16.msra.mxu3 %v4730_v15  ;;  %v5913_v15 = vld [vmem:[%s8908_s1 + $0x8a4] sm:$0xf] }
 0x108   :  { %2533 = vmatpush.bf16.msra.mxu0 %v4974_v30  ;;  %v1584_v3 = vpop.f32.mrf.mxu2  ;;  %v947_v11 = vpop.f32.mrf.mxu0  ;;  %v5026_v19 = vor.u32 %v5913_v15, %v5023_v16  ;;  %v5911_v30 = vld [vmem:[%s8908_s1 + $0x894] sm:$0xf]  ;;  %v4999_v16 = vld [vmem:[%s8908_s1 + $0x878] sm:$0xf0] }
 0x109   :  { %2552 = vmatpush.bf16.msra.mxu1 %v5038_v31  ;;  %v1603_v5 = vpop.f32.mrf.mxu3  ;;  %v966_v12 = vpop.f32.mrf.mxu1  ;;  %v948_v18 = vadd.f32 %v947_v11, %v7735_v21  ;;  %v4823_v21 = vld [vmem:[%s8908_s1 + $0x718] sm:$0xf0]  ;;  %v5907_v15 = vld [vmem:[%s8908_s1 + $0x874] sm:$0xf] }
 0x10a   :  { %v7874_v49 = vadd.f32 %v1603_v5, %v1584_v3  ;;  %2641 = vmatpush.bf16.msrb.mxu2 %v4962_v6  ;;  %v4826_v26 = vor.u32 %v5863_v23, %v4823_v21  ;;  %v5015_v31 = vld [vmem:[%s8908_s1 + $0x898] sm:$0xf0]  ;;  %v4818_v3 = vor.u32 %v5861_v48, %v4815_v43  ;;  %v5010_v6 = vor.u32 %v5909_v0, %v5007_v1  ;;  %v4927_v23 = vld [vmem:[%s8908_s1 + $0x7e8] sm:$0xf0]  ;;  %v5871_v1 = vld [vmem:[%s8908_s1 + $0x754] sm:$0xf] }
 0x10b   :  { %2590 = vmatpush.bf16.msra.mxu3 %v4722_v33  ;;  %v7892_v24 = vadd.f32 %v966_v12, %v948_v18  ;;  %v5018_v33 = vor.u32 %v5911_v30, %v5015_v31  ;;  %v4807_v12 = vld [vmem:[%s8908_s1 + $0x6f8] sm:$0xf0]  ;;  %v5002_v20 = vor.u32 %v5907_v15, %v4999_v16  ;;  %v4930_v9 = vor.u32 %v5889_v22, %v4927_v23  ;;  %v4863_v30 = vld [vmem:[%s8908_s1 + $0x768] sm:$0xf0] }
 0x10c   :  { %2602 = vmatpush.bf16.msrb.mxu0 %v4842_v44  ;;  %v5877_v44 = vld [vmem:[%s8908_s1 + $0x784] sm:$0xf]  ;;  %v4810_v18 = vor.u32 %v5859_v10, %v4807_v12  ;;  %v4991_v48 = vld [vmem:[%s8908_s1 + $0x868] sm:$0xf0]  ;;  %v4791_v0 = vld [vmem:[%s8908_s1 + $0x6d8] sm:$0xf0] }
 0x10d   :  { %2621 = vmatpush.bf16.msrb.mxu1 %v4906_v54  ;;  %v4879_v54 = vld [vmem:[%s8908_s1 + $0x788] sm:$0xf0]  ;;  %v4994_v43 = vor.u32 %v5905_v36, %v4991_v48  ;;  %v5885_v10 = vld [vmem:[%s8908_s1 + $0x7c4] sm:$0xf]  ;;  %v5095_v48 = vld [vmem:[%s8908_s1 + $0x938] sm:$0xf0] }
 0x10e   :  { %2642 = vmatpush.bf16.msrb.mxu2 %v4954_v17  ;;  %v4882_v5 = vor.u32 %v5877_v44, %v4879_v54  ;;  %v5857_v17 = vld [vmem:[%s8908_s1 + $0x6e4] sm:$0xf]  ;;  %v5887_v44 = vld [vmem:[%s8908_s1 + $0x7d4] sm:$0xf]  ;;  %v4919_v54 = vld [vmem:[%s8908_s1 + $0x7d8] sm:$0xf0] }
 0x10f   :  { %2659 = vmatpush.bf16.msrb.mxu3 %v5034_v28  ;;  %v5853_v12 = vld [vmem:[%s8908_s1 + $0x6c4] sm:$0xf]  ;;  %v4783_v16 = vld [vmem:[%s8908_s1 + $0x6c8] sm:$0xf0] }
 0x110   :  { %2603 = vmatpush.bf16.msrb.mxu0 %v4834_v7  ;;  %v1586_v38 = vpop.f32.mrf.mxu2  ;;  %v950_v61 = vpop.f32.mrf.mxu0  ;;  %v5875_v7 = vld [vmem:[%s8908_s1 + $0x774] sm:$0xf] }
 0x111   :  { %2622 = vmatpush.bf16.msrb.mxu1 %v4898_v14  ;;  %v1605_v39 = vpop.f32.mrf.mxu3  ;;  %v969_v28 = vpop.f32.mrf.mxu1  ;;  %v951_v2 = vadd.f32 %v950_v61, %v7785_v4  ;;  %v4938_v4 = vor.u32 %v5891_v8, %v4935_v46  ;;  %v4871_v14 = vld [vmem:[%s8908_s1 + $0x778] sm:$0xf0]  ;;  %v5855_v61 = vld [vmem:[%s8908_s1 + $0x6d4] sm:$0xf] }
 0x112   :  { %v7927_v60 = vadd.f32 %v1605_v39, %v1586_v38  ;;  %2643 = vmatpush.bf16.msrb.mxu2 %v4946_v42 }
 0x113   :  { %2660 = vmatpush.bf16.msrb.mxu3 %v5026_v19  ;;  %v7945_v11 = vadd.f32 %v969_v28, %v951_v2  ;;  %2463 = vmatmul.bf16.gmra.mxu0 %v6412_v35  ;;  %v4874_v19 = vor.u32 %v5875_v7, %v4871_v14  ;;  %v4922_v28 = vor.u32 %v5887_v44, %v4919_v54  ;;  %v4855_v2 = vld [vmem:[%s8908_s1 + $0x758] sm:$0xf0]  ;;  %v5269_v44 = vld [vmem:[%s8908_s1 + $0x9c0] sm:$0xf]  ;;  %v5950_v54 = vld [vmem:[%s8908_s1 + $0x9c4] sm:$0xf0] }
 0x114   :  { %2604 = vmatpush.bf16.msrb.mxu0 %v4826_v26  ;;  %2482 = vmatmul.bf16.gmra.mxu1 %v6423_v40  ;;  %v4799_v26 = vld [vmem:[%s8908_s1 + $0x6e8] sm:$0xf0]  ;;  %v4858_v8 = vor.u32 %v5871_v1, %v4855_v2  ;;  %v5270_v1 = vor.u32 %v5950_v54, %v5269_v44 }
 0x115   :  { %2623 = vmatpush.bf16.msrb.mxu1 %v4890_v27  ;;  %2501 = vmatmul.bf16.gmra.mxu2 %v6425_v41  ;;  %v5873_v27 = vld [vmem:[%s8908_s1 + $0x764] sm:$0xf]  ;;  %v4802_v39 = vor.u32 %v5857_v17, %v4799_v26  ;;  %v5087_v2 = vld [vmem:[%s8908_s1 + $0x928] sm:$0xf0] }
 0x116   :  { %2520 = vmatmul.bf16.gmra.mxu3 %v6433_v45  ;;  %2644 = vmatpush.bf16.msrb.mxu2 %v4938_v4  ;;  %v4866_v42 = vor.u32 %v5873_v27, %v4863_v30  ;;  %v4911_v4 = vld [vmem:[%s8908_s1 + $0x7c8] sm:$0xf0]  ;;  %v5901_v17 = vld [vmem:[%s8908_s1 + $0x844] sm:$0xf]  ;;  %v5277_v30 = vld [vmem:[%s8908_s1 + $0x9d0] sm:$0xf] }
 0x117   :  { %2661 = vmatpush.bf16.msrb.mxu3 %v5018_v33  ;;  %v4914_v15 = vor.u32 %v5885_v10, %v4911_v4 }
 0x118   :  { %2605 = vmatpush.bf16.msrb.mxu0 %v4818_v3  ;;  %v1589_v21 = vpop.f32.mrf.mxu2  ;;  %v952_v33 = vpop.f32.mrf.mxu0  ;;  %v5903_v3 = vld [vmem:[%s8908_s1 + $0x854] sm:$0xf] }
 0x119   :  { %2624 = vmatpush.bf16.msrb.mxu1 %v4882_v5  ;;  %v1608_v25 = vpop.f32.mrf.mxu3  ;;  %v971_v34 = vpop.f32.mrf.mxu1  ;;  %v953_v38 = vadd.f32 %v952_v33, %v7824_v32  ;;  %v4983_v5 = vld [vmem:[%s8908_s1 + $0x858] sm:$0xf0]  ;;  %v5952_v33 = vld [vmem:[%s8908_s1 + $0x9d4] sm:$0xf0] }
 0x11a   :  { %v7984_v31 = vadd.f32 %v1608_v25, %v1589_v21  ;;  %2645 = vmatpush.bf16.msrb.mxu2 %v4930_v9  ;;  %v4986_v46 = vor.u32 %v5903_v3, %v4983_v5  ;;  %v4975_v21 = vld [vmem:[%s8908_s1 + $0x848] sm:$0xf0]  ;;  %v4786_v9 = vor.u32 %v5853_v12, %v4783_v16  ;;  %v5278_v36 = vor.u32 %v5952_v33, %v5277_v30  ;;  %v5333_v3 = vld [vmem:[%s8908_s1 + $0xa40] sm:$0xf]  ;;  %v5966_v5 = vld [vmem:[%s8908_s1 + $0xa44] sm:$0xf0] }
 0x11b   :  { %2662 = vmatpush.bf16.msrb.mxu3 %v5010_v6  ;;  %v8002_v32 = vadd.f32 %v971_v34, %v953_v38  ;;  %v4794_v6 = vor.u32 %v5855_v61, %v4791_v0  ;;  %v4978_v27 = vor.u32 %v5901_v17, %v4975_v21  ;;  %v5931_v34 = vld [vmem:[%s8908_s1 + $0x934] sm:$0xf]  ;;  %v5341_v38 = vld [vmem:[%s8908_s1 + $0xa50] sm:$0xf]  ;;  %v5929_v61 = vld [vmem:[%s8908_s1 + $0x924] sm:$0xf]  ;;  %v5334_v4 = vor.u32 %v5966_v5, %v5333_v3 }
 0x11c   :  { %2606 = vmatpush.bf16.msrb.mxu0 %v4810_v18  ;;  %v5869_v18 = vld [vmem:[%s8908_s1 + $0x744] sm:$0xf]  ;;  %v5090_v10 = vor.u32 %v5929_v61, %v5087_v2  ;;  %v5261_v16 = vld [vmem:[%s8908_s1 + $0x9b0] sm:$0xf]  ;;  %v5946_v30 = vld [vmem:[%s8908_s1 + $0x9a4] sm:$0xf0] }
 0x11d   :  { %2625 = vmatpush.bf16.msrb.mxu1 %v4874_v19  ;;  %v4847_v19 = vld [vmem:[%s8908_s1 + $0x748] sm:$0xf0]  ;;  %v5925_v33 = vld [vmem:[%s8908_s1 + $0x904] sm:$0xf]  ;;  %v5944_v2 = vld [vmem:[%s8908_s1 + $0x994] sm:$0xf0] }
 0x11e   :  { %2646 = vmatpush.bf16.msrb.mxu2 %v4922_v28  ;;  %v4850_v26 = vor.u32 %v5869_v18, %v4847_v19  ;;  %v5923_v3 = vld [vmem:[%s8908_s1 + $0x8f4] sm:$0xf] }
 0x11f   :  { %2663 = vmatpush.bf16.msrb.mxu3 %v5002_v20 }
 0x120   :  { %2607 = vmatpush.bf16.msrb.mxu0 %v4802_v39  ;;  %v1591_v7 = vpop.f32.mrf.mxu2  ;;  %v1622_v22 = vpop.f32.mrf.mxu0  ;;  %v5968_v39 = vld [vmem:[%s8908_s1 + $0xa54] sm:$0xf0] }
 0x121   :  { %2626 = vmatpush.bf16.msrb.mxu1 %v4866_v42  ;;  %v1610_v14 = vpop.f32.mrf.mxu3  ;;  %v1641_v23 = vpop.f32.mrf.mxu1  ;;  %v1623_v25 = vadd.f32 %v1622_v22, %v7874_v49  ;;  %v5098_v42 = vor.u32 %v5931_v34, %v5095_v48  ;;  %v5927_v22 = vld [vmem:[%s8908_s1 + $0x914] sm:$0xf]  ;;  %v5071_v48 = vld [vmem:[%s8908_s1 + $0x908] sm:$0xf0] }
 0x122   :  { %v8037_v20 = vadd.f32 %v1610_v14, %v1591_v7  ;;  %2647 = vmatpush.bf16.msrb.mxu2 %v4914_v15  ;;  %v5935_v14 = vld [vmem:[%s8908_s1 + $0x954] sm:$0xf]  ;;  %v5111_v15 = vld [vmem:[%s8908_s1 + $0x958] sm:$0xf0]  ;;  %v5074_v61 = vor.u32 %v5925_v33, %v5071_v48  ;;  %v5103_v33 = vld [vmem:[%s8908_s1 + $0x948] sm:$0xf0] }
 0x123   :  { %2664 = vmatpush.bf16.msrb.mxu3 %v4994_v43  ;;  %v1642_v49 = vadd.f32 %v1641_v23, %v1623_v25  ;;  %2534 = vmatmul.bf16.vlgmr.msra.gmra.mxu0 %v6562_v50  ;;  %v5342_v43 = vor.u32 %v5968_v39, %v5341_v38  ;;  %v5114_v19 = vor.u32 %v5935_v14, %v5111_v15  ;;  %v5079_v23 = vld [vmem:[%s8908_s1 + $0x918] sm:$0xf0]  ;;  %v5325_v25 = vld [vmem:[%s8908_s1 + $0xa30] sm:$0xf]  ;;  %v5317_v38 = vld [vmem:[%s8908_s1 + $0xa20] sm:$0xf] }
 0x124   :  { %2608 = vmatpush.bf16.msrb.mxu0 %v4794_v6  ;;  %2553 = vmatmul.bf16.vlgmr.msra.gmra.mxu1 %v6564_v53  ;;  %v5082_v21 = vor.u32 %v5927_v22, %v5079_v23  ;;  %v5962_v39 = vld [vmem:[%s8908_s1 + $0xa24] sm:$0xf0]  ;;  %v5921_v15 = vld [vmem:[%s8908_s1 + $0x8e4] sm:$0xf]  ;;  %v5301_v22 = vld [vmem:[%s8908_s1 + $0xa00] sm:$0xf] }
 0x125   :  { %2627 = vmatpush.bf16.msrb.mxu1 %v4858_v8  ;;  %5115 = vmatmul.msk.bf16.vlgmr.msra.gmra.mxu2 %vm701_vm0, %v6575_v58  ;;  %v5942_v14 = vld [vmem:[%s8908_s1 + $0x984] sm:$0xf0]  ;;  %v5940_v48 = vld [vmem:[%s8908_s1 + $0x974] sm:$0xf0] }
 0x126   :  { %2591 = vmatmul.bf16.vlgmr.msra.gmra.mxu3 %v6295_v47  ;;  %3325 = vmatpush.bf16.msra.mxu2 %v5278_v36  ;;  %v5958_v23 = vld [vmem:[%s8908_s1 + $0xa04] sm:$0xf0] }
 0x127   :  { %2665 = vmatpush.bf16.msrb.mxu3 %v4986_v46 }
 0x128   :  { %2609 = vmatpush.bf16.msrb.mxu0 %v4786_v9  ;;  %v1660_v28 = vpop.f32.mrf.mxu2  ;;  %v1624_v8 = vpop.f32.mrf.mxu0  ;;  %v5964_v9 = vld [vmem:[%s8908_s1 + $0xa34] sm:$0xf0] }
 0x129   :  { %2628 = vmatpush.bf16.msrb.mxu1 %v4850_v26  ;;  %v1679_v0 = vpop.f32.mrf.mxu3  ;;  %v1661_v6 = vadd.f32 %v1660_v28, %v1642_v49  ;;  %v1643_v46 = vpop.f32.mrf.mxu1  ;;  %v1625_v12 = vadd.f32 %v1624_v8, %v7927_v60  ;;  %v5948_v60 = vld [vmem:[%s8908_s1 + $0x9b4] sm:$0xf0]  ;;  %v5326_v26 = vor.u32 %v5964_v9, %v5325_v25  ;;  %v5318_v28 = vor.u32 %v5962_v39, %v5317_v38  ;;  %v5309_v8 = vld [vmem:[%s8908_s1 + $0xa10] sm:$0xf]  ;;  %v5919_v38 = vld [vmem:[%s8908_s1 + $0x8d4] sm:$0xf] }
 0x12a   :  { %3326 = vmatpush.bf16.msra.mxu2 %v5270_v1  ;;  %v5262_v17 = vor.u32 %v5948_v60, %v5261_v16  ;;  %v5245_v1 = vld [vmem:[%s8908_s1 + $0x990] sm:$0xf]  ;;  %v5055_v60 = vld [vmem:[%s8908_s1 + $0x8e8] sm:$0xf0]  ;;  %v5047_v39 = vld [vmem:[%s8908_s1 + $0x8d8] sm:$0xf0] }
 0x12b   :  { %2666 = vmatpush.bf16.msrb.mxu3 %v4978_v27  ;;  %v8088_v7 = vadd.f32 %v1679_v0, %v1661_v6  ;;  %v1644_v18 = vadd.f32 %v1643_v46, %v1625_v12  ;;  %v5253_v27 = vld [vmem:[%s8908_s1 + $0x9a0] sm:$0xf]  ;;  %v5063_v6 = vld [vmem:[%s8908_s1 + $0x8f8] sm:$0xf0]  ;;  %v5960_v46 = vld [vmem:[%s8908_s1 + $0xa14] sm:$0xf0] }
 0x12c   :  { %2678 = vmatpush.bf16.msra.mxu0 %v5098_v42  ;;  %v5254_v36 = vor.u32 %v5946_v30, %v5253_v27  ;;  %v5237_v12 = vld [vmem:[%s8908_s1 + $0x980] sm:$0xf]  ;;  %v5933_v30 = vld [vmem:[%s8908_s1 + $0x944] sm:$0xf] }
 0x12d   :  { %2703 = vmatpush.bf16.msra.mxu1 %v5114_v19  ;;  %v5238_v19 = vor.u32 %v5942_v14, %v5237_v12 }
 0x12e   :  { %3327 = vmatpush.bf16.msra.mxu2 %v5262_v17 }
 0x12f   :  { %3344 = vmatpush.bf16.msra.mxu3 %v5342_v43 }
 0x130   :  { %2679 = vmatpush.bf16.msra.mxu0 %v5090_v10  ;;  %v1662_v34 = vpop.f32.mrf.mxu2  ;;  %v1627_v43 = vpop.f32.mrf.mxu0  ;;  %v5066_v10 = vor.u32 %v5923_v3, %v5063_v6  ;;  %v5039_v6 = vld [vmem:[%s8908_s1 + $0x8c8] sm:$0xf0] }
 0x131   :  { %v1681_v49 = vpop.f32.mrf.mxu3  ;;  %v1663_v42 = vadd.f32 %v1662_v34, %v1644_v18  ;;  %v1646_v44 = vpop.f32.mrf.mxu1  ;;  %v1628_v54 = vadd.f32 %v1627_v43, %v7984_v31  ;;  %v5246_v31 = vor.u32 %v5944_v2, %v5245_v1  ;;  %v5302_v34 = vor.u32 %v5958_v23, %v5301_v22  ;;  %v5293_v43 = vld [vmem:[%s8908_s1 + $0x9f0] sm:$0xf]  ;;  %v5938_v1 = vld [vmem:[%s8908_s1 + $0x964] sm:$0xf0]  ;;  %v5917_v2 = vld [vmem:[%s8908_s1 + $0x8c4] sm:$0xf] }
 0x132   :  { %3328 = vmatpush.bf16.msra.mxu2 %v5254_v36  ;;  %v5106_v36 = vor.u32 %v5933_v30, %v5103_v33  ;;  %v5597_v30 = vld [vmem:[%s8908_s1 + $0xc50] sm:$0xf]  ;;  %v6032_v33 = vld [vmem:[%s8908_s1 + $0xc54] sm:$0xf0] }
 0x133   :  { %3345 = vmatpush.bf16.msra.mxu3 %v5334_v4  ;;  %v8133_v0 = vadd.f32 %v1681_v49, %v1663_v42  ;;  %v1647_v5 = vadd.f32 %v1646_v44, %v1628_v54  ;;  %2539 = vmatmul.bf16.gmra.mxu0 %v6687_v56  ;;  %v5310_v4 = vor.u32 %v5960_v46, %v5309_v8  ;;  %v5229_v49 = vld [vmem:[%s8908_s1 + $0x970] sm:$0xf]  ;;  %v5956_v44 = vld [vmem:[%s8908_s1 + $0x9f4] sm:$0xf0]  ;;  %v5285_v8 = vld [vmem:[%s8908_s1 + $0x9e0] sm:$0xf] }
 0x134   :  { %2680 = vmatpush.bf16.msra.mxu0 %v5082_v21  ;;  %2558 = vmatmul.bf16.gmra.mxu1 %v6689_v57  ;;  %v5230_v42 = vor.u32 %v5940_v48, %v5229_v49  ;;  %v5050_v54 = vor.u32 %v5919_v38, %v5047_v39  ;;  %v5954_v46 = vld [vmem:[%s8908_s1 + $0x9e4] sm:$0xf0]  ;;  %v5525_v49 = vld [vmem:[%s8908_s1 + $0xbc0] sm:$0xf] }
 0x135   :  { %5116 = vmatmul.msk.bf16.gmra.mxu2 %vm701_vm0, %v6700_v62  ;;  %2704 = vmatpush.bf16.msra.mxu1 %v5106_v36  ;;  %v5397_v36 = vld [vmem:[%s8908_s1 + $0xac0] sm:$0xf] }
 0x136   :  { %2596 = vmatmul.bf16.gmra.mxu3 %v6412_v35  ;;  %3329 = vmatpush.bf16.msra.mxu2 %v5246_v31 }
 0x137   :  { %3346 = vmatpush.bf16.msra.mxu3 %v5326_v26  ;;  %v5058_v26 = vor.u32 %v5921_v15, %v5055_v60  ;;  %v5042_v15 = vor.u32 %v5917_v2, %v5039_v6  ;;  %v6016_v60 = vld [vmem:[%s8908_s1 + $0xbd4] sm:$0xf0] }
 0x138   :  { %2681 = vmatpush.bf16.msra.mxu0 %v5074_v61  ;;  %v1665_v16 = vpop.f32.mrf.mxu2  ;;  %v1629_v21 = vpop.f32.mrf.mxu0  ;;  %v5294_v61 = vor.u32 %v5956_v44, %v5293_v43  ;;  %v5461_v43 = vld [vmem:[%s8908_s1 + $0xb40] sm:$0xf]  ;;  %v5998_v44 = vld [vmem:[%s8908_s1 + $0xb44] sm:$0xf0] }
 0x139   :  { %v1684_v18 = vpop.f32.mrf.mxu3  ;;  %v1666_v17 = vadd.f32 %v1665_v16, %v1647_v5  ;;  %v1648_v25 = vpop.f32.mrf.mxu1  ;;  %v1630_v9 = vadd.f32 %v1629_v21, %v8037_v20  ;;  %v5469_v21 = vld [vmem:[%s8908_s1 + $0xb50] sm:$0xf]  ;;  %v5462_v2 = vor.u32 %v5998_v44, %v5461_v43  ;;  %v5573_v43 = vld [vmem:[%s8908_s1 + $0xc20] sm:$0xf]  ;;  %v6026_v44 = vld [vmem:[%s8908_s1 + $0xc24] sm:$0xf0] }
 0x13a   :  { %3330 = vmatpush.bf16.msra.mxu2 %v5238_v19  ;;  %v5533_v19 = vld [vmem:[%s8908_s1 + $0xbd0] sm:$0xf] }
 0x13b   :  { %3347 = vmatpush.bf16.msra.mxu3 %v5318_v28  ;;  %v8177_v27 = vadd.f32 %v1684_v18, %v1666_v17  ;;  %v1649_v20 = vadd.f32 %v1648_v25, %v1630_v9  ;;  %v5221_v28 = vld [vmem:[%s8908_s1 + $0x960] sm:$0xf]  ;;  %v5286_v18 = vor.u32 %v5954_v46, %v5285_v8  ;;  %v5534_v23 = vor.u32 %v6016_v60, %v5533_v19  ;;  %v5984_v17 = vld [vmem:[%s8908_s1 + $0xad4] sm:$0xf0]  ;;  %v5517_v46 = vld [vmem:[%s8908_s1 + $0xbb0] sm:$0xf] }
 0x13c   :  { %2682 = vmatpush.bf16.msra.mxu0 %v5066_v10  ;;  %v5222_v31 = vor.u32 %v5938_v1, %v5221_v28  ;;  %v6000_v25 = vld [vmem:[%s8908_s1 + $0xb54] sm:$0xf0] }
 0x13d   :  { %v5996_v19 = vld [vmem:[%s8908_s1 + $0xb34] sm:$0xf0] }
 0x13e   :  { %3331 = vmatpush.bf16.msra.mxu2 %v5230_v42  ;;  %v5982_v42 = vld [vmem:[%s8908_s1 + $0xac4] sm:$0xf0] }
 0x13f   :  { %3348 = vmatpush.bf16.msra.mxu3 %v5310_v4  ;;  %v5398_v1 = vor.u32 %v5982_v42, %v5397_v36  ;;  %v5994_v36 = vld [vmem:[%s8908_s1 + $0xb24] sm:$0xf0] }
 0x140   :  { %2683 = vmatpush.bf16.msra.mxu0 %v5058_v26  ;;  %v1667_v3 = vpop.f32.mrf.mxu2  ;;  %v1698_v4 = vpop.f32.mrf.mxu0  ;;  %v5470_v26 = vor.u32 %v6000_v25, %v5469_v21  ;;  %v5509_v25 = vld [vmem:[%s8908_s1 + $0xba0] sm:$0xf] }
 0x141   :  { %v1686_v5 = vpop.f32.mrf.mxu3  ;;  %v1668_v10 = vadd.f32 %v1667_v3, %v1649_v20  ;;  %v1717_v12 = vpop.f32.mrf.mxu1  ;;  %v8222_v14 = vadd.f32 %v1698_v4, %v8088_v7  ;;  %v5405_v7 = vld [vmem:[%s8908_s1 + $0xad0] sm:$0xf]  ;;  %v6014_v20 = vld [vmem:[%s8908_s1 + $0xbc4] sm:$0xf0]  ;;  %v5589_v3 = vld [vmem:[%s8908_s1 + $0xc40] sm:$0xf] }
 0x142   :  { %3332 = vmatpush.bf16.msra.mxu2 %v5222_v31  ;;  %v5406_v9 = vor.u32 %v5984_v17, %v5405_v7  ;;  %v5526_v39 = vor.u32 %v6014_v20, %v5525_v49  ;;  %v5389_v4 = vld [vmem:[%s8908_s1 + $0xab0] sm:$0xf]  ;;  %v6028_v17 = vld [vmem:[%s8908_s1 + $0xc34] sm:$0xf0]  ;;  %v5978_v49 = vld [vmem:[%s8908_s1 + $0xaa4] sm:$0xf0] }
 0x143   :  { %3349 = vmatpush.bf16.msra.mxu3 %v5302_v34  ;;  %v8224_v16 = vadd.f32 %v1686_v5, %v1668_v10  ;;  %v1841_v22 = vmax.f32 %v7472_v63, %v8222_v14  ;;  %2610 = vmatmul.bf16.vlgmr.msrb.gmra.mxu0 %v6303_v51  ;;  %v5598_v34 = vor.u32 %v6032_v33, %v5597_v30  ;;  %v6030_v5 = vld [vmem:[%s8908_s1 + $0xc44] sm:$0xf0]  ;;  %v6012_v10 = vld [vmem:[%s8908_s1 + $0xbb4] sm:$0xf0]  ;;  %v5445_v20 = vld [vmem:[%s8908_s1 + $0xb20] sm:$0xf] }
 0x144   :  { %2684 = vmatpush.bf16.msra.mxu0 %v5050_v54  ;;  %2629 = vmatmul.bf16.vlgmr.msrb.gmra.mxu1 %v6305_v52  ;;  %v5590_v6 = vor.u32 %v6030_v5, %v5589_v3  ;;  %v6008_v3 = vld [vmem:[%s8908_s1 + $0xb94] sm:$0xf0]  ;;  %v5373_v5 = vld [vmem:[%s8908_s1 + $0xa90] sm:$0xf] }
 0x145   :  { %2648 = vmatmul.bf16.vlgmr.msrb.gmra.mxu2 %v6313_v55  ;;  %3382 = vmatpush.bf16.msrb.mxu1 %v5470_v26  ;;  %v5381_v26 = vld [vmem:[%s8908_s1 + $0xaa0] sm:$0xf] }
 0x146   :  { %2667 = vmatmul.bf16.vlgmr.msrb.gmra.mxu3 %v6562_v50  ;;  %3401 = vmatpush.bf16.msrb.mxu2 %v5534_v23  ;;  %v5581_v23 = vld [vmem:[%s8908_s1 + $0xc30] sm:$0xf]  ;;  %v5382_v42 = vor.u32 %v5978_v49, %v5381_v26  ;;  %v5974_v26 = vld [vmem:[%s8908_s1 + $0xa84] sm:$0xf0] }
 0x147   :  { %3350 = vmatpush.bf16.msra.mxu3 %v5294_v61  ;;  %v5582_v21 = vor.u32 %v6028_v17, %v5581_v23  ;;  %v6006_v23 = vld [vmem:[%s8908_s1 + $0xb84] sm:$0xf0]  ;;  %v5365_v17 = vld [vmem:[%s8908_s1 + $0xa80] sm:$0xf] }
 0x148   :  { %2685 = vmatpush.bf16.msra.mxu0 %v5042_v15  ;;  %v1736_v48 = vpop.f32.mrf.mxu2  ;;  %v1700_v61 = vpop.f32.mrf.mxu0  ;;  %v5980_v15 = vld [vmem:[%s8908_s1 + $0xab4] sm:$0xf0] }
 0x149   :  { %v1755_v38 = vpop.f32.mrf.mxu3  ;;  %v1737_v54 = vadd.f32 %v1736_v48, %v1717_v12  ;;  %v1719_v28 = vpop.f32.mrf.mxu1  ;;  %v8281_v31 = vadd.f32 %v1700_v61, %v8133_v0  ;;  %3383 = vmatpush.bf16.msrb.mxu1 %v5462_v2  ;;  %v5518_v12 = vor.u32 %v6012_v10, %v5517_v46  ;;  %v5390_v60 = vor.u32 %v5980_v15, %v5389_v4  ;;  %v5976_v46 = vld [vmem:[%s8908_s1 + $0xa94] sm:$0xf0]  ;;  %v5437_v10 = vld [vmem:[%s8908_s1 + $0xb10] sm:$0xf] }
 0x14a   :  { %3402 = vmatpush.bf16.msrb.mxu2 %v5526_v39  ;;  %v5446_v61 = vor.u32 %v5994_v36, %v5445_v20  ;;  %v5992_v4 = vld [vmem:[%s8908_s1 + $0xb14] sm:$0xf0]  ;;  %v5565_v15 = vld [vmem:[%s8908_s1 + $0xc10] sm:$0xf]  ;;  %v5366_v36 = vor.u32 %v5974_v26, %v5365_v17  ;;  %v5986_v26 = vld [vmem:[%s8908_s1 + $0xae4] sm:$0xf0] }
 0x14b   :  { %3351 = vmatpush.bf16.msra.mxu3 %v5286_v18  ;;  %v8283_v8 = vadd.f32 %v1755_v38, %v1737_v54  ;;  %v1843_v0 = vmax.f32 %v7522_v29, %v8281_v31  ;;  %v5453_v18 = vld [vmem:[%s8908_s1 + $0xb30] sm:$0xf] }
 0x14c   :  { %3363 = vmatpush.bf16.msrb.mxu0 %v5406_v9  ;;  %v5454_v7 = vor.u32 %v5996_v19, %v5453_v18  ;;  %v6010_v9 = vld [vmem:[%s8908_s1 + $0xba4] sm:$0xf0]  ;;  %v6024_v18 = vld [vmem:[%s8908_s1 + $0xc14] sm:$0xf0]  ;;  %v5438_v19 = vor.u32 %v5992_v4, %v5437_v10  ;;  %v5549_v4 = vld [vmem:[%s8908_s1 + $0xbf0] sm:$0xf] }
 0x14e   :  { %3403 = vmatpush.bf16.msrb.mxu2 %v5518_v12  ;;  %3384 = vmatpush.bf16.msrb.mxu1 %v5454_v7  ;;  %v5374_v12 = vor.u32 %v5976_v46, %v5373_v5  ;;  %v5493_v7 = vld [vmem:[%s8908_s1 + $0xb80] sm:$0xf]  ;;  %v5972_v5 = vld [vmem:[%s8908_s1 + $0xa74] sm:$0xf0] }
 0x14f   :  { %3420 = vmatpush.bf16.msrb.mxu3 %v5598_v34  ;;  %v5510_v34 = vor.u32 %v6010_v9, %v5509_v25  ;;  %v5494_v9 = vor.u32 %v6006_v23, %v5493_v7  ;;  %v5988_v46 = vld [vmem:[%s8908_s1 + $0xaf4] sm:$0xf0]  ;;  %v5349_v7 = vld [vmem:[%s8908_s1 + $0xa60] sm:$0xf] }
 0x150   :  { %3364 = vmatpush.bf16.msrb.mxu0 %v5398_v1  ;;  %v1738_v30 = vpop.f32.mrf.mxu2  ;;  %v1703_v38 = vpop.f32.mrf.mxu0  ;;  %v5574_v1 = vor.u32 %v6026_v44, %v5573_v43 }
 0x151   :  { %v1757_v33 = vpop.f32.mrf.mxu3  ;;  %v1739_v48 = vadd.f32 %v1738_v30, %v1719_v28  ;;  %v1722_v39 = vpop.f32.mrf.mxu1  ;;  %v8336_v54 = vadd.f32 %v1703_v38, %v8177_v27  ;;  %v5501_v28 = vld [vmem:[%s8908_s1 + $0xb90] sm:$0xf]  ;;  %v5429_v30 = vld [vmem:[%s8908_s1 + $0xb00] sm:$0xf]  ;;  %v6022_v38 = vld [vmem:[%s8908_s1 + $0xc04] sm:$0xf0] }
 0x152   :  { %3404 = vmatpush.bf16.msrb.mxu2 %v5510_v34  ;;  %3385 = vmatpush.bf16.msrb.mxu1 %v5446_v61 }
 0x153   :  { %3421 = vmatpush.bf16.msrb.mxu3 %v5590_v6  ;;  %v8338_v2 = vadd.f32 %v1757_v33, %v1739_v48  ;;  %v1845_v27 = vmax.f32 %v7580_v13, %v8336_v54  ;;  %2615 = vmatmul.bf16.gmra.mxu0 %v6423_v40  ;;  %v5502_v6 = vor.u32 %v6008_v3, %v5501_v28  ;;  %v5990_v33 = vld [vmem:[%s8908_s1 + $0xb04] sm:$0xf0]  ;;  %v5557_v48 = vld [vmem:[%s8908_s1 + $0xc00] sm:$0xf] }
 0x154   :  { %3365 = vmatpush.bf16.msrb.mxu0 %v5390_v60  ;;  %2634 = vmatmul.bf16.gmra.mxu1 %v6425_v41  ;;  %v5566_v60 = vor.u32 %v6024_v18, %v5565_v15  ;;  %v5430_v43 = vor.u32 %v5990_v33, %v5429_v30  ;;  %v5558_v44 = vor.u32 %v6022_v38, %v5557_v48  ;;  %v6018_v48 = vld [vmem:[%s8908_s1 + $0xbe4] sm:$0xf0] }
 0x155   :  { %2653 = vmatmul.bf16.gmra.mxu2 %v6433_v45 }
 0x156   :  { %2672 = vmatmul.bf16.gmra.mxu3 %v6687_v56  ;;  %3405 = vmatpush.bf16.msrb.mxu2 %v5502_v6  ;;  %v5421_v6 = vld [vmem:[%s8908_s1 + $0xaf0] sm:$0xf] }
 0x157   :  { %3422 = vmatpush.bf16.msrb.mxu3 %v5582_v21  ;;  %3386 = vmatpush.bf16.msrb.mxu1 %v5438_v19  ;;  %v5422_v15 = vor.u32 %v5988_v46, %v5421_v6  ;;  %v5477_v19 = vld [vmem:[%s8908_s1 + $0xb60] sm:$0xf]  ;;  %v5983_v6 = vld [vmem:[%s8908_s1 + $0xad4] sm:$0xf]  ;;  %v5407_v46 = vld [vmem:[%s8908_s1 + $0xad8] sm:$0xf0] }
 0x158   :  { %3366 = vmatpush.bf16.msrb.mxu0 %v5382_v42  ;;  %v1741_v21 = vpop.f32.mrf.mxu2  ;;  %v1705_v49 = vpop.f32.mrf.mxu0 }
 0x159   :  { %v1760_v25 = vpop.f32.mrf.mxu3  ;;  %v1742_v34 = vadd.f32 %v1741_v21, %v1722_v39  ;;  %v1724_v20 = vpop.f32.mrf.mxu1  ;;  %v8395_v42 = vadd.f32 %v1705_v49, %v8224_v16  ;;  %v5485_v39 = vld [vmem:[%s8908_s1 + $0xb70] sm:$0xf] }
 0x15a   :  { %3406 = vmatpush.bf16.msrb.mxu2 %v5494_v9  ;;  %v5357_v16 = vld [vmem:[%s8908_s1 + $0xa70] sm:$0xf]  ;;  %v5413_v9 = vld [vmem:[%s8908_s1 + $0xae0] sm:$0xf] }
 0x15b   :  { %3423 = vmatpush.bf16.msrb.mxu3 %v5574_v1  ;;  %v8397_v61 = vadd.f32 %v1760_v25, %v1742_v34  ;;  %v6004_v1 = vld [vmem:[%s8908_s1 + $0xb74] sm:$0xf0]  ;;  %v1847_v28 = vmax.f32 %v7633_v59, %v8395_v42  ;;  %v5358_v10 = vor.u32 %v5972_v5, %v5357_v16  ;;  %3387 = vmatpush.bf16.msrb.mxu1 %v5430_v43  ;;  %v5970_v25 = vld [vmem:[%s8908_s1 + $0xa64] sm:$0xf0]  ;;  %v5279_v5 = vld [vmem:[%s8908_s1 + $0x9d8] sm:$0xf0] }
 0x15c   :  { %3367 = vmatpush.bf16.msrb.mxu0 %v5374_v12  ;;  %v5486_v3 = vor.u32 %v6004_v1, %v5485_v39  ;;  %v6020_v12 = vld [vmem:[%s8908_s1 + $0xbf4] sm:$0xf0]  ;;  %v5350_v49 = vor.u32 %v5970_v25, %v5349_v7  ;;  %v5414_v43 = vor.u32 %v5986_v26, %v5413_v9  ;;  %v5343_v1 = vld [vmem:[%s8908_s1 + $0xa58] sm:$0xf0]  ;;  %v5949_v7 = vld [vmem:[%s8908_s1 + $0x9c4] sm:$0xf] }
 0x15d   :  { %v5550_v18 = vor.u32 %v6020_v12, %v5549_v4  ;;  %v5410_v4 = vor.u32 %v5983_v6, %v5407_v46  ;;  %v5613_v12 = vld [vmem:[%s8908_s1 + $0xc70] sm:$0xf]  ;;  %v5271_v25 = vld [vmem:[%s8908_s1 + $0x9c8] sm:$0xf0]  ;;  %v5981_v9 = vld [vmem:[%s8908_s1 + $0xac4] sm:$0xf] }
 0x15e   :  { %3407 = vmatpush.bf16.msrb.mxu2 %v5486_v3  ;;  %v5399_v26 = vld [vmem:[%s8908_s1 + $0xac8] sm:$0xf0] }
 0x15f   :  { %3424 = vmatpush.bf16.msrb.mxu3 %v5566_v60  ;;  %v6002_v60 = vld [vmem:[%s8908_s1 + $0xb64] sm:$0xf0]  ;;  %3388 = vmatpush.bf16.msrb.mxu1 %v5422_v15  ;;  %v6036_v15 = vld [vmem:[%s8908_s1 + $0xc74] sm:$0xf0] }
 0x160   :  { %3368 = vmatpush.bf16.msrb.mxu0 %v5366_v36  ;;  %v1743_v23 = vpop.f32.mrf.mxu2  ;;  %v5478_v21 = vor.u32 %v6002_v60, %v5477_v19  ;;  %v1774_v33 = vpop.f32.mrf.mxu0  ;;  %v5541_v36 = vld [vmem:[%s8908_s1 + $0xbe0] sm:$0xf]  ;;  %v5965_v19 = vld [vmem:[%s8908_s1 + $0xa44] sm:$0xf]  ;;  %v5335_v60 = vld [vmem:[%s8908_s1 + $0xa48] sm:$0xf0] }
 0x161   :  { %v1762_v17 = vpop.f32.mrf.mxu3  ;;  %v1744_v30 = vadd.f32 %v1743_v23, %v1724_v20  ;;  %v1793_v34 = vpop.f32.mrf.mxu1  ;;  %v1775_v38 = vadd.f32 %v1774_v33, %v8283_v8  ;;  %v5967_v20 = vld [vmem:[%s8908_s1 + $0xa54] sm:$0xf] }
 0x162   :  { %3408 = vmatpush.bf16.msrb.mxu2 %v5478_v21  ;;  %v5951_v8 = vld [vmem:[%s8908_s1 + $0x9d4] sm:$0xf]  ;;  %v5346_v3 = vor.u32 %v5967_v20, %v5343_v1  ;;  %v5338_v21 = vor.u32 %v5965_v19, %v5335_v60  ;;  %v5255_v60 = vld [vmem:[%s8908_s1 + $0x9a8] sm:$0xf0] }
 0x163   :  { %3425 = vmatpush.bf16.msrb.mxu3 %v5558_v44  ;;  %v5542_v44 = vor.u32 %v6018_v48, %v5541_v36  ;;  %v8450_v39 = vadd.f32 %v1762_v17, %v1744_v30  ;;  %v1794_v16 = vadd.f32 %v1793_v34, %v1775_v38  ;;  %2686 = vmatmul.bf16.vlgmr.msra.gmra.mxu0 %v6564_v53  ;;  %v5947_v20 = vld [vmem:[%s8908_s1 + $0x9b4] sm:$0xf] }
 0x164   :  { %3369 = vmatpush.bf16.msrb.mxu0 %v5358_v10  ;;  %5117 = vmatmul.msk.bf16.vlgmr.msra.gmra.mxu1 %vm701_vm0, %v6575_v58  ;;  %v5282_v10 = vor.u32 %v5951_v8, %v5279_v5  ;;  %v5402_v36 = vor.u32 %v5981_v9, %v5399_v26 }
 0x165   :  { %3333 = vmatmul.bf16.vlgmr.msra.gmra.mxu2 %v6295_v47  ;;  %3389 = vmatpush.bf16.msrb.mxu1 %v5414_v43  ;;  %v5963_v43 = vld [vmem:[%s8908_s1 + $0xa34] sm:$0xf] }
 0x166   :  { %3352 = vmatmul.bf16.vlgmr.msra.gmra.mxu3 %v6303_v51  ;;  %3477 = vmatpush.bf16.msra.mxu2 %v5346_v3  ;;  %v5391_v3 = vld [vmem:[%s8908_s1 + $0xab8] sm:$0xf0] }
 0x167   :  { %3426 = vmatpush.bf16.msrb.mxu3 %v5550_v18  ;;  %v5614_v18 = vor.u32 %v6036_v15, %v5613_v12  ;;  %v5945_v12 = vld [vmem:[%s8908_s1 + $0x9a4] sm:$0xf] }
 0x168   :  { %3370 = vmatpush.bf16.msrb.mxu0 %v5350_v49  ;;  %v1812_v23 = vpop.f32.mrf.mxu2  ;;  %v1776_v33 = vpop.f32.mrf.mxu0  ;;  %v5274_v49 = vor.u32 %v5949_v7, %v5271_v25  ;;  %v5977_v7 = vld [vmem:[%s8908_s1 + $0xaa4] sm:$0xf]  ;;  %v5258_v9 = vor.u32 %v5945_v12, %v5255_v60 }
 0x169   :  { %3458 = vmatpush.bf16.msra.mxu1 %v5282_v10  ;;  %v1831_v17 = vpop.f32.mrf.mxu3  ;;  %v1813_v30 = vadd.f32 %v1812_v23, %v1794_v16  ;;  %v1795_v34 = vpop.f32.mrf.mxu1  ;;  %v1777_v48 = vadd.f32 %v1776_v33, %v8338_v2  ;;  %v5263_v2 = vld [vmem:[%s8908_s1 + $0x9b8] sm:$0xf0]  ;;  %v5979_v16 = vld [vmem:[%s8908_s1 + $0xab4] sm:$0xf]  ;;  %v5961_v10 = vld [vmem:[%s8908_s1 + $0xa24] sm:$0xf] }
 0x16a   :  { %3478 = vmatpush.bf16.msra.mxu2 %v5338_v21  ;;  %v5266_v6 = vor.u32 %v5947_v20, %v5263_v2  ;;  %v5394_v46 = vor.u32 %v5979_v16, %v5391_v3  ;;  %v5383_v23 = vld [vmem:[%s8908_s1 + $0xaa8] sm:$0xf0]  ;;  %v5375_v20 = vld [vmem:[%s8908_s1 + $0xa98] sm:$0xf0]  ;;  %v5605_v2 = vld [vmem:[%s8908_s1 + $0xc60] sm:$0xf] }
 0x16b   :  { %3427 = vmatpush.bf16.msrb.mxu3 %v5542_v44  ;;  %v8500_v38 = vadd.f32 %v1831_v17, %v1813_v30  ;;  %v5327_v44 = vld [vmem:[%s8908_s1 + $0xa38] sm:$0xf0]  ;;  %v1796_v1 = vadd.f32 %v1795_v34, %v1777_v48  ;;  %v5386_v30 = vor.u32 %v5977_v7, %v5383_v23  ;;  %v5959_v34 = vld [vmem:[%s8908_s1 + $0xa14] sm:$0xf]  ;;  %v6034_v16 = vld [vmem:[%s8908_s1 + $0xc64] sm:$0xf0] }
 0x16c   :  { %3445 = vmatpush.bf16.msra.mxu0 %v5614_v18  ;;  %v5330_v8 = vor.u32 %v5963_v43, %v5327_v44  ;;  %v5247_v43 = vld [vmem:[%s8908_s1 + $0x998] sm:$0xf0]  ;;  %v5975_v44 = vld [vmem:[%s8908_s1 + $0xa94] sm:$0xf]  ;;  %v5973_v60 = vld [vmem:[%s8908_s1 + $0xa84] sm:$0xf] }
 0x16d   :  { %3459 = vmatpush.bf16.msra.mxu1 %v5274_v49  ;;  %v1842_v5 = vmax.f32 %v7835_v37, %v8500_v38  ;;  %v5311_v49 = vld [vmem:[%s8908_s1 + $0xa18] sm:$0xf0]  ;;  %v5378_v3 = vor.u32 %v5975_v44, %v5375_v20  ;;  %v5367_v7 = vld [vmem:[%s8908_s1 + $0xa88] sm:$0xf0] }
 0x16e   :  { %3479 = vmatpush.bf16.msra.mxu2 %v5330_v8  ;;  %v5359_v44 = vld [vmem:[%s8908_s1 + $0xa78] sm:$0xf0] }
 0x16f   :  { %3496 = vmatpush.bf16.msra.mxu3 %v5410_v4  ;;  %v5319_v4 = vld [vmem:[%s8908_s1 + $0xa28] sm:$0xf0] }
 0x170   :  { %v1814_v15 = vpop.f32.mrf.mxu2  ;;  %v5322_v19 = vor.u32 %v5961_v10, %v5319_v4  ;;  %v1779_v21 = vpop.f32.mrf.mxu0  ;;  %v5303_v10 = vld [vmem:[%s8908_s1 + $0xa08] sm:$0xf0]  ;;  %v5941_v4 = vld [vmem:[%s8908_s1 + $0x984] sm:$0xf] }
 0x171   :  { %3460 = vmatpush.bf16.msra.mxu1 %v5266_v6  ;;  %v1833_v18 = vpop.f32.mrf.mxu3  ;;  %v1815_v17 = vadd.f32 %v1814_v15, %v1796_v1  ;;  %v1798_v25 = vpop.f32.mrf.mxu1  ;;  %v1780_v26 = vadd.f32 %v1779_v21, %v8397_v61  ;;  %v5314_v61 = vor.u32 %v5959_v34, %v5311_v49  ;;  %v5606_v6 = vor.u32 %v6034_v16, %v5605_v2  ;;  %v5955_v34 = vld [vmem:[%s8908_s1 + $0x9f4] sm:$0xf]  ;;  %v5295_v49 = vld [vmem:[%s8908_s1 + $0x9f8] sm:$0xf0]  ;;  %v5953_v16 = vld [vmem:[%s8908_s1 + $0x9e4] sm:$0xf] }
 0x172   :  { %3480 = vmatpush.bf16.msra.mxu2 %v5322_v19  ;;  %v5239_v19 = vld [vmem:[%s8908_s1 + $0x988] sm:$0xf0] }
 0x173   :  { %3497 = vmatpush.bf16.msra.mxu3 %v5402_v36  ;;  %v8541_v33 = vadd.f32 %v1833_v18, %v1815_v17  ;;  %v5943_v36 = vld [vmem:[%s8908_s1 + $0x994] sm:$0xf]  ;;  %v1799_v48 = vadd.f32 %v1798_v25, %v1780_v26  ;;  %2691 = vmatmul.bf16.gmra.mxu0 %v6689_v57  ;;  %v5242_v25 = vor.u32 %v5941_v4, %v5239_v19 }
 0x174   :  { %5118 = vmatmul.msk.bf16.gmra.mxu1 %vm701_vm0, %v6700_v62  ;;  %v5250_v8 = vor.u32 %v5943_v36, %v5247_v43  ;;  %3446 = vmatpush.bf16.msra.mxu0 %v5606_v6  ;;  %v5370_v26 = vor.u32 %v5973_v60, %v5367_v7  ;;  %v5939_v36 = vld [vmem:[%s8908_s1 + $0x974] sm:$0xf]  ;;  %v5937_v6 = vld [vmem:[%s8908_s1 + $0x964] sm:$0xf] }
 0x175   :  { %3461 = vmatpush.bf16.msra.mxu1 %v5258_v9  ;;  %v1844_v1 = vmax.f32 %v7892_v24, %v8541_v33  ;;  %3338 = vmatmul.bf16.gmra.mxu2 %v6412_v35  ;;  %v5971_v43 = vld [vmem:[%s8908_s1 + $0xa74] sm:$0xf] }
 0x176   :  { %3357 = vmatmul.bf16.gmra.mxu3 %v6423_v40  ;;  %3481 = vmatpush.bf16.msra.mxu2 %v5314_v61  ;;  %v5231_v61 = vld [vmem:[%s8908_s1 + $0x978] sm:$0xf0]  ;;  %v5362_v2 = vor.u32 %v5971_v43, %v5359_v44 }
 0x177   :  { %3498 = vmatpush.bf16.msra.mxu3 %v5394_v46  ;;  %v5957_v46 = vld [vmem:[%s8908_s1 + $0xa04] sm:$0xf] }
 0x178   :  { %v1817_v12 = vpop.f32.mrf.mxu2  ;;  %v5306_v18 = vor.u32 %v5957_v46, %v5303_v10  ;;  %v1781_v17 = vpop.f32.mrf.mxu0 }
 0x179   :  { %3462 = vmatpush.bf16.msra.mxu1 %v5250_v8  ;;  %v1836_v15 = vpop.f32.mrf.mxu3  ;;  %v1818_v23 = vadd.f32 %v1817_v12, %v1799_v48  ;;  %v1800_v21 = vpop.f32.mrf.mxu1  ;;  %v1782_v9 = vadd.f32 %v1781_v17, %v8450_v39  ;;  %v5298_v39 = vor.u32 %v5955_v34, %v5295_v49  ;;  %v5234_v8 = vor.u32 %v5939_v36, %v5231_v61  ;;  %v5223_v12 = vld [vmem:[%s8908_s1 + $0x968] sm:$0xf0]  ;;  %v5999_v34 = vld [vmem:[%s8908_s1 + $0xb54] sm:$0xf]  ;;  %v5471_v36 = vld [vmem:[%s8908_s1 + $0xb58] sm:$0xf0] }
 0x17a   :  { %3482 = vmatpush.bf16.msra.mxu2 %v5306_v18  ;;  %v5351_v18 = vld [vmem:[%s8908_s1 + $0xa68] sm:$0xf0]  ;;  %v5474_v43 = vor.u32 %v5999_v34, %v5471_v36  ;;  %v5583_v36 = vld [vmem:[%s8908_s1 + $0xc38] sm:$0xf0] }
 0x17b   :  { %3499 = vmatpush.bf16.msra.mxu3 %v5386_v30  ;;  %v8593_v30 = vadd.f32 %v1836_v15, %v1818_v23  ;;  %v1801_v48 = vadd.f32 %v1800_v21, %v1782_v9  ;;  %v5969_v15 = vld [vmem:[%s8908_s1 + $0xa64] sm:$0xf]  ;;  %v5226_v23 = vor.u32 %v5937_v6, %v5223_v12  ;;  %v6031_v9 = vld [vmem:[%s8908_s1 + $0xc54] sm:$0xf]  ;;  %v5591_v6 = vld [vmem:[%s8908_s1 + $0xc48] sm:$0xf0] }
 0x17c   :  { %v5354_v21 = vor.u32 %v5969_v15, %v5351_v18  ;;  %v5463_v15 = vld [vmem:[%s8908_s1 + $0xb48] sm:$0xf0]  ;;  %v6013_v18 = vld [vmem:[%s8908_s1 + $0xbc4] sm:$0xf] }
 0x17d   :  { %3463 = vmatpush.bf16.msra.mxu1 %v5242_v25  ;;  %v1846_v20 = vmax.f32 %v7945_v11, %v8593_v30 }
 0x17e   :  { %3483 = vmatpush.bf16.msra.mxu2 %v5298_v39  ;;  %v5535_v39 = vld [vmem:[%s8908_s1 + $0xbd8] sm:$0xf0] }
 0x17f   :  { %3500 = vmatpush.bf16.msra.mxu3 %v5378_v3  ;;  %v5287_v3 = vld [vmem:[%s8908_s1 + $0x9e8] sm:$0xf0] }
 0x180   :  { %v1819_v46 = vpop.f32.mrf.mxu2  ;;  %v5290_v4 = vor.u32 %v5953_v16, %v5287_v3  ;;  %v2459_v60 = vpop.f32.mrf.mxu0  ;;  %v6029_v3 = vld [vmem:[%s8908_s1 + $0xc44] sm:$0xf] }
 0x181   :  { %3464 = vmatpush.bf16.msra.mxu1 %v5234_v8  ;;  %v1838_v10 = vpop.f32.mrf.mxu3  ;;  %v1820_v19 = vadd.f32 %v1819_v46, %v1801_v48  ;;  %v2478_v7 = vpop.f32.mrf.mxu1  ;;  %v6015_v48 = vld [vmem:[%s8908_s1 + $0xbd4] sm:$0xf]  ;;  %v5997_v46 = vld [vmem:[%s8908_s1 + $0xb44] sm:$0xf]  ;;  %v5594_v12 = vor.u32 %v6029_v3, %v5591_v6  ;;  %v5575_v3 = vld [vmem:[%s8908_s1 + $0xc28] sm:$0xf0] }
 0x182   :  { %v2479_v17 = vadd.f32 %v2478_v7, %v2459_v60  ;;  %3484 = vmatpush.bf16.msra.mxu2 %v5290_v4  ;;  %v5538_v44 = vor.u32 %v6015_v48, %v5535_v39  ;;  %v6035_v8 = vld [vmem:[%s8908_s1 + $0xc74] sm:$0xf]  ;;  %v5455_v39 = vld [vmem:[%s8908_s1 + $0xb38] sm:$0xf0]  ;;  %v5993_v6 = vld [vmem:[%s8908_s1 + $0xb24] sm:$0xf] }
 0x183   :  { %3501 = vmatpush.bf16.msra.mxu3 %v5370_v26  ;;  %v8633_v25 = vadd.f32 %v1838_v10, %v1820_v19  ;;  %v5599_v26 = vld [vmem:[%s8908_s1 + $0xc58] sm:$0xf0]  ;;  %3371 = vmatmul.bf16.vlgmr.msrb.gmra.mxu0 %v6305_v52  ;;  %v5527_v19 = vld [vmem:[%s8908_s1 + $0xbc8] sm:$0xf0] }
 0x184   :  { %3390 = vmatmul.bf16.vlgmr.msrb.gmra.mxu1 %v6313_v55  ;;  %v5602_v49 = vor.u32 %v6031_v9, %v5599_v26  ;;  %3515 = vmatpush.bf16.msrb.mxu0 %v5474_v43  ;;  %v5530_v9 = vor.u32 %v6013_v18, %v5527_v19  ;;  %v6011_v43 = vld [vmem:[%s8908_s1 + $0xbb4] sm:$0xf]  ;;  %v5511_v18 = vld [vmem:[%s8908_s1 + $0xba8] sm:$0xf0] }
 0x185   :  { %3465 = vmatpush.bf16.msra.mxu1 %v5226_v23  ;;  %v1848_v61 = vmax.f32 %v8002_v32, %v8633_v25  ;;  %3409 = vmatmul.bf16.vlgmr.msrb.gmra.mxu2 %v6562_v50 }
 0x186   :  { %3428 = vmatmul.bf16.vlgmr.msrb.gmra.mxu3 %v6564_v53  ;;  %3553 = vmatpush.bf16.msrb.mxu2 %v5602_v49  ;;  %v6027_v49 = vld [vmem:[%s8908_s1 + $0xc34] sm:$0xf] }
 0x187   :  { %3502 = vmatpush.bf16.msra.mxu3 %v5362_v2  ;;  %v5615_v2 = vld [vmem:[%s8908_s1 + $0xc78] sm:$0xf0]  ;;  %v5586_v48 = vor.u32 %v6027_v49, %v5583_v36  ;;  %v3599_v36 = vld [vmem:[%s8910_s2] sm:$0xff] }
 0x188   :  { %v5618_v16 = vor.u32 %v6035_v8, %v5615_v2  ;;  %v2497_v10 = vpop.f32.mrf.mxu2  ;;  %v2461_v7 = vpop.f32.mrf.mxu0 }
 0x189   :  { %3534 = vmatpush.bf16.msrb.mxu1 %v5538_v44  ;;  %v2516_v4 = vpop.f32.mrf.mxu3  ;;  %v2498_v60 = vadd.f32 %v2497_v10, %v2479_v17  ;;  %v2480_v23 = vpop.f32.mrf.mxu1  ;;  %v5995_v17 = vld [vmem:[%s8908_s1 + $0xb34] sm:$0xf]  ;;  %v5519_v44 = vld [vmem:[%s8908_s1 + $0xbb8] sm:$0xf0] }
 0x18a   :  { %v2481_v26 = vadd.f32 %v2480_v23, %v2461_v7  ;;  %3554 = vmatpush.bf16.msrb.mxu2 %v5594_v12  ;;  %v5458_v8 = vor.u32 %v5995_v17, %v5455_v39  ;;  %v5522_v2 = vor.u32 %v6011_v43, %v5519_v44  ;;  %v5447_v12 = vld [vmem:[%s8908_s1 + $0xb28] sm:$0xf0]  ;;  %v6023_v17 = vld [vmem:[%s8908_s1 + $0xc14] sm:$0xf]  ;;  %v5439_v43 = vld [vmem:[%s8908_s1 + $0xb18] sm:$0xf0] }
 0x18b   :  { %3503 = vmatpush.bf16.msra.mxu3 %v5354_v21  ;;  %v5466_v21 = vor.u32 %v5997_v46, %v5463_v15  ;;  %v8683_v34 = vadd.f32 %v2516_v4, %v2498_v60  ;;  %v6009_v15 = vld [vmem:[%s8908_s1 + $0xba4] sm:$0xf]  ;;  %v5450_v23 = vor.u32 %v5993_v6, %v5447_v12  ;;  %v5991_v39 = vld [vmem:[%s8908_s1 + $0xb14] sm:$0xf]  ;;  %v6040_v6 = vmov 0  }
 0x18c   :  { %v6007_v44 = vld [vmem:[%s8908_s1 + $0xb94] sm:$0xf]  ;;  %6038 = vset.pattern.permute.xlu0 %v6040_v6  ;;  %v5559_v12 = vld [vmem:[%s8908_s1 + $0xc08] sm:$0xf0]  ;;  %6039 = vset.pattern.permute.xlu1 %v6040_v6  ;;  %v5423_v6 = vld [vmem:[%s8908_s1 + $0xaf8] sm:$0xf0] }
 0x18d   :  { %3516 = vmatpush.bf16.msrb.mxu0 %v5466_v21  ;;  %3535 = vmatpush.bf16.msrb.mxu1 %v5530_v9  ;;  %v5514_v21 = vor.u32 %v6009_v15, %v5511_v18  ;;  %v5989_v15 = vld [vmem:[%s8908_s1 + $0xb04] sm:$0xf] }
 0x18e   :  { %3555 = vmatpush.bf16.msrb.mxu2 %v5586_v48  ;;  %3605 = vperm.xlu0 %6038, %v3599_v36  }
 0x18f   :  { %3578 = vmatpush.bf16.msrb.mxu3 %v5618_v16  ;;  %v6025_v16 = vld [vmem:[%s8908_s1 + $0xc24] sm:$0xf] }
 0x190   :  { %v2499_v46 = vpop.f32.mrf.mxu2  ;;  %v5578_v4 = vor.u32 %v6025_v16, %v5575_v3  ;;  %v2464_v60 = vpop.f32.mrf.mxu0  ;;  %v6033_v16 = vld [vmem:[%s8908_s1 + $0xc64] sm:$0xf]  ;;  %v5607_v3 = vld [vmem:[%s8908_s1 + $0xc68] sm:$0xf0] }
 0x191   :  { %3517 = vmatpush.bf16.msrb.mxu0 %v5458_v8  ;;  %3536 = vmatpush.bf16.msrb.mxu1 %v5522_v2  ;;  %v2518_v10 = vpop.f32.mrf.mxu3  ;;  %v2500_v19 = vadd.f32 %v2499_v46, %v2481_v26  ;;  %v2483_v7 = vpop.f32.mrf.mxu1  ;;  %v5567_v26 = vld [vmem:[%s8908_s1 + $0xc18] sm:$0xf0]  ;;  %v5442_v8 = vor.u32 %v5991_v39, %v5439_v43 }
 0x192   :  { %v2484_v9 = vadd.f32 %v2483_v7, %v2464_v60  ;;  %3556 = vmatpush.bf16.msrb.mxu2 %v5578_v4  ;;  %v5570_v48 = vor.u32 %v6023_v17, %v5567_v26  ;;  %v5503_v2 = vld [vmem:[%s8908_s1 + $0xb98] sm:$0xf0]  ;;  %v6021_v4 = vld [vmem:[%s8908_s1 + $0xc04] sm:$0xf]  ;;  %v5431_v7 = vld [vmem:[%s8908_s1 + $0xb08] sm:$0xf0] }
 0x193   :  { %v8721_v49 = vadd.f32 %v2518_v10, %v2500_v19  ;;  %3376 = vmatmul.bf16.gmra.mxu0 %v6425_v41  ;;  %v5506_v46 = vor.u32 %v6007_v44, %v5503_v2  ;;  %v5610_v10 = vor.u32 %v6033_v16, %v5607_v3  ;;  %v5562_v60 = vor.u32 %v6021_v4, %v5559_v12  ;;  %v6019_v2 = vld [vmem:[%s8908_s1 + $0xbf4] sm:$0xf]  ;;  %v5487_v4 = vld [vmem:[%s8908_s1 + $0xb78] sm:$0xf0] }
 0x194   :  { %3395 = vmatmul.bf16.gmra.mxu1 %v6433_v45  ;;  %v5987_v3 = vld [vmem:[%s8908_s1 + $0xaf4] sm:$0xf] }
 0x195   :  { %3518 = vmatpush.bf16.msrb.mxu0 %v5450_v23  ;;  %3537 = vmatpush.bf16.msrb.mxu1 %v5514_v21  ;;  %v6005_v23 = vld [vmem:[%s8908_s1 + $0xb84] sm:$0xf]  ;;  %v5495_v21 = vld [vmem:[%s8908_s1 + $0xb88] sm:$0xf0] }
 0x196   :  { %3414 = vmatmul.bf16.gmra.mxu2 %v6687_v56  ;;  %3433 = vmatmul.bf16.gmra.mxu3 %v6689_v57  ;;  %v5498_v39 = vor.u32 %v6005_v23, %v5495_v21  ;;  %v5415_v21 = vld [vmem:[%s8908_s1 + $0xae8] sm:$0xf0] }
 0x197   :  { %3557 = vmatpush.bf16.msrb.mxu2 %v5570_v48  ;;  %3579 = vmatpush.bf16.msrb.mxu3 %v5610_v10  ;;  %v5434_v48 = vor.u32 %v5989_v15, %v5431_v7  ;;  %v5426_v10 = vor.u32 %v5987_v3, %v5423_v6  ;;  %v6017_v15 = vld [vmem:[%s8908_s1 + $0xbe4] sm:$0xf]  ;;  %v3601_v3 = vld [vmem:[%s8910_s2 + $0x10] sm:$0xff] }
 0x198   :  { %v2502_v18 = vpop.f32.mrf.mxu2  ;;  %v2466_v17 = vpop.f32.mrf.mxu0  ;;  %3615 = vperm.xlu1 %6039, %v3601_v3  }
 0x199   :  { %3519 = vmatpush.bf16.msrb.mxu0 %v5442_v8  ;;  %v2521_v19 = vpop.f32.mrf.mxu3  ;;  %3538 = vmatpush.bf16.msrb.mxu1 %v5506_v46  ;;  %v2503_v36 = vadd.f32 %v2502_v18, %v2484_v9  ;;  %v2485_v26 = vpop.f32.mrf.mxu1  ;;  %v3600_v8 = vld [vmem:[%s8910_s2 + $0x8] sm:$0xff]  ;;  %v5551_v9 = vld [vmem:[%s8908_s1 + $0xbf8] sm:$0xf0]  ;;  %v6003_v46 = vld [vmem:[%s8908_s1 + $0xb74] sm:$0xf] }
 0x19a   :  { %v2486_v43 = vadd.f32 %v2485_v26, %v2466_v17  ;;  %v5554_v16 = vor.u32 %v6019_v2, %v5551_v9  ;;  %v5490_v12 = vor.u32 %v6003_v46, %v5487_v4  ;;  %3610 = vperm.xlu0 %6038, %v3600_v8   ;;  %v5543_v18 = vld [vmem:[%s8908_s1 + $0xbe8] sm:$0xf0] }
 0x19b   :  { %3558 = vmatpush.bf16.msrb.mxu2 %v5562_v60  ;;  %v2522_v44 = vadd.f32 %v2521_v19, %v2503_v36  ;;  %v5985_v19 = vld [vmem:[%s8908_s1 + $0xae4] sm:$0xf]  ;;  %v5546_v23 = vor.u32 %v6017_v15, %v5543_v18  ;;  %v5479_v17 = vld [vmem:[%s8908_s1 + $0xb68] sm:$0xf0] }
 0x19c   :  { %v6001_v36 = vld [vmem:[%s8908_s1 + $0xb64] sm:$0xf]  ;;  %v5418_v8 = vor.u32 %v5985_v19, %v5415_v21 }
 0x19d   :  { %3520 = vmatpush.bf16.msrb.mxu0 %v5434_v48  ;;  %3539 = vmatpush.bf16.msrb.mxu1 %v5498_v39  ;;  %v5482_v9 = vor.u32 %v6001_v36, %v5479_v17 }
 0x19f   :  { %3559 = vmatpush.bf16.msrb.mxu2 %v5554_v16 }
 0x1a0   :  { %v2504_v60 = vpop.f32.mrf.mxu2  ;;  %v2535_v48 = vpop.f32.mrf.mxu0 }
 0x1a1   :  { %3521 = vmatpush.bf16.msrb.mxu0 %v5426_v10  ;;  %v2523_v7 = vpop.f32.mrf.mxu3  ;;  %3540 = vmatpush.bf16.msrb.mxu1 %v5490_v12  ;;  %v2505_v26 = vadd.f32 %v2504_v60, %v2486_v43  ;;  %v2554_v39 = vpop.f32.mrf.mxu1  ;;  %v2536_v2 = vadd.f32 %v2535_v48, %v8683_v34 }
 0x1a3   :  { %3560 = vmatpush.bf16.msrb.mxu2 %v5546_v23  ;;  %v2524_v16 = vadd.f32 %v2523_v7, %v2505_v26  ;;  %v2555_v6 = vadd.f32 %v2554_v39, %v2536_v2  ;;  %5619 = vmatmul.msk.bf16.vlgmr.msra.gmra.mxu0 %vm701_vm0, %v6575_v58 }
 0x1a4   :  { %3466 = vmatmul.bf16.vlgmr.msra.gmra.mxu1 %v6295_v47  ;;  %v3602_v47 = vld [vmem:[%s8910_s2 + $0x18] sm:$0xff] }
 0x1a5   :  { %3522 = vmatpush.bf16.msrb.mxu0 %v5418_v8  ;;  %3541 = vmatpush.bf16.msrb.mxu1 %v5482_v9 }
 0x1a6   :  { %3485 = vmatmul.bf16.vlgmr.msra.gmra.mxu2 %v6303_v51  ;;  %3504 = vmatmul.bf16.vlgmr.msra.gmra.mxu3 %v6305_v52 }
 0x1a7   :  { %3620 = vperm.xlu1 %6039, %v3602_v47  }
 0x1a8   :  { %v2573_v34 = vpop.f32.mrf.mxu2  ;;  %v2537_v10 = vpop.f32.mrf.mxu0 }
 0x1a9   :  { %v2592_v43 = vpop.f32.mrf.mxu3  ;;  %v2574_v46 = vadd.f32 %v2573_v34, %v2555_v6  ;;  %v2556_v4 = vpop.f32.mrf.mxu1  ;;  %v2538_v12 = vadd.f32 %v2537_v10, %v8721_v49 }
 0x1ab   :  { %v8824_v15 = vmax.f32 %v1841_v22, %v2574_v46  ;;  %v2557_v51 = vadd.f32 %v2556_v4, %v2538_v12 }
 0x1b0   :  { %v2575_v52 = vpop.f32.mrf.mxu2  ;;  %v2540_v60 = vpop.f32.mrf.mxu0 }
 0x1b1   :  { %v2594_v18 = vpop.f32.mrf.mxu3  ;;  %v2576_v19 = vadd.f32 %v2575_v52, %v2557_v51  ;;  %v2559_v7 = vpop.f32.mrf.mxu1  ;;  %v2541_v23 = vadd.f32 %v2540_v60, %v2522_v44 }
 0x1b3   :  { %v8832_v49 = vmax.f32 %v1843_v0, %v2576_v19  ;;  %v2560_v63 = vadd.f32 %v2559_v7, %v2541_v23  ;;  %5620 = vmatmul.msk.bf16.gmra.mxu0 %vm701_vm0, %v6700_v62 }
 0x1b4   :  { %3471 = vmatmul.bf16.gmra.mxu1 %v6412_v35 }
 0x1b6   :  { %3490 = vmatmul.bf16.gmra.mxu2 %v6423_v40  ;;  %3509 = vmatmul.bf16.gmra.mxu3 %v6425_v41 }
 0x1b8   :  { %v2578_v14 = vpop.f32.mrf.mxu2  ;;  %v2542_v36 = vpop.f32.mrf.mxu0 }
 0x1b9   :  { %v2597_v22 = vpop.f32.mrf.mxu3  ;;  %v2579_v21 = vadd.f32 %v2578_v14, %v2560_v63  ;;  %v2561_v44 = vpop.f32.mrf.mxu1  ;;  %v2543_v17 = vadd.f32 %v2542_v36, %v2524_v16 }
 0x1bb   :  { %v8842_v29 = vmax.f32 %v1845_v27, %v2579_v21  ;;  %v2562_v31 = vadd.f32 %v2561_v44, %v2543_v17 }
 0x1c0   :  { %v2580_v0 = vpop.f32.mrf.mxu2  ;;  %v2611_v35 = vpop.f32.mrf.mxu0 }
 0x1c1   :  { %v2599_v26 = vpop.f32.mrf.mxu3  ;;  %v2581_v48 = vadd.f32 %v2580_v0, %v2562_v31  ;;  %v2630_v39 = vpop.f32.mrf.mxu1  ;;  %v2612_v40 = vadd.f32 %v2611_v35, %v2592_v43 }
 0x1c3   :  { %v8847_v41 = vmax.f32 %v1847_v28, %v2581_v48  ;;  %v2631_v8 = vadd.f32 %v2630_v39, %v2612_v40  ;;  %3523 = vmatmul.bf16.vlgmr.msrb.gmra.mxu0 %v6313_v55 }
 0x1c4   :  { %3542 = vmatmul.bf16.vlgmr.msrb.gmra.mxu1 %v6562_v50 }
 0x1c6   :  { %3561 = vmatmul.bf16.vlgmr.msrb.gmra.mxu2 %v6564_v53  ;;  %5621 = vmatmul.msk.bf16.vlgmr.msrb.gmra.mxu3 %vm701_vm0, %v6575_v58 }
 0x1c8   :  { %v2649_v13 = vpop.f32.mrf.mxu2  ;;  %v2613_v2 = vpop.f32.mrf.mxu0 }
 0x1c9   :  { %v2668_v54 = vpop.f32.mrf.mxu3  ;;  %v2650_v27 = vadd.f32 %v2649_v13, %v2631_v8  ;;  %v2632_v9 = vpop.f32.mrf.mxu1  ;;  %v2614_v16 = vadd.f32 %v2613_v2, %v2594_v18 }
 0x1cb   :  { %v2669_v3 = vadd.f32 %v2668_v54, %v2650_v27  ;;  %v2633_v59 = vadd.f32 %v2632_v9, %v2614_v16 }
 0x1d0   :  { %v2651_v42 = vpop.f32.mrf.mxu2  ;;  %v2616_v34 = vpop.f32.mrf.mxu0 }
 0x1d1   :  { %v2670_v28 = vpop.f32.mrf.mxu3  ;;  %v2652_v6 = vadd.f32 %v2651_v42, %v2633_v59  ;;  %v2635_v55 = vpop.f32.mrf.mxu1  ;;  %v2617_v43 = vadd.f32 %v2616_v34, %v2597_v22 }
 0x1d3   :  { %v2671_v50 = vadd.f32 %v2670_v28, %v2652_v6  ;;  %v2636_v46 = vadd.f32 %v2635_v55, %v2617_v43  ;;  %3528 = vmatmul.bf16.gmra.mxu0 %v6433_v45 }
 0x1d4   :  { %3547 = vmatmul.bf16.gmra.mxu1 %v6687_v56 }
 0x1d6   :  { %3566 = vmatmul.bf16.gmra.mxu2 %v6689_v57  ;;  %5622 = vmatmul.msk.bf16.gmra.mxu3 %vm701_vm0, %v6700_v62 }
 0x1d8   :  { %v2654_v53 = vpop.f32.mrf.mxu2  ;;  %v2618_v4 = vpop.f32.mrf.mxu0 }
 0x1d9   :  { %v2673_v58 = vpop.f32.mrf.mxu3  ;;  %v2655_v10 = vadd.f32 %v2654_v53, %v2636_v46  ;;  %v2637_v12 = vpop.f32.mrf.mxu1  ;;  %v2619_v47 = vadd.f32 %v2618_v4, %v2599_v26 }
 0x1db   :  { %v2674_v51 = vadd.f32 %v2673_v58, %v2655_v10  ;;  %v2638_v52 = vadd.f32 %v2637_v12, %v2619_v47 }
 0x1e0   :  { %v2656_v18 = vpop.f32.mrf.mxu2  ;;  %v2687_v7 = vpop.f32.mrf.mxu0 }
 0x1e1   :  { %v2675_v19 = vpop.f32.mrf.mxu3  ;;  %v2657_v60 = vadd.f32 %v2656_v18, %v2638_v52  ;;  %v2706_v45 = vpop.f32.mrf.mxu1  ;;  %v2688_v23 = vadd.f32 %v2687_v7, %v2669_v3 }
 0x1e3   :  { %v2676_v56 = vadd.f32 %v2675_v19, %v2657_v60  ;;  %v2707_v63 = vadd.f32 %v2706_v45, %v2688_v23 }
 0x1e5   :  { %v8862_v57 = vmax.f32 %v1842_v5, %v2707_v63 }
 0x1e8   :  { %v3334_v62 = vpop.f32.mrf.mxu2  ;;  %v2689_v21 = vpop.f32.mrf.mxu0 }
 0x1e9   :  { %v3353_v14 = vpop.f32.mrf.mxu3  ;;  %v2708_v36 = vpop.f32.mrf.mxu1  ;;  %v2690_v44 = vadd.f32 %v2689_v21, %v2671_v50 }
 0x1ea   :  { %v3354_v22 = vadd.f32 %v3353_v14, %v3334_v62 }
 0x1eb   :  { %v2709_v17 = vadd.f32 %v2708_v36, %v2690_v44 }
 0x1ed   :  { %v8867_v31 = vmax.f32 %v1844_v1, %v2709_v17 }
 0x1f0   :  { %v3336_v0 = vpop.f32.mrf.mxu2  ;;  %v2692_v35 = vpop.f32.mrf.mxu0 }
 0x1f1   :  { %v3355_v26 = vpop.f32.mrf.mxu3  ;;  %v2711_v39 = vpop.f32.mrf.mxu1  ;;  %v2693_v37 = vadd.f32 %v2692_v35, %v2674_v51 }
 0x1f2   :  { %v3356_v48 = vadd.f32 %v3355_v26, %v3336_v0 }
 0x1f3   :  { %v2712_v38 = vadd.f32 %v2711_v39, %v2693_v37 }
 0x1f5   :  { %v8872_v5 = vmax.f32 %v1846_v20, %v2712_v38 }
 0x1f8   :  { %v3339_v40 = vpop.f32.mrf.mxu2  ;;  %v2694_v54 = vpop.f32.mrf.mxu0 }
 0x1f9   :  { %v3358_v8 = vpop.f32.mrf.mxu3  ;;  %v2713_v27 = vpop.f32.mrf.mxu1  ;;  %v2695_v24 = vadd.f32 %v2694_v54, %v2676_v56 }
 0x1fa   :  { %v3359_v13 = vadd.f32 %v3358_v8, %v3339_v40 }
 0x1fb   :  { %v2714_v33 = vadd.f32 %v2713_v27, %v2695_v24 }
 0x1fd   :  { %v8877_v1 = vmax.f32 %v1848_v61, %v2714_v33 }
 0x200   :  { %v3341_v2 = vpop.f32.mrf.mxu2  ;;  %v3372_v3 = vpop.f32.mrf.mxu0 }
 0x201   :  { %v3360_v9 = vpop.f32.mrf.mxu3  ;;  %v3391_v59 = vpop.f32.mrf.mxu1  ;;  %v3373_v43 = vadd.f32 %v3372_v3, %v3354_v22 }
 0x202   :  { %v3361_v16 = vadd.f32 %v3360_v9, %v3341_v2 }
 0x203   :  { %v3392_v25 = vadd.f32 %v3391_v59, %v3373_v43 }
 0x208   :  { %v3410_v11 = vpop.f32.mrf.mxu2  ;;  %v3374_v20 = vpop.f32.mrf.mxu0 }
 0x209   :  { %v3429_v30 = vpop.f32.mrf.mxu3  ;;  %v3393_v42 = vpop.f32.mrf.mxu1  ;;  %v3411_v61 = vadd.f32 %v3410_v11, %v3392_v25  ;;  %v3375_v58 = vadd.f32 %v3374_v20, %v3356_v48 }
 0x20a   :  { %v3606_v20 = vpop.permute.xlu0 %3605 }
 0x20b   :  { %v3430_v10 = vadd.f32 %v3429_v30, %v3411_v61  ;;  %v3394_v52 = vadd.f32 %v3393_v42, %v3375_v58 }
 0x210   :  { %v3412_v28 = vpop.f32.mrf.mxu2  ;;  %v3377_v34 = vpop.f32.mrf.mxu0 }
 0x211   :  { %v3431_v6 = vpop.f32.mrf.mxu3  ;;  %v3396_v55 = vpop.f32.mrf.mxu1  ;;  %v3413_v19 = vadd.f32 %v3412_v28, %v3394_v52  ;;  %v3378_v7 = vadd.f32 %v3377_v34, %v3359_v13 }
 0x213   :  { %v3432_v45 = vadd.f32 %v3431_v6, %v3413_v19  ;;  %v3397_v14 = vadd.f32 %v3396_v55, %v3378_v7  ;;  %v3611_v19 = vpop.permute.xlu0 %3610 }
 0x218   :  { %v3379_v53 = vpop.f32.mrf.mxu0 }
 0x219   :  { %v3415_v50 = vpop.f32.mrf.mxu2  ;;  %v3434_v46 = vpop.f32.mrf.mxu3  ;;  %v3380_v44 = vadd.f32 %v3379_v53, %v3361_v16 }
 0x21a   :  { %v3398_v32 = vpop.f32.mrf.mxu1  ;;  %v3416_v21 = vadd.f32 %v3415_v50, %v3397_v14 }
 0x21b   :  { %v3399_v39 = vadd.f32 %v3398_v32, %v3380_v44 }
 0x21c   :  { %v3435_v17 = vadd.f32 %v3434_v46, %v3416_v21 }
 0x220   :  { %v3448_v47 = vpop.f32.mrf.mxu0 }
 0x221   :  { %v3417_v4 = vpop.f32.mrf.mxu2  ;;  %v3436_v12 = vpop.f32.mrf.mxu3  ;;  %v3449_v18 = vadd.f32 %v3448_v47, %v3430_v10 }
 0x222   :  { %v3467_v51 = vpop.f32.mrf.mxu1 }
 0x223   :  { %v3591_v60 = vmax.f32 %v8824_v15, %v3449_v18  ;;  %v3418_v15 = vadd.f32 %v3417_v4, %v3399_v39 }
 0x225   :  { %v3437_v40 = vadd.f32 %v3436_v12, %v3418_v15  ;;  %v3623_v53 = vadd.f32 %v3606_v20, %v3591_v60  ;;  %v3616_v60 = vpop.permute.xlu1 %3615 }
 0x227   :  { %v3631_v12 = vmax.f32 %v3623_v53, 0.0 }
 0x228   :  { %v3450_v63 = vpop.f32.mrf.mxu0 }
 0x229   :  { %v3486_v23 = vpop.f32.mrf.mxu2  ;;  %v3505_v56 = vpop.f32.mrf.mxu3  ;;  %v3451_v22 = vadd.f32 %v3450_v63, %v3432_v45 }
 0x22a   :  { %v3469_v62 = vpop.f32.mrf.mxu1  ;;  %v3487_v33 = vadd.f32 %v3486_v23, %v3467_v51 }
 0x22b   :  { %v3593_v36 = vmax.f32 %v8832_v49, %v3451_v22 }
 0x22c   :  { %v3506_v16 = vadd.f32 %v3505_v56, %v3487_v33 }
 0x22d   :  { %v3625_v63 = vadd.f32 %v3611_v19, %v3593_v36 }
 0x230   :  { %v3453_v48 = vpop.f32.mrf.mxu0 }
 0x231   :  { %v3488_v0 = vpop.f32.mrf.mxu2  ;;  %v3507_v26 = vpop.f32.mrf.mxu3  ;;  %v8881_v37 = vadd.f32 %v3453_v48, %v3435_v17  ;;  %v3633_v17 = vmax.f32 %v3625_v63, 0.0 }
 0x232   :  { %v3472_v35 = vpop.f32.mrf.mxu1  ;;  %v3489_v30 = vadd.f32 %v3488_v0, %v3469_v62 }
 0x233   :  { %v3595_v38 = vmax.f32 %v8842_v29, %v8881_v37 }
 0x234   :  { %v3508_v6 = vadd.f32 %v3507_v26, %v3489_v30 }
 0x235   :  { %v3627_v15 = vadd.f32 %v3616_v60, %v3595_v38 }
 0x238   :  { %v3455_v54 = vpop.f32.mrf.mxu0 }
 0x239   :  { %v3491_v8 = vpop.f32.mrf.mxu2  ;;  %v3510_v13 = vpop.f32.mrf.mxu3  ;;  %v8885_v24 = vadd.f32 %v3455_v54, %v3437_v40 }
 0x23a   :  { %v3474_v27 = vpop.f32.mrf.mxu1  ;;  %v3492_v32 = vadd.f32 %v3491_v8, %v3472_v35 }
 0x23b   :  { %v3597_v49 = vmax.f32 %v8847_v41, %v8885_v24 }
 0x23c   :  { %v3511_v47 = vadd.f32 %v3510_v13, %v3492_v32 }
 0x240   :  { %v3524_v3 = vpop.f32.mrf.mxu0 }
 0x241   :  { %v3493_v2 = vpop.f32.mrf.mxu2  ;;  %v3512_v9 = vpop.f32.mrf.mxu3  ;;  %v3525_v11 = vadd.f32 %v3524_v3, %v3506_v16 }
 0x242   :  { %v3543_v59 = vpop.f32.mrf.mxu1  ;;  %v3494_v62 = vadd.f32 %v3493_v2, %v3474_v27  ;;  %v3635_v27 = vmax.f32 %v3627_v15, 0.0 }
 0x243   :  { %v3544_v29 = vadd.f32 %v3543_v59, %v3525_v11 }
 0x244   :  { %v3513_v0 = vadd.f32 %v3512_v9, %v3494_v62  ;;  %v3621_v9 = vpop.permute.xlu1 %3620 }
 0x245   :  { %v3629_v38 = vadd.f32 %v3621_v9, %v3597_v49 }
 0x247   :  { %v3637_v30 = vmax.f32 %v3629_v38, 0.0 }
 0x248   :  { %v3526_v55 = vpop.f32.mrf.mxu0 }
 0x249   :  { %v3562_v42 = vpop.f32.mrf.mxu2  ;;  %v3581_v28 = vpop.f32.mrf.mxu3  ;;  %v3527_v46 = vadd.f32 %v3526_v55, %v3508_v6 }
 0x24a   :  { %v3563_v34 = vadd.f32 %v3562_v42, %v3544_v29  ;;  %v3545_v43 = vpop.f32.mrf.mxu1 }
 0x24b   :  { %v3546_v58 = vadd.f32 %v3545_v43, %v3527_v46 }
 0x24c   :  { %v3582_v50 = vadd.f32 %v3581_v28, %v3563_v34 }
 0x24e   :  { %v3592_v25 = vmax.f32 %v8862_v57, %v3582_v50 }
 0x250   :  { %v3624_v61 = vadd.f32 %v3606_v20, %v3592_v25  ;;  %v3529_v18 = vpop.f32.mrf.mxu0 }
 0x251   :  { %v3564_v10 = vpop.f32.mrf.mxu2  ;;  %v3583_v4 = vpop.f32.mrf.mxu3  ;;  %v3530_v23 = vadd.f32 %v3529_v18, %v3511_v47 }
 0x252   :  { %v3632_v51 = vmax.f32 %v3624_v61, 0.0  ;;  %v3565_v52 = vadd.f32 %v3564_v10, %v3546_v58  ;;  %v3548_v56 = vpop.f32.mrf.mxu1 }
 0x253   :  { %v3549_v22 = vadd.f32 %v3548_v56, %v3530_v23 }
 0x254   :  { %v3639_v7 = vpack.c.bf16 %v3632_v51, %v3631_v12  ;;  %v3584_v45 = vadd.f32 %v3583_v4, %v3565_v52 }
 0x256   :  { %3643 = vst [vmem:[%s8911_s3] sm:$0xff] %v3639_v7  ;;  %v3594_v57 = vmax.f32 %v8867_v31, %v3584_v45 }
 0x258   :  { %v3626_v14 = vadd.f32 %v3611_v19, %v3594_v57  ;;  %v3531_v35 = vpop.f32.mrf.mxu0 }
 0x259   :  { %v3567_v21 = vpop.f32.mrf.mxu2  ;;  %v3586_v44 = vpop.f32.mrf.mxu3  ;;  %v3532_v36 = vadd.f32 %v3531_v35, %v3513_v0 }
 0x25a   :  { %v3634_v26 = vmax.f32 %v3626_v14, 0.0  ;;  %v3568_v48 = vadd.f32 %v3567_v21, %v3549_v22  ;;  %v3550_v40 = vpop.f32.mrf.mxu1 }
 0x25b   :  { %v3551_v13 = vadd.f32 %v3550_v40, %v3532_v36 }
 0x25c   :  { %v3640_v39 = vpack.c.bf16 %v3634_v26, %v3633_v17  ;;  %v3587_v37 = vadd.f32 %v3586_v44, %v3568_v48 }
 0x25e   :  { %3644 = vst [vmem:[%s8911_s3 + $0x8] sm:$0xff] %v3640_v39  ;;  %v3596_v31 = vmax.f32 %v8872_v5, %v3587_v37 }
 0x260   :  { %v3628_v8 = vadd.f32 %v3616_v60, %v3596_v31 }
 0x261   :  { %v3569_v54 = vpop.f32.mrf.mxu2  ;;  %v3588_v16 = vpop.f32.mrf.mxu3 }
 0x262   :  { %v3636_v33 = vmax.f32 %v3628_v8, 0.0  ;;  %v3570_v2 = vadd.f32 %v3569_v54, %v3551_v13 }
 0x264   :  { %v3641_v3 = vpack.c.bf16 %v3636_v33, %v3635_v27  ;;  %v3589_v59 = vadd.f32 %v3588_v16, %v3570_v2 }
 0x266   :  { %3645 = vst [vmem:[%s8911_s3 + $0x10] sm:$0xff] %v3641_v3  ;;  %v3598_v5 = vmax.f32 %v8877_v1, %v3589_v59 }
 0x268   :  { %v3630_v11 = vadd.f32 %v3621_v9, %v3598_v5 }
 0x26a   :  { %v3638_v20 = vmax.f32 %v3630_v11, 0.0 }
 0x26c   :  { %v3642_v29 = vpack.c.bf16 %v3638_v20, %v3637_v30 }
 0x26e   :  { %3646 = vst [vmem:[%s8911_s3 + $0x18] sm:$0xff] %v3642_v29 }

// kernel: cnn_forward.6
= control target key start
LH: loop header
LB: loop body
LE: loop exit
PB: predicated region body
PF: predicated region fallthrough
CT: control target
= control target key end

     0   :  { %vm587_vm0 = vcmask 261120   ;;  %s5443_s1 = inlined_call_operand.vmem [shape: bf16[4,800,128], index: 1, kind: input, shape index: {}]   ;;  %s5444_s0 = inlined_call_operand.vmem [shape: bf16[64,800], index: 0, kind: input, shape index: {}]   ;;  %s5445_s2 = inlined_call_operand.vmem [shape: f32[64,1], index: 2, kind: input, shape index: {}]   ;;  %s5446_s3 = inlined_call_operand.vmem [shape: bf16[64,128], index: 3, kind: output, shape index: {}]  }
   0x1   :  { %v3986_v0 = vld [vmem:[%s5443_s1 + $0x38] sm:$0xff]  ;;  %v3985_v4 = vld [vmem:[%s5443_s1 + $0x30] sm:$0xff]  ;;  %v3984_v8 = vld [vmem:[%s5443_s1 + $0x28] sm:$0xff] }
   0x2   :  { %v3994_v1 = vld [vmem:[%s5443_s1 + $0x78] sm:$0xff]  ;;  %600 = vmatpush.bf16.msra.mxu0 %v3986_v0  ;;  %v3993_v5 = vld [vmem:[%s5443_s1 + $0x70] sm:$0xff]  ;;  %v3992_v9 = vld [vmem:[%s5443_s1 + $0x68] sm:$0xff] }
   0x3   :  { %v4002_v2 = vld [vmem:[%s5443_s1 + $0xb8] sm:$0xff]  ;;  %629 = vmatpush.bf16.msra.mxu1 %v3994_v1  ;;  %v4001_v6 = vld [vmem:[%s5443_s1 + $0xb0] sm:$0xff]  ;;  %v4000_v10 = vld [vmem:[%s5443_s1 + $0xa8] sm:$0xff] }
   0x4   :  { %v4010_v3 = vld [vmem:[%s5443_s1 + $0xf8] sm:$0xff]  ;;  %658 = vmatpush.bf16.msra.mxu2 %v4002_v2  ;;  %v4009_v7 = vld [vmem:[%s5443_s1 + $0xf0] sm:$0xff]  ;;  %v4008_v11 = vld [vmem:[%s5443_s1 + $0xe8] sm:$0xff] }
   0x5   :  { %687 = vmatpush.bf16.msra.mxu3 %v4010_v3  ;;  %v3983_v12 = vld [vmem:[%s5443_s1 + $0x20] sm:$0xff]  ;;  %v3982_v16 = vld [vmem:[%s5443_s1 + $0x18] sm:$0xff]  ;;  %v3981_v20 = vld [vmem:[%s5443_s1 + $0x10] sm:$0xff] }
   0x6   :  { %601 = vmatpush.bf16.msra.mxu0 %v3985_v4  ;;  %v3991_v13 = vld [vmem:[%s5443_s1 + $0x60] sm:$0xff]  ;;  %v3990_v17 = vld [vmem:[%s5443_s1 + $0x58] sm:$0xff]  ;;  %v3989_v21 = vld [vmem:[%s5443_s1 + $0x50] sm:$0xff] }
   0x7   :  { %630 = vmatpush.bf16.msra.mxu1 %v3993_v5  ;;  %v3999_v14 = vld [vmem:[%s5443_s1 + $0xa0] sm:$0xff]  ;;  %v3998_v18 = vld [vmem:[%s5443_s1 + $0x98] sm:$0xff]  ;;  %v3997_v22 = vld [vmem:[%s5443_s1 + $0x90] sm:$0xff] }
   0x8   :  { %659 = vmatpush.bf16.msra.mxu2 %v4001_v6  ;;  %v4007_v15 = vld [vmem:[%s5443_s1 + $0xe0] sm:$0xff]  ;;  %v4006_v19 = vld [vmem:[%s5443_s1 + $0xd8] sm:$0xff]  ;;  %v4005_v23 = vld [vmem:[%s5443_s1 + $0xd0] sm:$0xff] }
   0x9   :  { %688 = vmatpush.bf16.msra.mxu3 %v4009_v7  ;;  %v3980_v24 = vld [vmem:[%s5443_s1 + $0x8] sm:$0xff]  ;;  %v3979_v28 = vld [vmem:[%s5443_s1] sm:$0xff]  ;;  %v3954_v33 = vld [vmem:[%s5444_s0 + $0x18] sm:$0xf0] }
   0xa   :  { %602 = vmatpush.bf16.msra.mxu0 %v3984_v8  ;;  %v3988_v25 = vld [vmem:[%s5443_s1 + $0x48] sm:$0xff]  ;;  %v3987_v29 = vld [vmem:[%s5443_s1 + $0x40] sm:$0xff]  ;;  %v4018_v41 = vld [vmem:[%s5443_s1 + $0x138] sm:$0xff] }
   0xb   :  { %631 = vmatpush.bf16.msra.mxu1 %v3992_v9  ;;  %v3996_v26 = vld [vmem:[%s5443_s1 + $0x88] sm:$0xff]  ;;  %v3995_v30 = vld [vmem:[%s5443_s1 + $0x80] sm:$0xff]  ;;  %v4026_v47 = vld [vmem:[%s5443_s1 + $0x178] sm:$0xff] }
   0xc   :  { %660 = vmatpush.bf16.msra.mxu2 %v4000_v10  ;;  %v4004_v27 = vld [vmem:[%s5443_s1 + $0xc8] sm:$0xff]  ;;  %v4003_v31 = vld [vmem:[%s5443_s1 + $0xc0] sm:$0xff]  ;;  %v4017_v48 = vld [vmem:[%s5443_s1 + $0x130] sm:$0xff] }
   0xd   :  { %689 = vmatpush.bf16.msra.mxu3 %v4008_v11  ;;  %v2725_v32 = vld [vmem:[%s5444_s0] sm:$0xf]  ;;  %v3951_v34 = vld [vmem:[%s5444_s0 + $0x4] sm:$0xf]  ;;  %v2733_v36 = vld [vmem:[%s5444_s0 + $0x8] sm:$0xf] }
   0xe   :  { %603 = vmatpush.bf16.msra.mxu0 %v3983_v12  ;;  %v2727_v35 = vld [vmem:[%s5444_s0 + $0x1c] sm:$0xf0]  ;;  %v3955_v37 = vld [vmem:[%s5444_s0 + $0x20] sm:$0xf0]  ;;  %v3952_v38 = vld [vmem:[%s5444_s0 + $0xc] sm:$0xf]  ;;  %v4353_v42 = vor.u32 %v3954_v33, %v2725_v32 }
   0xf   :  { %632 = vmatpush.bf16.msra.mxu1 %v3991_v13  ;;  %v2735_v39 = vld [vmem:[%s5444_s0 + $0x24] sm:$0xf0]  ;;  %v4355_v43 = vor.u32 %v3951_v34, %v2727_v35  ;;  %v4357_v44 = vor.u32 %v3955_v37, %v2733_v36  ;;  %v4027_v49 = vld [vmem:[%s5443_s1 + $0x180] sm:$0xff]  ;;  %v4025_v51 = vld [vmem:[%s5443_s1 + $0x170] sm:$0xff] }
  0x10   :  { %661 = vmatpush.bf16.msra.mxu2 %v3999_v14  ;;  %v4028_v40 = vld [vmem:[%s5443_s1 + $0x188] sm:$0xff]  ;;  %v4359_v45 = vor.u32 %v3952_v38, %v2735_v39  ;;  %v4035_v50 = vld [vmem:[%s5443_s1 + $0x1c0] sm:$0xff]  ;;  %v4034_v53 = vld [vmem:[%s5443_s1 + $0x1b8] sm:$0xff] }
  0x11   :  { %690 = vmatpush.bf16.msra.mxu3 %v4007_v15  ;;  %v4036_v46 = vld [vmem:[%s5443_s1 + $0x1c8] sm:$0xff]  ;;  %v2753_v55 = vld [vmem:[%s5444_s0 + $0x38] sm:$0xf]  ;;  %v4015_v56 = vld [vmem:[%s5443_s1 + $0x120] sm:$0xff] }
  0x12   :  { %604 = vmatpush.bf16.msra.mxu0 %v3982_v16  ;;  %v4016_v52 = vld [vmem:[%s5443_s1 + $0x128] sm:$0xff]  ;;  %v3961_v57 = vld [vmem:[%s5444_s0 + $0x50] sm:$0xf0]  ;;  %v3958_v58 = vld [vmem:[%s5444_s0 + $0x3c] sm:$0xf] }
  0x13   :  { %633 = vmatpush.bf16.msra.mxu1 %v3990_v17  ;;  %v4024_v54 = vld [vmem:[%s5443_s1 + $0x168] sm:$0xff]  ;;  %v2755_v59 = vld [vmem:[%s5444_s0 + $0x54] sm:$0xf0]  ;;  %v2761_v60 = vld [vmem:[%s5444_s0 + $0x40] sm:$0xf]  ;;  %v4428_v3 = vor.u32 %v3961_v57, %v2753_v55 }
  0x14   :  { %662 = vmatpush.bf16.msra.mxu2 %v3998_v18  ;;  %v3962_v61 = vld [vmem:[%s5444_s0 + $0x58] sm:$0xf0]  ;;  %v3959_v62 = vld [vmem:[%s5444_s0 + $0x44] sm:$0xf]  ;;  %v2763_v63 = vld [vmem:[%s5444_s0 + $0x5c] sm:$0xf0]  ;;  %v4430_v4 = vor.u32 %v3958_v58, %v2755_v59 }
  0x15   :  { %691 = vmatpush.bf16.msra.mxu3 %v4006_v19  ;;  %v4033_v0 = vld [vmem:[%s5443_s1 + $0x1b0] sm:$0xff]  ;;  %v4023_v1 = vld [vmem:[%s5443_s1 + $0x160] sm:$0xff]  ;;  %v4014_v2 = vld [vmem:[%s5443_s1 + $0x118] sm:$0xff]  ;;  %v4432_v5 = vor.u32 %v3962_v61, %v2761_v60  ;;  %v4434_v6 = vor.u32 %v3959_v62, %v2763_v63 }
  0x16   :  { %605 = vmatpush.bf16.msra.mxu0 %v3981_v20  ;;  %v4032_v7 = vld [vmem:[%s5443_s1 + $0x1a8] sm:$0xff]  ;;  %v4022_v8 = vld [vmem:[%s5443_s1 + $0x158] sm:$0xff]  ;;  %v4013_v9 = vld [vmem:[%s5443_s1 + $0x110] sm:$0xff] }
  0x17   :  { %634 = vmatpush.bf16.msra.mxu1 %v3989_v21  ;;  %v4031_v10 = vld [vmem:[%s5443_s1 + $0x1a0] sm:$0xff]  ;;  %v4021_v11 = vld [vmem:[%s5443_s1 + $0x150] sm:$0xff]  ;;  %v4012_v12 = vld [vmem:[%s5443_s1 + $0x108] sm:$0xff] }
  0x18   :  { %663 = vmatpush.bf16.msra.mxu2 %v3997_v22  ;;  %v4030_v13 = vld [vmem:[%s5443_s1 + $0x198] sm:$0xff]  ;;  %v4020_v14 = vld [vmem:[%s5443_s1 + $0x148] sm:$0xff]  ;;  %v2781_v15 = vld [vmem:[%s5444_s0 + $0x70] sm:$0xf] }
  0x19   :  { %692 = vmatpush.bf16.msra.mxu3 %v4005_v23  ;;  %v4011_v16 = vld [vmem:[%s5443_s1 + $0x100] sm:$0xff]  ;;  %v3968_v17 = vld [vmem:[%s5444_s0 + $0x88] sm:$0xf0]  ;;  %v3965_v18 = vld [vmem:[%s5444_s0 + $0x74] sm:$0xf] }
  0x1a   :  { %606 = vmatpush.bf16.msra.mxu0 %v3980_v24  ;;  %v2783_v19 = vld [vmem:[%s5444_s0 + $0x8c] sm:$0xf0]  ;;  %v2789_v20 = vld [vmem:[%s5444_s0 + $0x78] sm:$0xf]  ;;  %v3969_v21 = vld [vmem:[%s5444_s0 + $0x90] sm:$0xf0] }
  0x1b   :  { %635 = vmatpush.bf16.msra.mxu1 %v3988_v25  ;;  %v3966_v22 = vld [vmem:[%s5444_s0 + $0x7c] sm:$0xf]  ;;  %v2791_v23 = vld [vmem:[%s5444_s0 + $0x94] sm:$0xf0]  ;;  %v4029_v24 = vld [vmem:[%s5443_s1 + $0x190] sm:$0xff] }
  0x1c   :  { %664 = vmatpush.bf16.msra.mxu2 %v3996_v26  ;;  %v4019_v25 = vld [vmem:[%s5443_s1 + $0x140] sm:$0xff]  ;;  %v4497_v26 = vor.u32 %v3968_v17, %v2781_v15  ;;  %v4068_v32 = vld [vmem:[%s5443_s1 + $0x2c8] sm:$0xff]  ;;  %v4042_v55 = vld [vmem:[%s5443_s1 + $0x1f8] sm:$0xff] }
  0x1d   :  { %693 = vmatpush.bf16.msra.mxu3 %v4004_v27  ;;  %v4499_v27 = vor.u32 %v3965_v18, %v2783_v19  ;;  %v4052_v33 = vld [vmem:[%s5443_s1 + $0x248] sm:$0xff]  ;;  %v4059_v34 = vld [vmem:[%s5443_s1 + $0x280] sm:$0xff]  ;;  %v4050_v57 = vld [vmem:[%s5443_s1 + $0x238] sm:$0xff] }
  0x1e   :  { %607 = vmatpush.bf16.msra.mxu0 %v3979_v28  ;;  %v4501_v28 = vor.u32 %v3969_v21, %v2789_v20  ;;  %v4043_v35 = vld [vmem:[%s5443_s1 + $0x200] sm:$0xff]  ;;  %v2809_v38 = vld [vmem:[%s5444_s0 + $0xa8] sm:$0xf]  ;;  %v4057_v58 = vld [vmem:[%s5443_s1 + $0x270] sm:$0xff] }
  0x1f   :  { %636 = vmatpush.bf16.msra.mxu1 %v3987_v29  ;;  %v4503_v29 = vor.u32 %v3966_v22, %v2791_v23  ;;  %v4067_v36 = vld [vmem:[%s5443_s1 + $0x2c0] sm:$0xff]  ;;  %v4041_v59 = vld [vmem:[%s5443_s1 + $0x1f0] sm:$0xff]  ;;  %v3956_v63 = vld [vmem:[%s5444_s0 + $0x28] sm:$0xf0] }
  0x20   :  { %665 = vmatpush.bf16.msra.mxu2 %v3995_v30  ;;  %v4060_v30 = vld [vmem:[%s5443_s1 + $0x288] sm:$0xff]  ;;  %v4051_v37 = vld [vmem:[%s5443_s1 + $0x240] sm:$0xff]  ;;  %v4065_v60 = vld [vmem:[%s5443_s1 + $0x2b0] sm:$0xff] }
  0x21   :  { %694 = vmatpush.bf16.msra.mxu3 %v4003_v31  ;;  %608 = vmatmul.bf16.vlgmr.msra.gmra.mxu0 %v4353_v42  ;;  %v4044_v31 = vld [vmem:[%s5443_s1 + $0x208] sm:$0xff]  ;;  %v3975_v39 = vld [vmem:[%s5444_s0 + $0xc0] sm:$0xf0]  ;;  %v4049_v61 = vld [vmem:[%s5443_s1 + $0x230] sm:$0xff] }
  0x22   :  { %716 = vmatpush.bf16.msrb.mxu0 %v4018_v41  ;;  %637 = vmatmul.bf16.vlgmr.msra.gmra.mxu1 %v4355_v43  ;;  %v2811_v41 = vld [vmem:[%s5444_s0 + $0xc4] sm:$0xf0]  ;;  %v2741_v62 = vld [vmem:[%s5444_s0 + $0x10] sm:$0xf]  ;;  %v4055_v15 = vld [vmem:[%s5443_s1 + $0x260] sm:$0xff] }
  0x23   :  { %666 = vmatmul.bf16.vlgmr.msra.gmra.mxu2 %v4357_v44  ;;  %745 = vmatpush.bf16.msrb.mxu1 %v4026_v47  ;;  %v3976_v47 = vld [vmem:[%s5444_s0 + $0xc8] sm:$0xf0]  ;;  %v4063_v17 = vld [vmem:[%s5443_s1 + $0x2a0] sm:$0xff]  ;;  %v2769_v19 = vld [vmem:[%s5444_s0 + $0x48] sm:$0xf] }
  0x24   :  { %780 = vmatpush.bf16.msrb.mxu2 %v4028_v40  ;;  %695 = vmatmul.bf16.vlgmr.msra.gmra.mxu3 %v4359_v45  ;;  %v3972_v40 = vld [vmem:[%s5444_s0 + $0xac] sm:$0xf]  ;;  %v4047_v18 = vld [vmem:[%s5443_s1 + $0x220] sm:$0xff]  ;;  %v2771_v22 = vld [vmem:[%s5444_s0 + $0x64] sm:$0xf0] }
  0x25   :  { %1204 = vmatpush.bf16.msrb.mxu3 %v4036_v46  ;;  %v2817_v46 = vld [vmem:[%s5444_s0 + $0xb0] sm:$0xf]  ;;  %v3963_v20 = vld [vmem:[%s5444_s0 + $0x60] sm:$0xf0]  ;;  %v3960_v21 = vld [vmem:[%s5444_s0 + $0x4c] sm:$0xf] }
  0x26   :  { %717 = vmatpush.bf16.msrb.mxu0 %v4017_v48  ;;  %v3973_v48 = vld [vmem:[%s5444_s0 + $0xb4] sm:$0xf]  ;;  %v2777_v23 = vld [vmem:[%s5444_s0 + $0x50] sm:$0xf] }
  0x27   :  { %746 = vmatpush.bf16.msrb.mxu1 %v4025_v51  ;;  %v4559_v51 = vor.u32 %v3972_v40, %v2811_v41  ;;  %v2797_v40 = vld [vmem:[%s5444_s0 + $0x80] sm:$0xf]  ;;  %v3970_v41 = vld [vmem:[%s5444_s0 + $0x98] sm:$0xf0] }
  0x28   :  { %781 = vmatpush.bf16.msrb.mxu2 %v4027_v49  ;;  %v2819_v49 = vld [vmem:[%s5444_s0 + $0xcc] sm:$0xf0] }
  0x29   :  { %1205 = vmatpush.bf16.msrb.mxu3 %v4035_v50  ;;  %v4557_v50 = vor.u32 %v3975_v39, %v2809_v38  ;;  %v4061_v38 = vld [vmem:[%s5443_s1 + $0x290] sm:$0xff] }
  0x2a   :  { %718 = vmatpush.bf16.msrb.mxu0 %v4016_v52  ;;  %v4561_v52 = vor.u32 %v3976_v47, %v2817_v46  ;;  %v4045_v39 = vld [vmem:[%s5443_s1 + $0x210] sm:$0xff]  ;;  %v3967_v46 = vld [vmem:[%s5444_s0 + $0x84] sm:$0xf]  ;;  %v2799_v47 = vld [vmem:[%s5444_s0 + $0x9c] sm:$0xf0] }
  0x2b   :  { %747 = vmatpush.bf16.msrb.mxu1 %v4024_v54  ;;  %v4058_v54 = vld [vmem:[%s5443_s1 + $0x278] sm:$0xff] }
  0x2c   :  { %1291 = vmatpush.bf16.msra.mxu2 %v4060_v30  ;;  %v4666_v30 = vor.u32 %v3960_v21, %v2771_v22  ;;  %v4091_v21 = vld [vmem:[%s5443_s1 + $0x380] sm:$0xff] }
  0x2d   :  { %1206 = vmatpush.bf16.msrb.mxu3 %v4034_v53  ;;  %v4563_v53 = vor.u32 %v3973_v48, %v2819_v49  ;;  %v2805_v48 = vld [vmem:[%s5444_s0 + $0x88] sm:$0xf]  ;;  %v3971_v49 = vld [vmem:[%s5444_s0 + $0xa0] sm:$0xf0] }
  0x2e   :  { %719 = vmatpush.bf16.msrb.mxu0 %v4015_v56  ;;  %v4066_v56 = vld [vmem:[%s5443_s1 + $0x2b8] sm:$0xff] }
  0x2f   :  { %748 = vmatpush.bf16.msrb.mxu1 %v4023_v1  ;;  %v2743_v1 = vld [vmem:[%s5444_s0 + $0x2c] sm:$0xf0] }
  0x30   :  { %1292 = vmatpush.bf16.msra.mxu2 %v4059_v34  ;;  %v4062_v34 = vld [vmem:[%s5443_s1 + $0x298] sm:$0xff] }
  0x31   :  { %1207 = vmatpush.bf16.msrb.mxu3 %v4033_v0  ;;  %613 = vmatmul.bf16.gmra.mxu0 %v4428_v3  ;;  %v3953_v0 = vld [vmem:[%s5444_s0 + $0x14] sm:$0xf] }
  0x32   :  { %720 = vmatpush.bf16.msrb.mxu0 %v4014_v2  ;;  %642 = vmatmul.bf16.gmra.mxu1 %v4430_v4  ;;  %v2749_v2 = vld [vmem:[%s5444_s0 + $0x18] sm:$0xf] }
  0x33   :  { %671 = vmatmul.bf16.gmra.mxu2 %v4432_v5  ;;  %749 = vmatpush.bf16.msrb.mxu1 %v4022_v8  ;;  %v4611_v8 = vor.u32 %v3956_v63, %v2741_v62  ;;  %v4075_v62 = vld [vmem:[%s5443_s1 + $0x300] sm:$0xff]  ;;  %v2825_v63 = vld [vmem:[%s5444_s0 + $0xb8] sm:$0xf] }
  0x34   :  { %700 = vmatmul.bf16.gmra.mxu3 %v4434_v6  ;;  %1293 = vmatpush.bf16.msra.mxu2 %v4058_v54  ;;  %v4717_v54 = vor.u32 %v3970_v41, %v2797_v40 }
  0x35   :  { %1208 = vmatpush.bf16.msrb.mxu3 %v4032_v7  ;;  %v3957_v7 = vld [vmem:[%s5444_s0 + $0x30] sm:$0xf0] }
  0x36   :  { %721 = vmatpush.bf16.msrb.mxu0 %v4013_v9  ;;  %v4613_v9 = vor.u32 %v3953_v0, %v2743_v1  ;;  %v4093_v0 = vld [vmem:[%s5443_s1 + $0x390] sm:$0xff] }
  0x37   :  { %750 = vmatpush.bf16.msrb.mxu1 %v4021_v11  ;;  %v4056_v11 = vld [vmem:[%s5443_s1 + $0x268] sm:$0xff]  ;;  %v3977_v1 = vld [vmem:[%s5444_s0 + $0xd0] sm:$0xf0] }
  0x38   :  { %1294 = vmatpush.bf16.msra.mxu2 %v4057_v58  ;;  %v4076_v58 = vld [vmem:[%s5443_s1 + $0x308] sm:$0xff] }
  0x39   :  { %1209 = vmatpush.bf16.msrb.mxu3 %v4031_v10  ;;  %v4615_v10 = vor.u32 %v3957_v7, %v2749_v2  ;;  %v3974_v2 = vld [vmem:[%s5444_s0 + $0xbc] sm:$0xf]  ;;  %v2827_v7 = vld [vmem:[%s5444_s0 + $0xd4] sm:$0xf0] }
  0x3a   :  { %722 = vmatpush.bf16.msrb.mxu0 %v4012_v12  ;;  %v4040_v12 = vld [vmem:[%s5443_s1 + $0x1e8] sm:$0xff] }
  0x3b   :  { %751 = vmatpush.bf16.msrb.mxu1 %v4020_v14  ;;  %v4048_v14 = vld [vmem:[%s5443_s1 + $0x228] sm:$0xff] }
  0x3c   :  { %1295 = vmatpush.bf16.msra.mxu2 %v4056_v11  ;;  %v2833_v11 = vld [vmem:[%s5444_s0 + $0xc0] sm:$0xf] }
  0x3d   :  { %1210 = vmatpush.bf16.msrb.mxu3 %v4030_v13  ;;  %v4064_v13 = vld [vmem:[%s5443_s1 + $0x2a8] sm:$0xff] }
  0x3e   :  { %723 = vmatpush.bf16.msrb.mxu0 %v4011_v16  ;;  %v4039_v16 = vld [vmem:[%s5443_s1 + $0x1e0] sm:$0xff] }
  0x3f   :  { %752 = vmatpush.bf16.msrb.mxu1 %v4019_v25  ;;  %v4664_v25 = vor.u32 %v3963_v20, %v2769_v19  ;;  %v4083_v19 = vld [vmem:[%s5443_s1 + $0x340] sm:$0xff]  ;;  %v4073_v20 = vld [vmem:[%s5443_s1 + $0x2f0] sm:$0xff] }
  0x40   :  { %1296 = vmatpush.bf16.msra.mxu2 %v4055_v15 }
  0x41   :  { %1211 = vmatpush.bf16.msrb.mxu3 %v4029_v24  ;;  %618 = vmatmul.bf16.gmra.mxu0 %v4497_v26  ;;  %v3964_v24 = vld [vmem:[%s5444_s0 + $0x68] sm:$0xf0] }
  0x42   :  { %647 = vmatmul.bf16.gmra.mxu1 %v4499_v27  ;;  %1233 = vmatpush.bf16.msra.mxu0 %v4044_v31  ;;  %v4668_v31 = vor.u32 %v3964_v24, %v2777_v23 }
  0x43   :  { %676 = vmatmul.bf16.gmra.mxu2 %v4501_v28  ;;  %1262 = vmatpush.bf16.msra.mxu1 %v4052_v33  ;;  %v4038_v33 = vld [vmem:[%s5443_s1 + $0x1d8] sm:$0xff] }
  0x44   :  { %705 = vmatmul.bf16.gmra.mxu3 %v4503_v29 }
  0x45   :  { %1320 = vmatpush.bf16.msra.mxu3 %v4068_v32  ;;  %v4054_v32 = vld [vmem:[%s5443_s1 + $0x258] sm:$0xff] }
  0x46   :  { %1234 = vmatpush.bf16.msra.mxu0 %v4043_v35  ;;  %v4046_v35 = vld [vmem:[%s5443_s1 + $0x218] sm:$0xff]  ;;  %1297 = vmatpush.bf16.msra.mxu2 %v4054_v32 }
  0x47   :  { %1263 = vmatpush.bf16.msra.mxu1 %v4051_v37  ;;  %v4037_v37 = vld [vmem:[%s5443_s1 + $0x1d0] sm:$0xff]  ;;  %v4082_v32 = vld [vmem:[%s5443_s1 + $0x338] sm:$0xff] }
  0x49   :  { %1321 = vmatpush.bf16.msra.mxu3 %v4067_v36  ;;  %v4053_v36 = vld [vmem:[%s5443_s1 + $0x250] sm:$0xff] }
  0x4a   :  { %1235 = vmatpush.bf16.msra.mxu0 %v4042_v55  ;;  %1298 = vmatpush.bf16.msra.mxu2 %v4053_v36  ;;  %v4719_v55 = vor.u32 %v3967_v46, %v2799_v47  ;;  %v4077_v46 = vld [vmem:[%s5443_s1 + $0x310] sm:$0xff] }
  0x4b   :  { %1264 = vmatpush.bf16.msra.mxu1 %v4050_v57  ;;  %v4086_v57 = vld [vmem:[%s5443_s1 + $0x358] sm:$0xff]  ;;  %v4081_v47 = vld [vmem:[%s5443_s1 + $0x330] sm:$0xff] }
  0x4d   :  { %1322 = vmatpush.bf16.msra.mxu3 %v4066_v56  ;;  %v4721_v56 = vor.u32 %v3971_v49, %v2805_v48  ;;  %v4071_v48 = vld [vmem:[%s5443_s1 + $0x2e0] sm:$0xff]  ;;  %v4089_v49 = vld [vmem:[%s5443_s1 + $0x370] sm:$0xff] }
  0x4e   :  { %1236 = vmatpush.bf16.msra.mxu0 %v4041_v59  ;;  %v4094_v59 = vld [vmem:[%s5443_s1 + $0x398] sm:$0xff] }
  0x4f   :  { %1265 = vmatpush.bf16.msra.mxu1 %v4049_v61  ;;  %v4085_v61 = vld [vmem:[%s5443_s1 + $0x350] sm:$0xff] }
  0x51   :  { %623 = vmatmul.bf16.gmra.mxu0 %v4557_v50  ;;  %1323 = vmatpush.bf16.msra.mxu3 %v4065_v60  ;;  %v4078_v60 = vld [vmem:[%s5443_s1 + $0x318] sm:$0xff] }
  0x52   :  { %652 = vmatmul.bf16.gmra.mxu1 %v4559_v51  ;;  %1237 = vmatpush.bf16.msra.mxu0 %v4040_v12  ;;  %v3978_v12 = vld [vmem:[%s5444_s0 + $0xd8] sm:$0xf0] }
  0x53   :  { %681 = vmatmul.bf16.gmra.mxu2 %v4561_v52  ;;  %1266 = vmatpush.bf16.msra.mxu1 %v4048_v14  ;;  %v4769_v14 = vor.u32 %v3974_v2, %v2827_v7  ;;  %v4771_v15 = vor.u32 %v3978_v12, %v2833_v11  ;;  %v4088_v2 = vld [vmem:[%s5443_s1 + $0x368] sm:$0xff] }
  0x54   :  { %710 = vmatmul.bf16.gmra.mxu3 %v4563_v53 }
  0x55   :  { %1324 = vmatpush.bf16.msra.mxu3 %v4064_v13  ;;  %v4767_v13 = vor.u32 %v3977_v1, %v2825_v63  ;;  %v4070_v1 = vld [vmem:[%s5443_s1 + $0x2d8] sm:$0xff] }
  0x56   :  { %1238 = vmatpush.bf16.msra.mxu0 %v4039_v16  ;;  %v4084_v16 = vld [vmem:[%s5443_s1 + $0x348] sm:$0xff] }
  0x57   :  { %1267 = vmatpush.bf16.msra.mxu1 %v4047_v18  ;;  %v4092_v18 = vld [vmem:[%s5443_s1 + $0x388] sm:$0xff] }
  0x59   :  { %1325 = vmatpush.bf16.msra.mxu3 %v4063_v17  ;;  %v4074_v17 = vld [vmem:[%s5443_s1 + $0x2f8] sm:$0xff] }
  0x5a   :  { %1239 = vmatpush.bf16.msra.mxu0 %v4038_v33  ;;  %v4072_v33 = vld [vmem:[%s5443_s1 + $0x2e8] sm:$0xff] }
  0x5b   :  { %1268 = vmatpush.bf16.msra.mxu1 %v4046_v35 }
  0x5d   :  { %1326 = vmatpush.bf16.msra.mxu3 %v4062_v34  ;;  %v4090_v34 = vld [vmem:[%s5443_s1 + $0x378] sm:$0xff] }
  0x5e   :  { %1240 = vmatpush.bf16.msra.mxu0 %v4037_v37 }
  0x5f   :  { %1269 = vmatpush.bf16.msra.mxu1 %v4045_v39 }
  0x61   :  { %724 = vmatmul.bf16.vlgmr.msrb.gmra.mxu0 %v4611_v8  ;;  %1327 = vmatpush.bf16.msra.mxu3 %v4061_v38 }
  0x62   :  { %753 = vmatmul.bf16.vlgmr.msrb.gmra.mxu1 %v4613_v9  ;;  %1349 = vmatpush.bf16.msrb.mxu0 %v4076_v58 }
  0x63   :  { %3035 = vmatmul.msk.bf16.vlgmr.msrb.gmra.mxu2 %vm587_vm0, %v4615_v10  ;;  %1384 = vmatpush.bf16.msrb.mxu1 %v4078_v60 }
  0x64   :  { %1212 = vmatmul.bf16.vlgmr.msrb.gmra.mxu3 %v4353_v42  ;;  %1816 = vmatpush.bf16.msrb.mxu2 %v4086_v57 }
  0x65   :  { %1845 = vmatpush.bf16.msrb.mxu3 %v4094_v59 }
  0x66   :  { %1350 = vmatpush.bf16.msrb.mxu0 %v4075_v62 }
  0x67   :  { %1385 = vmatpush.bf16.msrb.mxu1 %v4077_v46 }
  0x68   :  { %1817 = vmatpush.bf16.msrb.mxu2 %v4085_v61 }
  0x69   :  { %1846 = vmatpush.bf16.msrb.mxu3 %v4093_v0  ;;  %v4080_v0 = vld [vmem:[%s5443_s1 + $0x328] sm:$0xff] }
  0x6a   :  { %1351 = vmatpush.bf16.msrb.mxu0 %v4074_v17 }
  0x6c   :  { %1818 = vmatpush.bf16.msrb.mxu2 %v4084_v16 }
  0x6d   :  { %1847 = vmatpush.bf16.msrb.mxu3 %v4092_v18 }
  0x6e   :  { %1352 = vmatpush.bf16.msrb.mxu0 %v4073_v20  ;;  %v4079_v20 = vld [vmem:[%s5443_s1 + $0x320] sm:$0xff] }
  0x70   :  { %1819 = vmatpush.bf16.msrb.mxu2 %v4083_v19 }
  0x71   :  { %729 = vmatmul.bf16.gmra.mxu0 %v4664_v25  ;;  %1848 = vmatpush.bf16.msrb.mxu3 %v4091_v21  ;;  %v4069_v21 = vld [vmem:[%s5443_s1 + $0x2d0] sm:$0xff] }
  0x72   :  { %758 = vmatmul.bf16.gmra.mxu1 %v4666_v30  ;;  %1353 = vmatpush.bf16.msrb.mxu0 %v4072_v33 }
  0x73   :  { %3036 = vmatmul.msk.bf16.gmra.mxu2 %vm587_vm0, %v4668_v31 }
  0x74   :  { %1217 = vmatmul.bf16.gmra.mxu3 %v4428_v3  ;;  %1820 = vmatpush.bf16.msrb.mxu2 %v4082_v32 }
  0x75   :  { %1849 = vmatpush.bf16.msrb.mxu3 %v4090_v34 }
  0x76   :  { %1354 = vmatpush.bf16.msrb.mxu0 %v4071_v48 }
  0x78   :  { %1821 = vmatpush.bf16.msrb.mxu2 %v4081_v47 }
  0x79   :  { %1850 = vmatpush.bf16.msrb.mxu3 %v4089_v49 }
  0x7a   :  { %1355 = vmatpush.bf16.msrb.mxu0 %v4070_v1 }
  0x7c   :  { %1822 = vmatpush.bf16.msrb.mxu2 %v4080_v0 }
  0x7d   :  { %1851 = vmatpush.bf16.msrb.mxu3 %v4088_v2 }
  0x7e   :  { %1356 = vmatpush.bf16.msrb.mxu0 %v4069_v21  ;;  %v4124_v21 = vld [vmem:[%s5443_s1 + $0x488] sm:$0xff] }
  0x80   :  { %1823 = vmatpush.bf16.msrb.mxu2 %v4079_v20  ;;  %v4100_v20 = vld [vmem:[%s5443_s1 + $0x3c8] sm:$0xff] }
  0x81   :  { %734 = vmatmul.bf16.gmra.mxu0 %v4717_v54 }
  0x82   :  { %763 = vmatmul.bf16.gmra.mxu1 %v4719_v55 }
  0x83   :  { %3037 = vmatmul.msk.bf16.gmra.mxu2 %vm587_vm0, %v4721_v56 }
  0x84   :  { %1222 = vmatmul.bf16.gmra.mxu3 %v4497_v26 }
  0x91   :  { %739 = vmatmul.bf16.gmra.mxu0 %v4767_v13 }
  0x92   :  { %768 = vmatmul.bf16.gmra.mxu1 %v4769_v14 }
  0x93   :  { %3038 = vmatmul.msk.bf16.gmra.mxu2 %vm587_vm0, %v4771_v15 }
  0x94   :  { %1227 = vmatmul.bf16.gmra.mxu3 %v4557_v50 }
  0x9e   :  { %v609_v22 = vpop.f32.mrf.mxu0 }
  0x9f   :  { %v638_v23 = vpop.f32.mrf.mxu1 }
  0xa0   :  { %v639_v24 = vadd.f32 %v638_v23, %v609_v22  ;;  %v4087_v22 = vld [vmem:[%s5443_s1 + $0x360] sm:$0xff] }
  0xa1   :  { %1241 = vmatmul.bf16.vlgmr.msra.gmra.mxu0 %v4355_v43  ;;  %1852 = vmatpush.bf16.msrb.mxu3 %v4087_v22 }
  0xa2   :  { %1270 = vmatmul.bf16.vlgmr.msra.gmra.mxu1 %v4357_v44 }
  0xa3   :  { %1299 = vmatmul.bf16.vlgmr.msra.gmra.mxu2 %v4359_v45 }
  0xa4   :  { %1328 = vmatmul.bf16.vlgmr.msra.gmra.mxu3 %v4611_v8 }
  0xa6   :  { %v667_v35 = vpop.f32.mrf.mxu2  ;;  %v611_v38 = vpop.f32.mrf.mxu0 }
  0xa7   :  { %v696_v36 = vpop.f32.mrf.mxu3  ;;  %v668_v37 = vadd.f32 %v667_v35, %v639_v24  ;;  %v640_v39 = vpop.f32.mrf.mxu1 }
  0xa8   :  { %v641_v40 = vadd.f32 %v640_v39, %v611_v38  ;;  %v4102_v38 = vld [vmem:[%s5443_s1 + $0x3d8] sm:$0xff] }
  0xa9   :  { %v4809_v41 = vadd.f32 %v696_v36, %v668_v37  ;;  %v4118_v37 = vld [vmem:[%s5443_s1 + $0x458] sm:$0xff]  ;;  %1874 = vmatpush.bf16.msra.mxu0 %v4102_v38  ;;  %v4115_v38 = vld [vmem:[%s5443_s1 + $0x440] sm:$0xff] }
  0xaa   :  { %v4126_v39 = vld [vmem:[%s5443_s1 + $0x498] sm:$0xff]  ;;  %1932 = vmatpush.bf16.msra.mxu2 %v4118_v37 }
  0xab   :  { %1961 = vmatpush.bf16.msra.mxu3 %v4126_v39  ;;  %v4099_v39 = vld [vmem:[%s5443_s1 + $0x3c0] sm:$0xff] }
  0xae   :  { %v669_v57 = vpop.f32.mrf.mxu2  ;;  %v614_v60 = vpop.f32.mrf.mxu0 }
  0xaf   :  { %v698_v58 = vpop.f32.mrf.mxu3  ;;  %v670_v59 = vadd.f32 %v669_v57, %v641_v40  ;;  %v643_v61 = vpop.f32.mrf.mxu1  ;;  %v4110_v57 = vld [vmem:[%s5443_s1 + $0x418] sm:$0xff] }
  0xb0   :  { %v644_v62 = vadd.f32 %v643_v61, %v614_v60  ;;  %1903 = vmatpush.bf16.msra.mxu1 %v4110_v57  ;;  %v4117_v60 = vld [vmem:[%s5443_s1 + $0x450] sm:$0xff] }
  0xb1   :  { %v4823_v63 = vadd.f32 %v698_v58, %v670_v59  ;;  %1246 = vmatmul.bf16.gmra.mxu0 %v4430_v4  ;;  %v4101_v61 = vld [vmem:[%s5443_s1 + $0x3d0] sm:$0xff]  ;;  %1933 = vmatpush.bf16.msra.mxu2 %v4117_v60 }
  0xb2   :  { %1275 = vmatmul.bf16.gmra.mxu1 %v4432_v5  ;;  %1875 = vmatpush.bf16.msra.mxu0 %v4101_v61 }
  0xb3   :  { %1304 = vmatmul.bf16.gmra.mxu2 %v4434_v6 }
  0xb4   :  { %1333 = vmatmul.bf16.gmra.mxu3 %v4664_v25 }
  0xb6   :  { %v672_v7 = vpop.f32.mrf.mxu2  ;;  %v616_v16 = vpop.f32.mrf.mxu0  ;;  %1876 = vmatpush.bf16.msra.mxu0 %v4100_v20 }
  0xb7   :  { %v701_v11 = vpop.f32.mrf.mxu3  ;;  %v673_v12 = vadd.f32 %v672_v7, %v644_v62  ;;  %v645_v17 = vpop.f32.mrf.mxu1  ;;  %v4125_v62 = vld [vmem:[%s5443_s1 + $0x490] sm:$0xff] }
  0xb8   :  { %v646_v18 = vadd.f32 %v645_v17, %v616_v16  ;;  %1962 = vmatpush.bf16.msra.mxu3 %v4125_v62 }
  0xb9   :  { %v4838_v19 = vadd.f32 %v701_v11, %v673_v12  ;;  %v4109_v12 = vld [vmem:[%s5443_s1 + $0x410] sm:$0xff] }
  0xba   :  { %1904 = vmatpush.bf16.msra.mxu1 %v4109_v12  ;;  %1877 = vmatpush.bf16.msra.mxu0 %v4099_v39 }
  0xbc   :  { %1963 = vmatpush.bf16.msra.mxu3 %v4124_v21 }
  0xbe   :  { %v674_v23 = vpop.f32.mrf.mxu2  ;;  %v619_v33 = vpop.f32.mrf.mxu0 }
  0xbf   :  { %v703_v24 = vpop.f32.mrf.mxu3  ;;  %v675_v32 = vadd.f32 %v674_v23, %v646_v18  ;;  %v648_v34 = vpop.f32.mrf.mxu1  ;;  %v4116_v18 = vld [vmem:[%s5443_s1 + $0x448] sm:$0xff] }
  0xc0   :  { %v649_v35 = vadd.f32 %v648_v34, %v619_v33  ;;  %1934 = vmatpush.bf16.msra.mxu2 %v4116_v18  ;;  %v4108_v34 = vld [vmem:[%s5443_s1 + $0x408] sm:$0xff]  ;;  %v4106_v18 = vld [vmem:[%s5443_s1 + $0x3f8] sm:$0xff] }
  0xc1   :  { %v4849_v36 = vadd.f32 %v703_v24, %v675_v32  ;;  %1251 = vmatmul.bf16.gmra.mxu0 %v4499_v27  ;;  %1905 = vmatpush.bf16.msra.mxu1 %v4108_v34 }
  0xc2   :  { %1280 = vmatmul.bf16.gmra.mxu1 %v4501_v28 }
  0xc3   :  { %1309 = vmatmul.bf16.gmra.mxu2 %v4503_v29 }
  0xc4   :  { %1338 = vmatmul.bf16.gmra.mxu3 %v4717_v54  ;;  %1935 = vmatpush.bf16.msra.mxu2 %v4115_v38  ;;  %v4105_v38 = vld [vmem:[%s5443_s1 + $0x3f0] sm:$0xff] }
  0xc6   :  { %v677_v40 = vpop.f32.mrf.mxu2  ;;  %v621_v48 = vpop.f32.mrf.mxu0 }
  0xc7   :  { %v706_v46 = vpop.f32.mrf.mxu3  ;;  %v678_v47 = vadd.f32 %v677_v40, %v649_v35  ;;  %v650_v49 = vpop.f32.mrf.mxu1  ;;  %v4123_v40 = vld [vmem:[%s5443_s1 + $0x480] sm:$0xff] }
  0xc8   :  { %v651_v58 = vadd.f32 %v650_v49, %v621_v48  ;;  %1964 = vmatpush.bf16.msra.mxu3 %v4123_v40 }
  0xc9   :  { %v4867_v59 = vadd.f32 %v706_v46, %v678_v47 }
  0xce   :  { %v679_v0 = vpop.f32.mrf.mxu2  ;;  %v624_v7 = vpop.f32.mrf.mxu0 }
  0xcf   :  { %v708_v1 = vpop.f32.mrf.mxu3  ;;  %v680_v2 = vadd.f32 %v679_v0, %v651_v58  ;;  %v653_v11 = vpop.f32.mrf.mxu1  ;;  %v4107_v58 = vld [vmem:[%s5443_s1 + $0x400] sm:$0xff]  ;;  %v4114_v0 = vld [vmem:[%s5443_s1 + $0x438] sm:$0xff] }
  0xd0   :  { %v654_v16 = vadd.f32 %v653_v11, %v624_v7  ;;  %1906 = vmatpush.bf16.msra.mxu1 %v4107_v58  ;;  %1936 = vmatpush.bf16.msra.mxu2 %v4114_v0 }
  0xd1   :  { %v4881_v17 = vadd.f32 %v708_v1, %v680_v2  ;;  %1256 = vmatmul.bf16.gmra.mxu0 %v4559_v51  ;;  %v4122_v1 = vld [vmem:[%s5443_s1 + $0x478] sm:$0xff] }
  0xd2   :  { %1285 = vmatmul.bf16.gmra.mxu1 %v4561_v52  ;;  %1965 = vmatpush.bf16.msra.mxu3 %v4122_v1  ;;  %v4111_v1 = vld [vmem:[%s5443_s1 + $0x420] sm:$0xff] }
  0xd3   :  { %1314 = vmatmul.bf16.gmra.mxu2 %v4563_v53 }
  0xd4   :  { %1343 = vmatmul.bf16.gmra.mxu3 %v4767_v13  ;;  %1907 = vmatpush.bf16.msra.mxu1 %v4106_v18 }
  0xd6   :  { %v682_v22 = vpop.f32.mrf.mxu2  ;;  %v626_v32 = vpop.f32.mrf.mxu0 }
  0xd7   :  { %v711_v23 = vpop.f32.mrf.mxu3  ;;  %v683_v24 = vadd.f32 %v682_v22, %v654_v16  ;;  %v655_v33 = vpop.f32.mrf.mxu1  ;;  %v4113_v22 = vld [vmem:[%s5443_s1 + $0x430] sm:$0xff] }
  0xd8   :  { %v656_v35 = vadd.f32 %v655_v33, %v626_v32  ;;  %1937 = vmatpush.bf16.msra.mxu2 %v4113_v22  ;;  %1908 = vmatpush.bf16.msra.mxu1 %v4105_v38 }
  0xd9   :  { %v4899_v37 = vadd.f32 %v711_v23, %v683_v24  ;;  %v4097_v23 = vld [vmem:[%s5443_s1 + $0x3b0] sm:$0xff] }
  0xda   :  { %v4121_v24 = vld [vmem:[%s5443_s1 + $0x470] sm:$0xff] }
  0xdb   :  { %1966 = vmatpush.bf16.msra.mxu3 %v4121_v24 }
  0xde   :  { %v684_v46 = vpop.f32.mrf.mxu2  ;;  %v725_v49 = vpop.f32.mrf.mxu0 }
  0xdf   :  { %v713_v47 = vpop.f32.mrf.mxu3  ;;  %v685_v48 = vadd.f32 %v684_v46, %v656_v35  ;;  %v754_v57 = vpop.f32.mrf.mxu1  ;;  %v726_v60 = vadd.f32 %v725_v49, %v4809_v41  ;;  %v4098_v41 = vld [vmem:[%s5443_s1 + $0x3b8] sm:$0xff]  ;;  %v4112_v46 = vld [vmem:[%s5443_s1 + $0x428] sm:$0xff] }
  0xe0   :  { %1878 = vmatpush.bf16.msra.mxu0 %v4098_v41  ;;  %1938 = vmatpush.bf16.msra.mxu2 %v4112_v46 }
  0xe1   :  { %v4914_v61 = vadd.f32 %v713_v47, %v685_v48  ;;  %v755_v62 = vadd.f32 %v754_v57, %v726_v60  ;;  %1357 = vmatmul.bf16.vlgmr.msrb.gmra.mxu0 %v4613_v9  ;;  %v4096_v47 = vld [vmem:[%s5443_s1 + $0x3a8] sm:$0xff] }
  0xe2   :  { %3339 = vmatmul.msk.bf16.vlgmr.msrb.gmra.mxu1 %vm587_vm0, %v4615_v10 }
  0xe3   :  { %1824 = vmatmul.bf16.vlgmr.msrb.gmra.mxu2 %v4353_v42 }
  0xe4   :  { %1853 = vmatmul.bf16.vlgmr.msrb.gmra.mxu3 %v4355_v43  ;;  %1879 = vmatpush.bf16.msra.mxu0 %v4097_v23 }
  0xe5   :  { %1939 = vmatpush.bf16.msra.mxu2 %v4111_v1 }
  0xe6   :  { %v783_v2 = vpop.f32.mrf.mxu2  ;;  %v727_v12 = vpop.f32.mrf.mxu0 }
  0xe7   :  { %v4930_v7 = vpop.f32.mrf.mxu3  ;;  %v4932_v11 = vadd.f32 %v783_v2, %v755_v62  ;;  %v756_v16 = vpop.f32.mrf.mxu1  ;;  %v728_v20 = vadd.f32 %v727_v12, %v4823_v63  ;;  %v4104_v62 = vld [vmem:[%s5443_s1 + $0x3e8] sm:$0xff]  ;;  %v4095_v2 = vld [vmem:[%s5443_s1 + $0x3a0] sm:$0xff] }
  0xe8   :  { %1880 = vmatpush.bf16.msra.mxu0 %v4096_v47  ;;  %1909 = vmatpush.bf16.msra.mxu1 %v4104_v62  ;;  %v4119_v12 = vld [vmem:[%s5443_s1 + $0x460] sm:$0xff] }
  0xe9   :  { %v757_v21 = vadd.f32 %v756_v16, %v728_v20 }
  0xec   :  { %1881 = vmatpush.bf16.msra.mxu0 %v4095_v2 }
  0xee   :  { %v785_v32 = vpop.f32.mrf.mxu2  ;;  %v730_v34 = vpop.f32.mrf.mxu0 }
  0xef   :  { %v4947_v33 = vpop.f32.mrf.mxu3  ;;  %v4949_v63 = vadd.f32 %v785_v32, %v757_v21  ;;  %v759_v35 = vpop.f32.mrf.mxu1  ;;  %v731_v39 = vadd.f32 %v730_v34, %v4838_v19  ;;  %v4120_v19 = vld [vmem:[%s5443_s1 + $0x468] sm:$0xff] }
  0xf0   :  { %1967 = vmatpush.bf16.msra.mxu3 %v4120_v19  ;;  %v4144_v32 = vld [vmem:[%s5443_s1 + $0x528] sm:$0xff] }
  0xf1   :  { %v760_v40 = vadd.f32 %v759_v35, %v731_v39  ;;  %1362 = vmatmul.bf16.gmra.mxu0 %v4666_v30  ;;  %v4128_v34 = vld [vmem:[%s5443_s1 + $0x4a8] sm:$0xff]  ;;  %2457 = vmatpush.bf16.msrb.mxu2 %v4144_v32 }
  0xf2   :  { %3340 = vmatmul.msk.bf16.gmra.mxu1 %vm587_vm0, %v4668_v31  ;;  %1996 = vmatpush.bf16.msrb.mxu0 %v4128_v34  ;;  %v4136_v19 = vld [vmem:[%s5443_s1 + $0x4e8] sm:$0xff] }
  0xf3   :  { %1829 = vmatmul.bf16.gmra.mxu2 %v4428_v3 }
  0xf4   :  { %1858 = vmatmul.bf16.gmra.mxu3 %v4430_v4 }
  0xf5   :  { %1968 = vmatpush.bf16.msra.mxu3 %v4119_v12  ;;  %v4135_v12 = vld [vmem:[%s5443_s1 + $0x4e0] sm:$0xff] }
  0xf6   :  { %v788_v48 = vpop.f32.mrf.mxu2  ;;  %v732_v58 = vpop.f32.mrf.mxu0 }
  0xf7   :  { %v4969_v49 = vpop.f32.mrf.mxu3  ;;  %v4971_v57 = vadd.f32 %v788_v48, %v760_v40  ;;  %v761_v60 = vpop.f32.mrf.mxu1  ;;  %v733_v0 = vadd.f32 %v732_v58, %v4849_v36  ;;  %v4103_v36 = vld [vmem:[%s5443_s1 + $0x3e0] sm:$0xff] }
  0xf8   :  { %1910 = vmatpush.bf16.msra.mxu1 %v4103_v36  ;;  %v4143_v58 = vld [vmem:[%s5443_s1 + $0x520] sm:$0xff]  ;;  %v4142_v36 = vld [vmem:[%s5443_s1 + $0x518] sm:$0xff] }
  0xf9   :  { %v762_v41 = vadd.f32 %v761_v60, %v733_v0  ;;  %v4151_v60 = vld [vmem:[%s5443_s1 + $0x560] sm:$0xff]  ;;  %2458 = vmatpush.bf16.msrb.mxu2 %v4143_v58 }
  0xfc   :  { %2428 = vmatpush.bf16.msrb.mxu1 %v4136_v19 }
  0xfd   :  { %2459 = vmatpush.bf16.msrb.mxu2 %v4142_v36 }
  0xfe   :  { %v790_v16 = vpop.f32.mrf.mxu2  ;;  %v735_v21 = vpop.f32.mrf.mxu0 }
  0xff   :  { %v4986_v18 = vpop.f32.mrf.mxu3  ;;  %v4991_v20 = vadd.f32 %v790_v16, %v762_v41  ;;  %v764_v22 = vpop.f32.mrf.mxu1  ;;  %v736_v23 = vadd.f32 %v735_v21, %v4867_v59  ;;  %v4152_v59 = vld [vmem:[%s5443_s1 + $0x568] sm:$0xff] }
 0x100   :  { %2486 = vmatpush.bf16.msrb.mxu3 %v4152_v59  ;;  %2429 = vmatpush.bf16.msrb.mxu1 %v4135_v12  ;;  %v4134_v59 = vld [vmem:[%s5443_s1 + $0x4d8] sm:$0xff] }
 0x101   :  { %v765_v24 = vadd.f32 %v764_v22, %v736_v23  ;;  %1367 = vmatmul.bf16.gmra.mxu0 %v4719_v55 }
 0x102   :  { %3341 = vmatmul.msk.bf16.gmra.mxu1 %vm587_vm0, %v4721_v56 }
 0x103   :  { %1834 = vmatmul.bf16.gmra.mxu2 %v4497_v26 }
 0x104   :  { %1863 = vmatmul.bf16.gmra.mxu3 %v4499_v27  ;;  %2430 = vmatpush.bf16.msrb.mxu1 %v4134_v59 }
 0x105   :  { %2487 = vmatpush.bf16.msrb.mxu3 %v4151_v60 }
 0x106   :  { %v793_v35 = vpop.f32.mrf.mxu2  ;;  %v737_v40 = vpop.f32.mrf.mxu0 }
 0x107   :  { %v5008_v38 = vpop.f32.mrf.mxu3  ;;  %v5010_v39 = vadd.f32 %v793_v35, %v765_v24  ;;  %v766_v46 = vpop.f32.mrf.mxu1  ;;  %v738_v47 = vadd.f32 %v737_v40, %v4881_v17  ;;  %v4141_v40 = vld [vmem:[%s5443_s1 + $0x510] sm:$0xff] }
 0x108   :  { %2460 = vmatpush.bf16.msrb.mxu2 %v4141_v40  ;;  %v4147_v40 = vld [vmem:[%s5443_s1 + $0x540] sm:$0xff] }
 0x109   :  { %v767_v48 = vadd.f32 %v766_v46, %v738_v47  ;;  %v4149_v46 = vld [vmem:[%s5443_s1 + $0x550] sm:$0xff] }
 0x10e   :  { %v795_v62 = vpop.f32.mrf.mxu2  ;;  %v740_v41 = vpop.f32.mrf.mxu0 }
 0x10f   :  { %v5022_v0 = vpop.f32.mrf.mxu3  ;;  %v5024_v17 = vadd.f32 %v795_v62, %v767_v48  ;;  %v769_v1 = vpop.f32.mrf.mxu1  ;;  %v741_v2 = vadd.f32 %v740_v41, %v4899_v37  ;;  %v4150_v37 = vld [vmem:[%s5443_s1 + $0x558] sm:$0xff]  ;;  %v4133_v62 = vld [vmem:[%s5443_s1 + $0x4d0] sm:$0xff] }
 0x110   :  { %2488 = vmatpush.bf16.msrb.mxu3 %v4150_v37  ;;  %2431 = vmatpush.bf16.msrb.mxu1 %v4133_v62 }
 0x111   :  { %v770_v16 = vadd.f32 %v769_v1, %v741_v2  ;;  %1372 = vmatmul.bf16.gmra.mxu0 %v4769_v14  ;;  %v4140_v1 = vld [vmem:[%s5443_s1 + $0x508] sm:$0xff] }
 0x112   :  { %3342 = vmatmul.msk.bf16.gmra.mxu1 %vm587_vm0, %v4771_v15  ;;  %v4148_v2 = vld [vmem:[%s5443_s1 + $0x548] sm:$0xff]  ;;  %2461 = vmatpush.bf16.msrb.mxu2 %v4140_v1 }
 0x113   :  { %1839 = vmatmul.bf16.gmra.mxu2 %v4557_v50 }
 0x114   :  { %1868 = vmatmul.bf16.gmra.mxu3 %v4559_v51 }
 0x115   :  { %2489 = vmatpush.bf16.msrb.mxu3 %v4149_v46 }
 0x116   :  { %v798_v21 = vpop.f32.mrf.mxu2  ;;  %v742_v24 = vpop.f32.mrf.mxu0 }
 0x117   :  { %v5041_v22 = vpop.f32.mrf.mxu3  ;;  %v5043_v23 = vadd.f32 %v798_v21, %v770_v16  ;;  %v771_v32 = vpop.f32.mrf.mxu1  ;;  %v743_v34 = vadd.f32 %v742_v24, %v4914_v61 }
 0x119   :  { %v772_v35 = vadd.f32 %v771_v32, %v743_v34  ;;  %2490 = vmatpush.bf16.msrb.mxu3 %v4148_v2  ;;  %v4132_v34 = vld [vmem:[%s5443_s1 + $0x4c8] sm:$0xff] }
 0x11a   :  { %2432 = vmatpush.bf16.msrb.mxu1 %v4132_v34  ;;  %v4130_v34 = vld [vmem:[%s5443_s1 + $0x4b8] sm:$0xff] }
 0x11d   :  { %2491 = vmatpush.bf16.msrb.mxu3 %v4147_v40  ;;  %v4145_v40 = vld [vmem:[%s5443_s1 + $0x530] sm:$0xff] }
 0x11e   :  { %v800_v47 = vpop.f32.mrf.mxu2  ;;  %v1242_v48 = vpop.f32.mrf.mxu0 }
 0x11f   :  { %v5055_v19 = vpop.f32.mrf.mxu3  ;;  %v5057_v61 = vadd.f32 %v800_v47, %v772_v35  ;;  %v1271_v58 = vpop.f32.mrf.mxu1  ;;  %v1243_v60 = vadd.f32 %v1242_v48, %v4930_v7  ;;  %v4127_v7 = vld [vmem:[%s5443_s1 + $0x4a0] sm:$0xff] }
 0x120   :  { %1997 = vmatpush.bf16.msrb.mxu0 %v4127_v7  ;;  %v4139_v35 = vld [vmem:[%s5443_s1 + $0x500] sm:$0xff]  ;;  %v4138_v7 = vld [vmem:[%s5443_s1 + $0x4f8] sm:$0xff] }
 0x121   :  { %v1272_v41 = vadd.f32 %v1271_v58, %v1243_v60  ;;  %1882 = vmatmul.bf16.vlgmr.msra.gmra.mxu0 %v4357_v44  ;;  %2462 = vmatpush.bf16.msrb.mxu2 %v4139_v35  ;;  %v4137_v35 = vld [vmem:[%s5443_s1 + $0x4f0] sm:$0xff] }
 0x122   :  { %1911 = vmatmul.bf16.vlgmr.msra.gmra.mxu1 %v4359_v45 }
 0x123   :  { %1940 = vmatmul.bf16.vlgmr.msra.gmra.mxu2 %v4611_v8 }
 0x124   :  { %1969 = vmatmul.bf16.vlgmr.msra.gmra.mxu3 %v4613_v9 }
 0x125   :  { %2463 = vmatpush.bf16.msrb.mxu2 %v4138_v7  ;;  %v4176_v7 = vld [vmem:[%s5443_s1 + $0x628] sm:$0xff] }
 0x126   :  { %v1300_v12 = vpop.f32.mrf.mxu2  ;;  %v1244_v37 = vpop.f32.mrf.mxu0 }
 0x127   :  { %v1329_v16 = vpop.f32.mrf.mxu3  ;;  %v1301_v36 = vadd.f32 %v1300_v12, %v1272_v41  ;;  %v1273_v21 = vpop.f32.mrf.mxu1  ;;  %v1245_v24 = vadd.f32 %v1244_v37, %v4947_v33  ;;  %v4131_v41 = vld [vmem:[%s5443_s1 + $0x4c0] sm:$0xff] }
 0x128   :  { %2433 = vmatpush.bf16.msrb.mxu1 %v4131_v41 }
 0x129   :  { %v5077_v32 = vadd.f32 %v1329_v16, %v1301_v36  ;;  %v1274_v59 = vadd.f32 %v1273_v21, %v1245_v24  ;;  %2464 = vmatpush.bf16.msrb.mxu2 %v4137_v35 }
 0x12c   :  { %2434 = vmatpush.bf16.msrb.mxu1 %v4130_v34 }
 0x12d   :  { %2573 = vmatpush.bf16.msra.mxu2 %v4176_v7 }
 0x12e   :  { %v1302_v46 = vpop.f32.mrf.mxu2  ;;  %v1247_v48 = vpop.f32.mrf.mxu0 }
 0x12f   :  { %v1331_v33 = vpop.f32.mrf.mxu3  ;;  %v1303_v47 = vadd.f32 %v1302_v46, %v1274_v59  ;;  %v1276_v58 = vpop.f32.mrf.mxu1  ;;  %v1248_v60 = vadd.f32 %v1247_v48, %v4969_v49  ;;  %v4146_v49 = vld [vmem:[%s5443_s1 + $0x538] sm:$0xff] }
 0x130   :  { %2492 = vmatpush.bf16.msrb.mxu3 %v4146_v49  ;;  %v4178_v49 = vld [vmem:[%s5443_s1 + $0x638] sm:$0xff] }
 0x131   :  { %v5089_v62 = vadd.f32 %v1331_v33, %v1303_v47  ;;  %v1277_v1 = vadd.f32 %v1276_v58, %v1248_v60  ;;  %1887 = vmatmul.bf16.gmra.mxu0 %v4432_v5  ;;  %v4129_v33 = vld [vmem:[%s5443_s1 + $0x4b0] sm:$0xff] }
 0x132   :  { %1916 = vmatmul.bf16.gmra.mxu1 %v4434_v6 }
 0x133   :  { %1945 = vmatmul.bf16.gmra.mxu2 %v4664_v25  ;;  %2435 = vmatpush.bf16.msrb.mxu1 %v4129_v33 }
 0x134   :  { %1974 = vmatmul.bf16.gmra.mxu3 %v4666_v30 }
 0x135   :  { %2493 = vmatpush.bf16.msrb.mxu3 %v4145_v40  ;;  %v4175_v40 = vld [vmem:[%s5443_s1 + $0x620] sm:$0xff] }
 0x136   :  { %v1305_v2 = vpop.f32.mrf.mxu2  ;;  %v1249_v36 = vpop.f32.mrf.mxu0  ;;  %2574 = vmatpush.bf16.msra.mxu2 %v4175_v40  ;;  %v4173_v40 = vld [vmem:[%s5443_s1 + $0x610] sm:$0xff] }
 0x137   :  { %v1334_v12 = vpop.f32.mrf.mxu3  ;;  %v1306_v16 = vadd.f32 %v1305_v2, %v1277_v1  ;;  %v1278_v37 = vpop.f32.mrf.mxu1  ;;  %v1250_v21 = vadd.f32 %v1249_v36, %v4986_v18 }
 0x139   :  { %v5105_v24 = vadd.f32 %v1334_v12, %v1306_v16  ;;  %v1279_v59 = vadd.f32 %v1278_v37, %v1250_v21  ;;  %2608 = vmatpush.bf16.msra.mxu3 %v4178_v49  ;;  %v4168_v21 = vld [vmem:[%s5443_s1 + $0x5e8] sm:$0xff] }
 0x13a   :  { %2544 = vmatpush.bf16.msra.mxu1 %v4168_v21 }
 0x13e   :  { %v1307_v46 = vpop.f32.mrf.mxu2  ;;  %v1252_v48 = vpop.f32.mrf.mxu0 }
 0x13f   :  { %v1336_v18 = vpop.f32.mrf.mxu3  ;;  %v1308_v47 = vadd.f32 %v1307_v46, %v1279_v59  ;;  %v1281_v58 = vpop.f32.mrf.mxu1  ;;  %v1253_v60 = vadd.f32 %v1252_v48, %v5008_v38  ;;  %v4160_v38 = vld [vmem:[%s5443_s1 + $0x5a8] sm:$0xff]  ;;  %v4159_v46 = vld [vmem:[%s5443_s1 + $0x5a0] sm:$0xff] }
 0x140   :  { %2515 = vmatpush.bf16.msra.mxu0 %v4160_v38  ;;  %v4174_v38 = vld [vmem:[%s5443_s1 + $0x618] sm:$0xff] }
 0x141   :  { %v5120_v41 = vadd.f32 %v1336_v18, %v1308_v47  ;;  %v1282_v1 = vadd.f32 %v1281_v58, %v1253_v60  ;;  %1892 = vmatmul.bf16.gmra.mxu0 %v4501_v28  ;;  %2575 = vmatpush.bf16.msra.mxu2 %v4174_v38 }
 0x142   :  { %1921 = vmatmul.bf16.gmra.mxu1 %v4503_v29 }
 0x143   :  { %1950 = vmatmul.bf16.gmra.mxu2 %v4717_v54 }
 0x144   :  { %1979 = vmatmul.bf16.gmra.mxu3 %v4719_v55  ;;  %2516 = vmatpush.bf16.msra.mxu0 %v4159_v46  ;;  %v4157_v46 = vld [vmem:[%s5443_s1 + $0x590] sm:$0xff] }
 0x145   :  { %2576 = vmatpush.bf16.msra.mxu2 %v4173_v40  ;;  %v4155_v40 = vld [vmem:[%s5443_s1 + $0x580] sm:$0xff] }
 0x146   :  { %v1310_v2 = vpop.f32.mrf.mxu2  ;;  %v1254_v36 = vpop.f32.mrf.mxu0 }
 0x147   :  { %v1339_v12 = vpop.f32.mrf.mxu3  ;;  %v1311_v16 = vadd.f32 %v1310_v2, %v1282_v1  ;;  %v1283_v37 = vpop.f32.mrf.mxu1  ;;  %v1255_v34 = vadd.f32 %v1254_v36, %v5022_v0  ;;  %v4167_v0 = vld [vmem:[%s5443_s1 + $0x5e0] sm:$0xff] }
 0x148   :  { %2545 = vmatpush.bf16.msra.mxu1 %v4167_v0 }
 0x149   :  { %v5139_v59 = vadd.f32 %v1339_v12, %v1311_v16  ;;  %v1284_v35 = vadd.f32 %v1283_v37, %v1255_v34  ;;  %v4166_v37 = vld [vmem:[%s5443_s1 + $0x5d8] sm:$0xff] }
 0x14c   :  { %2546 = vmatpush.bf16.msra.mxu1 %v4166_v37 }
 0x14e   :  { %v1312_v18 = vpop.f32.mrf.mxu2  ;;  %v1257_v48 = vpop.f32.mrf.mxu0 }
 0x14f   :  { %v1341_v33 = vpop.f32.mrf.mxu3  ;;  %v1313_v47 = vadd.f32 %v1312_v18, %v1284_v35  ;;  %v1286_v58 = vpop.f32.mrf.mxu1  ;;  %v1258_v60 = vadd.f32 %v1257_v48, %v5041_v22  ;;  %v4158_v22 = vld [vmem:[%s5443_s1 + $0x598] sm:$0xff] }
 0x150   :  { %2517 = vmatpush.bf16.msra.mxu0 %v4158_v22  ;;  %v4156_v22 = vld [vmem:[%s5443_s1 + $0x588] sm:$0xff] }
 0x151   :  { %v5151_v1 = vadd.f32 %v1341_v33, %v1313_v47  ;;  %v1287_v7 = vadd.f32 %v1286_v58, %v1258_v60  ;;  %1897 = vmatmul.bf16.gmra.mxu0 %v4561_v52 }
 0x152   :  { %1926 = vmatmul.bf16.gmra.mxu1 %v4563_v53 }
 0x153   :  { %1955 = vmatmul.bf16.gmra.mxu2 %v4767_v13 }
 0x154   :  { %1984 = vmatmul.bf16.gmra.mxu3 %v4769_v14  ;;  %2518 = vmatpush.bf16.msra.mxu0 %v4157_v46 }
 0x156   :  { %v1315_v49 = vpop.f32.mrf.mxu2  ;;  %v1259_v16 = vpop.f32.mrf.mxu0 }
 0x157   :  { %v1344_v2 = vpop.f32.mrf.mxu3  ;;  %v1316_v12 = vadd.f32 %v1315_v49, %v1287_v7  ;;  %v1288_v36 = vpop.f32.mrf.mxu1  ;;  %v1260_v21 = vadd.f32 %v1259_v16, %v5055_v19  ;;  %v4165_v19 = vld [vmem:[%s5443_s1 + $0x5d0] sm:$0xff]  ;;  %v4164_v16 = vld [vmem:[%s5443_s1 + $0x5c8] sm:$0xff] }
 0x158   :  { %2547 = vmatpush.bf16.msra.mxu1 %v4165_v19  ;;  %v4177_v49 = vld [vmem:[%s5443_s1 + $0x630] sm:$0xff]  ;;  %2519 = vmatpush.bf16.msra.mxu0 %v4156_v22 }
 0x159   :  { %v5167_v34 = vadd.f32 %v1344_v2, %v1316_v12  ;;  %v1289_v35 = vadd.f32 %v1288_v36, %v1260_v21  ;;  %2609 = vmatpush.bf16.msra.mxu3 %v4177_v49 }
 0x15c   :  { %2548 = vmatpush.bf16.msra.mxu1 %v4164_v16  ;;  %2520 = vmatpush.bf16.msra.mxu0 %v4155_v40  ;;  %v4169_v16 = vld [vmem:[%s5443_s1 + $0x5f0] sm:$0xff] }
 0x15e   :  { %v1317_v18 = vpop.f32.mrf.mxu2  ;;  %v1358_v48 = vpop.f32.mrf.mxu0 }
 0x15f   :  { %v1346_v33 = vpop.f32.mrf.mxu3  ;;  %v1318_v47 = vadd.f32 %v1317_v18, %v1289_v35  ;;  %v1387_v58 = vpop.f32.mrf.mxu1  ;;  %v1359_v0 = vadd.f32 %v1358_v48, %v5077_v32  ;;  %v4172_v32 = vld [vmem:[%s5443_s1 + $0x608] sm:$0xff]  ;;  %v4171_v35 = vld [vmem:[%s5443_s1 + $0x600] sm:$0xff] }
 0x160   :  { %2577 = vmatpush.bf16.msra.mxu2 %v4172_v32  ;;  %v4163_v48 = vld [vmem:[%s5443_s1 + $0x5c0] sm:$0xff]  ;;  %v4170_v32 = vld [vmem:[%s5443_s1 + $0x5f8] sm:$0xff] }
 0x161   :  { %v5179_v60 = vadd.f32 %v1346_v33, %v1318_v47  ;;  %v5181_v7 = vadd.f32 %v1387_v58, %v1359_v0  ;;  %3643 = vmatmul.msk.bf16.vlgmr.msrb.gmra.mxu0 %vm587_vm0, %v4615_v10  ;;  %2549 = vmatpush.bf16.msra.mxu1 %v4163_v48 }
 0x162   :  { %2436 = vmatmul.bf16.vlgmr.msrb.gmra.mxu1 %v4353_v42 }
 0x163   :  { %2465 = vmatmul.bf16.vlgmr.msrb.gmra.mxu2 %v4355_v43  ;;  %v1407_v38 = vmax.f32 %v4932_v11, %v5181_v7 }
 0x164   :  { %2494 = vmatmul.bf16.vlgmr.msrb.gmra.mxu3 %v4357_v44  ;;  %2578 = vmatpush.bf16.msra.mxu2 %v4171_v35 }
 0x166   :  { %v1825_v42 = vpop.f32.mrf.mxu2  ;;  %v1360_v44 = vpop.f32.mrf.mxu0 }
 0x167   :  { %v1854_v2 = vpop.f32.mrf.mxu3  ;;  %v1389_v12 = vpop.f32.mrf.mxu1  ;;  %v1361_v36 = vadd.f32 %v1360_v44, %v5089_v62 }
 0x168   :  { %v5199_v43 = vadd.f32 %v1854_v2, %v1825_v42  ;;  %2579 = vmatpush.bf16.msra.mxu2 %v4170_v32 }
 0x169   :  { %v5205_v37 = vadd.f32 %v1389_v12, %v1361_v36  ;;  %v4153_v36 = vld [vmem:[%s5443_s1 + $0x570] sm:$0xff] }
 0x16b   :  { %v1408_v21 = vmax.f32 %v4949_v63, %v5205_v37 }
 0x16c   :  { %2580 = vmatpush.bf16.msra.mxu2 %v4169_v16 }
 0x16e   :  { %v1827_v46 = vpop.f32.mrf.mxu2  ;;  %v1363_v62 = vpop.f32.mrf.mxu0 }
 0x16f   :  { %v1856_v18 = vpop.f32.mrf.mxu3  ;;  %v1392_v47 = vpop.f32.mrf.mxu1  ;;  %v1364_v58 = vadd.f32 %v1363_v62, %v5105_v24  ;;  %v4154_v24 = vld [vmem:[%s5443_s1 + $0x578] sm:$0xff] }
 0x170   :  { %v5215_v33 = vadd.f32 %v1856_v18, %v1827_v46  ;;  %2521 = vmatpush.bf16.msra.mxu0 %v4154_v24 }
 0x171   :  { %v5221_v19 = vadd.f32 %v1392_v47, %v1364_v58  ;;  %3644 = vmatmul.msk.bf16.gmra.mxu0 %vm587_vm0, %v4668_v31 }
 0x172   :  { %2441 = vmatmul.bf16.gmra.mxu1 %v4428_v3 }
 0x173   :  { %2470 = vmatmul.bf16.gmra.mxu2 %v4430_v4  ;;  %v1409_v0 = vmax.f32 %v4971_v57, %v5221_v19 }
 0x174   :  { %2499 = vmatmul.bf16.gmra.mxu3 %v4432_v5  ;;  %v4162_v5 = vld [vmem:[%s5443_s1 + $0x5b8] sm:$0xff]  ;;  %2522 = vmatpush.bf16.msra.mxu0 %v4153_v36 }
 0x175   :  { %2550 = vmatpush.bf16.msra.mxu1 %v4162_v5 }
 0x176   :  { %v1830_v22 = vpop.f32.mrf.mxu2  ;;  %v1365_v4 = vpop.f32.mrf.mxu0 }
 0x177   :  { %v1859_v49 = vpop.f32.mrf.mxu3  ;;  %v1394_v42 = vpop.f32.mrf.mxu1  ;;  %v1366_v2 = vadd.f32 %v1365_v4, %v5120_v41  ;;  %v4161_v41 = vld [vmem:[%s5443_s1 + $0x5b0] sm:$0xff] }
 0x178   :  { %v5236_v3 = vadd.f32 %v1859_v49, %v1830_v22 }
 0x179   :  { %v5242_v44 = vadd.f32 %v1394_v42, %v1366_v2  ;;  %2551 = vmatpush.bf16.msra.mxu1 %v4161_v41 }
 0x17b   :  { %v1410_v12 = vmax.f32 %v4991_v20, %v5242_v44 }
 0x17e   :  { %v1832_v35 = vpop.f32.mrf.mxu2  ;;  %v1368_v18 = vpop.f32.mrf.mxu0 }
 0x17f   :  { %v1861_v40 = vpop.f32.mrf.mxu3  ;;  %v1397_v62 = vpop.f32.mrf.mxu1  ;;  %v1369_v47 = vadd.f32 %v1368_v18, %v5139_v59 }
 0x180   :  { %v5255_v46 = vadd.f32 %v1861_v40, %v1832_v35 }
 0x181   :  { %v5258_v48 = vadd.f32 %v1397_v62, %v1369_v47  ;;  %3645 = vmatmul.msk.bf16.gmra.mxu0 %vm587_vm0, %v4721_v56 }
 0x182   :  { %2446 = vmatmul.bf16.gmra.mxu1 %v4497_v26 }
 0x183   :  { %2475 = vmatmul.bf16.gmra.mxu2 %v4499_v27  ;;  %v1411_v58 = vmax.f32 %v5010_v39, %v5258_v48 }
 0x184   :  { %2504 = vmatmul.bf16.gmra.mxu3 %v4501_v28 }
 0x186   :  { %v1835_v32 = vpop.f32.mrf.mxu2  ;;  %v1370_v59 = vpop.f32.mrf.mxu0 }
 0x187   :  { %v1864_v24 = vpop.f32.mrf.mxu3  ;;  %v1399_v49 = vpop.f32.mrf.mxu1  ;;  %v1371_v4 = vadd.f32 %v1370_v59, %v5151_v1 }
 0x188   :  { %v5267_v22 = vadd.f32 %v1864_v24, %v1835_v32  ;;  %v4206_v32 = vmov 0  }
 0x189   :  { %v5270_v42 = vadd.f32 %v1399_v49, %v1371_v4  ;;  %4203 = vset.pattern.permute.xlu0 %v4206_v32  ;;  %4204 = vset.pattern.permute.xlu1 %v4206_v32 }
 0x18a   :  { %4205 = vset.pattern.permute.xlu2 %v4206_v32 }
 0x18b   :  { %v1412_v26 = vmax.f32 %v5024_v17, %v5270_v42 }
 0x18e   :  { %v1837_v5 = vpop.f32.mrf.mxu2  ;;  %v1373_v28 = vpop.f32.mrf.mxu0 }
 0x18f   :  { %v1866_v27 = vpop.f32.mrf.mxu3  ;;  %v1402_v16 = vpop.f32.mrf.mxu1  ;;  %v1374_v36 = vadd.f32 %v1373_v28, %v5167_v34 }
 0x190   :  { %v5274_v2 = vadd.f32 %v1866_v27, %v1837_v5  ;;  %v2640_v27 = vld [vmem:[%s5445_s2 + $0x8] sm:$0xff] }
 0x191   :  { %v5277_v35 = vadd.f32 %v1402_v16, %v1374_v36  ;;  %3646 = vmatmul.msk.bf16.gmra.mxu0 %vm587_vm0, %v4771_v15 }
 0x192   :  { %2451 = vmatmul.bf16.gmra.mxu1 %v4557_v50  ;;  %v2639_v50 = vld [vmem:[%s5445_s2] sm:$0xff] }
 0x193   :  { %2480 = vmatmul.bf16.gmra.mxu2 %v4559_v51  ;;  %v1413_v1 = vmax.f32 %v5043_v23, %v5277_v35  ;;  %2649 = vperm.xlu0 %4203, %v2639_v50  }
 0x194   :  { %2509 = vmatmul.bf16.gmra.mxu3 %v4561_v52 }
 0x196   :  { %v1840_v40 = vpop.f32.mrf.mxu2  ;;  %v1375_v62 = vpop.f32.mrf.mxu0 }
 0x197   :  { %v1869_v41 = vpop.f32.mrf.mxu3  ;;  %v1404_v34 = vpop.f32.mrf.mxu1  ;;  %v1376_v47 = vadd.f32 %v1375_v62, %v5179_v60 }
 0x198   :  { %v5286_v18 = vadd.f32 %v1869_v41, %v1840_v40 }
 0x199   :  { %v5292_v51 = vadd.f32 %v1404_v34, %v1376_v47 }
 0x19b   :  { %v1414_v52 = vmax.f32 %v5057_v61, %v5292_v51  ;;  %2654 = vperm.xlu0 %4203, %v2640_v27  }
 0x19e   :  { %v1842_v24 = vpop.f32.mrf.mxu2  ;;  %v1883_v4 = vpop.f32.mrf.mxu0 }
 0x19f   :  { %v1871_v59 = vpop.f32.mrf.mxu3  ;;  %v1912_v60 = vpop.f32.mrf.mxu1  ;;  %v1884_v5 = vadd.f32 %v1883_v4, %v5199_v43 }
 0x1a0   :  { %v5296_v49 = vadd.f32 %v1871_v59, %v1842_v24 }
 0x1a1   :  { %v1913_v28 = vadd.f32 %v1912_v60, %v1884_v5  ;;  %2523 = vmatmul.bf16.vlgmr.msra.gmra.mxu0 %v4359_v45  ;;  %v2641_v45 = vld [vmem:[%s5445_s2 + $0x10] sm:$0xff] }
 0x1a2   :  { %2552 = vmatmul.bf16.vlgmr.msra.gmra.mxu1 %v4611_v8  ;;  %2659 = vperm.xlu1 %4204, %v2641_v45  }
 0x1a3   :  { %2581 = vmatmul.bf16.vlgmr.msra.gmra.mxu2 %v4613_v9 }
 0x1a4   :  { %3947 = vmatmul.msk.bf16.vlgmr.msra.gmra.mxu3 %vm587_vm0, %v4615_v10 }
 0x1a6   :  { %v1941_v16 = vpop.f32.mrf.mxu2  ;;  %v1885_v41 = vpop.f32.mrf.mxu0 }
 0x1a7   :  { %v1970_v36 = vpop.f32.mrf.mxu3  ;;  %v1942_v40 = vadd.f32 %v1941_v16, %v1913_v28  ;;  %v1914_v43 = vpop.f32.mrf.mxu1  ;;  %v1886_v62 = vadd.f32 %v1885_v41, %v5215_v33  ;;  %v2642_v33 = vld [vmem:[%s5445_s2 + $0x18] sm:$0xff] }
 0x1a9   :  { %v5308_v34 = vadd.f32 %v1970_v36, %v1942_v40  ;;  %v1915_v8 = vadd.f32 %v1914_v43, %v1886_v62 }
 0x1aa   :  { %2664 = vperm.xlu1 %4204, %v2642_v33  }
 0x1ae   :  { %v1943_v9 = vpop.f32.mrf.mxu2  ;;  %v1888_v10 = vpop.f32.mrf.mxu0 }
 0x1af   :  { %v1972_v47 = vpop.f32.mrf.mxu3  ;;  %v1944_v32 = vadd.f32 %v1943_v9, %v1915_v8  ;;  %v1917_v50 = vpop.f32.mrf.mxu1  ;;  %v1889_v24 = vadd.f32 %v1888_v10, %v5236_v3 }
 0x1b1   :  { %v5314_v59 = vadd.f32 %v1972_v47, %v1944_v32  ;;  %v1918_v4 = vadd.f32 %v1917_v50, %v1889_v24  ;;  %2528 = vmatmul.bf16.gmra.mxu0 %v4434_v6 }
 0x1b2   :  { %2557 = vmatmul.bf16.gmra.mxu1 %v4664_v25 }
 0x1b3   :  { %2586 = vmatmul.bf16.gmra.mxu2 %v4666_v30 }
 0x1b4   :  { %3948 = vmatmul.msk.bf16.gmra.mxu3 %vm587_vm0, %v4668_v31  ;;  %v2646_v31 = vld [vmem:[%s5445_s2 + $0x38] sm:$0xff] }
 0x1b5   :  { %2684 = vperm.xlu1 %4204, %v2646_v31  }
 0x1b6   :  { %v1946_v60 = vpop.f32.mrf.mxu2  ;;  %v1890_v27 = vpop.f32.mrf.mxu0 }
 0x1b7   :  { %v1975_v5 = vpop.f32.mrf.mxu3  ;;  %v1947_v3 = vadd.f32 %v1946_v60, %v1918_v4  ;;  %v1919_v28 = vpop.f32.mrf.mxu1  ;;  %v1891_v16 = vadd.f32 %v1890_v27, %v5255_v46  ;;  %v2645_v46 = vld [vmem:[%s5445_s2 + $0x30] sm:$0xff] }
 0x1b8   :  { %2679 = vperm.xlu0 %4203, %v2645_v46  }
 0x1b9   :  { %v5325_v36 = vadd.f32 %v1975_v5, %v1947_v3  ;;  %v1920_v40 = vadd.f32 %v1919_v28, %v1891_v16 }
 0x1be   :  { %v1948_v41 = vpop.f32.mrf.mxu2  ;;  %v1893_v25 = vpop.f32.mrf.mxu0 }
 0x1bf   :  { %v1977_v6 = vpop.f32.mrf.mxu3  ;;  %v1949_v43 = vadd.f32 %v1948_v41, %v1920_v40  ;;  %v1922_v62 = vpop.f32.mrf.mxu1  ;;  %v1894_v30 = vadd.f32 %v1893_v25, %v5267_v22 }
 0x1c1   :  { %v5328_v45 = vadd.f32 %v1977_v6, %v1949_v43  ;;  %v1923_v8 = vadd.f32 %v1922_v62, %v1894_v30  ;;  %2533 = vmatmul.bf16.gmra.mxu0 %v4503_v29 }
 0x1c2   :  { %2562 = vmatmul.bf16.gmra.mxu1 %v4717_v54 }
 0x1c3   :  { %2591 = vmatmul.bf16.gmra.mxu2 %v4719_v55 }
 0x1c4   :  { %3949 = vmatmul.msk.bf16.gmra.mxu3 %vm587_vm0, %v4721_v56  ;;  %v2643_v56 = vld [vmem:[%s5445_s2 + $0x20] sm:$0xff] }
 0x1c5   :  { %2669 = vperm.xlu2 %4205, %v2643_v56  }
 0x1c6   :  { %v1951_v22 = vpop.f32.mrf.mxu2  ;;  %v1895_v32 = vpop.f32.mrf.mxu0 }
 0x1c7   :  { %v1980_v9 = vpop.f32.mrf.mxu3  ;;  %v1952_v47 = vadd.f32 %v1951_v22, %v1923_v8  ;;  %v1924_v10 = vpop.f32.mrf.mxu1  ;;  %v1896_v50 = vadd.f32 %v1895_v32, %v5274_v2 }
 0x1c9   :  { %v1981_v24 = vadd.f32 %v1980_v9, %v1952_v47  ;;  %v1925_v33 = vadd.f32 %v1924_v10, %v1896_v50 }
 0x1ce   :  { %v1953_v4 = vpop.f32.mrf.mxu2  ;;  %v1898_v54 = vpop.f32.mrf.mxu0 }
 0x1cf   :  { %v1982_v29 = vpop.f32.mrf.mxu3  ;;  %v1954_v60 = vadd.f32 %v1953_v4, %v1925_v33  ;;  %v1927_v5 = vpop.f32.mrf.mxu1  ;;  %v1899_v55 = vadd.f32 %v1898_v54, %v5286_v18 }
 0x1d1   :  { %v1983_v3 = vadd.f32 %v1982_v29, %v1954_v60  ;;  %v1928_v27 = vadd.f32 %v1927_v5, %v1899_v55  ;;  %2538 = vmatmul.bf16.gmra.mxu0 %v4563_v53  ;;  %v2644_v53 = vld [vmem:[%s5445_s2 + $0x28] sm:$0xff] }
 0x1d2   :  { %2567 = vmatmul.bf16.gmra.mxu1 %v4767_v13  ;;  %2674 = vperm.xlu2 %4205, %v2644_v53  }
 0x1d3   :  { %2596 = vmatmul.bf16.gmra.mxu2 %v4769_v14 }
 0x1d4   :  { %3950 = vmatmul.msk.bf16.gmra.mxu3 %vm587_vm0, %v4771_v15 }
 0x1d6   :  { %v1956_v2 = vpop.f32.mrf.mxu2  ;;  %v1900_v18 = vpop.f32.mrf.mxu0 }
 0x1d7   :  { %v1985_v28 = vpop.f32.mrf.mxu3  ;;  %v1957_v16 = vadd.f32 %v1956_v2, %v1928_v27  ;;  %v1929_v40 = vpop.f32.mrf.mxu1  ;;  %v1901_v41 = vadd.f32 %v1900_v18, %v5296_v49 }
 0x1d9   :  { %v1986_v6 = vadd.f32 %v1985_v28, %v1957_v16  ;;  %v1930_v43 = vadd.f32 %v1929_v40, %v1901_v41 }
 0x1de   :  { %v1958_v13 = vpop.f32.mrf.mxu2  ;;  %v1999_v62 = vpop.f32.mrf.mxu0 }
 0x1df   :  { %v1987_v14 = vpop.f32.mrf.mxu3  ;;  %v1959_v25 = vadd.f32 %v1958_v13, %v1930_v43  ;;  %v2437_v15 = vpop.f32.mrf.mxu1  ;;  %v2000_v30 = vadd.f32 %v1999_v62, %v5308_v34 }
 0x1e1   :  { %v1988_v31 = vadd.f32 %v1987_v14, %v1959_v25  ;;  %v5359_v46 = vmax.f32 %v1407_v38, %v2000_v30 }
 0x1e6   :  { %v2466_v49 = vpop.f32.mrf.mxu2  ;;  %v2001_v9 = vpop.f32.mrf.mxu0 }
 0x1e7   :  { %v2495_v8 = vpop.f32.mrf.mxu3  ;;  %v2467_v22 = vadd.f32 %v2466_v49, %v2437_v15  ;;  %v2439_v47 = vpop.f32.mrf.mxu1  ;;  %v2002_v32 = vadd.f32 %v2001_v9, %v5314_v59 }
 0x1e9   :  { %v2496_v10 = vadd.f32 %v2495_v8, %v2467_v22  ;;  %v5365_v50 = vmax.f32 %v1408_v21, %v2002_v32 }
 0x1ee   :  { %v2468_v34 = vpop.f32.mrf.mxu2  ;;  %v2004_v4 = vpop.f32.mrf.mxu0 }
 0x1ef   :  { %v2497_v33 = vpop.f32.mrf.mxu3  ;;  %v2442_v29 = vpop.f32.mrf.mxu1  ;;  %v2005_v11 = vadd.f32 %v2004_v4, %v5325_v36  ;;  %v2469_v25 = vadd.f32 %v2468_v34, %v2439_v47 }
 0x1f1   :  { %v5371_v7 = vmax.f32 %v1409_v0, %v2005_v11  ;;  %v2498_v49 = vadd.f32 %v2497_v33, %v2469_v25 }
 0x1f6   :  { %v2471_v38 = vpop.f32.mrf.mxu2  ;;  %v2006_v54 = vpop.f32.mrf.mxu0 }
 0x1f7   :  { %v2500_v60 = vpop.f32.mrf.mxu3  ;;  %v2472_v59 = vadd.f32 %v2471_v38, %v2442_v29  ;;  %v2444_v5 = vpop.f32.mrf.mxu1  ;;  %v2007_v63 = vadd.f32 %v2006_v54, %v5328_v45 }
 0x1f9   :  { %v2501_v37 = vadd.f32 %v2500_v60, %v2472_v59  ;;  %v5377_v21 = vmax.f32 %v1410_v12, %v2007_v63 }
 0x1fe   :  { %v2473_v55 = vpop.f32.mrf.mxu2  ;;  %v2009_v56 = vpop.f32.mrf.mxu0 }
 0x1ff   :  { %v2502_v36 = vpop.f32.mrf.mxu3  ;;  %v2447_v27 = vpop.f32.mrf.mxu1  ;;  %v2010_v57 = vadd.f32 %v2009_v56, %v1981_v24  ;;  %v2474_v59 = vadd.f32 %v2473_v55, %v2444_v5 }
 0x201   :  { %v5382_v19 = vmax.f32 %v1411_v58, %v2010_v57 }
 0x205   :  { %v2650_v9 = vpop.permute.xlu0 %2649 }
 0x206   :  { %v2476_v0 = vpop.f32.mrf.mxu2  ;;  %v2011_v45 = vpop.f32.mrf.mxu0 }
 0x207   :  { %v2505_v2 = vpop.f32.mrf.mxu3  ;;  %v2477_v28 = vadd.f32 %v2476_v0, %v2447_v27  ;;  %v5384_v16 = vpop.f32.mrf.mxu1  ;;  %v2012_v18 = vadd.f32 %v2011_v45, %v1983_v3  ;;  %v2503_v0 = vadd.f32 %v2502_v36, %v2474_v59 }
 0x209   :  { %v5386_v20 = vadd.f32 %v2505_v2, %v2477_v28  ;;  %v5391_v44 = vmax.f32 %v1412_v26, %v2012_v18 }
 0x20d   :  { %v2655_v34 = vpop.permute.xlu0 %2654 }
 0x20e   :  { %v5393_v12 = vpop.f32.mrf.mxu2  ;;  %v2014_v39 = vpop.f32.mrf.mxu0 }
 0x20f   :  { %v5395_v24 = vpop.f32.mrf.mxu3  ;;  %v2452_v48 = vpop.f32.mrf.mxu1  ;;  %v2015_v58 = vadd.f32 %v2014_v39, %v1986_v6 }
 0x211   :  { %v5400_v40 = vmax.f32 %v1413_v1, %v2015_v58 }
 0x214   :  { %v2660_v39 = vpop.permute.xlu1 %2659 }
 0x216   :  { %v2481_v3 = vpop.f32.mrf.mxu2  ;;  %v2016_v43 = vpop.f32.mrf.mxu0 }
 0x217   :  { %v2510_v41 = vpop.f32.mrf.mxu3  ;;  %v2482_v53 = vadd.f32 %v2481_v3, %v2452_v48  ;;  %v5402_v13 = vpop.f32.mrf.mxu1  ;;  %v2017_v17 = vadd.f32 %v2016_v43, %v1988_v31 }
 0x219   :  { %v5404_v42 = vadd.f32 %v2510_v41, %v2482_v53  ;;  %v5409_v26 = vmax.f32 %v1414_v52, %v2017_v17 }
 0x21e   :  { %v5411_v6 = vpop.f32.mrf.mxu2  ;;  %v2524_v23 = vpop.f32.mrf.mxu0 }
 0x21f   :  { %v5413_v14 = vpop.f32.mrf.mxu3  ;;  %v2553_v35 = vpop.f32.mrf.mxu1  ;;  %v2525_v1 = vadd.f32 %v2524_v23, %v2496_v10 }
 0x220   :  { %v2665_v23 = vpop.permute.xlu1 %2664 }
 0x221   :  { %v2554_v62 = vadd.f32 %v2553_v35, %v2525_v1  ;;  %v2479_v35 = vadd.f32 %v5393_v12, %v5384_v16 }
 0x226   :  { %v2582_v15 = vpop.f32.mrf.mxu2  ;;  %v2526_v8 = vpop.f32.mrf.mxu0 }
 0x227   :  { %v2611_v30 = vpop.f32.mrf.mxu3  ;;  %v2583_v31 = vadd.f32 %v2582_v15, %v2554_v62  ;;  %v2555_v22 = vpop.f32.mrf.mxu1  ;;  %v2527_v61 = vadd.f32 %v2526_v8, %v2498_v49  ;;  %v2508_v49 = vadd.f32 %v5395_v24, %v2479_v35 }
 0x229   :  { %v2612_v32 = vadd.f32 %v2611_v30, %v2583_v31  ;;  %v2556_v52 = vadd.f32 %v2555_v22, %v2527_v61  ;;  %v2670_v61 = vpop.permute.xlu2 %2669 }
 0x22b   :  { %v2631_v51 = vmax.f32 %v5359_v46, %v2612_v32 }
 0x22d   :  { %v2687_v54 = vadd.f32 %v2650_v9, %v2631_v51 }
 0x22e   :  { %v2584_v4 = vpop.f32.mrf.mxu2  ;;  %v2529_v38 = vpop.f32.mrf.mxu0 }
 0x22f   :  { %v2613_v29 = vpop.f32.mrf.mxu3  ;;  %v2585_v11 = vadd.f32 %v2584_v4, %v2556_v52  ;;  %v2558_v60 = vpop.f32.mrf.mxu1  ;;  %v2530_v47 = vadd.f32 %v2529_v38, %v2501_v37  ;;  %v2695_v2 = vmax.f32 %v2687_v54, 0.0 }
 0x231   :  { %v2614_v10 = vadd.f32 %v2613_v29, %v2585_v11  ;;  %v2559_v63 = vadd.f32 %v2558_v60, %v2530_v47  ;;  %v2484_v47 = vadd.f32 %v5411_v6, %v5402_v13 }
 0x233   :  { %v2632_v33 = vmax.f32 %v5365_v50, %v2614_v10  ;;  %v2675_v10 = vpop.permute.xlu2 %2674 }
 0x235   :  { %v2688_v56 = vadd.f32 %v2655_v34, %v2632_v33 }
 0x236   :  { %v2587_v27 = vpop.f32.mrf.mxu2  ;;  %v2531_v45 = vpop.f32.mrf.mxu0 }
 0x237   :  { %v2616_v57 = vpop.f32.mrf.mxu3  ;;  %v2696_v46 = vmax.f32 %v2688_v56, 0.0  ;;  %v2588_v28 = vadd.f32 %v2587_v27, %v2559_v63  ;;  %v2560_v18 = vpop.f32.mrf.mxu1  ;;  %v2532_v3 = vadd.f32 %v2531_v45, %v2503_v0  ;;  %v2513_v56 = vadd.f32 %v5413_v14, %v2484_v47 }
 0x238   :  { %v2680_v14 = vpop.permute.xlu0 %2679 }
 0x239   :  { %v4182_v48 = vpack.c.bf16 %v2696_v46, %v2695_v2  ;;  %v2617_v58 = vadd.f32 %v2616_v57, %v2588_v28  ;;  %v2561_v5 = vadd.f32 %v2560_v18, %v2532_v3 }
 0x23b   :  { %4183 = vst [vmem:[%s5446_s3] sm:$0xff] %v4182_v48   ;;  %v2633_v50 = vmax.f32 %v5371_v7, %v2617_v58 }
 0x23d   :  { %v2689_v1 = vadd.f32 %v2660_v39, %v2633_v50  ;;  %v2685_v50 = vpop.permute.xlu1 %2684 }
 0x23e   :  { %v2589_v37 = vpop.f32.mrf.mxu2  ;;  %v2534_v36 = vpop.f32.mrf.mxu0 }
 0x23f   :  { %v2618_v55 = vpop.f32.mrf.mxu3  ;;  %v2590_v41 = vadd.f32 %v2589_v37, %v2561_v5  ;;  %v2563_v53 = vpop.f32.mrf.mxu1  ;;  %v2535_v17 = vadd.f32 %v2534_v36, %v5386_v20  ;;  %v2697_v31 = vmax.f32 %v2689_v1, 0.0 }
 0x241   :  { %v2619_v43 = vadd.f32 %v2618_v55, %v2590_v41  ;;  %v2564_v62 = vadd.f32 %v2563_v53, %v2535_v17 }
 0x243   :  { %v2634_v25 = vmax.f32 %v5377_v21, %v2619_v43 }
 0x245   :  { %v2690_v15 = vadd.f32 %v2665_v23, %v2634_v25 }
 0x246   :  { %v2592_v30 = vpop.f32.mrf.mxu2  ;;  %v2536_v9 = vpop.f32.mrf.mxu0 }
 0x247   :  { %v2621_v7 = vpop.f32.mrf.mxu3  ;;  %v2698_v8 = vmax.f32 %v2690_v15, 0.0  ;;  %v2593_v22 = vadd.f32 %v2592_v30, %v2564_v62  ;;  %v2565_v32 = vpop.f32.mrf.mxu1  ;;  %v2537_v52 = vadd.f32 %v2536_v9, %v2508_v49 }
 0x249   :  { %v4187_v20 = vpack.c.bf16 %v2698_v8, %v2697_v31  ;;  %v2622_v51 = vadd.f32 %v2621_v7, %v2593_v22  ;;  %v2566_v16 = vadd.f32 %v2565_v32, %v2537_v52 }
 0x24b   :  { %4199 = vst [vmem:[%s5446_s3 + $0x8] sm:$0xff] %v4187_v20   ;;  %v2635_v21 = vmax.f32 %v5382_v19, %v2622_v51 }
 0x24d   :  { %v2691_v34 = vadd.f32 %v2670_v61, %v2635_v21 }
 0x24e   :  { %v2594_v12 = vpop.f32.mrf.mxu2  ;;  %v2539_v24 = vpop.f32.mrf.mxu0 }
 0x24f   :  { %v2623_v4 = vpop.f32.mrf.mxu3  ;;  %v2595_v29 = vadd.f32 %v2594_v12, %v2566_v16  ;;  %v2540_v38 = vadd.f32 %v2539_v24, %v5404_v42  ;;  %v2568_v60 = vpop.f32.mrf.mxu1  ;;  %v2699_v27 = vmax.f32 %v2691_v34, 0.0 }
 0x251   :  { %v2624_v11 = vadd.f32 %v2623_v4, %v2595_v29  ;;  %v2569_v54 = vadd.f32 %v2568_v60, %v2540_v38 }
 0x253   :  { %v2636_v59 = vmax.f32 %v5391_v44, %v2624_v11 }
 0x255   :  { %v2692_v33 = vadd.f32 %v2675_v10, %v2636_v59 }
 0x256   :  { %v2597_v63 = vpop.f32.mrf.mxu2  ;;  %v2541_v2 = vpop.f32.mrf.mxu0 }
 0x257   :  { %v2626_v19 = vpop.f32.mrf.mxu3  ;;  %v2700_v57 = vmax.f32 %v2692_v33, 0.0  ;;  %v2598_v0 = vadd.f32 %v2597_v63, %v2569_v54  ;;  %v2542_v28 = vadd.f32 %v2541_v2, %v2513_v56  ;;  %v2570_v44 = vpop.f32.mrf.mxu1 }
 0x259   :  { %v4192_v46 = vpack.c.bf16 %v2700_v57, %v2699_v27  ;;  %v2627_v42 = vadd.f32 %v2626_v19, %v2598_v0  ;;  %v2571_v6 = vadd.f32 %v2570_v44, %v2542_v28 }
 0x25b   :  { %4200 = vst [vmem:[%s5446_s3 + $0x10] sm:$0xff] %v4192_v46   ;;  %v2637_v13 = vmax.f32 %v5400_v40, %v2627_v42 }
 0x25d   :  { %v2693_v58 = vadd.f32 %v2680_v14, %v2637_v13 }
 0x25e   :  { %v2599_v45 = vpop.f32.mrf.mxu2 }
 0x25f   :  { %v2600_v18 = vadd.f32 %v2599_v45, %v2571_v6  ;;  %v2628_v39 = vpop.f32.mrf.mxu3  ;;  %v2701_v37 = vmax.f32 %v2693_v58, 0.0 }
 0x261   :  { %v2629_v48 = vadd.f32 %v2628_v39, %v2600_v18 }
 0x263   :  { %v2638_v3 = vmax.f32 %v5409_v26, %v2629_v48 }
 0x265   :  { %v2694_v5 = vadd.f32 %v2685_v50, %v2638_v3 }
 0x267   :  { %v2702_v55 = vmax.f32 %v2694_v5, 0.0 }
 0x269   :  { %v4197_v41 = vpack.c.bf16 %v2702_v55, %v2701_v37 }
 0x26b   :  { %4201 = vst [vmem:[%s5446_s3 + $0x18] sm:$0xff] %v4197_v41  }

// kernel: cnn_forward.7
= control target key start
LH: loop header
LB: loop body
LE: loop exit
PB: predicated region body
PF: predicated region fallthrough
CT: control target
= control target key end

     0   :  { %vm479_vm0 = vcmask 523264   ;;  %vm775_vm1 = vcmask 80896   ;;  %s1793_s1 = inlined_call_operand.vmem [shape: bf16[576,256], index: 1, kind: input, shape index: {}]   ;;  %s1794_s0 = inlined_call_operand.vmem [shape: bf16[8,576], index: 0, kind: input, shape index: {}]   ;;  %s1795_s3 = inlined_call_operand.vmem [shape: bf16[256,10], index: 3, kind: input, shape index: {}]   ;;  %s1796_s4 = inlined_call_operand.vmem [shape: f32[1,10], index: 4, kind: input, shape index: {}]   ;;  %s1797_s2 = inlined_call_operand.vmem [shape: f32[1,256], index: 2, kind: input, shape index: {}]   ;;  %s1798_s5 = inlined_call_operand.vmem [shape: f32[8,10], index: 5, kind: output, shape index: {}]  }
   0x1   :  { %v851_v0 = vld [vmem:[%s1793_s1 + $0x70] sm:$0xf]  ;;  %v1162_v1 = vld [vmem:[%s1793_s1 + $0x74] sm:$0xf0]  ;;  %v843_v11 = vld [vmem:[%s1793_s1 + $0x60] sm:$0xf] }
   0x2   :  { %v915_v2 = vld [vmem:[%s1793_s1 + $0xf0] sm:$0xf]  ;;  %v852_v3 = vor.u32 %v1162_v1, %v851_v0  ;;  %v1178_v4 = vld [vmem:[%s1793_s1 + $0xf4] sm:$0xf0]  ;;  %v1160_v13 = vld [vmem:[%s1793_s1 + $0x64] sm:$0xf0] }
   0x3   :  { %v979_v5 = vld [vmem:[%s1793_s1 + $0x170] sm:$0xf]  ;;  %v1194_v6 = vld [vmem:[%s1793_s1 + $0x174] sm:$0xf0]  ;;  %v916_v7 = vor.u32 %v1178_v4, %v915_v2  ;;  %v907_v14 = vld [vmem:[%s1793_s1 + $0xe0] sm:$0xf]  ;;  %v844_v16 = vor.u32 %v1160_v13, %v843_v11 }
   0x4   :  { %v980_v8 = vor.u32 %v1194_v6, %v979_v5  ;;  %v1043_v9 = vld [vmem:[%s1793_s1 + $0x1f0] sm:$0xf]  ;;  %v1210_v10 = vld [vmem:[%s1793_s1 + $0x1f4] sm:$0xf0]  ;;  %483 = vmatpush.bf16.msra.mxu0 %v852_v3  ;;  %v1176_v15 = vld [vmem:[%s1793_s1 + $0xe4] sm:$0xf0] }
   0x5   :  { %v1044_v12 = vor.u32 %v1210_v10, %v1043_v9  ;;  %496 = vmatpush.bf16.msra.mxu1 %v916_v7  ;;  %v908_v17 = vor.u32 %v1176_v15, %v907_v14  ;;  %v971_v18 = vld [vmem:[%s1793_s1 + $0x160] sm:$0xf]  ;;  %v1192_v19 = vld [vmem:[%s1793_s1 + $0x164] sm:$0xf0]  ;;  %v835_v23 = vld [vmem:[%s1793_s1 + $0x50] sm:$0xf] }
   0x6   :  { %509 = vmatpush.bf16.msra.mxu2 %v980_v8  ;;  %v1035_v20 = vld [vmem:[%s1793_s1 + $0x1e0] sm:$0xf]  ;;  %v972_v21 = vor.u32 %v1192_v19, %v971_v18  ;;  %v1208_v22 = vld [vmem:[%s1793_s1 + $0x1e4] sm:$0xf0]  ;;  %v1158_v24 = vld [vmem:[%s1793_s1 + $0x54] sm:$0xf0] }
   0x7   :  { %522 = vmatpush.bf16.msra.mxu3 %v1044_v12  ;;  %v1036_v25 = vor.u32 %v1208_v22, %v1035_v20  ;;  %v899_v26 = vld [vmem:[%s1793_s1 + $0xd0] sm:$0xf]  ;;  %v1174_v27 = vld [vmem:[%s1793_s1 + $0xd4] sm:$0xf0]  ;;  %v836_v29 = vor.u32 %v1158_v24, %v835_v23  ;;  %v827_v35 = vld [vmem:[%s1793_s1 + $0x40] sm:$0xf] }
   0x8   :  { %v963_v28 = vld [vmem:[%s1793_s1 + $0x150] sm:$0xf]  ;;  %484 = vmatpush.bf16.msra.mxu0 %v844_v16  ;;  %v1190_v30 = vld [vmem:[%s1793_s1 + $0x154] sm:$0xf0]  ;;  %v900_v33 = vor.u32 %v1174_v27, %v899_v26  ;;  %v1156_v36 = vld [vmem:[%s1793_s1 + $0x44] sm:$0xf0] }
   0x9   :  { %v1027_v31 = vld [vmem:[%s1793_s1 + $0x1d0] sm:$0xf]  ;;  %v1206_v32 = vld [vmem:[%s1793_s1 + $0x1d4] sm:$0xf0]  ;;  %497 = vmatpush.bf16.msra.mxu1 %v908_v17  ;;  %v964_v34 = vor.u32 %v1190_v30, %v963_v28  ;;  %v891_v37 = vld [vmem:[%s1793_s1 + $0xc0] sm:$0xf]  ;;  %v828_v44 = vor.u32 %v1156_v36, %v827_v35 }
   0xa   :  { %510 = vmatpush.bf16.msra.mxu2 %v972_v21  ;;  %v1028_v38 = vor.u32 %v1206_v32, %v1027_v31  ;;  %v1172_v39 = vld [vmem:[%s1793_s1 + $0xc4] sm:$0xf0]  ;;  %v955_v40 = vld [vmem:[%s1793_s1 + $0x140] sm:$0xf]  ;;  %v819_v47 = vld [vmem:[%s1793_s1 + $0x30] sm:$0xf] }
   0xb   :  { %523 = vmatpush.bf16.msra.mxu3 %v1036_v25  ;;  %v1188_v41 = vld [vmem:[%s1793_s1 + $0x144] sm:$0xf0]  ;;  %v1019_v42 = vld [vmem:[%s1793_s1 + $0x1c0] sm:$0xf]  ;;  %v892_v45 = vor.u32 %v1172_v39, %v891_v37  ;;  %v1154_v48 = vld [vmem:[%s1793_s1 + $0x34] sm:$0xf0] }
   0xc   :  { %v1204_v43 = vld [vmem:[%s1793_s1 + $0x1c4] sm:$0xf0]  ;;  %485 = vmatpush.bf16.msra.mxu0 %v836_v29  ;;  %v956_v46 = vor.u32 %v1188_v41, %v955_v40  ;;  %v883_v49 = vld [vmem:[%s1793_s1 + $0xb0] sm:$0xf]  ;;  %v1170_v51 = vld [vmem:[%s1793_s1 + $0xb4] sm:$0xf0]  ;;  %v820_v56 = vor.u32 %v1154_v48, %v819_v47 }
   0xd   :  { %498 = vmatpush.bf16.msra.mxu1 %v900_v33  ;;  %v1020_v50 = vor.u32 %v1204_v43, %v1019_v42  ;;  %v947_v52 = vld [vmem:[%s1793_s1 + $0x130] sm:$0xf]  ;;  %v1186_v53 = vld [vmem:[%s1793_s1 + $0x134] sm:$0xf0]  ;;  %v884_v57 = vor.u32 %v1170_v51, %v883_v49  ;;  %v811_v59 = vld [vmem:[%s1793_s1 + $0x20] sm:$0xf] }
   0xe   :  { %511 = vmatpush.bf16.msra.mxu2 %v964_v34  ;;  %v1011_v54 = vld [vmem:[%s1793_s1 + $0x1b0] sm:$0xf]  ;;  %v1202_v55 = vld [vmem:[%s1793_s1 + $0x1b4] sm:$0xf0]  ;;  %v948_v58 = vor.u32 %v1186_v53, %v947_v52  ;;  %v1152_v60 = vld [vmem:[%s1793_s1 + $0x24] sm:$0xf0] }
   0xf   :  { %524 = vmatpush.bf16.msra.mxu3 %v1028_v38  ;;  %v875_v61 = vld [vmem:[%s1793_s1 + $0xa0] sm:$0xf]  ;;  %v1012_v62 = vor.u32 %v1202_v55, %v1011_v54  ;;  %v1168_v63 = vld [vmem:[%s1793_s1 + $0xa4] sm:$0xf0]  ;;  %v812_v4 = vor.u32 %v1152_v60, %v811_v59  ;;  %v803_v7 = vld [vmem:[%s1793_s1 + $0x10] sm:$0xf] }
  0x10   :  { %486 = vmatpush.bf16.msra.mxu0 %v828_v44  ;;  %v939_v0 = vld [vmem:[%s1793_s1 + $0x120] sm:$0xf]  ;;  %v1184_v1 = vld [vmem:[%s1793_s1 + $0x124] sm:$0xf0]  ;;  %v876_v5 = vor.u32 %v1168_v63, %v875_v61  ;;  %v1150_v8 = vld [vmem:[%s1793_s1 + $0x14] sm:$0xf0] }
  0x11   :  { %499 = vmatpush.bf16.msra.mxu1 %v892_v45  ;;  %v1003_v2 = vld [vmem:[%s1793_s1 + $0x1a0] sm:$0xf]  ;;  %v1200_v3 = vld [vmem:[%s1793_s1 + $0x1a4] sm:$0xf0]  ;;  %v940_v6 = vor.u32 %v1184_v1, %v939_v0  ;;  %v867_v9 = vld [vmem:[%s1793_s1 + $0x90] sm:$0xf]  ;;  %v804_v17 = vor.u32 %v1150_v8, %v803_v7 }
  0x12   :  { %512 = vmatpush.bf16.msra.mxu2 %v956_v46  ;;  %v1004_v10 = vor.u32 %v1200_v3, %v1003_v2  ;;  %v1166_v11 = vld [vmem:[%s1793_s1 + $0x94] sm:$0xf0]  ;;  %v931_v12 = vld [vmem:[%s1793_s1 + $0x110] sm:$0xf]  ;;  %v795_v16 = vld [vmem:[%s1793_s1] sm:$0xf] }
  0x13   :  { %525 = vmatpush.bf16.msra.mxu3 %v1020_v50  ;;  %v1182_v13 = vld [vmem:[%s1793_s1 + $0x114] sm:$0xf0]  ;;  %v995_v14 = vld [vmem:[%s1793_s1 + $0x190] sm:$0xf]  ;;  %v1148_v18 = vld [vmem:[%s1793_s1 + $0x4] sm:$0xf0]  ;;  %v868_v21 = vor.u32 %v1166_v11, %v867_v9 }
  0x14   :  { %487 = vmatpush.bf16.msra.mxu0 %v820_v56  ;;  %v1198_v15 = vld [vmem:[%s1793_s1 + $0x194] sm:$0xf0]  ;;  %v859_v19 = vld [vmem:[%s1793_s1 + $0x80] sm:$0xf]  ;;  %v1164_v20 = vld [vmem:[%s1793_s1 + $0x84] sm:$0xf0]  ;;  %v932_v22 = vor.u32 %v1182_v13, %v931_v12  ;;  %v796_v33 = vor.u32 %v1148_v18, %v795_v16 }
  0x15   :  { %500 = vmatpush.bf16.msra.mxu1 %v884_v57  ;;  %v923_v23 = vld [vmem:[%s1793_s1 + $0x100] sm:$0xf]  ;;  %v1180_v24 = vld [vmem:[%s1793_s1 + $0x104] sm:$0xf0]  ;;  %v996_v26 = vor.u32 %v1198_v15, %v995_v14  ;;  %v1075_v29 = vld [vmem:[%s1793_s1 + $0x230] sm:$0xf]  ;;  %v860_v38 = vor.u32 %v1164_v20, %v859_v19 }
  0x16   :  { %513 = vmatpush.bf16.msra.mxu2 %v948_v58  ;;  %v21_v25 = vld [vmem:[%s1794_s0] sm:$0xff]  ;;  %v1196_v28 = vld [vmem:[%s1793_s1 + $0x184] sm:$0xf0]  ;;  %v1218_v30 = vld [vmem:[%s1793_s1 + $0x234] sm:$0xf0]  ;;  %v924_v39 = vor.u32 %v1180_v24, %v923_v23 }
  0x17   :  { %526 = vmatpush.bf16.msra.mxu3 %v1012_v62  ;;  %v987_v27 = vld [vmem:[%s1793_s1 + $0x180] sm:$0xf]  ;;  %v1161_v31 = vld [vmem:[%s1793_s1 + $0x74] sm:$0xf]  ;;  %v853_v32 = vld [vmem:[%s1793_s1 + $0x78] sm:$0xf0]  ;;  %v105_v36 = vunpack.c.l.b16 %v21_v25  ;;  %v106_v42 = vunpack.c.h.b16 %v21_v25  ;;  %v1076_v45 = vor.u32 %v1218_v30, %v1075_v29 }
  0x18   :  { %488 = vmatpush.bf16.msra.mxu0 %v812_v4  ;;  %v1177_v34 = vld [vmem:[%s1793_s1 + $0xf4] sm:$0xf]  ;;  %v917_v35 = vld [vmem:[%s1793_s1 + $0xf8] sm:$0xf0]  ;;  %v22_v37 = vld [vmem:[%s1794_s0 + $0x8] sm:$0xff]  ;;  %v988_v44 = vor.u32 %v1196_v28, %v987_v27  ;;  %v856_v47 = vor.u32 %v1161_v31, %v853_v32 }
  0x19   :  { %501 = vmatpush.bf16.msra.mxu1 %v876_v5  ;;  %v1193_v40 = vld [vmem:[%s1793_s1 + $0x174] sm:$0xf]  ;;  %v981_v41 = vld [vmem:[%s1793_s1 + $0x178] sm:$0xf0]  ;;  %v107_v43 = vunpack.c.l.b16 %v22_v37  ;;  %v108_v46 = vunpack.c.h.b16 %v22_v37  ;;  %v920_v48 = vor.u32 %v1177_v34, %v917_v35  ;;  %v1067_v49 = vld [vmem:[%s1793_s1 + $0x220] sm:$0xf]  ;;  %v1501_v53 = vpack.c.b16 %v105_v36, %v105_v36 }
  0x1a   :  { %514 = vmatpush.bf16.msra.mxu2 %v940_v6  ;;  %v1216_v50 = vld [vmem:[%s1793_s1 + $0x224] sm:$0xf0]  ;;  %v1159_v51 = vld [vmem:[%s1793_s1 + $0x64] sm:$0xf]  ;;  %v984_v52 = vor.u32 %v1193_v40, %v981_v41  ;;  %v845_v54 = vld [vmem:[%s1793_s1 + $0x68] sm:$0xf0]  ;;  %v1518_v59 = vpack.c.b16 %v106_v42, %v106_v42 }
  0x1b   :  { %527 = vmatpush.bf16.msra.mxu3 %v1004_v10  ;;  %v1175_v55 = vld [vmem:[%s1793_s1 + $0xe4] sm:$0xf]  ;;  %v909_v56 = vld [vmem:[%s1793_s1 + $0xe8] sm:$0xf0]  ;;  %v1520_v60 = vpack.c.b16 %v107_v43, %v107_v43  ;;  %v1068_v61 = vor.u32 %v1216_v50, %v1067_v49  ;;  %v1522_v62 = vpack.c.b16 %v108_v46, %v108_v46  ;;  %v848_v63 = vor.u32 %v1159_v51, %v845_v54  ;;  %v1059_v1 = vld [vmem:[%s1793_s1 + $0x210] sm:$0xf] }
  0x1c   :  { %489 = vmatpush.bf16.msra.mxu0 %v804_v17  ;;  %v1191_v57 = vld [vmem:[%s1793_s1 + $0x164] sm:$0xf]  ;;  %v973_v58 = vld [vmem:[%s1793_s1 + $0x168] sm:$0xf0]  ;;  %v912_v0 = vor.u32 %v1175_v55, %v909_v56  ;;  %v1214_v2 = vld [vmem:[%s1793_s1 + $0x214] sm:$0xf0] }
  0x1d   :  { %502 = vmatpush.bf16.msra.mxu1 %v868_v21  ;;  %v1157_v3 = vld [vmem:[%s1793_s1 + $0x54] sm:$0xf]  ;;  %v976_v4 = vor.u32 %v1191_v57, %v973_v58  ;;  %v837_v5 = vld [vmem:[%s1793_s1 + $0x58] sm:$0xf0]  ;;  %v1060_v10 = vor.u32 %v1214_v2, %v1059_v1  ;;  %v1051_v11 = vld [vmem:[%s1793_s1 + $0x200] sm:$0xf] }
  0x1e   :  { %515 = vmatpush.bf16.msra.mxu2 %v932_v22  ;;  %v1173_v6 = vld [vmem:[%s1793_s1 + $0xd4] sm:$0xf]  ;;  %v901_v7 = vld [vmem:[%s1793_s1 + $0xd8] sm:$0xf0]  ;;  %v840_v12 = vor.u32 %v1157_v3, %v837_v5  ;;  %v1212_v14 = vld [vmem:[%s1793_s1 + $0x204] sm:$0xf0] }
  0x1f   :  { %528 = vmatpush.bf16.msra.mxu3 %v996_v26  ;;  %v1189_v8 = vld [vmem:[%s1793_s1 + $0x154] sm:$0xf]  ;;  %v965_v9 = vld [vmem:[%s1793_s1 + $0x158] sm:$0xf0]  ;;  %v904_v13 = vor.u32 %v1173_v6, %v901_v7  ;;  %v1155_v15 = vld [vmem:[%s1793_s1 + $0x44] sm:$0xf]  ;;  %v1052_v25 = vor.u32 %v1212_v14, %v1051_v11 }
  0x20   :  { %490 = vmatpush.bf16.msra.mxu0 %v796_v33  ;;  %v829_v16 = vld [vmem:[%s1793_s1 + $0x48] sm:$0xf0]  ;;  %v968_v17 = vor.u32 %v1189_v8, %v965_v9  ;;  %v1171_v18 = vld [vmem:[%s1793_s1 + $0xc4] sm:$0xf]  ;;  %v1209_v22 = vld [vmem:[%s1793_s1 + $0x1f4] sm:$0xf] }
  0x21   :  { %503 = vmatpush.bf16.msra.mxu1 %v860_v38  ;;  %v893_v19 = vld [vmem:[%s1793_s1 + $0xc8] sm:$0xf0]  ;;  %v1187_v20 = vld [vmem:[%s1793_s1 + $0x144] sm:$0xf]  ;;  %v1045_v23 = vld [vmem:[%s1793_s1 + $0x1f8] sm:$0xf0]  ;;  %v832_v26 = vor.u32 %v1155_v15, %v829_v16 }
  0x22   :  { %516 = vmatpush.bf16.msra.mxu2 %v924_v39  ;;  %v957_v21 = vld [vmem:[%s1793_s1 + $0x148] sm:$0xf0]  ;;  %v23_v24 = vld [vmem:[%s1794_s0 + $0x10] sm:$0xf]  ;;  %v896_v27 = vor.u32 %v1171_v18, %v893_v19  ;;  %v1153_v28 = vld [vmem:[%s1793_s1 + $0x34] sm:$0xf]  ;;  %v1048_v31 = vor.u32 %v1209_v22, %v1045_v23 }
  0x23   :  { %529 = vmatpush.bf16.msra.mxu3 %v988_v44  ;;  %491 = vmatmul.bf16.vlgmr.msra.gmra.mxu0 %v1501_v53  ;;  %v821_v29 = vld [vmem:[%s1793_s1 + $0x38] sm:$0xf0]  ;;  %v960_v30 = vor.u32 %v1187_v20, %v957_v21  ;;  %v1169_v32 = vld [vmem:[%s1793_s1 + $0xb4] sm:$0xf]  ;;  %v109_v35 = vunpack.c.l.b16 %v23_v24  ;;  %v1207_v37 = vld [vmem:[%s1793_s1 + $0x1e4] sm:$0xf] }
  0x24   :  { %539 = vmatpush.bf16.msrb.mxu0 %v1076_v45  ;;  %504 = vmatmul.bf16.vlgmr.msra.gmra.mxu1 %v1518_v59  ;;  %v885_v33 = vld [vmem:[%s1793_s1 + $0xb8] sm:$0xf0]  ;;  %v1185_v34 = vld [vmem:[%s1793_s1 + $0x134] sm:$0xf]  ;;  %v1037_v38 = vld [vmem:[%s1793_s1 + $0x1e8] sm:$0xf0]  ;;  %v824_v39 = vor.u32 %v1153_v28, %v821_v29 }
  0x25   :  { %548 = vmatpush.bf16.msrb.mxu1 %v856_v47  ;;  %517 = vmatmul.bf16.vlgmr.msra.gmra.mxu2 %v1520_v60  ;;  %v949_v36 = vld [vmem:[%s1793_s1 + $0x138] sm:$0xf0]  ;;  %v888_v40 = vor.u32 %v1169_v32, %v885_v33  ;;  %v1151_v41 = vld [vmem:[%s1793_s1 + $0x24] sm:$0xf]  ;;  %v813_v42 = vld [vmem:[%s1793_s1 + $0x28] sm:$0xf0]  ;;  %v1040_v44 = vor.u32 %v1207_v37, %v1037_v38 }
  0x26   :  { %561 = vmatpush.bf16.msrb.mxu2 %v920_v48  ;;  %530 = vmatmul.bf16.vlgmr.msra.gmra.mxu3 %v1522_v62  ;;  %v952_v43 = vor.u32 %v1185_v34, %v949_v36  ;;  %v1167_v45 = vld [vmem:[%s1793_s1 + $0xa4] sm:$0xf]  ;;  %v877_v46 = vld [vmem:[%s1793_s1 + $0xa8] sm:$0xf0]  ;;  %v1624_v48 = vpack.c.b16 %v109_v35, %v109_v35  ;;  %v1205_v50 = vld [vmem:[%s1793_s1 + $0x1d4] sm:$0xf] }
  0x27   :  { %574 = vmatpush.bf16.msrb.mxu3 %v984_v52  ;;  %v1183_v47 = vld [vmem:[%s1793_s1 + $0x124] sm:$0xf]  ;;  %v941_v49 = vld [vmem:[%s1793_s1 + $0x128] sm:$0xf0]  ;;  %v1029_v51 = vld [vmem:[%s1793_s1 + $0x1d8] sm:$0xf0]  ;;  %v816_v52 = vor.u32 %v1151_v41, %v813_v42  ;;  %v880_v54 = vor.u32 %v1167_v45, %v877_v46 }
  0x28   :  { %540 = vmatpush.bf16.msrb.mxu0 %v1068_v61  ;;  %v1149_v55 = vld [vmem:[%s1793_s1 + $0x14] sm:$0xf]  ;;  %v805_v56 = vld [vmem:[%s1793_s1 + $0x18] sm:$0xf0]  ;;  %v944_v57 = vor.u32 %v1183_v47, %v941_v49  ;;  %v1032_v58 = vor.u32 %v1205_v50, %v1029_v51  ;;  %v1203_v2 = vld [vmem:[%s1793_s1 + $0x1c4] sm:$0xf] }
  0x29   :  { %549 = vmatpush.bf16.msrb.mxu1 %v848_v63  ;;  %v1165_v61 = vld [vmem:[%s1793_s1 + $0x94] sm:$0xf]  ;;  %v869_v63 = vld [vmem:[%s1793_s1 + $0x98] sm:$0xf0]  ;;  %v1021_v3 = vld [vmem:[%s1793_s1 + $0x1c8] sm:$0xf0] }
  0x2a   :  { %562 = vmatpush.bf16.msrb.mxu2 %v912_v0  ;;  %v1181_v0 = vld [vmem:[%s1793_s1 + $0x114] sm:$0xf]  ;;  %v933_v1 = vld [vmem:[%s1793_s1 + $0x118] sm:$0xf0]  ;;  %v872_v5 = vor.u32 %v1165_v61, %v869_v63  ;;  %v1147_v6 = vld [vmem:[%s1793_s1 + $0x4] sm:$0xf]  ;;  %v1024_v9 = vor.u32 %v1203_v2, %v1021_v3 }
  0x2b   :  { %575 = vmatpush.bf16.msrb.mxu3 %v976_v4  ;;  %v808_v4 = vor.u32 %v1149_v55, %v805_v56  ;;  %v797_v7 = vld [vmem:[%s1793_s1 + $0x8] sm:$0xf0]  ;;  %v936_v8 = vor.u32 %v1181_v0, %v933_v1  ;;  %v1201_v14 = vld [vmem:[%s1793_s1 + $0x1b4] sm:$0xf]  ;;  %v1013_v15 = vld [vmem:[%s1793_s1 + $0x1b8] sm:$0xf0] }
  0x2c   :  { %541 = vmatpush.bf16.msrb.mxu0 %v1060_v10  ;;  %v1163_v10 = vld [vmem:[%s1793_s1 + $0x84] sm:$0xf]  ;;  %v861_v11 = vld [vmem:[%s1793_s1 + $0x88] sm:$0xf0]  ;;  %v1217_v16 = vld [vmem:[%s1793_s1 + $0x234] sm:$0xf]  ;;  %v800_v18 = vor.u32 %v1147_v6, %v797_v7  ;;  %v1016_v21 = vor.u32 %v1201_v14, %v1013_v15 }
  0x2d   :  { %550 = vmatpush.bf16.msrb.mxu1 %v840_v12  ;;  %v1179_v12 = vld [vmem:[%s1793_s1 + $0x104] sm:$0xf]  ;;  %v864_v19 = vor.u32 %v1163_v10, %v861_v11  ;;  %v1005_v24 = vld [vmem:[%s1793_s1 + $0x1a8] sm:$0xf0]  ;;  %v1225_v32 = vld [vmem:[%s1795_s3 + $0x30] sm:$0xff] }
  0x2e   :  { %563 = vmatpush.bf16.msrb.mxu2 %v904_v13  ;;  %v925_v13 = vld [vmem:[%s1793_s1 + $0x108] sm:$0xf0]  ;;  %v1199_v23 = vld [vmem:[%s1793_s1 + $0x1a4] sm:$0xf]  ;;  %v1213_v33 = vld [vmem:[%s1793_s1 + $0x214] sm:$0xf] }
  0x2f   :  { %576 = vmatpush.bf16.msrb.mxu3 %v968_v17  ;;  %v1077_v17 = vld [vmem:[%s1793_s1 + $0x238] sm:$0xf0]  ;;  %v928_v20 = vor.u32 %v1179_v12, %v925_v13  ;;  %v1008_v28 = vor.u32 %v1199_v23, %v1005_v24  ;;  %v1211_v37 = vld [vmem:[%s1793_s1 + $0x204] sm:$0xf]  ;;  %v1233_v46 = vld [vmem:[%s1795_s3 + $0x70] sm:$0xff] }
  0x30   :  { %542 = vmatpush.bf16.msrb.mxu0 %v1052_v25  ;;  %v1080_v22 = vor.u32 %v1217_v16, %v1077_v17  ;;  %v1226_v25 = vld [vmem:[%s1795_s3 + $0x38] sm:$0xff]  ;;  %v1223_v41 = vld [vmem:[%s1795_s3 + $0x20] sm:$0xff]  ;;  %v1228_v2 = vld [vmem:[%s1795_s3 + $0x48] sm:$0xff] }
  0x31   :  { %551 = vmatpush.bf16.msrb.mxu1 %v832_v26  ;;  %v1215_v26 = vld [vmem:[%s1793_s1 + $0x224] sm:$0xf]  ;;  %v1061_v34 = vld [vmem:[%s1793_s1 + $0x218] sm:$0xf0]  ;;  %v96_v47 = vld [vmem:[%s1797_s2] sm:$0x3] }
  0x32   :  { %564 = vmatpush.bf16.msrb.mxu2 %v896_v27  ;;  %v1069_v27 = vld [vmem:[%s1793_s1 + $0x228] sm:$0xf0]  ;;  %v1064_v36 = vor.u32 %v1213_v33, %v1061_v34  ;;  %v1222_v42 = vld [vmem:[%s1795_s3 + $0x18] sm:$0xff]  ;;  %v98_v49 = vperm.slane %v96_v47, 0  ;;  %v1231_v50 = vld [vmem:[%s1795_s3 + $0x60] sm:$0xff]  ;;  %v99_v13 = vperm.slane %v96_v47, 1 }
  0x33   :  { %577 = vmatpush.bf16.msrb.mxu3 %v960_v30  ;;  %1081 = vmatmul.msk.bf16.vlgmr.msrb.gmra.mxu0 %vm479_vm0, %v1624_v48  ;;  %v1072_v29 = vor.u32 %v1215_v26, %v1069_v27  ;;  %v1197_v30 = vld [vmem:[%s1793_s1 + $0x194] sm:$0xf]  ;;  %v1234_v45 = vld [vmem:[%s1795_s3 + $0x78] sm:$0xff]  ;;  %v1227_v7 = vld [vmem:[%s1795_s3 + $0x40] sm:$0xff] }
  0x34   :  { %587 = vmatpush.bf16.msra.mxu0 %v1048_v31  ;;  %v997_v31 = vld [vmem:[%s1793_s1 + $0x198] sm:$0xf0] }
  0x35   :  { %552 = vmatpush.bf16.msrb.mxu1 %v824_v39  ;;  %v1000_v35 = vor.u32 %v1197_v30, %v997_v31  ;;  %v1230_v55 = vld [vmem:[%s1795_s3 + $0x58] sm:$0xff] }
  0x36   :  { %565 = vmatpush.bf16.msrb.mxu2 %v888_v40  ;;  %v1224_v40 = vld [vmem:[%s1795_s3 + $0x28] sm:$0xff] }
  0x37   :  { %578 = vmatpush.bf16.msrb.mxu3 %v952_v43  ;;  %v1220_v43 = vld [vmem:[%s1795_s3 + $0x8] sm:$0xff] }
  0x38   :  { %588 = vmatpush.bf16.msra.mxu0 %v1040_v44  ;;  %v1219_v44 = vld [vmem:[%s1795_s3] sm:$0xff] }
  0x39   :  { %553 = vmatpush.bf16.msrb.mxu1 %v816_v52 }
  0x3a   :  { %566 = vmatpush.bf16.msrb.mxu2 %v880_v54 }
  0x3b   :  { %579 = vmatpush.bf16.msrb.mxu3 %v944_v57 }
  0x3c   :  { %589 = vmatpush.bf16.msra.mxu0 %v1032_v58  ;;  %v1229_v58 = vld [vmem:[%s1795_s3 + $0x50] sm:$0xff] }
  0x3d   :  { %554 = vmatpush.bf16.msrb.mxu1 %v808_v4 }
  0x3e   :  { %567 = vmatpush.bf16.msrb.mxu2 %v872_v5 }
  0x3f   :  { %580 = vmatpush.bf16.msrb.mxu3 %v936_v8 }
  0x40   :  { %590 = vmatpush.bf16.msra.mxu0 %v1024_v9 }
  0x41   :  { %555 = vmatpush.bf16.msrb.mxu1 %v800_v18 }
  0x42   :  { %568 = vmatpush.bf16.msrb.mxu2 %v864_v19 }
  0x43   :  { %581 = vmatpush.bf16.msrb.mxu3 %v928_v20 }
  0x44   :  { %591 = vmatpush.bf16.msra.mxu0 %v1016_v21  ;;  %556 = vmatmul.bf16.vlgmr.msrb.gmra.mxu1 %v1501_v53  ;;  %v1195_v53 = vld [vmem:[%s1793_s1 + $0x184] sm:$0xf] }
  0x45   :  { %604 = vmatpush.bf16.msra.mxu1 %v1080_v22  ;;  %569 = vmatmul.bf16.vlgmr.msrb.gmra.mxu2 %v1518_v59  ;;  %v989_v59 = vld [vmem:[%s1793_s1 + $0x188] sm:$0xf0] }
  0x46   :  { %749 = vmatpush.bf16.msra.mxu2 %v1226_v25  ;;  %582 = vmatmul.bf16.vlgmr.msrb.gmra.mxu3 %v1520_v60  ;;  %v1053_v60 = vld [vmem:[%s1793_s1 + $0x208] sm:$0xf0]  ;;  %v992_v38 = vor.u32 %v1195_v53, %v989_v59 }
  0x47   :  { %v1056_v39 = vor.u32 %v1211_v37, %v1053_v60  ;;  %762 = vmatpush.bf16.msra.mxu3 %v1234_v45 }
  0x48   :  { %592 = vmatpush.bf16.msra.mxu0 %v1008_v28 }
  0x49   :  { %605 = vmatpush.bf16.msra.mxu1 %v1072_v29 }
  0x4a   :  { %750 = vmatpush.bf16.msra.mxu2 %v1225_v32  ;;  %v1235_v32 = vld [vmem:[%s1796_s4] ss:$0 sm:$0xff] }
  0x4b   :  { %763 = vmatpush.bf16.msra.mxu3 %v1233_v46 }
  0x4c   :  { %593 = vmatpush.bf16.msra.mxu0 %v1000_v35 }
  0x4d   :  { %606 = vmatpush.bf16.msra.mxu1 %v1064_v36 }
  0x4e   :  { %751 = vmatpush.bf16.msra.mxu2 %v1224_v40 }
  0x50   :  { %594 = vmatpush.bf16.msra.mxu0 %v992_v38 }
  0x51   :  { %607 = vmatpush.bf16.msra.mxu1 %v1056_v39 }
  0x52   :  { %752 = vmatpush.bf16.msra.mxu2 %v1223_v41 }
  0x53   :  { %595 = vmatmul.bf16.vlgmr.msra.gmra.mxu0 %v1522_v62  ;;  %v1221_v62 = vld [vmem:[%s1795_s3 + $0x10] sm:$0xff] }
  0x54   :  { %1082 = vmatmul.msk.bf16.vlgmr.msra.gmra.mxu1 %vm479_vm0, %v1624_v48  ;;  %v1232_v48 = vld [vmem:[%s1795_s3 + $0x68] sm:$0xff] }
  0x55   :  { %764 = vmatpush.bf16.msra.mxu3 %v1232_v48 }
  0x56   :  { %753 = vmatpush.bf16.msra.mxu2 %v1222_v42 }
  0x59   :  { %765 = vmatpush.bf16.msra.mxu3 %v1231_v50 }
  0x5a   :  { %754 = vmatpush.bf16.msra.mxu2 %v1221_v62 }
  0x5d   :  { %766 = vmatpush.bf16.msra.mxu3 %v1230_v55 }
  0x5e   :  { %755 = vmatpush.bf16.msra.mxu2 %v1220_v43 }
  0x61   :  { %767 = vmatpush.bf16.msra.mxu3 %v1229_v58 }
  0x62   :  { %756 = vmatpush.bf16.msra.mxu2 %v1219_v44 }
  0x65   :  { %768 = vmatpush.bf16.msra.mxu3 %v1228_v2 }
  0x69   :  { %769 = vmatpush.bf16.msra.mxu3 %v1227_v7 }
  0xa0   :  { %v492_v51 = vpop.f32.mrf.mxu0 }
  0xa1   :  { %v505_v52 = vpop.f32.mrf.mxu1  ;;  %v493_v54 = vadd.f32 %v492_v51, %v98_v49 }
  0xa3   :  { %v506_v56 = vadd.f32 %v505_v52, %v493_v54 }
  0xa8   :  { %v518_v57 = vpop.f32.mrf.mxu2  ;;  %v494_v61 = vpop.f32.mrf.mxu0 }
  0xa9   :  { %v531_v63 = vpop.f32.mrf.mxu3  ;;  %v507_v0 = vpop.f32.mrf.mxu1  ;;  %v519_v1 = vadd.f32 %v518_v57, %v506_v56 }
  0xab   :  { %v532_v3 = vadd.f32 %v531_v63, %v519_v1 }
  0xb0   :  { %v520_v4 = vpop.f32.mrf.mxu2  ;;  %v544_v6 = vpop.f32.mrf.mxu0 }
  0xb1   :  { %v533_v5 = vpop.f32.mrf.mxu3  ;;  %v545_v8 = vadd.f32 %v544_v6, %v532_v3 }
  0xb3   :  { %v613_v9 = vmax.f32 %v545_v8, 0.0 }
  0xb5   :  { %v615_v10 = vpack.c.bf16 %v613_v9, %v613_v9 }
  0xb7   :  { %757 = vmatmul.bf16.vlgmr.msra.gmra.mxu2 %v615_v10 }
  0xb8   :  { %v546_v11 = vpop.f32.mrf.mxu0 }
  0xc1   :  { %v557_v12 = vpop.f32.mrf.mxu1 }
  0xc2   :  { %v558_v14 = vadd.f32 %v557_v12, %v99_v13 }
  0xc8   :  { %v570_v15 = vpop.f32.mrf.mxu2 }
  0xc9   :  { %v583_v16 = vpop.f32.mrf.mxu3  ;;  %v571_v17 = vadd.f32 %v570_v15, %v558_v14  ;;  %v559_v18 = vpop.f32.mrf.mxu1 }
  0xcb   :  { %v584_v19 = vadd.f32 %v583_v16, %v571_v17 }
  0xd0   :  { %v596_v20 = vpop.f32.mrf.mxu0  ;;  %v572_v22 = vpop.f32.mrf.mxu2 }
  0xd1   :  { %v597_v21 = vadd.f32 %v596_v20, %v584_v19  ;;  %v585_v23 = vpop.f32.mrf.mxu3  ;;  %v609_v24 = vpop.f32.mrf.mxu1 }
  0xd3   :  { %v610_v25 = vadd.f32 %v609_v24, %v597_v21 }
  0xd5   :  { %v614_v26 = vmax.f32 %v610_v25, 0.0 }
  0xd7   :  { %v616_v27 = vpack.c.bf16 %v614_v26, %v614_v26 }
  0xd8   :  { %v598_v28 = vpop.f32.mrf.mxu0 }
  0xd9   :  { %770 = vmatmul.bf16.vlgmr.msra.gmra.mxu3 %v616_v27  ;;  %v611_v29 = vpop.f32.mrf.mxu1 }
 0x13a   :  { %v758_v30 = vpop.f32.mrf.mxu2 }
 0x13b   :  { %v759_v33 = vadd.f32 %v1235_v32, %v758_v30 }
 0x142   :  { %v760_v31 = vpop.f32.mrf.mxu2 }
 0x15c   :  { %v771_v34 = vpop.f32.mrf.mxu3 }
 0x15d   :  { %v772_v35 = vadd.f32 %v771_v34, %v759_v33 }
 0x15f   :  { %v776_v36 = vsel %vm775_vm1, %v772_v35, -inf }
 0x160   :  { %777 = vmax.xlane.f32.xlu0 %v776_v36 }
 0x164   :  { %v773_v53 = vpop.f32.mrf.mxu3 }
 0x1d3   :  { %v778_v59 = vpop.xlane.xlu0 %777 }
 0x1d4   :  { %v779_v37 = vsub.f32 %v772_v35, %v778_v59 }
 0x1d6   :  { %v780_v60 = vmul.f32 1.442695, %v779_v37 }
 0x1d8   :  { %1236 = vpow2.f32 %v780_v60 }
 0x1de   :  { %v1237_v38 = vpop.eup %1236 }
 0x1df   :  { %v782_v39 = vsel %vm775_vm1, %v1237_v38, 0.0 }
 0x1e0   :  { %783 = vadd.xlane.f32.xlu0 %v782_v39 }
 0x253   :  { %v784_v40 = vpop.xlane.xlu0 %783 }
 0x254   :  { %1238 = vlog2.f32 %v784_v40 }
 0x25a   :  { %v1239_v41 = vpop.eup %1238 }
 0x25b   :  { %v786_v42 = vmul.f32 0.6931472, %v1239_v41 }
 0x25d   :  { %v787_v62 = vsub.f32 %v779_v37, %v786_v42 }
 0x25f   :  { %788 = vst.msk [vmem:[%s1798_s5] sm:$0xff] %vm775_vm1, %v787_v62 }

</bundles_post_ra>
